<compile_context>
chip_gen: v6e
topology: v6e:2x2x1
jax: 0.10.0
libtpu: 0.0.40
codegen_flags: <defaults>
</compile_context>

<pallas_src>
import numpy as np

import jax
import jax.numpy as jnp
from jax.experimental import pallas as pl
from jax.experimental.pallas import tpu as pltpu


# --------------------------------------------------------------------------
# One-time host-side constants: 0/1 gather matrices that let the MXU perform
# pooling-window extraction and conv2's im2col while activations stay in VMEM.
# --------------------------------------------------------------------------

def _pool2x2_corner_mats(h, w):
    """4 one-hot matrices; corner d of the 2x2/stride-2 pool over a row-major
    flattened (h, w) grid: out row i*(w//2)+j <- in row (2i+di)*w + (2j+dj)."""
    ph, pw = h // 2, w // 2
    S = np.zeros((4, ph * pw, h * w), np.float32)
    for d, (di, dj) in enumerate(((0, 0), (0, 1), (1, 0), (1, 1))):
        for i in range(ph):
            for j in range(pw):
                S[d, i * pw + j, (2 * i + di) * w + (2 * j + dj)] = 1.0
    return S


def _conv_tap_gather_mats(h, w, k):
    """k*k one-hot matrices; tap (ki,kj) gathers rows (i+ki, j+kj) of a
    row-major (h, w) grid for every valid output position (i, j)."""
    oh, ow = h - k + 1, w - k + 1
    G = np.zeros((k * k, oh * ow, h * w), np.float32)
    for ki in range(k):
        for kj in range(k):
            t = ki * k + kj
            for i in range(oh):
                for j in range(ow):
                    G[t, i * ow + j, (i + ki) * w + (j + kj)] = 1.0
    return G


# ----------------------------- fused Pallas kernel --------------------------

def _cnn_fused_kernel(p1_ref, s1_ref, g2_ref, s2_ref,
                      w1_ref, b1_ref, w2_ref, b2_ref,
                      wf1_ref, bf1_ref, wf2_ref, bf2_ref,
                      o_ref):
    f32 = jnp.float32

    # ---- conv1 (1->10, k=5) as one dense im2col matmul: (576,25)@(25,10) ----
    y1 = jnp.dot(p1_ref[0], w1_ref[...], preferred_element_type=f32)
    y1 = y1 + b1_ref[...]                                    # (576, 10), rows (oh, ow)

    # ---- maxpool 2x2 + relu; window corners gathered by the MXU ----
    c00 = jnp.dot(s1_ref[0], y1, preferred_element_type=f32)
    c01 = jnp.dot(s1_ref[1], y1, preferred_element_type=f32)
    c10 = jnp.dot(s1_ref[2], y1, preferred_element_type=f32)
    c11 = jnp.dot(s1_ref[3], y1, preferred_element_type=f32)
    h1 = jnp.maximum(jnp.maximum(c00, c01), jnp.maximum(c10, c11))
    h1 = jnp.maximum(h1, 0.0)                                # (144, 10), rows (ph, pw)

    # ---- conv2 (10->20, k=5): in-VMEM im2col (row gathers) + 25 tap matmuls.
    #      Dropout2d is identity in eval mode. ----
    y2 = jnp.zeros((64, 20), f32) + b2_ref[...]
    for t in range(25):
        patch = jnp.dot(g2_ref[t], h1, preferred_element_type=f32)        # (64, 10)
        y2 = y2 + jnp.dot(patch, w2_ref[t], preferred_element_type=f32)   # (64, 20)

    # ---- maxpool 2x2 + relu ----
    d00 = jnp.dot(s2_ref[0], y2, preferred_element_type=f32)
    d01 = jnp.dot(s2_ref[1], y2, preferred_element_type=f32)
    d10 = jnp.dot(s2_ref[2], y2, preferred_element_type=f32)
    d11 = jnp.dot(s2_ref[3], y2, preferred_element_type=f32)
    h2 = jnp.maximum(jnp.maximum(d00, d01), jnp.maximum(d10, d11))
    h2 = jnp.maximum(h2, 0.0)                                # (16, 20), rows (h, w)

    # ---- fc1 + relu (dropout = identity in eval).  The (1,320)@(320,50) matmul
    #      is done as a sum of 16 per-spatial-position (1,20)@(20,50) matmuls so
    #      the NCHW flatten never has to move data across lanes. ----
    a = jnp.zeros((1, 50), f32) + bf1_ref[...]
    for t in range(16):
        a = a + jnp.dot(h2[t:t + 1, :], wf1_ref[t], preferred_element_type=f32)
    h3 = jnp.maximum(a, 0.0)                                 # (1, 50)

    # ---- fc2 ----
    logits = jnp.dot(h3, wf2_ref[...], preferred_element_type=f32) + bf2_ref[...]
    o_ref[0] = logits.astype(o_ref.dtype)                    # (1, 10)


# --------------------------------- wrappers ---------------------------------

def _im2col_c1(x_nchw, k):
    """(B, 1, H, W) -> (B, OH*OW, k*k); rows (oh, ow), cols (ki, kj)."""
    B, C, H, W = x_nchw.shape
    oh, ow = H - k + 1, W - k + 1
    x2 = x_nchw[:, 0]
    cols = [x2[:, ki:ki + oh, kj:kj + ow] for ki in range(k) for kj in range(k)]
    p = jnp.stack(cols, axis=-1)                             # (B, oh, ow, k*k)
    return p.reshape(B, oh * ow, k * k)


@jax.jit
def cnn_forward(x, params):
    """x: (B, 1, 28, 28) float32 NCHW -> logits (B, 10)."""
    (w1m, b1, w2t, b2, wf1t, bf1, wf2, bf2, S1, G2, S2) = params
    B = x.shape[0]
    p1 = _im2col_c1(x, 5)                                    # (B, 576, 25), tiny (C_in=1)

    out = pl.pallas_call(
        _cnn_fused_kernel,
        out_shape=jax.ShapeDtypeStruct((B, 1, 10), jnp.float32),
        grid=(B,),
        in_specs=[
            pl.BlockSpec((1, 576, 25), lambda i: (i, 0, 0)),    # per-sample conv1 patches
            pl.BlockSpec((4, 144, 576), lambda i: (0, 0, 0)),   # pool1 corner gathers
            pl.BlockSpec((25, 64, 144), lambda i: (0, 0, 0)),   # conv2 im2col gathers
            pl.BlockSpec((4, 16, 64), lambda i: (0, 0, 0)),     # pool2 corner gathers
            pl.BlockSpec((25, 10), lambda i: (0, 0)),           # conv1 weight
            pl.BlockSpec((1, 10), lambda i: (0, 0)),            # conv1 bias
            pl.BlockSpec((25, 10, 20), lambda i: (0, 0, 0)),    # conv2 weight taps
            pl.BlockSpec((1, 20), lambda i: (0, 0)),            # conv2 bias
            pl.BlockSpec((16, 20, 50), lambda i: (0, 0, 0)),    # fc1 weight (permuted)
            pl.BlockSpec((1, 50), lambda i: (0, 0)),            # fc1 bias
            pl.BlockSpec((50, 10), lambda i: (0, 0)),           # fc2 weight
            pl.BlockSpec((1, 10), lambda i: (0, 0)),            # fc2 bias
        ],
        out_specs=pl.BlockSpec((1, 1, 10), lambda i: (i, 0, 0)),
        compiler_params=pltpu.CompilerParams(
            dimension_semantics=("parallel",)),
    )(p1, S1, G2, S2, w1m, b1, w2t, b2, wf1t, bf1, wf2, bf2)
    return out.reshape(B, 10)


def init_params(key):
    """Deterministic init, same shapes/bounds as PyTorch's default Conv2d/Linear."""
    def u(k, shape, fan_in):
        bound = 1.0 / (fan_in ** 0.5)
        return jax.random.uniform(k, shape, jnp.float32, -bound, bound)
    ks = jax.random.split(key, 8)
    w1 = u(ks[0], (10, 1, 5, 5), 25);    b1 = u(ks[1], (10,), 25)
    w2 = u(ks[2], (20, 10, 5, 5), 250);  b2 = u(ks[3], (20,), 250)
    wfc1 = u(ks[4], (50, 320), 320);     bfc1 = u(ks[5], (50,), 320)
    wfc2 = u(ks[6], (10, 50), 50);       bfc2 = u(ks[7], (10,), 50)
    return (w1, b1, w2, b2, wfc1, bfc1, wfc2, bfc2)


def prepare_params(raw):
    """One-time repack of PyTorch-layout weights into the kernel's layout."""
    w1, b1, w2, b2, wfc1, bfc1, wfc2, bfc2 = raw
    w1m = w1.reshape(10, 25).T                                    # (25, 10)
    w2t = jnp.transpose(w2, (2, 3, 1, 0)).reshape(25, 10, 20)     # (ki*5+kj, c, oc)
    # fc1 columns are NCHW-flatten order (c*16 + h*4 + w); regroup per (h, w).
    wf1t = jnp.transpose(wfc1.reshape(50, 20, 4, 4),
                         (2, 3, 1, 0)).reshape(16, 20, 50)        # (h*4+w, c, n)
    wf2 = wfc2.T                                                  # (50, 10)
    S1 = jnp.asarray(_pool2x2_corner_mats(24, 24))                # (4, 144, 576)
    G2 = jnp.asarray(_conv_tap_gather_mats(12, 12, 5))            # (25, 64, 144)
    S2 = jnp.asarray(_pool2x2_corner_mats(8, 8))                  # (4, 16, 64)
    return (w1m, b1.reshape(1, 10), w2t, b2.reshape(1, 20),
            wf1t, bfc1.reshape(1, 50), wf2, bfc2.reshape(1, 10),
            S1, G2, S2)


if __name__ == "__main__":
    key = jax.random.PRNGKey(0)
    k_x, k_p = jax.random.split(key)
    # Spatial size 28 is required by fc1 (20*4*4 = 320); small batch of 2.
    x = jax.random.normal(k_x, (2, 1, 28, 28), dtype=jnp.float32)
    params = prepare_params(init_params(k_p))

    logits = cnn_forward(x, params)
    logits = jax.block_until_ready(logits)
    assert logits.shape == (2, 10) and logits.dtype == jnp.float32
    print("KERNEL_OK")
</pallas_src>

<mosaic_0001>
module attributes {stable_mosaic.version = 11 : i64} {
  func.func @_cnn_fused_kernel(%arg0: i32, %arg1: memref<1x576x25xf32, #tpu.memory_space<vmem>>, %arg2: memref<4x144x576xf32, #tpu.memory_space<vmem>>, %arg3: memref<25x64x144xf32, #tpu.memory_space<vmem>>, %arg4: memref<4x16x64xf32, #tpu.memory_space<vmem>>, %arg5: memref<25x10xf32, #tpu.memory_space<vmem>>, %arg6: memref<1x10xf32, #tpu.memory_space<vmem>>, %arg7: memref<25x10x20xf32, #tpu.memory_space<vmem>>, %arg8: memref<1x20xf32, #tpu.memory_space<vmem>>, %arg9: memref<16x20x50xf32, #tpu.memory_space<vmem>>, %arg10: memref<1x50xf32, #tpu.memory_space<vmem>>, %arg11: memref<50x10xf32, #tpu.memory_space<vmem>>, %arg12: memref<1x10xf32, #tpu.memory_space<vmem>>, %arg13: memref<1x1x10xf32, #tpu.memory_space<vmem>>) attributes {dimension_semantics = [#tpu.dimension_semantics<parallel>], iteration_bounds = array<i64: 2>, scalar_prefetch = 0 : i64, scratch_operands = 0 : i64, tpu.core_type = #tpu.core_type<tc>, window_params = [{transform_indices = @transform_0, window_bounds = array<i64: 1, 576, 25>}, {pipeline_mode = #tpu.pipeline_mode<synchronous>, transform_indices = @transform_1, window_bounds = array<i64: 4, 144, 576>}, {pipeline_mode = #tpu.pipeline_mode<synchronous>, transform_indices = @transform_2, window_bounds = array<i64: 25, 64, 144>}, {pipeline_mode = #tpu.pipeline_mode<synchronous>, transform_indices = @transform_3, window_bounds = array<i64: 4, 16, 64>}, {pipeline_mode = #tpu.pipeline_mode<synchronous>, transform_indices = @transform_4, window_bounds = array<i64: 25, 10>}, {pipeline_mode = #tpu.pipeline_mode<synchronous>, transform_indices = @transform_5, window_bounds = array<i64: 1, 10>}, {pipeline_mode = #tpu.pipeline_mode<synchronous>, transform_indices = @transform_6, window_bounds = array<i64: 25, 10, 20>}, {pipeline_mode = #tpu.pipeline_mode<synchronous>, transform_indices = @transform_7, window_bounds = array<i64: 1, 20>}, {pipeline_mode = #tpu.pipeline_mode<synchronous>, transform_indices = @transform_8, window_bounds = array<i64: 16, 20, 50>}, {pipeline_mode = #tpu.pipeline_mode<synchronous>, transform_indices = @transform_9, window_bounds = array<i64: 1, 50>}, {pipeline_mode = #tpu.pipeline_mode<synchronous>, transform_indices = @transform_10, window_bounds = array<i64: 50, 10>}, {pipeline_mode = #tpu.pipeline_mode<synchronous>, transform_indices = @transform_11, window_bounds = array<i64: 1, 10>}, {transform_indices = @transform_12, window_bounds = array<i64: 1, 1, 10>}]} {
    %c0 = arith.constant 0 : index
    %c0_0 = arith.constant 0 : index
    %c0_1 = arith.constant 0 : index
    %0 = vector.load %arg1[%c0, %c0_0, %c0_1] : memref<1x576x25xf32, #tpu.memory_space<vmem>>, vector<1x576x25xf32>
    %1 = vector.shape_cast %0 : vector<1x576x25xf32> to vector<576x25xf32>
    %c0_2 = arith.constant 0 : index
    %c0_3 = arith.constant 0 : index
    %2 = vector.load %arg5[%c0_2, %c0_3] : memref<25x10xf32, #tpu.memory_space<vmem>>, vector<25x10xf32>
    %cst = arith.constant dense<0.000000e+00> : vector<576x10xf32>
    %3 = tpu.matmul %1, %2, %cst {dimension_numbers = #tpu.dot_dimension_numbers<[1], [0], [0], [1], [0, 0, 1, 1], [], []>} : vector<576x25xf32>, vector<25x10xf32>, vector<576x10xf32> -> vector<576x10xf32>
    %c0_4 = arith.constant 0 : index
    %c0_5 = arith.constant 0 : index
    %4 = vector.load %arg6[%c0_4, %c0_5] : memref<1x10xf32, #tpu.memory_space<vmem>>, vector<1x10xf32>
    %5 = vector.broadcast %4 : vector<1x10xf32> to vector<576x10xf32>
    %6 = arith.addf %3, %5 : vector<576x10xf32>
    %c0_6 = arith.constant 0 : index
    %c0_7 = arith.constant 0 : index
    %c0_8 = arith.constant 0 : index
    %7 = vector.load %arg2[%c0_6, %c0_7, %c0_8] : memref<4x144x576xf32, #tpu.memory_space<vmem>>, vector<1x144x576xf32>
    %8 = vector.shape_cast %7 : vector<1x144x576xf32> to vector<144x576xf32>
    %cst_9 = arith.constant dense<0.000000e+00> : vector<144x10xf32>
    %9 = tpu.matmul %8, %6, %cst_9 {dimension_numbers = #tpu.dot_dimension_numbers<[1], [0], [0], [1], [0, 0, 1, 1], [], []>} : vector<144x576xf32>, vector<576x10xf32>, vector<144x10xf32> -> vector<144x10xf32>
    %c1 = arith.constant 1 : index
    %c0_10 = arith.constant 0 : index
    %c0_11 = arith.constant 0 : index
    %10 = vector.load %arg2[%c1, %c0_10, %c0_11] : memref<4x144x576xf32, #tpu.memory_space<vmem>>, vector<1x144x576xf32>
    %11 = vector.shape_cast %10 : vector<1x144x576xf32> to vector<144x576xf32>
    %cst_12 = arith.constant dense<0.000000e+00> : vector<144x10xf32>
    %12 = tpu.matmul %11, %6, %cst_12 {dimension_numbers = #tpu.dot_dimension_numbers<[1], [0], [0], [1], [0, 0, 1, 1], [], []>} : vector<144x576xf32>, vector<576x10xf32>, vector<144x10xf32> -> vector<144x10xf32>
    %c2 = arith.constant 2 : index
    %c0_13 = arith.constant 0 : index
    %c0_14 = arith.constant 0 : index
    %13 = vector.load %arg2[%c2, %c0_13, %c0_14] : memref<4x144x576xf32, #tpu.memory_space<vmem>>, vector<1x144x576xf32>
    %14 = vector.shape_cast %13 : vector<1x144x576xf32> to vector<144x576xf32>
    %cst_15 = arith.constant dense<0.000000e+00> : vector<144x10xf32>
    %15 = tpu.matmul %14, %6, %cst_15 {dimension_numbers = #tpu.dot_dimension_numbers<[1], [0], [0], [1], [0, 0, 1, 1], [], []>} : vector<144x576xf32>, vector<576x10xf32>, vector<144x10xf32> -> vector<144x10xf32>
    %c3 = arith.constant 3 : index
    %c0_16 = arith.constant 0 : index
    %c0_17 = arith.constant 0 : index
    %16 = vector.load %arg2[%c3, %c0_16, %c0_17] : memref<4x144x576xf32, #tpu.memory_space<vmem>>, vector<1x144x576xf32>
    %17 = vector.shape_cast %16 : vector<1x144x576xf32> to vector<144x576xf32>
    %cst_18 = arith.constant dense<0.000000e+00> : vector<144x10xf32>
    %18 = tpu.matmul %17, %6, %cst_18 {dimension_numbers = #tpu.dot_dimension_numbers<[1], [0], [0], [1], [0, 0, 1, 1], [], []>} : vector<144x576xf32>, vector<576x10xf32>, vector<144x10xf32> -> vector<144x10xf32>
    %19 = arith.maximumf %9, %12 : vector<144x10xf32>
    %20 = arith.maximumf %15, %18 : vector<144x10xf32>
    %21 = arith.maximumf %19, %20 : vector<144x10xf32>
    %cst_19 = arith.constant 0.000000e+00 : f32
    %22 = vector.broadcast %cst_19 : f32 to vector<144x10xf32>
    %23 = arith.maximumf %21, %22 : vector<144x10xf32>
    %cst_20 = arith.constant 0.000000e+00 : f32
    %24 = vector.broadcast %cst_20 : f32 to vector<64x20xf32>
    %c0_21 = arith.constant 0 : index
    %c0_22 = arith.constant 0 : index
    %25 = vector.load %arg8[%c0_21, %c0_22] : memref<1x20xf32, #tpu.memory_space<vmem>>, vector<1x20xf32>
    %26 = vector.broadcast %25 : vector<1x20xf32> to vector<64x20xf32>
    %27 = arith.addf %24, %26 : vector<64x20xf32>
    %c0_23 = arith.constant 0 : index
    %c0_24 = arith.constant 0 : index
    %c0_25 = arith.constant 0 : index
    %28 = vector.load %arg3[%c0_23, %c0_24, %c0_25] : memref<25x64x144xf32, #tpu.memory_space<vmem>>, vector<1x64x144xf32>
    %29 = vector.shape_cast %28 : vector<1x64x144xf32> to vector<64x144xf32>
    %cst_26 = arith.constant dense<0.000000e+00> : vector<64x10xf32>
    %30 = tpu.matmul %29, %23, %cst_26 {dimension_numbers = #tpu.dot_dimension_numbers<[1], [0], [0], [1], [0, 0, 1, 1], [], []>} : vector<64x144xf32>, vector<144x10xf32>, vector<64x10xf32> -> vector<64x10xf32>
    %c0_27 = arith.constant 0 : index
    %c0_28 = arith.constant 0 : index
    %c0_29 = arith.constant 0 : index
    %31 = vector.load %arg7[%c0_27, %c0_28, %c0_29] : memref<25x10x20xf32, #tpu.memory_space<vmem>>, vector<1x10x20xf32>
    %32 = vector.shape_cast %31 : vector<1x10x20xf32> to vector<10x20xf32>
    %cst_30 = arith.constant dense<0.000000e+00> : vector<64x20xf32>
    %33 = tpu.matmul %30, %32, %cst_30 {dimension_numbers = #tpu.dot_dimension_numbers<[1], [0], [0], [1], [0, 0, 1, 1], [], []>} : vector<64x10xf32>, vector<10x20xf32>, vector<64x20xf32> -> vector<64x20xf32>
    %34 = arith.addf %27, %33 : vector<64x20xf32>
    %c1_31 = arith.constant 1 : index
    %c0_32 = arith.constant 0 : index
    %c0_33 = arith.constant 0 : index
    %35 = vector.load %arg3[%c1_31, %c0_32, %c0_33] : memref<25x64x144xf32, #tpu.memory_space<vmem>>, vector<1x64x144xf32>
    %36 = vector.shape_cast %35 : vector<1x64x144xf32> to vector<64x144xf32>
    %cst_34 = arith.constant dense<0.000000e+00> : vector<64x10xf32>
    %37 = tpu.matmul %36, %23, %cst_34 {dimension_numbers = #tpu.dot_dimension_numbers<[1], [0], [0], [1], [0, 0, 1, 1], [], []>} : vector<64x144xf32>, vector<144x10xf32>, vector<64x10xf32> -> vector<64x10xf32>
    %c1_35 = arith.constant 1 : index
    %c0_36 = arith.constant 0 : index
    %c0_37 = arith.constant 0 : index
    %38 = vector.load %arg7[%c1_35, %c0_36, %c0_37] : memref<25x10x20xf32, #tpu.memory_space<vmem>>, vector<1x10x20xf32>
    %39 = vector.shape_cast %38 : vector<1x10x20xf32> to vector<10x20xf32>
    %cst_38 = arith.constant dense<0.000000e+00> : vector<64x20xf32>
    %40 = tpu.matmul %37, %39, %cst_38 {dimension_numbers = #tpu.dot_dimension_numbers<[1], [0], [0], [1], [0, 0, 1, 1], [], []>} : vector<64x10xf32>, vector<10x20xf32>, vector<64x20xf32> -> vector<64x20xf32>
    %41 = arith.addf %34, %40 : vector<64x20xf32>
    %c2_39 = arith.constant 2 : index
    %c0_40 = arith.constant 0 : index
    %c0_41 = arith.constant 0 : index
    %42 = vector.load %arg3[%c2_39, %c0_40, %c0_41] : memref<25x64x144xf32, #tpu.memory_space<vmem>>, vector<1x64x144xf32>
    %43 = vector.shape_cast %42 : vector<1x64x144xf32> to vector<64x144xf32>
    %cst_42 = arith.constant dense<0.000000e+00> : vector<64x10xf32>
    %44 = tpu.matmul %43, %23, %cst_42 {dimension_numbers = #tpu.dot_dimension_numbers<[1], [0], [0], [1], [0, 0, 1, 1], [], []>} : vector<64x144xf32>, vector<144x10xf32>, vector<64x10xf32> -> vector<64x10xf32>
    %c2_43 = arith.constant 2 : index
    %c0_44 = arith.constant 0 : index
    %c0_45 = arith.constant 0 : index
    %45 = vector.load %arg7[%c2_43, %c0_44, %c0_45] : memref<25x10x20xf32, #tpu.memory_space<vmem>>, vector<1x10x20xf32>
    %46 = vector.shape_cast %45 : vector<1x10x20xf32> to vector<10x20xf32>
    %cst_46 = arith.constant dense<0.000000e+00> : vector<64x20xf32>
    %47 = tpu.matmul %44, %46, %cst_46 {dimension_numbers = #tpu.dot_dimension_numbers<[1], [0], [0], [1], [0, 0, 1, 1], [], []>} : vector<64x10xf32>, vector<10x20xf32>, vector<64x20xf32> -> vector<64x20xf32>
    %48 = arith.addf %41, %47 : vector<64x20xf32>
    %c3_47 = arith.constant 3 : index
    %c0_48 = arith.constant 0 : index
    %c0_49 = arith.constant 0 : index
    %49 = vector.load %arg3[%c3_47, %c0_48, %c0_49] : memref<25x64x144xf32, #tpu.memory_space<vmem>>, vector<1x64x144xf32>
    %50 = vector.shape_cast %49 : vector<1x64x144xf32> to vector<64x144xf32>
    %cst_50 = arith.constant dense<0.000000e+00> : vector<64x10xf32>
    %51 = tpu.matmul %50, %23, %cst_50 {dimension_numbers = #tpu.dot_dimension_numbers<[1], [0], [0], [1], [0, 0, 1, 1], [], []>} : vector<64x144xf32>, vector<144x10xf32>, vector<64x10xf32> -> vector<64x10xf32>
    %c3_51 = arith.constant 3 : index
    %c0_52 = arith.constant 0 : index
    %c0_53 = arith.constant 0 : index
    %52 = vector.load %arg7[%c3_51, %c0_52, %c0_53] : memref<25x10x20xf32, #tpu.memory_space<vmem>>, vector<1x10x20xf32>
    %53 = vector.shape_cast %52 : vector<1x10x20xf32> to vector<10x20xf32>
    %cst_54 = arith.constant dense<0.000000e+00> : vector<64x20xf32>
    %54 = tpu.matmul %51, %53, %cst_54 {dimension_numbers = #tpu.dot_dimension_numbers<[1], [0], [0], [1], [0, 0, 1, 1], [], []>} : vector<64x10xf32>, vector<10x20xf32>, vector<64x20xf32> -> vector<64x20xf32>
    %55 = arith.addf %48, %54 : vector<64x20xf32>
    %c4 = arith.constant 4 : index
    %c0_55 = arith.constant 0 : index
    %c0_56 = arith.constant 0 : index
    %56 = vector.load %arg3[%c4, %c0_55, %c0_56] : memref<25x64x144xf32, #tpu.memory_space<vmem>>, vector<1x64x144xf32>
    %57 = vector.shape_cast %56 : vector<1x64x144xf32> to vector<64x144xf32>
    %cst_57 = arith.constant dense<0.000000e+00> : vector<64x10xf32>
    %58 = tpu.matmul %57, %23, %cst_57 {dimension_numbers = #tpu.dot_dimension_numbers<[1], [0], [0], [1], [0, 0, 1, 1], [], []>} : vector<64x144xf32>, vector<144x10xf32>, vector<64x10xf32> -> vector<64x10xf32>
    %c4_58 = arith.constant 4 : index
    %c0_59 = arith.constant 0 : index
    %c0_60 = arith.constant 0 : index
    %59 = vector.load %arg7[%c4_58, %c0_59, %c0_60] : memref<25x10x20xf32, #tpu.memory_space<vmem>>, vector<1x10x20xf32>
    %60 = vector.shape_cast %59 : vector<1x10x20xf32> to vector<10x20xf32>
    %cst_61 = arith.constant dense<0.000000e+00> : vector<64x20xf32>
    %61 = tpu.matmul %58, %60, %cst_61 {dimension_numbers = #tpu.dot_dimension_numbers<[1], [0], [0], [1], [0, 0, 1, 1], [], []>} : vector<64x10xf32>, vector<10x20xf32>, vector<64x20xf32> -> vector<64x20xf32>
    %62 = arith.addf %55, %61 : vector<64x20xf32>
    %c5 = arith.constant 5 : index
    %c0_62 = arith.constant 0 : index
    %c0_63 = arith.constant 0 : index
    %63 = vector.load %arg3[%c5, %c0_62, %c0_63] : memref<25x64x144xf32, #tpu.memory_space<vmem>>, vector<1x64x144xf32>
    %64 = vector.shape_cast %63 : vector<1x64x144xf32> to vector<64x144xf32>
    %cst_64 = arith.constant dense<0.000000e+00> : vector<64x10xf32>
    %65 = tpu.matmul %64, %23, %cst_64 {dimension_numbers = #tpu.dot_dimension_numbers<[1], [0], [0], [1], [0, 0, 1, 1], [], []>} : vector<64x144xf32>, vector<144x10xf32>, vector<64x10xf32> -> vector<64x10xf32>
    %c5_65 = arith.constant 5 : index
    %c0_66 = arith.constant 0 : index
    %c0_67 = arith.constant 0 : index
    %66 = vector.load %arg7[%c5_65, %c0_66, %c0_67] : memref<25x10x20xf32, #tpu.memory_space<vmem>>, vector<1x10x20xf32>
    %67 = vector.shape_cast %66 : vector<1x10x20xf32> to vector<10x20xf32>
    %cst_68 = arith.constant dense<0.000000e+00> : vector<64x20xf32>
    %68 = tpu.matmul %65, %67, %cst_68 {dimension_numbers = #tpu.dot_dimension_numbers<[1], [0], [0], [1], [0, 0, 1, 1], [], []>} : vector<64x10xf32>, vector<10x20xf32>, vector<64x20xf32> -> vector<64x20xf32>
    %69 = arith.addf %62, %68 : vector<64x20xf32>
    %c6 = arith.constant 6 : index
    %c0_69 = arith.constant 0 : index
    %c0_70 = arith.constant 0 : index
    %70 = vector.load %arg3[%c6, %c0_69, %c0_70] : memref<25x64x144xf32, #tpu.memory_space<vmem>>, vector<1x64x144xf32>
    %71 = vector.shape_cast %70 : vector<1x64x144xf32> to vector<64x144xf32>
    %cst_71 = arith.constant dense<0.000000e+00> : vector<64x10xf32>
    %72 = tpu.matmul %71, %23, %cst_71 {dimension_numbers = #tpu.dot_dimension_numbers<[1], [0], [0], [1], [0, 0, 1, 1], [], []>} : vector<64x144xf32>, vector<144x10xf32>, vector<64x10xf32> -> vector<64x10xf32>
    %c6_72 = arith.constant 6 : index
    %c0_73 = arith.constant 0 : index
    %c0_74 = arith.constant 0 : index
    %73 = vector.load %arg7[%c6_72, %c0_73, %c0_74] : memref<25x10x20xf32, #tpu.memory_space<vmem>>, vector<1x10x20xf32>
    %74 = vector.shape_cast %73 : vector<1x10x20xf32> to vector<10x20xf32>
    %cst_75 = arith.constant dense<0.000000e+00> : vector<64x20xf32>
    %75 = tpu.matmul %72, %74, %cst_75 {dimension_numbers = #tpu.dot_dimension_numbers<[1], [0], [0], [1], [0, 0, 1, 1], [], []>} : vector<64x10xf32>, vector<10x20xf32>, vector<64x20xf32> -> vector<64x20xf32>
    %76 = arith.addf %69, %75 : vector<64x20xf32>
    %c7 = arith.constant 7 : index
    %c0_76 = arith.constant 0 : index
    %c0_77 = arith.constant 0 : index
    %77 = vector.load %arg3[%c7, %c0_76, %c0_77] : memref<25x64x144xf32, #tpu.memory_space<vmem>>, vector<1x64x144xf32>
    %78 = vector.shape_cast %77 : vector<1x64x144xf32> to vector<64x144xf32>
    %cst_78 = arith.constant dense<0.000000e+00> : vector<64x10xf32>
    %79 = tpu.matmul %78, %23, %cst_78 {dimension_numbers = #tpu.dot_dimension_numbers<[1], [0], [0], [1], [0, 0, 1, 1], [], []>} : vector<64x144xf32>, vector<144x10xf32>, vector<64x10xf32> -> vector<64x10xf32>
    %c7_79 = arith.constant 7 : index
    %c0_80 = arith.constant 0 : index
    %c0_81 = arith.constant 0 : index
    %80 = vector.load %arg7[%c7_79, %c0_80, %c0_81] : memref<25x10x20xf32, #tpu.memory_space<vmem>>, vector<1x10x20xf32>
    %81 = vector.shape_cast %80 : vector<1x10x20xf32> to vector<10x20xf32>
    %cst_82 = arith.constant dense<0.000000e+00> : vector<64x20xf32>
    %82 = tpu.matmul %79, %81, %cst_82 {dimension_numbers = #tpu.dot_dimension_numbers<[1], [0], [0], [1], [0, 0, 1, 1], [], []>} : vector<64x10xf32>, vector<10x20xf32>, vector<64x20xf32> -> vector<64x20xf32>
    %83 = arith.addf %76, %82 : vector<64x20xf32>
    %c8 = arith.constant 8 : index
    %c0_83 = arith.constant 0 : index
    %c0_84 = arith.constant 0 : index
    %84 = vector.load %arg3[%c8, %c0_83, %c0_84] : memref<25x64x144xf32, #tpu.memory_space<vmem>>, vector<1x64x144xf32>
    %85 = vector.shape_cast %84 : vector<1x64x144xf32> to vector<64x144xf32>
    %cst_85 = arith.constant dense<0.000000e+00> : vector<64x10xf32>
    %86 = tpu.matmul %85, %23, %cst_85 {dimension_numbers = #tpu.dot_dimension_numbers<[1], [0], [0], [1], [0, 0, 1, 1], [], []>} : vector<64x144xf32>, vector<144x10xf32>, vector<64x10xf32> -> vector<64x10xf32>
    %c8_86 = arith.constant 8 : index
    %c0_87 = arith.constant 0 : index
    %c0_88 = arith.constant 0 : index
    %87 = vector.load %arg7[%c8_86, %c0_87, %c0_88] : memref<25x10x20xf32, #tpu.memory_space<vmem>>, vector<1x10x20xf32>
    %88 = vector.shape_cast %87 : vector<1x10x20xf32> to vector<10x20xf32>
    %cst_89 = arith.constant dense<0.000000e+00> : vector<64x20xf32>
    %89 = tpu.matmul %86, %88, %cst_89 {dimension_numbers = #tpu.dot_dimension_numbers<[1], [0], [0], [1], [0, 0, 1, 1], [], []>} : vector<64x10xf32>, vector<10x20xf32>, vector<64x20xf32> -> vector<64x20xf32>
    %90 = arith.addf %83, %89 : vector<64x20xf32>
    %c9 = arith.constant 9 : index
    %c0_90 = arith.constant 0 : index
    %c0_91 = arith.constant 0 : index
    %91 = vector.load %arg3[%c9, %c0_90, %c0_91] : memref<25x64x144xf32, #tpu.memory_space<vmem>>, vector<1x64x144xf32>
    %92 = vector.shape_cast %91 : vector<1x64x144xf32> to vector<64x144xf32>
    %cst_92 = arith.constant dense<0.000000e+00> : vector<64x10xf32>
    %93 = tpu.matmul %92, %23, %cst_92 {dimension_numbers = #tpu.dot_dimension_numbers<[1], [0], [0], [1], [0, 0, 1, 1], [], []>} : vector<64x144xf32>, vector<144x10xf32>, vector<64x10xf32> -> vector<64x10xf32>
    %c9_93 = arith.constant 9 : index
    %c0_94 = arith.constant 0 : index
    %c0_95 = arith.constant 0 : index
    %94 = vector.load %arg7[%c9_93, %c0_94, %c0_95] : memref<25x10x20xf32, #tpu.memory_space<vmem>>, vector<1x10x20xf32>
    %95 = vector.shape_cast %94 : vector<1x10x20xf32> to vector<10x20xf32>
    %cst_96 = arith.constant dense<0.000000e+00> : vector<64x20xf32>
    %96 = tpu.matmul %93, %95, %cst_96 {dimension_numbers = #tpu.dot_dimension_numbers<[1], [0], [0], [1], [0, 0, 1, 1], [], []>} : vector<64x10xf32>, vector<10x20xf32>, vector<64x20xf32> -> vector<64x20xf32>
    %97 = arith.addf %90, %96 : vector<64x20xf32>
    %c10 = arith.constant 10 : index
    %c0_97 = arith.constant 0 : index
    %c0_98 = arith.constant 0 : index
    %98 = vector.load %arg3[%c10, %c0_97, %c0_98] : memref<25x64x144xf32, #tpu.memory_space<vmem>>, vector<1x64x144xf32>
    %99 = vector.shape_cast %98 : vector<1x64x144xf32> to vector<64x144xf32>
    %cst_99 = arith.constant dense<0.000000e+00> : vector<64x10xf32>
    %100 = tpu.matmul %99, %23, %cst_99 {dimension_numbers = #tpu.dot_dimension_numbers<[1], [0], [0], [1], [0, 0, 1, 1], [], []>} : vector<64x144xf32>, vector<144x10xf32>, vector<64x10xf32> -> vector<64x10xf32>
    %c10_100 = arith.constant 10 : index
    %c0_101 = arith.constant 0 : index
    %c0_102 = arith.constant 0 : index
    %101 = vector.load %arg7[%c10_100, %c0_101, %c0_102] : memref<25x10x20xf32, #tpu.memory_space<vmem>>, vector<1x10x20xf32>
    %102 = vector.shape_cast %101 : vector<1x10x20xf32> to vector<10x20xf32>
    %cst_103 = arith.constant dense<0.000000e+00> : vector<64x20xf32>
    %103 = tpu.matmul %100, %102, %cst_103 {dimension_numbers = #tpu.dot_dimension_numbers<[1], [0], [0], [1], [0, 0, 1, 1], [], []>} : vector<64x10xf32>, vector<10x20xf32>, vector<64x20xf32> -> vector<64x20xf32>
    %104 = arith.addf %97, %103 : vector<64x20xf32>
    %c11 = arith.constant 11 : index
    %c0_104 = arith.constant 0 : index
    %c0_105 = arith.constant 0 : index
    %105 = vector.load %arg3[%c11, %c0_104, %c0_105] : memref<25x64x144xf32, #tpu.memory_space<vmem>>, vector<1x64x144xf32>
    %106 = vector.shape_cast %105 : vector<1x64x144xf32> to vector<64x144xf32>
    %cst_106 = arith.constant dense<0.000000e+00> : vector<64x10xf32>
    %107 = tpu.matmul %106, %23, %cst_106 {dimension_numbers = #tpu.dot_dimension_numbers<[1], [0], [0], [1], [0, 0, 1, 1], [], []>} : vector<64x144xf32>, vector<144x10xf32>, vector<64x10xf32> -> vector<64x10xf32>
    %c11_107 = arith.constant 11 : index
    %c0_108 = arith.constant 0 : index
    %c0_109 = arith.constant 0 : index
    %108 = vector.load %arg7[%c11_107, %c0_108, %c0_109] : memref<25x10x20xf32, #tpu.memory_space<vmem>>, vector<1x10x20xf32>
    %109 = vector.shape_cast %108 : vector<1x10x20xf32> to vector<10x20xf32>
    %cst_110 = arith.constant dense<0.000000e+00> : vector<64x20xf32>
    %110 = tpu.matmul %107, %109, %cst_110 {dimension_numbers = #tpu.dot_dimension_numbers<[1], [0], [0], [1], [0, 0, 1, 1], [], []>} : vector<64x10xf32>, vector<10x20xf32>, vector<64x20xf32> -> vector<64x20xf32>
    %111 = arith.addf %104, %110 : vector<64x20xf32>
    %c12 = arith.constant 12 : index
    %c0_111 = arith.constant 0 : index
    %c0_112 = arith.constant 0 : index
    %112 = vector.load %arg3[%c12, %c0_111, %c0_112] : memref<25x64x144xf32, #tpu.memory_space<vmem>>, vector<1x64x144xf32>
    %113 = vector.shape_cast %112 : vector<1x64x144xf32> to vector<64x144xf32>
    %cst_113 = arith.constant dense<0.000000e+00> : vector<64x10xf32>
    %114 = tpu.matmul %113, %23, %cst_113 {dimension_numbers = #tpu.dot_dimension_numbers<[1], [0], [0], [1], [0, 0, 1, 1], [], []>} : vector<64x144xf32>, vector<144x10xf32>, vector<64x10xf32> -> vector<64x10xf32>
    %c12_114 = arith.constant 12 : index
    %c0_115 = arith.constant 0 : index
    %c0_116 = arith.constant 0 : index
    %115 = vector.load %arg7[%c12_114, %c0_115, %c0_116] : memref<25x10x20xf32, #tpu.memory_space<vmem>>, vector<1x10x20xf32>
    %116 = vector.shape_cast %115 : vector<1x10x20xf32> to vector<10x20xf32>
    %cst_117 = arith.constant dense<0.000000e+00> : vector<64x20xf32>
    %117 = tpu.matmul %114, %116, %cst_117 {dimension_numbers = #tpu.dot_dimension_numbers<[1], [0], [0], [1], [0, 0, 1, 1], [], []>} : vector<64x10xf32>, vector<10x20xf32>, vector<64x20xf32> -> vector<64x20xf32>
    %118 = arith.addf %111, %117 : vector<64x20xf32>
    %c13 = arith.constant 13 : index
    %c0_118 = arith.constant 0 : index
    %c0_119 = arith.constant 0 : index
    %119 = vector.load %arg3[%c13, %c0_118, %c0_119] : memref<25x64x144xf32, #tpu.memory_space<vmem>>, vector<1x64x144xf32>
    %120 = vector.shape_cast %119 : vector<1x64x144xf32> to vector<64x144xf32>
    %cst_120 = arith.constant dense<0.000000e+00> : vector<64x10xf32>
    %121 = tpu.matmul %120, %23, %cst_120 {dimension_numbers = #tpu.dot_dimension_numbers<[1], [0], [0], [1], [0, 0, 1, 1], [], []>} : vector<64x144xf32>, vector<144x10xf32>, vector<64x10xf32> -> vector<64x10xf32>
    %c13_121 = arith.constant 13 : index
    %c0_122 = arith.constant 0 : index
    %c0_123 = arith.constant 0 : index
    %122 = vector.load %arg7[%c13_121, %c0_122, %c0_123] : memref<25x10x20xf32, #tpu.memory_space<vmem>>, vector<1x10x20xf32>
    %123 = vector.shape_cast %122 : vector<1x10x20xf32> to vector<10x20xf32>
    %cst_124 = arith.constant dense<0.000000e+00> : vector<64x20xf32>
    %124 = tpu.matmul %121, %123, %cst_124 {dimension_numbers = #tpu.dot_dimension_numbers<[1], [0], [0], [1], [0, 0, 1, 1], [], []>} : vector<64x10xf32>, vector<10x20xf32>, vector<64x20xf32> -> vector<64x20xf32>
    %125 = arith.addf %118, %124 : vector<64x20xf32>
    %c14 = arith.constant 14 : index
    %c0_125 = arith.constant 0 : index
    %c0_126 = arith.constant 0 : index
    %126 = vector.load %arg3[%c14, %c0_125, %c0_126] : memref<25x64x144xf32, #tpu.memory_space<vmem>>, vector<1x64x144xf32>
    %127 = vector.shape_cast %126 : vector<1x64x144xf32> to vector<64x144xf32>
    %cst_127 = arith.constant dense<0.000000e+00> : vector<64x10xf32>
    %128 = tpu.matmul %127, %23, %cst_127 {dimension_numbers = #tpu.dot_dimension_numbers<[1], [0], [0], [1], [0, 0, 1, 1], [], []>} : vector<64x144xf32>, vector<144x10xf32>, vector<64x10xf32> -> vector<64x10xf32>
    %c14_128 = arith.constant 14 : index
    %c0_129 = arith.constant 0 : index
    %c0_130 = arith.constant 0 : index
    %129 = vector.load %arg7[%c14_128, %c0_129, %c0_130] : memref<25x10x20xf32, #tpu.memory_space<vmem>>, vector<1x10x20xf32>
    %130 = vector.shape_cast %129 : vector<1x10x20xf32> to vector<10x20xf32>
    %cst_131 = arith.constant dense<0.000000e+00> : vector<64x20xf32>
    %131 = tpu.matmul %128, %130, %cst_131 {dimension_numbers = #tpu.dot_dimension_numbers<[1], [0], [0], [1], [0, 0, 1, 1], [], []>} : vector<64x10xf32>, vector<10x20xf32>, vector<64x20xf32> -> vector<64x20xf32>
    %132 = arith.addf %125, %131 : vector<64x20xf32>
    %c15 = arith.constant 15 : index
    %c0_132 = arith.constant 0 : index
    %c0_133 = arith.constant 0 : index
    %133 = vector.load %arg3[%c15, %c0_132, %c0_133] : memref<25x64x144xf32, #tpu.memory_space<vmem>>, vector<1x64x144xf32>
    %134 = vector.shape_cast %133 : vector<1x64x144xf32> to vector<64x144xf32>
    %cst_134 = arith.constant dense<0.000000e+00> : vector<64x10xf32>
    %135 = tpu.matmul %134, %23, %cst_134 {dimension_numbers = #tpu.dot_dimension_numbers<[1], [0], [0], [1], [0, 0, 1, 1], [], []>} : vector<64x144xf32>, vector<144x10xf32>, vector<64x10xf32> -> vector<64x10xf32>
    %c15_135 = arith.constant 15 : index
    %c0_136 = arith.constant 0 : index
    %c0_137 = arith.constant 0 : index
    %136 = vector.load %arg7[%c15_135, %c0_136, %c0_137] : memref<25x10x20xf32, #tpu.memory_space<vmem>>, vector<1x10x20xf32>
    %137 = vector.shape_cast %136 : vector<1x10x20xf32> to vector<10x20xf32>
    %cst_138 = arith.constant dense<0.000000e+00> : vector<64x20xf32>
    %138 = tpu.matmul %135, %137, %cst_138 {dimension_numbers = #tpu.dot_dimension_numbers<[1], [0], [0], [1], [0, 0, 1, 1], [], []>} : vector<64x10xf32>, vector<10x20xf32>, vector<64x20xf32> -> vector<64x20xf32>
    %139 = arith.addf %132, %138 : vector<64x20xf32>
    %c16 = arith.constant 16 : index
    %c0_139 = arith.constant 0 : index
    %c0_140 = arith.constant 0 : index
    %140 = vector.load %arg3[%c16, %c0_139, %c0_140] : memref<25x64x144xf32, #tpu.memory_space<vmem>>, vector<1x64x144xf32>
    %141 = vector.shape_cast %140 : vector<1x64x144xf32> to vector<64x144xf32>
    %cst_141 = arith.constant dense<0.000000e+00> : vector<64x10xf32>
    %142 = tpu.matmul %141, %23, %cst_141 {dimension_numbers = #tpu.dot_dimension_numbers<[1], [0], [0], [1], [0, 0, 1, 1], [], []>} : vector<64x144xf32>, vector<144x10xf32>, vector<64x10xf32> -> vector<64x10xf32>
    %c16_142 = arith.constant 16 : index
    %c0_143 = arith.constant 0 : index
    %c0_144 = arith.constant 0 : index
    %143 = vector.load %arg7[%c16_142, %c0_143, %c0_144] : memref<25x10x20xf32, #tpu.memory_space<vmem>>, vector<1x10x20xf32>
    %144 = vector.shape_cast %143 : vector<1x10x20xf32> to vector<10x20xf32>
    %cst_145 = arith.constant dense<0.000000e+00> : vector<64x20xf32>
    %145 = tpu.matmul %142, %144, %cst_145 {dimension_numbers = #tpu.dot_dimension_numbers<[1], [0], [0], [1], [0, 0, 1, 1], [], []>} : vector<64x10xf32>, vector<10x20xf32>, vector<64x20xf32> -> vector<64x20xf32>
    %146 = arith.addf %139, %145 : vector<64x20xf32>
    %c17 = arith.constant 17 : index
    %c0_146 = arith.constant 0 : index
    %c0_147 = arith.constant 0 : index
    %147 = vector.load %arg3[%c17, %c0_146, %c0_147] : memref<25x64x144xf32, #tpu.memory_space<vmem>>, vector<1x64x144xf32>
    %148 = vector.shape_cast %147 : vector<1x64x144xf32> to vector<64x144xf32>
    %cst_148 = arith.constant dense<0.000000e+00> : vector<64x10xf32>
    %149 = tpu.matmul %148, %23, %cst_148 {dimension_numbers = #tpu.dot_dimension_numbers<[1], [0], [0], [1], [0, 0, 1, 1], [], []>} : vector<64x144xf32>, vector<144x10xf32>, vector<64x10xf32> -> vector<64x10xf32>
    %c17_149 = arith.constant 17 : index
    %c0_150 = arith.constant 0 : index
    %c0_151 = arith.constant 0 : index
    %150 = vector.load %arg7[%c17_149, %c0_150, %c0_151] : memref<25x10x20xf32, #tpu.memory_space<vmem>>, vector<1x10x20xf32>
    %151 = vector.shape_cast %150 : vector<1x10x20xf32> to vector<10x20xf32>
    %cst_152 = arith.constant dense<0.000000e+00> : vector<64x20xf32>
    %152 = tpu.matmul %149, %151, %cst_152 {dimension_numbers = #tpu.dot_dimension_numbers<[1], [0], [0], [1], [0, 0, 1, 1], [], []>} : vector<64x10xf32>, vector<10x20xf32>, vector<64x20xf32> -> vector<64x20xf32>
    %153 = arith.addf %146, %152 : vector<64x20xf32>
    %c18 = arith.constant 18 : index
    %c0_153 = arith.constant 0 : index
    %c0_154 = arith.constant 0 : index
    %154 = vector.load %arg3[%c18, %c0_153, %c0_154] : memref<25x64x144xf32, #tpu.memory_space<vmem>>, vector<1x64x144xf32>
    %155 = vector.shape_cast %154 : vector<1x64x144xf32> to vector<64x144xf32>
    %cst_155 = arith.constant dense<0.000000e+00> : vector<64x10xf32>
    %156 = tpu.matmul %155, %23, %cst_155 {dimension_numbers = #tpu.dot_dimension_numbers<[1], [0], [0], [1], [0, 0, 1, 1], [], []>} : vector<64x144xf32>, vector<144x10xf32>, vector<64x10xf32> -> vector<64x10xf32>
    %c18_156 = arith.constant 18 : index
    %c0_157 = arith.constant 0 : index
    %c0_158 = arith.constant 0 : index
    %157 = vector.load %arg7[%c18_156, %c0_157, %c0_158] : memref<25x10x20xf32, #tpu.memory_space<vmem>>, vector<1x10x20xf32>
    %158 = vector.shape_cast %157 : vector<1x10x20xf32> to vector<10x20xf32>
    %cst_159 = arith.constant dense<0.000000e+00> : vector<64x20xf32>
    %159 = tpu.matmul %156, %158, %cst_159 {dimension_numbers = #tpu.dot_dimension_numbers<[1], [0], [0], [1], [0, 0, 1, 1], [], []>} : vector<64x10xf32>, vector<10x20xf32>, vector<64x20xf32> -> vector<64x20xf32>
    %160 = arith.addf %153, %159 : vector<64x20xf32>
    %c19 = arith.constant 19 : index
    %c0_160 = arith.constant 0 : index
    %c0_161 = arith.constant 0 : index
    %161 = vector.load %arg3[%c19, %c0_160, %c0_161] : memref<25x64x144xf32, #tpu.memory_space<vmem>>, vector<1x64x144xf32>
    %162 = vector.shape_cast %161 : vector<1x64x144xf32> to vector<64x144xf32>
    %cst_162 = arith.constant dense<0.000000e+00> : vector<64x10xf32>
    %163 = tpu.matmul %162, %23, %cst_162 {dimension_numbers = #tpu.dot_dimension_numbers<[1], [0], [0], [1], [0, 0, 1, 1], [], []>} : vector<64x144xf32>, vector<144x10xf32>, vector<64x10xf32> -> vector<64x10xf32>
    %c19_163 = arith.constant 19 : index
    %c0_164 = arith.constant 0 : index
    %c0_165 = arith.constant 0 : index
    %164 = vector.load %arg7[%c19_163, %c0_164, %c0_165] : memref<25x10x20xf32, #tpu.memory_space<vmem>>, vector<1x10x20xf32>
    %165 = vector.shape_cast %164 : vector<1x10x20xf32> to vector<10x20xf32>
    %cst_166 = arith.constant dense<0.000000e+00> : vector<64x20xf32>
    %166 = tpu.matmul %163, %165, %cst_166 {dimension_numbers = #tpu.dot_dimension_numbers<[1], [0], [0], [1], [0, 0, 1, 1], [], []>} : vector<64x10xf32>, vector<10x20xf32>, vector<64x20xf32> -> vector<64x20xf32>
    %167 = arith.addf %160, %166 : vector<64x20xf32>
    %c20 = arith.constant 20 : index
    %c0_167 = arith.constant 0 : index
    %c0_168 = arith.constant 0 : index
    %168 = vector.load %arg3[%c20, %c0_167, %c0_168] : memref<25x64x144xf32, #tpu.memory_space<vmem>>, vector<1x64x144xf32>
    %169 = vector.shape_cast %168 : vector<1x64x144xf32> to vector<64x144xf32>
    %cst_169 = arith.constant dense<0.000000e+00> : vector<64x10xf32>
    %170 = tpu.matmul %169, %23, %cst_169 {dimension_numbers = #tpu.dot_dimension_numbers<[1], [0], [0], [1], [0, 0, 1, 1], [], []>} : vector<64x144xf32>, vector<144x10xf32>, vector<64x10xf32> -> vector<64x10xf32>
    %c20_170 = arith.constant 20 : index
    %c0_171 = arith.constant 0 : index
    %c0_172 = arith.constant 0 : index
    %171 = vector.load %arg7[%c20_170, %c0_171, %c0_172] : memref<25x10x20xf32, #tpu.memory_space<vmem>>, vector<1x10x20xf32>
    %172 = vector.shape_cast %171 : vector<1x10x20xf32> to vector<10x20xf32>
    %cst_173 = arith.constant dense<0.000000e+00> : vector<64x20xf32>
    %173 = tpu.matmul %170, %172, %cst_173 {dimension_numbers = #tpu.dot_dimension_numbers<[1], [0], [0], [1], [0, 0, 1, 1], [], []>} : vector<64x10xf32>, vector<10x20xf32>, vector<64x20xf32> -> vector<64x20xf32>
    %174 = arith.addf %167, %173 : vector<64x20xf32>
    %c21 = arith.constant 21 : index
    %c0_174 = arith.constant 0 : index
    %c0_175 = arith.constant 0 : index
    %175 = vector.load %arg3[%c21, %c0_174, %c0_175] : memref<25x64x144xf32, #tpu.memory_space<vmem>>, vector<1x64x144xf32>
    %176 = vector.shape_cast %175 : vector<1x64x144xf32> to vector<64x144xf32>
    %cst_176 = arith.constant dense<0.000000e+00> : vector<64x10xf32>
    %177 = tpu.matmul %176, %23, %cst_176 {dimension_numbers = #tpu.dot_dimension_numbers<[1], [0], [0], [1], [0, 0, 1, 1], [], []>} : vector<64x144xf32>, vector<144x10xf32>, vector<64x10xf32> -> vector<64x10xf32>
    %c21_177 = arith.constant 21 : index
    %c0_178 = arith.constant 0 : index
    %c0_179 = arith.constant 0 : index
    %178 = vector.load %arg7[%c21_177, %c0_178, %c0_179] : memref<25x10x20xf32, #tpu.memory_space<vmem>>, vector<1x10x20xf32>
    %179 = vector.shape_cast %178 : vector<1x10x20xf32> to vector<10x20xf32>
    %cst_180 = arith.constant dense<0.000000e+00> : vector<64x20xf32>
    %180 = tpu.matmul %177, %179, %cst_180 {dimension_numbers = #tpu.dot_dimension_numbers<[1], [0], [0], [1], [0, 0, 1, 1], [], []>} : vector<64x10xf32>, vector<10x20xf32>, vector<64x20xf32> -> vector<64x20xf32>
    %181 = arith.addf %174, %180 : vector<64x20xf32>
    %c22 = arith.constant 22 : index
    %c0_181 = arith.constant 0 : index
    %c0_182 = arith.constant 0 : index
    %182 = vector.load %arg3[%c22, %c0_181, %c0_182] : memref<25x64x144xf32, #tpu.memory_space<vmem>>, vector<1x64x144xf32>
    %183 = vector.shape_cast %182 : vector<1x64x144xf32> to vector<64x144xf32>
    %cst_183 = arith.constant dense<0.000000e+00> : vector<64x10xf32>
    %184 = tpu.matmul %183, %23, %cst_183 {dimension_numbers = #tpu.dot_dimension_numbers<[1], [0], [0], [1], [0, 0, 1, 1], [], []>} : vector<64x144xf32>, vector<144x10xf32>, vector<64x10xf32> -> vector<64x10xf32>
    %c22_184 = arith.constant 22 : index
    %c0_185 = arith.constant 0 : index
    %c0_186 = arith.constant 0 : index
    %185 = vector.load %arg7[%c22_184, %c0_185, %c0_186] : memref<25x10x20xf32, #tpu.memory_space<vmem>>, vector<1x10x20xf32>
    %186 = vector.shape_cast %185 : vector<1x10x20xf32> to vector<10x20xf32>
    %cst_187 = arith.constant dense<0.000000e+00> : vector<64x20xf32>
    %187 = tpu.matmul %184, %186, %cst_187 {dimension_numbers = #tpu.dot_dimension_numbers<[1], [0], [0], [1], [0, 0, 1, 1], [], []>} : vector<64x10xf32>, vector<10x20xf32>, vector<64x20xf32> -> vector<64x20xf32>
    %188 = arith.addf %181, %187 : vector<64x20xf32>
    %c23 = arith.constant 23 : index
    %c0_188 = arith.constant 0 : index
    %c0_189 = arith.constant 0 : index
    %189 = vector.load %arg3[%c23, %c0_188, %c0_189] : memref<25x64x144xf32, #tpu.memory_space<vmem>>, vector<1x64x144xf32>
    %190 = vector.shape_cast %189 : vector<1x64x144xf32> to vector<64x144xf32>
    %cst_190 = arith.constant dense<0.000000e+00> : vector<64x10xf32>
    %191 = tpu.matmul %190, %23, %cst_190 {dimension_numbers = #tpu.dot_dimension_numbers<[1], [0], [0], [1], [0, 0, 1, 1], [], []>} : vector<64x144xf32>, vector<144x10xf32>, vector<64x10xf32> -> vector<64x10xf32>
    %c23_191 = arith.constant 23 : index
    %c0_192 = arith.constant 0 : index
    %c0_193 = arith.constant 0 : index
    %192 = vector.load %arg7[%c23_191, %c0_192, %c0_193] : memref<25x10x20xf32, #tpu.memory_space<vmem>>, vector<1x10x20xf32>
    %193 = vector.shape_cast %192 : vector<1x10x20xf32> to vector<10x20xf32>
    %cst_194 = arith.constant dense<0.000000e+00> : vector<64x20xf32>
    %194 = tpu.matmul %191, %193, %cst_194 {dimension_numbers = #tpu.dot_dimension_numbers<[1], [0], [0], [1], [0, 0, 1, 1], [], []>} : vector<64x10xf32>, vector<10x20xf32>, vector<64x20xf32> -> vector<64x20xf32>
    %195 = arith.addf %188, %194 : vector<64x20xf32>
    %c24 = arith.constant 24 : index
    %c0_195 = arith.constant 0 : index
    %c0_196 = arith.constant 0 : index
    %196 = vector.load %arg3[%c24, %c0_195, %c0_196] : memref<25x64x144xf32, #tpu.memory_space<vmem>>, vector<1x64x144xf32>
    %197 = vector.shape_cast %196 : vector<1x64x144xf32> to vector<64x144xf32>
    %cst_197 = arith.constant dense<0.000000e+00> : vector<64x10xf32>
    %198 = tpu.matmul %197, %23, %cst_197 {dimension_numbers = #tpu.dot_dimension_numbers<[1], [0], [0], [1], [0, 0, 1, 1], [], []>} : vector<64x144xf32>, vector<144x10xf32>, vector<64x10xf32> -> vector<64x10xf32>
    %c24_198 = arith.constant 24 : index
    %c0_199 = arith.constant 0 : index
    %c0_200 = arith.constant 0 : index
    %199 = vector.load %arg7[%c24_198, %c0_199, %c0_200] : memref<25x10x20xf32, #tpu.memory_space<vmem>>, vector<1x10x20xf32>
    %200 = vector.shape_cast %199 : vector<1x10x20xf32> to vector<10x20xf32>
    %cst_201 = arith.constant dense<0.000000e+00> : vector<64x20xf32>
    %201 = tpu.matmul %198, %200, %cst_201 {dimension_numbers = #tpu.dot_dimension_numbers<[1], [0], [0], [1], [0, 0, 1, 1], [], []>} : vector<64x10xf32>, vector<10x20xf32>, vector<64x20xf32> -> vector<64x20xf32>
    %202 = arith.addf %195, %201 : vector<64x20xf32>
    %c0_202 = arith.constant 0 : index
    %c0_203 = arith.constant 0 : index
    %c0_204 = arith.constant 0 : index
    %203 = vector.load %arg4[%c0_202, %c0_203, %c0_204] : memref<4x16x64xf32, #tpu.memory_space<vmem>>, vector<1x16x64xf32>
    %204 = vector.shape_cast %203 : vector<1x16x64xf32> to vector<16x64xf32>
    %cst_205 = arith.constant dense<0.000000e+00> : vector<16x20xf32>
    %205 = tpu.matmul %204, %202, %cst_205 {dimension_numbers = #tpu.dot_dimension_numbers<[1], [0], [0], [1], [0, 0, 1, 1], [], []>} : vector<16x64xf32>, vector<64x20xf32>, vector<16x20xf32> -> vector<16x20xf32>
    %c1_206 = arith.constant 1 : index
    %c0_207 = arith.constant 0 : index
    %c0_208 = arith.constant 0 : index
    %206 = vector.load %arg4[%c1_206, %c0_207, %c0_208] : memref<4x16x64xf32, #tpu.memory_space<vmem>>, vector<1x16x64xf32>
    %207 = vector.shape_cast %206 : vector<1x16x64xf32> to vector<16x64xf32>
    %cst_209 = arith.constant dense<0.000000e+00> : vector<16x20xf32>
    %208 = tpu.matmul %207, %202, %cst_209 {dimension_numbers = #tpu.dot_dimension_numbers<[1], [0], [0], [1], [0, 0, 1, 1], [], []>} : vector<16x64xf32>, vector<64x20xf32>, vector<16x20xf32> -> vector<16x20xf32>
    %c2_210 = arith.constant 2 : index
    %c0_211 = arith.constant 0 : index
    %c0_212 = arith.constant 0 : index
    %209 = vector.load %arg4[%c2_210, %c0_211, %c0_212] : memref<4x16x64xf32, #tpu.memory_space<vmem>>, vector<1x16x64xf32>
    %210 = vector.shape_cast %209 : vector<1x16x64xf32> to vector<16x64xf32>
    %cst_213 = arith.constant dense<0.000000e+00> : vector<16x20xf32>
    %211 = tpu.matmul %210, %202, %cst_213 {dimension_numbers = #tpu.dot_dimension_numbers<[1], [0], [0], [1], [0, 0, 1, 1], [], []>} : vector<16x64xf32>, vector<64x20xf32>, vector<16x20xf32> -> vector<16x20xf32>
    %c3_214 = arith.constant 3 : index
    %c0_215 = arith.constant 0 : index
    %c0_216 = arith.constant 0 : index
    %212 = vector.load %arg4[%c3_214, %c0_215, %c0_216] : memref<4x16x64xf32, #tpu.memory_space<vmem>>, vector<1x16x64xf32>
    %213 = vector.shape_cast %212 : vector<1x16x64xf32> to vector<16x64xf32>
    %cst_217 = arith.constant dense<0.000000e+00> : vector<16x20xf32>
    %214 = tpu.matmul %213, %202, %cst_217 {dimension_numbers = #tpu.dot_dimension_numbers<[1], [0], [0], [1], [0, 0, 1, 1], [], []>} : vector<16x64xf32>, vector<64x20xf32>, vector<16x20xf32> -> vector<16x20xf32>
    %215 = arith.maximumf %205, %208 : vector<16x20xf32>
    %216 = arith.maximumf %211, %214 : vector<16x20xf32>
    %217 = arith.maximumf %215, %216 : vector<16x20xf32>
    %cst_218 = arith.constant 0.000000e+00 : f32
    %218 = vector.broadcast %cst_218 : f32 to vector<16x20xf32>
    %219 = arith.maximumf %217, %218 : vector<16x20xf32>
    %cst_219 = arith.constant 0.000000e+00 : f32
    %220 = vector.broadcast %cst_219 : f32 to vector<1x50xf32>
    %c0_220 = arith.constant 0 : index
    %c0_221 = arith.constant 0 : index
    %221 = vector.load %arg10[%c0_220, %c0_221] : memref<1x50xf32, #tpu.memory_space<vmem>>, vector<1x50xf32>
    %222 = arith.addf %220, %221 : vector<1x50xf32>
    %223 = vector.extract_strided_slice %219 {offsets = [0, 0], sizes = [1, 20], strides = [1, 1]} : vector<16x20xf32> to vector<1x20xf32>
    %c0_222 = arith.constant 0 : index
    %c0_223 = arith.constant 0 : index
    %c0_224 = arith.constant 0 : index
    %224 = vector.load %arg9[%c0_222, %c0_223, %c0_224] : memref<16x20x50xf32, #tpu.memory_space<vmem>>, vector<1x20x50xf32>
    %225 = vector.shape_cast %224 : vector<1x20x50xf32> to vector<20x50xf32>
    %cst_225 = arith.constant dense<0.000000e+00> : vector<1x50xf32>
    %226 = tpu.matmul %223, %225, %cst_225 {dimension_numbers = #tpu.dot_dimension_numbers<[1], [0], [0], [1], [0, 0, 1, 1], [], []>} : vector<1x20xf32>, vector<20x50xf32>, vector<1x50xf32> -> vector<1x50xf32>
    %227 = arith.addf %222, %226 : vector<1x50xf32>
    %228 = vector.extract_strided_slice %219 {offsets = [1, 0], sizes = [1, 20], strides = [1, 1]} : vector<16x20xf32> to vector<1x20xf32>
    %c1_226 = arith.constant 1 : index
    %c0_227 = arith.constant 0 : index
    %c0_228 = arith.constant 0 : index
    %229 = vector.load %arg9[%c1_226, %c0_227, %c0_228] : memref<16x20x50xf32, #tpu.memory_space<vmem>>, vector<1x20x50xf32>
    %230 = vector.shape_cast %229 : vector<1x20x50xf32> to vector<20x50xf32>
    %cst_229 = arith.constant dense<0.000000e+00> : vector<1x50xf32>
    %231 = tpu.matmul %228, %230, %cst_229 {dimension_numbers = #tpu.dot_dimension_numbers<[1], [0], [0], [1], [0, 0, 1, 1], [], []>} : vector<1x20xf32>, vector<20x50xf32>, vector<1x50xf32> -> vector<1x50xf32>
    %232 = arith.addf %227, %231 : vector<1x50xf32>
    %233 = vector.extract_strided_slice %219 {offsets = [2, 0], sizes = [1, 20], strides = [1, 1]} : vector<16x20xf32> to vector<1x20xf32>
    %c2_230 = arith.constant 2 : index
    %c0_231 = arith.constant 0 : index
    %c0_232 = arith.constant 0 : index
    %234 = vector.load %arg9[%c2_230, %c0_231, %c0_232] : memref<16x20x50xf32, #tpu.memory_space<vmem>>, vector<1x20x50xf32>
    %235 = vector.shape_cast %234 : vector<1x20x50xf32> to vector<20x50xf32>
    %cst_233 = arith.constant dense<0.000000e+00> : vector<1x50xf32>
    %236 = tpu.matmul %233, %235, %cst_233 {dimension_numbers = #tpu.dot_dimension_numbers<[1], [0], [0], [1], [0, 0, 1, 1], [], []>} : vector<1x20xf32>, vector<20x50xf32>, vector<1x50xf32> -> vector<1x50xf32>
    %237 = arith.addf %232, %236 : vector<1x50xf32>
    %238 = vector.extract_strided_slice %219 {offsets = [3, 0], sizes = [1, 20], strides = [1, 1]} : vector<16x20xf32> to vector<1x20xf32>
    %c3_234 = arith.constant 3 : index
    %c0_235 = arith.constant 0 : index
    %c0_236 = arith.constant 0 : index
    %239 = vector.load %arg9[%c3_234, %c0_235, %c0_236] : memref<16x20x50xf32, #tpu.memory_space<vmem>>, vector<1x20x50xf32>
    %240 = vector.shape_cast %239 : vector<1x20x50xf32> to vector<20x50xf32>
    %cst_237 = arith.constant dense<0.000000e+00> : vector<1x50xf32>
    %241 = tpu.matmul %238, %240, %cst_237 {dimension_numbers = #tpu.dot_dimension_numbers<[1], [0], [0], [1], [0, 0, 1, 1], [], []>} : vector<1x20xf32>, vector<20x50xf32>, vector<1x50xf32> -> vector<1x50xf32>
    %242 = arith.addf %237, %241 : vector<1x50xf32>
    %243 = vector.extract_strided_slice %219 {offsets = [4, 0], sizes = [1, 20], strides = [1, 1]} : vector<16x20xf32> to vector<1x20xf32>
    %c4_238 = arith.constant 4 : index
    %c0_239 = arith.constant 0 : index
    %c0_240 = arith.constant 0 : index
    %244 = vector.load %arg9[%c4_238, %c0_239, %c0_240] : memref<16x20x50xf32, #tpu.memory_space<vmem>>, vector<1x20x50xf32>
    %245 = vector.shape_cast %244 : vector<1x20x50xf32> to vector<20x50xf32>
    %cst_241 = arith.constant dense<0.000000e+00> : vector<1x50xf32>
    %246 = tpu.matmul %243, %245, %cst_241 {dimension_numbers = #tpu.dot_dimension_numbers<[1], [0], [0], [1], [0, 0, 1, 1], [], []>} : vector<1x20xf32>, vector<20x50xf32>, vector<1x50xf32> -> vector<1x50xf32>
    %247 = arith.addf %242, %246 : vector<1x50xf32>
    %248 = vector.extract_strided_slice %219 {offsets = [5, 0], sizes = [1, 20], strides = [1, 1]} : vector<16x20xf32> to vector<1x20xf32>
    %c5_242 = arith.constant 5 : index
    %c0_243 = arith.constant 0 : index
    %c0_244 = arith.constant 0 : index
    %249 = vector.load %arg9[%c5_242, %c0_243, %c0_244] : memref<16x20x50xf32, #tpu.memory_space<vmem>>, vector<1x20x50xf32>
    %250 = vector.shape_cast %249 : vector<1x20x50xf32> to vector<20x50xf32>
    %cst_245 = arith.constant dense<0.000000e+00> : vector<1x50xf32>
    %251 = tpu.matmul %248, %250, %cst_245 {dimension_numbers = #tpu.dot_dimension_numbers<[1], [0], [0], [1], [0, 0, 1, 1], [], []>} : vector<1x20xf32>, vector<20x50xf32>, vector<1x50xf32> -> vector<1x50xf32>
    %252 = arith.addf %247, %251 : vector<1x50xf32>
    %253 = vector.extract_strided_slice %219 {offsets = [6, 0], sizes = [1, 20], strides = [1, 1]} : vector<16x20xf32> to vector<1x20xf32>
    %c6_246 = arith.constant 6 : index
    %c0_247 = arith.constant 0 : index
    %c0_248 = arith.constant 0 : index
    %254 = vector.load %arg9[%c6_246, %c0_247, %c0_248] : memref<16x20x50xf32, #tpu.memory_space<vmem>>, vector<1x20x50xf32>
    %255 = vector.shape_cast %254 : vector<1x20x50xf32> to vector<20x50xf32>
    %cst_249 = arith.constant dense<0.000000e+00> : vector<1x50xf32>
    %256 = tpu.matmul %253, %255, %cst_249 {dimension_numbers = #tpu.dot_dimension_numbers<[1], [0], [0], [1], [0, 0, 1, 1], [], []>} : vector<1x20xf32>, vector<20x50xf32>, vector<1x50xf32> -> vector<1x50xf32>
    %257 = arith.addf %252, %256 : vector<1x50xf32>
    %258 = vector.extract_strided_slice %219 {offsets = [7, 0], sizes = [1, 20], strides = [1, 1]} : vector<16x20xf32> to vector<1x20xf32>
    %c7_250 = arith.constant 7 : index
    %c0_251 = arith.constant 0 : index
    %c0_252 = arith.constant 0 : index
    %259 = vector.load %arg9[%c7_250, %c0_251, %c0_252] : memref<16x20x50xf32, #tpu.memory_space<vmem>>, vector<1x20x50xf32>
    %260 = vector.shape_cast %259 : vector<1x20x50xf32> to vector<20x50xf32>
    %cst_253 = arith.constant dense<0.000000e+00> : vector<1x50xf32>
    %261 = tpu.matmul %258, %260, %cst_253 {dimension_numbers = #tpu.dot_dimension_numbers<[1], [0], [0], [1], [0, 0, 1, 1], [], []>} : vector<1x20xf32>, vector<20x50xf32>, vector<1x50xf32> -> vector<1x50xf32>
    %262 = arith.addf %257, %261 : vector<1x50xf32>
    %263 = vector.extract_strided_slice %219 {offsets = [8, 0], sizes = [1, 20], strides = [1, 1]} : vector<16x20xf32> to vector<1x20xf32>
    %c8_254 = arith.constant 8 : index
    %c0_255 = arith.constant 0 : index
    %c0_256 = arith.constant 0 : index
    %264 = vector.load %arg9[%c8_254, %c0_255, %c0_256] : memref<16x20x50xf32, #tpu.memory_space<vmem>>, vector<1x20x50xf32>
    %265 = vector.shape_cast %264 : vector<1x20x50xf32> to vector<20x50xf32>
    %cst_257 = arith.constant dense<0.000000e+00> : vector<1x50xf32>
    %266 = tpu.matmul %263, %265, %cst_257 {dimension_numbers = #tpu.dot_dimension_numbers<[1], [0], [0], [1], [0, 0, 1, 1], [], []>} : vector<1x20xf32>, vector<20x50xf32>, vector<1x50xf32> -> vector<1x50xf32>
    %267 = arith.addf %262, %266 : vector<1x50xf32>
    %268 = vector.extract_strided_slice %219 {offsets = [9, 0], sizes = [1, 20], strides = [1, 1]} : vector<16x20xf32> to vector<1x20xf32>
    %c9_258 = arith.constant 9 : index
    %c0_259 = arith.constant 0 : index
    %c0_260 = arith.constant 0 : index
    %269 = vector.load %arg9[%c9_258, %c0_259, %c0_260] : memref<16x20x50xf32, #tpu.memory_space<vmem>>, vector<1x20x50xf32>
    %270 = vector.shape_cast %269 : vector<1x20x50xf32> to vector<20x50xf32>
    %cst_261 = arith.constant dense<0.000000e+00> : vector<1x50xf32>
    %271 = tpu.matmul %268, %270, %cst_261 {dimension_numbers = #tpu.dot_dimension_numbers<[1], [0], [0], [1], [0, 0, 1, 1], [], []>} : vector<1x20xf32>, vector<20x50xf32>, vector<1x50xf32> -> vector<1x50xf32>
    %272 = arith.addf %267, %271 : vector<1x50xf32>
    %273 = vector.extract_strided_slice %219 {offsets = [10, 0], sizes = [1, 20], strides = [1, 1]} : vector<16x20xf32> to vector<1x20xf32>
    %c10_262 = arith.constant 10 : index
    %c0_263 = arith.constant 0 : index
    %c0_264 = arith.constant 0 : index
    %274 = vector.load %arg9[%c10_262, %c0_263, %c0_264] : memref<16x20x50xf32, #tpu.memory_space<vmem>>, vector<1x20x50xf32>
    %275 = vector.shape_cast %274 : vector<1x20x50xf32> to vector<20x50xf32>
    %cst_265 = arith.constant dense<0.000000e+00> : vector<1x50xf32>
    %276 = tpu.matmul %273, %275, %cst_265 {dimension_numbers = #tpu.dot_dimension_numbers<[1], [0], [0], [1], [0, 0, 1, 1], [], []>} : vector<1x20xf32>, vector<20x50xf32>, vector<1x50xf32> -> vector<1x50xf32>
    %277 = arith.addf %272, %276 : vector<1x50xf32>
    %278 = vector.extract_strided_slice %219 {offsets = [11, 0], sizes = [1, 20], strides = [1, 1]} : vector<16x20xf32> to vector<1x20xf32>
    %c11_266 = arith.constant 11 : index
    %c0_267 = arith.constant 0 : index
    %c0_268 = arith.constant 0 : index
    %279 = vector.load %arg9[%c11_266, %c0_267, %c0_268] : memref<16x20x50xf32, #tpu.memory_space<vmem>>, vector<1x20x50xf32>
    %280 = vector.shape_cast %279 : vector<1x20x50xf32> to vector<20x50xf32>
    %cst_269 = arith.constant dense<0.000000e+00> : vector<1x50xf32>
    %281 = tpu.matmul %278, %280, %cst_269 {dimension_numbers = #tpu.dot_dimension_numbers<[1], [0], [0], [1], [0, 0, 1, 1], [], []>} : vector<1x20xf32>, vector<20x50xf32>, vector<1x50xf32> -> vector<1x50xf32>
    %282 = arith.addf %277, %281 : vector<1x50xf32>
    %283 = vector.extract_strided_slice %219 {offsets = [12, 0], sizes = [1, 20], strides = [1, 1]} : vector<16x20xf32> to vector<1x20xf32>
    %c12_270 = arith.constant 12 : index
    %c0_271 = arith.constant 0 : index
    %c0_272 = arith.constant 0 : index
    %284 = vector.load %arg9[%c12_270, %c0_271, %c0_272] : memref<16x20x50xf32, #tpu.memory_space<vmem>>, vector<1x20x50xf32>
    %285 = vector.shape_cast %284 : vector<1x20x50xf32> to vector<20x50xf32>
    %cst_273 = arith.constant dense<0.000000e+00> : vector<1x50xf32>
    %286 = tpu.matmul %283, %285, %cst_273 {dimension_numbers = #tpu.dot_dimension_numbers<[1], [0], [0], [1], [0, 0, 1, 1], [], []>} : vector<1x20xf32>, vector<20x50xf32>, vector<1x50xf32> -> vector<1x50xf32>
    %287 = arith.addf %282, %286 : vector<1x50xf32>
    %288 = vector.extract_strided_slice %219 {offsets = [13, 0], sizes = [1, 20], strides = [1, 1]} : vector<16x20xf32> to vector<1x20xf32>
    %c13_274 = arith.constant 13 : index
    %c0_275 = arith.constant 0 : index
    %c0_276 = arith.constant 0 : index
    %289 = vector.load %arg9[%c13_274, %c0_275, %c0_276] : memref<16x20x50xf32, #tpu.memory_space<vmem>>, vector<1x20x50xf32>
    %290 = vector.shape_cast %289 : vector<1x20x50xf32> to vector<20x50xf32>
    %cst_277 = arith.constant dense<0.000000e+00> : vector<1x50xf32>
    %291 = tpu.matmul %288, %290, %cst_277 {dimension_numbers = #tpu.dot_dimension_numbers<[1], [0], [0], [1], [0, 0, 1, 1], [], []>} : vector<1x20xf32>, vector<20x50xf32>, vector<1x50xf32> -> vector<1x50xf32>
    %292 = arith.addf %287, %291 : vector<1x50xf32>
    %293 = vector.extract_strided_slice %219 {offsets = [14, 0], sizes = [1, 20], strides = [1, 1]} : vector<16x20xf32> to vector<1x20xf32>
    %c14_278 = arith.constant 14 : index
    %c0_279 = arith.constant 0 : index
    %c0_280 = arith.constant 0 : index
    %294 = vector.load %arg9[%c14_278, %c0_279, %c0_280] : memref<16x20x50xf32, #tpu.memory_space<vmem>>, vector<1x20x50xf32>
    %295 = vector.shape_cast %294 : vector<1x20x50xf32> to vector<20x50xf32>
    %cst_281 = arith.constant dense<0.000000e+00> : vector<1x50xf32>
    %296 = tpu.matmul %293, %295, %cst_281 {dimension_numbers = #tpu.dot_dimension_numbers<[1], [0], [0], [1], [0, 0, 1, 1], [], []>} : vector<1x20xf32>, vector<20x50xf32>, vector<1x50xf32> -> vector<1x50xf32>
    %297 = arith.addf %292, %296 : vector<1x50xf32>
    %298 = vector.extract_strided_slice %219 {offsets = [15, 0], sizes = [1, 20], strides = [1, 1]} : vector<16x20xf32> to vector<1x20xf32>
    %c15_282 = arith.constant 15 : index
    %c0_283 = arith.constant 0 : index
    %c0_284 = arith.constant 0 : index
    %299 = vector.load %arg9[%c15_282, %c0_283, %c0_284] : memref<16x20x50xf32, #tpu.memory_space<vmem>>, vector<1x20x50xf32>
    %300 = vector.shape_cast %299 : vector<1x20x50xf32> to vector<20x50xf32>
    %cst_285 = arith.constant dense<0.000000e+00> : vector<1x50xf32>
    %301 = tpu.matmul %298, %300, %cst_285 {dimension_numbers = #tpu.dot_dimension_numbers<[1], [0], [0], [1], [0, 0, 1, 1], [], []>} : vector<1x20xf32>, vector<20x50xf32>, vector<1x50xf32> -> vector<1x50xf32>
    %302 = arith.addf %297, %301 : vector<1x50xf32>
    %cst_286 = arith.constant 0.000000e+00 : f32
    %303 = vector.broadcast %cst_286 : f32 to vector<1x50xf32>
    %304 = arith.maximumf %302, %303 : vector<1x50xf32>
    %c0_287 = arith.constant 0 : index
    %c0_288 = arith.constant 0 : index
    %305 = vector.load %arg11[%c0_287, %c0_288] : memref<50x10xf32, #tpu.memory_space<vmem>>, vector<50x10xf32>
    %cst_289 = arith.constant dense<0.000000e+00> : vector<1x10xf32>
    %306 = tpu.matmul %304, %305, %cst_289 {dimension_numbers = #tpu.dot_dimension_numbers<[1], [0], [0], [1], [0, 0, 1, 1], [], []>} : vector<1x50xf32>, vector<50x10xf32>, vector<1x10xf32> -> vector<1x10xf32>
    %c0_290 = arith.constant 0 : index
    %c0_291 = arith.constant 0 : index
    %307 = vector.load %arg12[%c0_290, %c0_291] : memref<1x10xf32, #tpu.memory_space<vmem>>, vector<1x10xf32>
    %308 = arith.addf %306, %307 : vector<1x10xf32>
    %c0_292 = arith.constant 0 : index
    %c0_293 = arith.constant 0 : index
    %c0_294 = arith.constant 0 : index
    %309 = vector.load %arg13[%c0_292, %c0_293, %c0_294] : memref<1x1x10xf32, #tpu.memory_space<vmem>>, vector<1x1x10xf32>
    %310 = vector.shape_cast %309 : vector<1x1x10xf32> to vector<1x10xf32>
    %311 = vector.shape_cast %308 : vector<1x10xf32> to vector<1x1x10xf32>
    tpu.vector_store %arg13[%c0_292, %c0_293, %c0_294], %311 {strides = array<i32>} : memref<1x1x10xf32, #tpu.memory_space<vmem>>, vector<1x1x10xf32>,
    return
  }
  func.func @transform_0(%arg0: i32) -> (i32, i32, i32) {
    %c0_i32 = arith.constant 0 : i32
    %c0_i32_0 = arith.constant 0 : i32
    %c0_i32_1 = arith.constant 0 : i32
    return %arg0, %c0_i32, %c0_i32_0 : i32, i32, i32
  }
  func.func @transform_1(%arg0: i32) -> (i32, i32, i32) {
    %c0_i32 = arith.constant 0 : i32
    %c0_i32_0 = arith.constant 0 : i32
    %c0_i32_1 = arith.constant 0 : i32
    %c0_i32_2 = arith.constant 0 : i32
    return %c0_i32, %c0_i32_0, %c0_i32_1 : i32, i32, i32
  }
  func.func @transform_2(%arg0: i32) -> (i32, i32, i32) {
    %c0_i32 = arith.constant 0 : i32
    %c0_i32_0 = arith.constant 0 : i32
    %c0_i32_1 = arith.constant 0 : i32
    %c0_i32_2 = arith.constant 0 : i32
    return %c0_i32, %c0_i32_0, %c0_i32_1 : i32, i32, i32
  }
  func.func @transform_3(%arg0: i32) -> (i32, i32, i32) {
    %c0_i32 = arith.constant 0 : i32
    %c0_i32_0 = arith.constant 0 : i32
    %c0_i32_1 = arith.constant 0 : i32
    %c0_i32_2 = arith.constant 0 : i32
    return %c0_i32, %c0_i32_0, %c0_i32_1 : i32, i32, i32
  }
  func.func @transform_4(%arg0: i32) -> (i32, i32) {
    %c0_i32 = arith.constant 0 : i32
    %c0_i32_0 = arith.constant 0 : i32
    %c0_i32_1 = arith.constant 0 : i32
    return %c0_i32, %c0_i32_0 : i32, i32
  }
  func.func @transform_5(%arg0: i32) -> (i32, i32) {
    %c0_i32 = arith.constant 0 : i32
    %c0_i32_0 = arith.constant 0 : i32
    %c0_i32_1 = arith.constant 0 : i32
    return %c0_i32, %c0_i32_0 : i32, i32
  }
  func.func @transform_6(%arg0: i32) -> (i32, i32, i32) {
    %c0_i32 = arith.constant 0 : i32
    %c0_i32_0 = arith.constant 0 : i32
    %c0_i32_1 = arith.constant 0 : i32
    %c0_i32_2 = arith.constant 0 : i32
    return %c0_i32, %c0_i32_0, %c0_i32_1 : i32, i32, i32
  }
  func.func @transform_7(%arg0: i32) -> (i32, i32) {
    %c0_i32 = arith.constant 0 : i32
    %c0_i32_0 = arith.constant 0 : i32
    %c0_i32_1 = arith.constant 0 : i32
    return %c0_i32, %c0_i32_0 : i32, i32
  }
  func.func @transform_8(%arg0: i32) -> (i32, i32, i32) {
    %c0_i32 = arith.constant 0 : i32
    %c0_i32_0 = arith.constant 0 : i32
    %c0_i32_1 = arith.constant 0 : i32
    %c0_i32_2 = arith.constant 0 : i32
    return %c0_i32, %c0_i32_0, %c0_i32_1 : i32, i32, i32
  }
  func.func @transform_9(%arg0: i32) -> (i32, i32) {
    %c0_i32 = arith.constant 0 : i32
    %c0_i32_0 = arith.constant 0 : i32
    %c0_i32_1 = arith.constant 0 : i32
    return %c0_i32, %c0_i32_0 : i32, i32
  }
  func.func @transform_10(%arg0: i32) -> (i32, i32) {
    %c0_i32 = arith.constant 0 : i32
    %c0_i32_0 = arith.constant 0 : i32
    %c0_i32_1 = arith.constant 0 : i32
    return %c0_i32, %c0_i32_0 : i32, i32
  }
  func.func @transform_11(%arg0: i32) -> (i32, i32) {
    %c0_i32 = arith.constant 0 : i32
    %c0_i32_0 = arith.constant 0 : i32
    %c0_i32_1 = arith.constant 0 : i32
    return %c0_i32, %c0_i32_0 : i32, i32
  }
  func.func @transform_12(%arg0: i32) -> (i32, i32, i32) {
    %c0_i32 = arith.constant 0 : i32
    %c0_i32_0 = arith.constant 0 : i32
    %c0_i32_1 = arith.constant 0 : i32
    return %arg0, %c0_i32, %c0_i32_0 : i32, i32, i32
  }
}

</mosaic_0001>

<bundles_post_ra>
// kernel: cnn_forward.1
= control target key start
LH: loop header
LB: loop body
LE: loop exit
PB: predicated region body
PF: predicated region fallthrough
CT: control target
= control target key end

     0   :  { %s22110_s0 = inlined_call_operand.vmem [shape: f32[2,576,25], index: 0, kind: input, shape index: {}]   ;;  %s22111_s1 = inlined_call_operand.vmem [shape: f32[4,144,576], index: 1, kind: input, shape index: {}]   ;;  %s22112_s2 = inlined_call_operand.vmem [shape: f32[25,64,144], index: 2, kind: input, shape index: {}]   ;;  %s22113_s3 = inlined_call_operand.vmem [shape: f32[4,16,64], index: 3, kind: input, shape index: {}]   ;;  %s22114_s4 = inlined_call_operand.vmem [shape: f32[25,10], index: 4, kind: input, shape index: {}]   ;;  %s22115_s5 = inlined_call_operand.vmem [shape: f32[1,10], index: 5, kind: input, shape index: {}]   ;;  %s22116_s6 = inlined_call_operand.vmem [shape: f32[25,10,20], index: 6, kind: input, shape index: {}]   ;;  %s22117_s7 = inlined_call_operand.vmem [shape: f32[1,20], index: 7, kind: input, shape index: {}]   ;;  %s22118_s8 = inlined_call_operand.vmem [shape: f32[16,20,50], index: 8, kind: input, shape index: {}]   ;;  %s22119_s9 = inlined_call_operand.vmem [shape: f32[1,50], index: 9, kind: input, shape index: {}]   ;;  %s22120_s10 = inlined_call_operand.vmem [shape: f32[50,10], index: 10, kind: input, shape index: {}]   ;;  %s22121_s11 = inlined_call_operand.vmem [shape: f32[1,10], index: 11, kind: input, shape index: {}]   ;;  %s22122_s12 = inlined_call_operand.hbm [shape: f32[2,1,10], index: 12, kind: output, shape index: {}]  }
   0x1   :  { %22236 = sst [smem:[#allocation53_spill]] %s22110_s0 }
   0x2   :  { %22237 = sst [smem:[#allocation54_spill]] %s22111_s1 }
   0x3   :  { %17 = vsyncpa [#allocation3], 0 }
   0x4   :  { %19 = vsyncpa [#allocation3 + $0x1], 0  ;;  %s15699_s21 = smov 0   ;;  %s15701_s22 = smov 0  }
   0x5   :  { %s15703_s23 = smov 0   ;;  %s15705_s24 = smov 0  }
   0x6 LB: > { %s15720_s25 = sadd.s32 4294967295, %s15629_s24   ;;  %s12684_s26 = sadd.s32 4294967294, %s15629_s24   ;;  %s15629_s24 = sphi %s15705_s24, %s22562_s24   ;;  %s15625_s23 = sphi %s15703_s23, %s22561_s23   ;;  %s15621_s22 = sphi %s15701_s22, %s22560_s22   ;;  %s15617_s21 = sphi %s15699_s21, %s22559_s21  }
   0x7   : > { %s15724_s27 = sadd.s32 1, %s15629_s24   ;;  %s289_s28 = sadd.s32 1, %s15625_s23 }
   0x8   : > { %s286_s29 = ssub.s32 %s15629_s24, %s15724_s27  ;;  %p299_p0 = scmp.ne.s32.totalorder %s15625_s23, %s15621_s22 }
   0x9   : > { %p287_p1 = scmp.eq.s32.totalorder %s286_s29, 0  ;;  %p300_p2 = scmp.eq.s32.totalorder %s15720_s25, 1 }
   0xa   : > { %p305_p3 = scmp.ne.s32.totalorder %s15621_s22, %s15617_s21  ;;  %p306_p4 = scmp.eq.s32.totalorder %s12684_s26, 1 }
   0xb   : > { %s15735_s30 = scalar_select %p287_p1, %s15625_s23, %s289_s28  }
   0xc   : > { %p15737_p5 = por %p300_p2, %p299_p0  ;;  %p15741_p6 = por %p306_p4, %p305_p3 }
   0xd   : > { %p12687_p7 = scmp.ge.s32.totalorder %s15629_s24, 1  ;;  %p365_p8 = scmp.lt.s32.totalorder %s15629_s24, 3 }
   0xf   : > { %p366_p9 = pnand %p12687_p7, %p365_p8 }
  0x11   : > { %369 = sbr.rel (%p366_p9) target bundleno = 5221 (0x1465), region = 68 }
  0x16   : > { %v486_v0 = vld [vmem:[%s22114_s4 + $0x18] sm:$0x1]  ;;  %vm711_vm0 = vcmask 1040384   ;;  %v485_v1 = vld [vmem:[%s22114_s4 + $0x10] sm:$0xff]  ;;  %p406_p10 = scmp.lt.s32.totalorder %s15720_s25, 1  ;;  %v484_v2 = vld [vmem:[%s22114_s4 + $0x8] sm:$0xff] }
  0x17   : > { %14601 = vmatprep.subr.msk.mxu0 %vm711_vm0, %v486_v0  ;;  %v483_v3 = vld [vmem:[%s22114_s4] sm:$0xff]  ;;  %vm494_vm1 = vcmask 203776   ;;  %s22240_s0 = sld [smem:[#allocation53_spill]]  ;;  %v22185_v55 = vmov 0.0   ;;  %vm1230_vm2 = vcmask 523264   ;;  %vm3676_vm3 = vcmask 130048  }
  0x18   : > { %14602 = vmatpush3.msk.msra.mxu0 %vm711_vm0, %v486_v0  ;;  %s407_s26 = scalar_select %p406_p10, %s15720_s25, 1  ;;  %1285 = vmatprep.subr.mxu1 %v22185_v55  ;;  %vm3833_vm4 = vcmask 1041408   ;;  %vm3808_vm5 = vcmask 80896   ;;  %vm11238_vm6 = vcmask 1043456   ;;  %vm15632_vm7 = vmmov 0  }
  0x19   : > { %14603 = vmatprep.subr.mxu0 %v485_v1  ;;  %s22241_s1 = sld [smem:[#allocation54_spill]]  ;;  %vm11234_vm8 = vcmask 162816   ;;  %vm12537_vm9 = vcmask 408576   ;;  %vm12614_vm10 = vcmask 73728  }
  0x1a   : > { %14604 = vmatpush3.msra.mxu0 %v485_v1  ;;  %s15526_s15 = smul.u32 576, %s407_s26  ;;  %s404_s26 = sand.u32 1, %s15621_s22  }
  0x1b   : > { %14605 = vmatprep.subr.mxu0 %v484_v2  ;;  %s12617_s20 = scalar_lea.sflag [#allocation3], %s404_s26 }
  0x1c   : > { %14606 = vmatpush3.msra.mxu0 %v484_v2 }
  0x1d   : > { %s15764_s18 = scalar_lea.vmem %s22240_s0, %s15526_s15  ;;  %14607 = vmatprep.subr.mxu0 %v483_v3  ;;  %s14056_s15 = sshll.u32 %s15720_s25, 4 }
  0x1e   : > { %v411_v4 = vld [vmem:[%s15764_s18] sm:$0xff]  ;;  %v412_v5 = vld [vmem:[%s15764_s18 + $0x8] sm:$0xff]  ;;  %v413_v6 = vld [vmem:[%s15764_s18 + $0x10] sm:$0xff]  ;;  %14608 = vmatpush3.msra.mxu0 %v483_v3  ;;  %s405_s0 = scalar_lea.vmem [#allocation2], %s404_s26  ;;  %s22075_s19 = scalar_lea.hbm %s22122_s12, %s14056_s15 }
  0x1f   : > { %14609 = vmatprep.mubr.msk.f32.mxu0 %vm494_vm1, %v411_v4  ;;  %v414_v7 = vld [vmem:[%s15764_s18 + $0x18] sm:$0xff]  ;;  %v415_v8 = vld [vmem:[%s15764_s18 + $0x20] sm:$0xff]  ;;  %v416_v9 = vld [vmem:[%s15764_s18 + $0x28] sm:$0xff]  ;;  %s12629_s16 = sshll.u32 %s405_s0, 4  ;;  %s15633_s25 = smov [#allocation2]   ;;  %s12630_s16 = int_to_ptr.vmem [resolvable:$true] %s12629_s16 }
  0x20   : > { %14610 = vmatmul.mubr.msk.f32.vlgmr.msra.gmra.mxu0 %vm494_vm1, %v412_v5  ;;  %v417_v10 = vld [vmem:[%s15764_s18 + $0x30] sm:$0xff]  ;;  %v418_v11 = vld [vmem:[%s15764_s18 + $0x38] sm:$0xff]  ;;  %v419_v12 = vld [vmem:[%s15764_s18 + $0x40] sm:$0xff]  ;;  %s15573_s28 = sshll.u32 %s15633_s25, 4  ;;  %s15574_s28 = int_to_ptr.vmem [resolvable:$false] %s15573_s28 }
  0x21   : > { %14612 = vmatprep.mubr.msk.f32.mxu0 %vm494_vm1, %v413_v6  ;;  %v420_v13 = vld [vmem:[%s15764_s18 + $0x48] sm:$0xff]  ;;  %v421_v14 = vld [vmem:[%s15764_s18 + $0x50] sm:$0xff]  ;;  %v422_v15 = vld [vmem:[%s15764_s18 + $0x58] sm:$0xff]  ;;  %s15575_s29 = scalar_lea.vmem %s15574_s28, 32  ;;  %p15576_p0 = scmp.lt.s32.totalorder %s12630_s16, %s15574_s28 }
  0x22   : > { %v423_v16 = vld [vmem:[%s15764_s18 + $0x60] sm:$0xff]  ;;  %v424_v17 = vld [vmem:[%s15764_s18 + $0x68] sm:$0xff]  ;;  %v425_v18 = vld [vmem:[%s15764_s18 + $0x70] sm:$0xff] }
  0x23   : > { %v426_v19 = vld [vmem:[%s15764_s18 + $0x78] sm:$0xff]  ;;  %v427_v20 = vld [vmem:[%s15764_s18 + $0x80] sm:$0xff]  ;;  %v428_v21 = vld [vmem:[%s15764_s18 + $0x88] sm:$0xff] }
  0x24   : > { %14613 = vmatmul.mubr.msk.f32.gmra.mxu0 %vm494_vm1, %v414_v7  ;;  %v429_v22 = vld [vmem:[%s15764_s18 + $0x90] sm:$0xff]  ;;  %v430_v23 = vld [vmem:[%s15764_s18 + $0x98] sm:$0xff]  ;;  %v431_v24 = vld [vmem:[%s15764_s18 + $0xa0] sm:$0xff] }
  0x25   : > { %14615 = vmatprep.mubr.msk.f32.mxu0 %vm494_vm1, %v415_v8  ;;  %v432_v25 = vld [vmem:[%s15764_s18 + $0xa8] sm:$0xff]  ;;  %v433_v26 = vld [vmem:[%s15764_s18 + $0xb0] sm:$0xff]  ;;  %v434_v27 = vld [vmem:[%s15764_s18 + $0xb8] sm:$0xff] }
  0x26   : > { %v435_v28 = vld [vmem:[%s15764_s18 + $0xc0] sm:$0xff]  ;;  %v436_v29 = vld [vmem:[%s15764_s18 + $0xc8] sm:$0xff]  ;;  %v437_v30 = vld [vmem:[%s15764_s18 + $0xd0] sm:$0xff] }
  0x27   : > { %v438_v31 = vld [vmem:[%s15764_s18 + $0xd8] sm:$0xff]  ;;  %v439_v32 = vld [vmem:[%s15764_s18 + $0xe0] sm:$0xff]  ;;  %v440_v33 = vld [vmem:[%s15764_s18 + $0xe8] sm:$0xff] }
  0x28   : > { %14616 = vmatmul.mubr.msk.f32.gmra.mxu0 %vm494_vm1, %v416_v9  ;;  %v441_v34 = vld [vmem:[%s15764_s18 + $0xf0] sm:$0xff]  ;;  %v442_v35 = vld [vmem:[%s15764_s18 + $0xf8] sm:$0xff]  ;;  %v443_v36 = vld [vmem:[%s15764_s18 + $0x100] sm:$0xff] }
  0x29   : > { %14618 = vmatprep.mubr.msk.f32.mxu0 %vm494_vm1, %v417_v10  ;;  %v444_v37 = vld [vmem:[%s15764_s18 + $0x108] sm:$0xff]  ;;  %v445_v38 = vld [vmem:[%s15764_s18 + $0x110] sm:$0xff]  ;;  %v446_v39 = vld [vmem:[%s15764_s18 + $0x118] sm:$0xff] }
  0x2a   : > { %v447_v40 = vld [vmem:[%s15764_s18 + $0x120] sm:$0xff]  ;;  %v448_v41 = vld [vmem:[%s15764_s18 + $0x128] sm:$0xff]  ;;  %v449_v42 = vld [vmem:[%s15764_s18 + $0x130] sm:$0xff] }
  0x2b   : > { %v450_v43 = vld [vmem:[%s15764_s18 + $0x138] sm:$0xff]  ;;  %v451_v44 = vld [vmem:[%s15764_s18 + $0x140] sm:$0xff]  ;;  %v452_v45 = vld [vmem:[%s15764_s18 + $0x148] sm:$0xff] }
  0x2c   : > { %14619 = vmatmul.mubr.msk.f32.gmra.mxu0 %vm494_vm1, %v418_v11  ;;  %v453_v46 = vld [vmem:[%s15764_s18 + $0x150] sm:$0xff]  ;;  %v454_v47 = vld [vmem:[%s15764_s18 + $0x158] sm:$0xff]  ;;  %v455_v48 = vld [vmem:[%s15764_s18 + $0x160] sm:$0xff] }
  0x2d   : > { %14621 = vmatprep.mubr.msk.f32.mxu0 %vm494_vm1, %v419_v12  ;;  %v456_v49 = vld [vmem:[%s15764_s18 + $0x168] sm:$0xff]  ;;  %v457_v50 = vld [vmem:[%s15764_s18 + $0x170] sm:$0xff]  ;;  %v458_v51 = vld [vmem:[%s15764_s18 + $0x178] sm:$0xff] }
  0x2e   : > { %v459_v52 = vld [vmem:[%s15764_s18 + $0x180] sm:$0xff]  ;;  %v460_v53 = vld [vmem:[%s15764_s18 + $0x188] sm:$0xff]  ;;  %v461_v54 = vld [vmem:[%s15764_s18 + $0x190] sm:$0xff] }
  0x2f   : > { %v462_v56 = vld [vmem:[%s15764_s18 + $0x198] sm:$0xff]  ;;  %v463_v57 = vld [vmem:[%s15764_s18 + $0x1a0] sm:$0xff]  ;;  %v464_v58 = vld [vmem:[%s15764_s18 + $0x1a8] sm:$0xff] }
  0x30   : > { %14622 = vmatmul.mubr.msk.f32.gmra.mxu0 %vm494_vm1, %v420_v13  ;;  %v465_v59 = vld [vmem:[%s15764_s18 + $0x1b0] sm:$0xff]  ;;  %v466_v60 = vld [vmem:[%s15764_s18 + $0x1b8] sm:$0xff]  ;;  %v467_v61 = vld [vmem:[%s15764_s18 + $0x1c0] sm:$0xff] }
  0x31   : > { %14624 = vmatprep.mubr.msk.f32.mxu0 %vm494_vm1, %v421_v14  ;;  %v468_v62 = vld [vmem:[%s15764_s18 + $0x1c8] sm:$0xff]  ;;  %v469_v63 = vld [vmem:[%s15764_s18 + $0x1d0] sm:$0xff]  ;;  %v470_v0 = vld [vmem:[%s15764_s18 + $0x1d8] sm:$0xff] }
  0x32   : > { %v471_v1 = vld [vmem:[%s15764_s18 + $0x1e0] sm:$0xff]  ;;  %v472_v2 = vld [vmem:[%s15764_s18 + $0x1e8] sm:$0xff]  ;;  %v473_v3 = vld [vmem:[%s15764_s18 + $0x1f0] sm:$0xff] }
  0x33   : > { %v474_v4 = vld [vmem:[%s15764_s18 + $0x1f8] sm:$0xff]  ;;  %v475_v5 = vld [vmem:[%s15764_s18 + $0x200] sm:$0xff]  ;;  %v476_v6 = vld [vmem:[%s15764_s18 + $0x208] sm:$0xff] }
  0x34   : > { %14625 = vmatmul.mubr.msk.f32.gmra.mxu0 %vm494_vm1, %v422_v15  ;;  %v477_v7 = vld [vmem:[%s15764_s18 + $0x210] sm:$0xff]  ;;  %v478_v8 = vld [vmem:[%s15764_s18 + $0x218] sm:$0xff]  ;;  %v479_v9 = vld [vmem:[%s15764_s18 + $0x220] sm:$0xff] }
  0x35   : > { %14627 = vmatprep.mubr.msk.f32.mxu0 %vm494_vm1, %v423_v16  ;;  %v480_v10 = vld [vmem:[%s15764_s18 + $0x228] sm:$0xff]  ;;  %v481_v11 = vld [vmem:[%s15764_s18 + $0x230] sm:$0xff]  ;;  %v482_v12 = vld [vmem:[%s15764_s18 + $0x238] sm:$0xff] }
  0x36   : > { %v1141_v13 = vld [vmem:[%s22241_s1 + $0x8] sm:$0xff] }
  0x37   : > { %1349 = vmatprep.mubr.f32.mxu1 %v1141_v13 }
  0x38   : > { %14628 = vmatmul.mubr.msk.f32.gmra.mxu0 %vm494_vm1, %v424_v17 }
  0x39   : > { %14630 = vmatprep.mubr.msk.f32.mxu0 %vm494_vm1, %v425_v18 }
  0x3c   : > { %14631 = vmatmul.mubr.msk.f32.gmra.mxu0 %vm494_vm1, %v426_v19 }
  0x3d   : > { %14633 = vmatprep.mubr.msk.f32.mxu0 %vm494_vm1, %v427_v20 }
  0x40   : > { %14634 = vmatmul.mubr.msk.f32.gmra.mxu0 %vm494_vm1, %v428_v21 }
  0x41   : > { %14636 = vmatprep.mubr.msk.f32.mxu0 %vm494_vm1, %v429_v22 }
  0x44   : > { %14637 = vmatmul.mubr.msk.f32.gmra.mxu0 %vm494_vm1, %v430_v23 }
  0x45   : > { %14639 = vmatprep.mubr.msk.f32.mxu0 %vm494_vm1, %v431_v24 }
  0x48   : > { %14640 = vmatmul.mubr.msk.f32.gmra.mxu0 %vm494_vm1, %v432_v25 }
  0x49   : > { %14642 = vmatprep.mubr.msk.f32.mxu0 %vm494_vm1, %v433_v26 }
  0x4c   : > { %14643 = vmatmul.mubr.msk.f32.gmra.mxu0 %vm494_vm1, %v434_v27 }
  0x4d   : > { %14645 = vmatprep.mubr.msk.f32.mxu0 %vm494_vm1, %v435_v28  ;;  %v15925_v28 = vld [vmem:[%s22115_s5] ss:$0 sm:$0xff] }
  0x50   : > { %14646 = vmatmul.mubr.msk.f32.gmra.mxu0 %vm494_vm1, %v436_v29 }
  0x51   : > { %14648 = vmatprep.mubr.msk.f32.mxu0 %vm494_vm1, %v437_v30 }
  0x54   : > { %14649 = vmatmul.mubr.msk.f32.gmra.mxu0 %vm494_vm1, %v438_v31 }
  0x55   : > { %14651 = vmatprep.mubr.msk.f32.mxu0 %vm494_vm1, %v439_v32 }
  0x58   : > { %14652 = vmatmul.mubr.msk.f32.gmra.mxu0 %vm494_vm1, %v440_v33 }
  0x59   : > { %14654 = vmatprep.mubr.msk.f32.mxu0 %vm494_vm1, %v441_v34 }
  0x5c   : > { %14655 = vmatmul.mubr.msk.f32.gmra.mxu0 %vm494_vm1, %v442_v35 }
  0x5d   : > { %14657 = vmatprep.mubr.msk.f32.mxu0 %vm494_vm1, %v443_v36  ;;  %v1144_v36 = vld [vmem:[%s22241_s1 + $0x20] sm:$0xff] }
  0x60   : > { %14658 = vmatmul.mubr.msk.f32.gmra.mxu0 %vm494_vm1, %v444_v37 }
  0x61   : > { %14660 = vmatprep.mubr.msk.f32.mxu0 %vm494_vm1, %v445_v38 }
  0x64   : > { %14661 = vmatmul.mubr.msk.f32.gmra.mxu0 %vm494_vm1, %v446_v39 }
  0x65   : > { %14663 = vmatprep.mubr.msk.f32.mxu0 %vm494_vm1, %v447_v40 }
  0x68   : > { %14664 = vmatmul.mubr.msk.f32.gmra.mxu0 %vm494_vm1, %v448_v41 }
  0x69   : > { %14666 = vmatprep.mubr.msk.f32.mxu0 %vm494_vm1, %v449_v42 }
  0x6c   : > { %14667 = vmatmul.mubr.msk.f32.gmra.mxu0 %vm494_vm1, %v450_v43 }
  0x6d   : > { %14669 = vmatprep.mubr.msk.f32.mxu0 %vm494_vm1, %v451_v44 }
  0x70   : > { %14670 = vmatmul.mubr.msk.f32.gmra.mxu0 %vm494_vm1, %v452_v45 }
  0x71   : > { %14672 = vmatprep.mubr.msk.f32.mxu0 %vm494_vm1, %v453_v46 }
  0x74   : > { %14673 = vmatmul.mubr.msk.f32.gmra.mxu0 %vm494_vm1, %v454_v47 }
  0x75   : > { %14675 = vmatprep.mubr.msk.f32.mxu0 %vm494_vm1, %v455_v48 }
  0x78   : > { %14676 = vmatmul.mubr.msk.f32.gmra.mxu0 %vm494_vm1, %v456_v49 }
  0x79   : > { %14678 = vmatprep.mubr.msk.f32.mxu0 %vm494_vm1, %v457_v50 }
  0x7c   : > { %14679 = vmatmul.mubr.msk.f32.gmra.mxu0 %vm494_vm1, %v458_v51 }
  0x7d   : > { %14681 = vmatprep.mubr.msk.f32.mxu0 %vm494_vm1, %v459_v52 }
  0x80   : > { %14682 = vmatmul.mubr.msk.f32.gmra.mxu0 %vm494_vm1, %v460_v53 }
  0x81   : > { %14684 = vmatprep.mubr.msk.f32.mxu0 %vm494_vm1, %v461_v54 }
  0x84   : > { %14685 = vmatmul.mubr.msk.f32.gmra.mxu0 %vm494_vm1, %v462_v56 }
  0x85   : > { %14687 = vmatprep.mubr.msk.f32.mxu0 %vm494_vm1, %v463_v57 }
  0x88   : > { %14688 = vmatmul.mubr.msk.f32.gmra.mxu0 %vm494_vm1, %v464_v58 }
  0x89   : > { %14690 = vmatprep.mubr.msk.f32.mxu0 %vm494_vm1, %v465_v59 }
  0x8c   : > { %14691 = vmatmul.mubr.msk.f32.gmra.mxu0 %vm494_vm1, %v466_v60 }
  0x8d   : > { %14693 = vmatprep.mubr.msk.f32.mxu0 %vm494_vm1, %v467_v61 }
  0x90   : > { %14694 = vmatmul.mubr.msk.f32.gmra.mxu0 %vm494_vm1, %v468_v62 }
  0x91   : > { %14696 = vmatprep.mubr.msk.f32.mxu0 %vm494_vm1, %v469_v63 }
  0x94   : > { %14697 = vmatmul.mubr.msk.f32.gmra.mxu0 %vm494_vm1, %v470_v0 }
  0x95   : > { %14699 = vmatprep.mubr.msk.f32.mxu0 %vm494_vm1, %v471_v1 }
  0x98   : > { %14700 = vmatmul.mubr.msk.f32.gmra.mxu0 %vm494_vm1, %v472_v2 }
  0x99   : > { %14702 = vmatprep.mubr.msk.f32.mxu0 %vm494_vm1, %v473_v3 }
  0x9c   : > { %14703 = vmatmul.mubr.msk.f32.gmra.mxu0 %vm494_vm1, %v474_v4 }
  0x9d   : > { %14705 = vmatprep.mubr.msk.f32.mxu0 %vm494_vm1, %v475_v5 }
  0xa0   : > { %14706 = vmatmul.mubr.msk.f32.gmra.mxu0 %vm494_vm1, %v476_v6 }
  0xa1   : > { %14708 = vmatprep.mubr.msk.f32.mxu0 %vm494_vm1, %v477_v7 }
  0xa4   : > { %14709 = vmatmul.mubr.msk.f32.gmra.mxu0 %vm494_vm1, %v478_v8 }
  0xa5   : > { %14711 = vmatprep.mubr.msk.f32.mxu0 %vm494_vm1, %v479_v9 }
  0xa8   : > { %14712 = vmatmul.mubr.msk.f32.gmra.mxu0 %vm494_vm1, %v480_v10 }
  0xa9   : > { %14714 = vmatprep.mubr.msk.f32.mxu0 %vm494_vm1, %v481_v11 }
  0xac   : > { %14715 = vmatmul.mubr.msk.f32.gmra.mxu0 %vm494_vm1, %v482_v12 }
  0xad   : > { %14733 = vmatprep.mubr.msk.f32.mxu0 %vm1230_vm2, %v1144_v36 }
  0xe0   : > { %v15914_v14 = vpop.f32.mrf.mxu0 }
  0xe1   : > { %v16019_v60 = vadd.f32 %v15914_v14, %v15925_v28 }
  0xe2   : > { %v15916_v15 = vpop.f32.mrf.mxu0 }
  0xe3   : > { %v16025_v62 = vadd.f32 %v15925_v28, %v15916_v15 }
  0xe4   : > { %v15918_v16 = vpop.f32.mrf.mxu0 }
  0xe5   : > { %v16007_v56 = vadd.f32 %v15918_v16, %v15925_v28  ;;  %22245 = vst [vmem:[#allocation8_spill] sm:$0xff] %v16025_v62 }
  0xe6   : > { %v15920_v17 = vpop.f32.mrf.mxu0 }
  0xe7   : > { %v16013_v58 = vadd.f32 %v15925_v28, %v15920_v17 }
  0xe8   : > { %v14617_v18 = vpop.f32.mrf.mxu0 }
  0xe9   : > { %v15996_v51 = vadd.f32 %v14617_v18, %v15925_v28 }
  0xea   : > { %v801_v19 = vpop.f32.mrf.mxu0 }
  0xeb   : > { %v16001_v53 = vadd.f32 %v15925_v28, %v801_v19 }
  0xec   : > { %v14620_v20 = vpop.f32.mrf.mxu0 }
  0xed   : > { %v15984_v47 = vadd.f32 %v14620_v20, %v15925_v28 }
  0xee   : > { %v811_v21 = vpop.f32.mrf.mxu0 }
  0xef   : > { %v15991_v49 = vadd.f32 %v15925_v28, %v811_v21 }
  0xf0   : > { %v14623_v22 = vpop.f32.mrf.mxu0 }
  0xf1   : > { %v15970_v43 = vadd.f32 %v14623_v22, %v15925_v28 }
  0xf2   : > { %v821_v23 = vpop.f32.mrf.mxu0 }
  0xf3   : > { %v15977_v45 = vadd.f32 %v15925_v28, %v821_v23 }
  0xf4   : > { %v14626_v24 = vpop.f32.mrf.mxu0 }
  0xf5   : > { %v15956_v39 = vadd.f32 %v14626_v24, %v15925_v28 }
  0xf6   : > { %v831_v25 = vpop.f32.mrf.mxu0 }
  0xf7   : > { %v15963_v41 = vadd.f32 %v15925_v28, %v831_v25 }
  0xf8   : > { %v14629_v26 = vpop.f32.mrf.mxu0 }
  0xf9   : > { %v15938_v34 = vadd.f32 %v14629_v26, %v15925_v28 }
  0xfa   : > { %v841_v27 = vpop.f32.mrf.mxu0 }
  0xfb   : > { %22244 = vst [vmem:[#allocation7_spill] sm:$0xff] %v15938_v34  ;;  %v15948_v37 = vadd.f32 %v15925_v28, %v841_v27 }
  0xfc   : > { %v14632_v29 = vpop.f32.mrf.mxu0 }
  0xfd   : > { %v15928_v30 = vadd.f32 %v14632_v29, %v15925_v28 }
  0xfe   : > { %v851_v31 = vpop.f32.mrf.mxu0 }
  0xff   : > { %22242 = vst [vmem:[#allocation5_spill] sm:$0xff] %v15928_v30  ;;  %v15931_v32 = vadd.f32 %v15925_v28, %v851_v31  ;;  %1286 = vmatpush1.msra.mxu1 %v15928_v30 }
 0x100   : > { %v15934_v33 = vpop.f32.mrf.mxu0  ;;  %1287 = vmatprep.subr.mxu1 %v22185_v55 }
 0x101   : > { %22243 = vst [vmem:[#allocation6_spill] sm:$0xff] %v15931_v32  ;;  %1288 = vmatpush1.msra.mxu1 %v15931_v32  ;;  %v16127_v29 = vadd.f32 %v15934_v33, %v15925_v28  ;;  %v1146_v33 = vld [vmem:[%s22241_s1 + $0x30] sm:$0xff] }
 0x102   : > { %v15941_v35 = vpop.f32.mrf.mxu0  ;;  %1289 = vmatprep.subr.mxu1 %v22185_v55 }
 0x103   : > { %1290 = vmatpush1.msra.mxu1 %v15938_v34  ;;  %22258 = vst [vmem:[#allocation21_spill] sm:$0xff] %v16127_v29  ;;  %v16133_v36 = vadd.f32 %v15925_v28, %v15941_v35 }
 0x104   : > { %v15952_v38 = vpop.f32.mrf.mxu0  ;;  %1291 = vmatprep.subr.mxu1 %v22185_v55 }
 0x105   : > { %1292 = vmatpush1.msra.mxu1 %v15948_v37  ;;  %v16115_v24 = vadd.f32 %v15952_v38, %v15925_v28  ;;  %22259 = vst [vmem:[#allocation22_spill] sm:$0xff] %v16133_v36  ;;  %v1140_v38 = vld [vmem:[%s22241_s1] sm:$0xff] }
 0x106   : > { %v15959_v40 = vpop.f32.mrf.mxu0  ;;  %1293 = vmatprep.subr.mxu1 %v22185_v55 }
 0x107   : > { %1294 = vmatpush1.msra.mxu1 %v15956_v39  ;;  %22256 = vst [vmem:[#allocation19_spill] sm:$0xff] %v16115_v24  ;;  %v16121_v26 = vadd.f32 %v15925_v28, %v15959_v40 }
 0x108   : > { %v15966_v42 = vpop.f32.mrf.mxu0  ;;  %1295 = vmatprep.subr.mxu1 %v22185_v55 }
 0x109   : > { %1296 = vmatpush1.msra.mxu1 %v15963_v41  ;;  %v16101_v20 = vadd.f32 %v15966_v42, %v15925_v28  ;;  %22257 = vst [vmem:[#allocation20_spill] sm:$0xff] %v16121_v26 }
 0x10a   : > { %v15973_v44 = vpop.f32.mrf.mxu0  ;;  %1297 = vmatprep.subr.mxu1 %v22185_v55 }
 0x10b   : > { %1298 = vmatpush1.msra.mxu1 %v15970_v43  ;;  %22254 = vst [vmem:[#allocation17_spill] sm:$0xff] %v16101_v20  ;;  %v16109_v22 = vadd.f32 %v15925_v28, %v15973_v44 }
 0x10c   : > { %v15980_v46 = vpop.f32.mrf.mxu0  ;;  %1299 = vmatprep.subr.mxu1 %v22185_v55 }
 0x10d   : > { %1300 = vmatpush1.msra.mxu1 %v15977_v45  ;;  %v16085_v16 = vadd.f32 %v15980_v46, %v15925_v28  ;;  %22255 = vst [vmem:[#allocation18_spill] sm:$0xff] %v16109_v22 }
 0x10e   : > { %v15987_v48 = vpop.f32.mrf.mxu0  ;;  %1301 = vmatprep.subr.mxu1 %v22185_v55 }
 0x10f   : > { %1302 = vmatpush1.msra.mxu1 %v15984_v47  ;;  %22252 = vst [vmem:[#allocation15_spill] sm:$0xff] %v16085_v16  ;;  %v16093_v18 = vadd.f32 %v15925_v28, %v15987_v48  ;;  %v1145_v48 = vld [vmem:[%s22241_s1 + $0x28] sm:$0xff] }
 0x110   : > { %v14647_v50 = vpop.f32.mrf.mxu0  ;;  %1303 = vmatprep.subr.mxu1 %v22185_v55 }
 0x111   : > { %1304 = vmatpush1.msra.mxu1 %v15991_v49  ;;  %v16070_v12 = vadd.f32 %v14647_v50, %v15925_v28  ;;  %22253 = vst [vmem:[#allocation16_spill] sm:$0xff] %v16093_v18 }
 0x112   : > { %v901_v52 = vpop.f32.mrf.mxu0  ;;  %1305 = vmatprep.subr.mxu1 %v22185_v55 }
 0x113   : > { %1306 = vmatpush1.msra.mxu1 %v15996_v51  ;;  %22250 = vst [vmem:[#allocation13_spill] sm:$0xff] %v16070_v12  ;;  %v16077_v14 = vadd.f32 %v15925_v28, %v901_v52  ;;  %v1151_v52 = vld [vmem:[%s22241_s1 + $0x58] sm:$0xff] }
 0x114   : > { %v14650_v54 = vpop.f32.mrf.mxu0  ;;  %1307 = vmatprep.subr.mxu1 %v22185_v55 }
 0x115   : > { %1308 = vmatpush1.msra.mxu1 %v16001_v53  ;;  %v16056_v8 = vadd.f32 %v14650_v54, %v15925_v28  ;;  %22251 = vst [vmem:[#allocation14_spill] sm:$0xff] %v16077_v14 }
 0x116   : > { %v911_v57 = vpop.f32.mrf.mxu0  ;;  %1309 = vmatprep.subr.mxu1 %v22185_v55 }
 0x117   : > { %1310 = vmatpush1.msra.mxu1 %v16007_v56  ;;  %22248 = vst [vmem:[#allocation11_spill] sm:$0xff] %v16056_v8  ;;  %v16063_v10 = vadd.f32 %v15925_v28, %v911_v57 }
 0x118   : > { %v14653_v59 = vpop.f32.mrf.mxu0  ;;  %1311 = vmatprep.subr.mxu1 %v22185_v55 }
 0x119   : > { %1312 = vmatpush1.msra.mxu1 %v16013_v58  ;;  %v16042_v4 = vadd.f32 %v14653_v59, %v15925_v28  ;;  %22249 = vst [vmem:[#allocation12_spill] sm:$0xff] %v16063_v10  ;;  %v1150_v59 = vld [vmem:[%s22241_s1 + $0x50] sm:$0xff] }
 0x11a   : > { %v921_v61 = vpop.f32.mrf.mxu0  ;;  %1313 = vmatprep.subr.mxu1 %v22185_v55 }
 0x11b   : > { %1314 = vmatpush1.msra.mxu1 %v16019_v60  ;;  %22246 = vst [vmem:[#allocation9_spill] sm:$0xff] %v16042_v4  ;;  %v16049_v6 = vadd.f32 %v15925_v28, %v921_v61 }
 0x11c   : > { %v14656_v63 = vpop.f32.mrf.mxu0  ;;  %1315 = vmatprep.subr.mxu1 %v22185_v55 }
 0x11d   : > { %v16030_v0 = vadd.f32 %v14656_v63, %v15925_v28  ;;  %1316 = vmatpush1.msra.mxu1 %v16025_v62  ;;  %22247 = vst [vmem:[#allocation10_spill] sm:$0xff] %v16049_v6  ;;  %v1156_v63 = vld [vmem:[%s22241_s1 + $0x80] sm:$0xff] }
 0x11e   : > { %v931_v1 = vpop.f32.mrf.mxu0  ;;  %1317 = vmatprep.subr.mxu1 %v22185_v55 }
 0x11f   : > { %v16035_v2 = vadd.f32 %v15925_v28, %v931_v1  ;;  %1318 = vmatpush2.msra.mxu1 %v16030_v0 }
 0x120   : > { %v16038_v3 = vpop.f32.mrf.mxu0  ;;  %1319 = vmatprep.subr.mxu1 %v22185_v55 }
 0x121   : > { %1320 = vmatpush2.msra.mxu1 %v16035_v2 }
 0x122   : > { %v16045_v5 = vpop.f32.mrf.mxu0  ;;  %1321 = vmatprep.subr.mxu1 %v22185_v55 }
 0x123   : > { %1322 = vmatpush2.msra.mxu1 %v16042_v4 }
 0x124   : > { %v16052_v7 = vpop.f32.mrf.mxu0  ;;  %1323 = vmatprep.subr.mxu1 %v22185_v55 }
 0x125   : > { %1324 = vmatpush2.msra.mxu1 %v16049_v6  ;;  %v1200_v6 = vld [vmem:[%s22241_s1 + $0x1e0] sm:$0xff] }
 0x126   : > { %v16059_v9 = vpop.f32.mrf.mxu0  ;;  %1325 = vmatprep.subr.mxu1 %v22185_v55 }
 0x127   : > { %1326 = vmatpush2.msra.mxu1 %v16056_v8 }
 0x128   : > { %v16066_v11 = vpop.f32.mrf.mxu0  ;;  %1327 = vmatprep.subr.mxu1 %v22185_v55 }
 0x129   : > { %1328 = vmatpush2.msra.mxu1 %v16063_v10  ;;  %v1195_v10 = vld [vmem:[%s22241_s1 + $0x1b8] sm:$0xff] }
 0x12a   : > { %v16073_v13 = vpop.f32.mrf.mxu0  ;;  %1329 = vmatprep.subr.mxu1 %v22185_v55 }
 0x12b   : > { %1330 = vmatpush2.msra.mxu1 %v16070_v12  ;;  %v1196_v12 = vld [vmem:[%s22241_s1 + $0x1c0] sm:$0xff] }
 0x12c   : > { %v16080_v15 = vpop.f32.mrf.mxu0  ;;  %1331 = vmatprep.subr.mxu1 %v22185_v55 }
 0x12d   : > { %1332 = vmatpush2.msra.mxu1 %v16077_v14 }
 0x12e   : > { %v16088_v17 = vpop.f32.mrf.mxu0  ;;  %1333 = vmatprep.subr.mxu1 %v22185_v55 }
 0x12f   : > { %1334 = vmatpush2.msra.mxu1 %v16085_v16 }
 0x130   : > { %v16096_v19 = vpop.f32.mrf.mxu0  ;;  %1335 = vmatprep.subr.mxu1 %v22185_v55 }
 0x131   : > { %1336 = vmatpush2.msra.mxu1 %v16093_v18 }
 0x132   : > { %v16104_v21 = vpop.f32.mrf.mxu0  ;;  %1337 = vmatprep.subr.mxu1 %v22185_v55 }
 0x133   : > { %1338 = vmatpush2.msra.mxu1 %v16101_v20 }
 0x134   : > { %v14674_v23 = vpop.f32.mrf.mxu0  ;;  %1339 = vmatprep.subr.mxu1 %v22185_v55 }
 0x135   : > { %1340 = vmatpush2.msra.mxu1 %v16109_v22  ;;  %v16182_v1 = vadd.f32 %v14674_v23, %v15925_v28  ;;  %v1161_v23 = vld [vmem:[%s22241_s1 + $0xa8] sm:$0xff]  ;;  %v1180_v22 = vld [vmem:[%s22241_s1 + $0x140] sm:$0xff] }
 0x136   : > { %v991_v25 = vpop.f32.mrf.mxu0  ;;  %1341 = vmatprep.subr.mxu1 %v22185_v55 }
 0x137   : > { %1342 = vmatpush2.msra.mxu1 %v16115_v24 }
 0x138   : > { %v14677_v27 = vpop.f32.mrf.mxu0  ;;  %1343 = vmatprep.subr.mxu1 %v22185_v55 }
 0x139   : > { %1344 = vmatpush2.msra.mxu1 %v16121_v26  ;;  %v16149_v44 = vadd.f32 %v14677_v27, %v15925_v28  ;;  %v1175_v26 = vld [vmem:[%s22241_s1 + $0x118] sm:$0xff] }
 0x13a   : > { %v1001_v31 = vpop.f32.mrf.mxu0  ;;  %1345 = vmatprep.subr.mxu1 %v22185_v55 }
 0x13b   : > { %1346 = vmatpush2.msra.mxu1 %v16127_v29  ;;  %v16169_v57 = vadd.f32 %v15925_v28, %v1001_v31  ;;  %v16189_v31 = vadd.f32 %v15925_v28, %v991_v25  ;;  %v16267_v29 = vadd.f32 %v16052_v7, %v15925_v28  ;;  %v1181_v7 = vld [vmem:[%s22241_s1 + $0x148] sm:$0xff] }
 0x13c   : > { %v14680_v40 = vpop.f32.mrf.mxu0  ;;  %1347 = vmatprep.subr.mxu1 %v22185_v55 }
 0x13d   : > { %v16144_v42 = vadd.f32 %v14680_v40, %v15925_v28  ;;  %1348 = vmatpush2.msra.mxu1 %v16133_v36  ;;  %v1170_v36 = vld [vmem:[%s22241_s1 + $0xf0] sm:$0xff] }
 0x13e   : > { %v1011_v35 = vpop.f32.mrf.mxu0  ;;  %1350 = vmatmul.mubr.f32.vlgmr.msra.gmra.mxu1 %v1140_v38  ;;  %1440 = vmatprep.subr.mxu1 %v22185_v55  ;;  %v1155_v38 = vld [vmem:[%s22241_s1 + $0x78] sm:$0xff] }
 0x13f   : > { %v16152_v46 = vadd.f32 %v15925_v28, %v1011_v35  ;;  %1441 = vmatpush1.msra.mxu1 %v16144_v42  ;;  %1354 = vmatprep.mubr.f32.mxu1 %v1146_v33  ;;  %v16203_v33 = vadd.f32 %v16096_v19, %v15925_v28  ;;  %v16211_v35 = vadd.f32 %v15925_v28, %v16104_v21 }
 0x140   : > { %v16158_v50 = vpop.f32.mrf.mxu0  ;;  %1442 = vmatprep.subr.mxu1 %v22185_v55 }
 0x141   : > { %1443 = vmatpush1.msra.mxu1 %v16152_v46 }
 0x142   : > { %v16165_v54 = vpop.f32.mrf.mxu0  ;;  %1355 = vmatmul.mubr.f32.gmra.mxu1 %v1145_v48  ;;  %1444 = vmatprep.subr.mxu1 %v22185_v55  ;;  %v1160_v48 = vld [vmem:[%s22241_s1 + $0xa0] sm:$0xff] }
 0x143   : > { %1445 = vmatpush1.msra.mxu1 %v16149_v44  ;;  %1359 = vmatprep.mubr.f32.mxu1 %v1151_v52  ;;  %v1166_v52 = vld [vmem:[%s22241_s1 + $0xd0] sm:$0xff] }
 0x144   : > { %v16175_v61 = vpop.f32.mrf.mxu0  ;;  %1446 = vmatprep.subr.mxu1 %v22185_v55 }
 0x145   : > { %1447 = vmatpush1.msra.mxu1 %v16169_v57 }
 0x146   : > { %v16185_v27 = vpop.f32.mrf.mxu0  ;;  %1360 = vmatmul.mubr.f32.gmra.mxu1 %v1150_v59  ;;  %1448 = vmatprep.subr.mxu1 %v22185_v55  ;;  %v16225_v59 = vadd.f32 %v16080_v15, %v15925_v28 }
 0x147   : > { %1449 = vmatpush1.msra.mxu1 %v16182_v1  ;;  %1364 = vmatprep.mubr.f32.mxu1 %v1156_v63  ;;  %v16233_v63 = vadd.f32 %v15925_v28, %v16088_v17 }
 0x148   : > { %v16195_v40 = vpop.f32.mrf.mxu0  ;;  %1450 = vmatprep.subr.mxu1 %v22185_v55 }
 0x149   : > { %1451 = vmatpush1.msra.mxu1 %v16189_v31 }
 0x14a   : > { %v16206_v25 = vpop.f32.mrf.mxu0  ;;  %1365 = vmatmul.mubr.f32.gmra.mxu1 %v1155_v38  ;;  %1452 = vmatprep.subr.mxu1 %v22185_v55  ;;  %v1165_v38 = vld [vmem:[%s22241_s1 + $0xc8] sm:$0xff] }
 0x14b   : > { %1453 = vmatpush1.msra.mxu1 %v16203_v33  ;;  %1369 = vmatprep.mubr.f32.mxu1 %v1161_v23  ;;  %v1171_v23 = vld [vmem:[%s22241_s1 + $0xf8] sm:$0xff] }
 0x14c   : > { %v16217_v19 = vpop.f32.mrf.mxu0  ;;  %1454 = vmatprep.subr.mxu1 %v22185_v55 }
 0x14d   : > { %1455 = vmatpush1.msra.mxu1 %v16211_v35 }
 0x14e   : > { %v16228_v21 = vpop.f32.mrf.mxu0  ;;  %1370 = vmatmul.mubr.f32.gmra.mxu1 %v1160_v48  ;;  %1456 = vmatprep.subr.mxu1 %v22185_v55  ;;  %v16247_v48 = vadd.f32 %v16066_v11, %v15925_v28 }
 0x14f   : > { %1457 = vmatpush1.msra.mxu1 %v16225_v59  ;;  %1374 = vmatprep.mubr.f32.mxu1 %v1166_v52  ;;  %v16255_v52 = vadd.f32 %v15925_v28, %v16073_v13 }
 0x150   : > { %v16239_v15 = vpop.f32.mrf.mxu0  ;;  %1458 = vmatprep.subr.mxu1 %v22185_v55 }
 0x151   : > { %1459 = vmatpush1.msra.mxu1 %v16233_v63 }
 0x152   : > { %v16250_v17 = vpop.f32.mrf.mxu0  ;;  %1375 = vmatmul.mubr.f32.gmra.mxu1 %v1165_v38  ;;  %1460 = vmatprep.subr.mxu1 %v22185_v55  ;;  %v1176_v38 = vld [vmem:[%s22241_s1 + $0x120] sm:$0xff] }
 0x153   : > { %1461 = vmatpush1.msra.mxu1 %v16247_v48  ;;  %1379 = vmatprep.mubr.f32.mxu1 %v1171_v23  ;;  %v16273_v23 = vadd.f32 %v15925_v28, %v16059_v9 }
 0x154   : > { %v14698_v11 = vpop.f32.mrf.mxu0  ;;  %1462 = vmatprep.subr.mxu1 %v22185_v55 }
 0x155   : > { %1463 = vmatpush1.msra.mxu1 %v16255_v52 }
 0x156   : > { %v1071_v13 = vpop.f32.mrf.mxu0  ;;  %1380 = vmatmul.mubr.f32.gmra.mxu1 %v1170_v36  ;;  %1464 = vmatprep.subr.mxu1 %v22185_v55  ;;  %v16285_v36 = vadd.f32 %v16038_v3, %v15925_v28  ;;  %v1186_v3 = vld [vmem:[%s22241_s1 + $0x170] sm:$0xff] }
 0x157   : > { %1465 = vmatpush1.msra.mxu1 %v16267_v29  ;;  %1384 = vmatprep.mubr.f32.mxu1 %v1176_v38  ;;  %v16291_v38 = vadd.f32 %v15925_v28, %v16045_v5 }
 0x158   : > { %v14701_v24 = vpop.f32.mrf.mxu0  ;;  %1466 = vmatprep.subr.mxu1 %v22185_v55 }
 0x159   : > { %1467 = vmatpush1.msra.mxu1 %v16273_v23 }
 0x15a   : > { %v1081_v9 = vpop.f32.mrf.mxu0  ;;  %1385 = vmatmul.mubr.f32.gmra.mxu1 %v1175_v26  ;;  %1468 = vmatprep.subr.mxu1 %v22185_v55 }
 0x15b   : > { %1469 = vmatpush1.msra.mxu1 %v16285_v36  ;;  %1389 = vmatprep.mubr.f32.mxu1 %v1181_v7  ;;  %v16307_v7 = vadd.f32 %v14701_v24, %v15925_v28 }
 0x15c   : > { %v14704_v20 = vpop.f32.mrf.mxu0  ;;  %1470 = vmatprep.subr.mxu1 %v22185_v55 }
 0x15d   : > { %v16302_v26 = vadd.f32 %v14704_v20, %v15925_v28  ;;  %1471 = vmatpush1.msra.mxu1 %v16291_v38  ;;  %v1185_v20 = vld [vmem:[%s22241_s1 + $0x168] sm:$0xff] }
 0x15e   : > { %v1091_v5 = vpop.f32.mrf.mxu0  ;;  %1390 = vmatmul.mubr.f32.gmra.mxu1 %v1180_v22  ;;  %1472 = vmatprep.subr.mxu1 %v22185_v55  ;;  %v1191_v22 = vld [vmem:[%s22241_s1 + $0x198] sm:$0xff] }
 0x15f   : > { %v16310_v18 = vadd.f32 %v15925_v28, %v1091_v5  ;;  %1473 = vmatpush2.msra.mxu1 %v16302_v26  ;;  %1394 = vmatprep.mubr.f32.mxu1 %v1186_v3  ;;  %v16327_v3 = vadd.f32 %v15925_v28, %v1081_v9  ;;  %v1190_v5 = vld [vmem:[%s22241_s1 + $0x190] sm:$0xff] }
 0x160   : > { %v16316_v16 = vpop.f32.mrf.mxu0  ;;  %1474 = vmatprep.subr.mxu1 %v22185_v55 }
 0x161   : > { %1475 = vmatpush2.msra.mxu1 %v16310_v18  ;;  %22260 = vst [vmem:[#allocation23_spill] sm:$0xff] %v16327_v3 }
 0x162   : > { %v16323_v24 = vpop.f32.mrf.mxu0  ;;  %1395 = vmatmul.mubr.f32.gmra.mxu1 %v1185_v20  ;;  %1476 = vmatprep.subr.mxu1 %v22185_v55  ;;  %v16338_v20 = vadd.f32 %v14698_v11, %v15925_v28  ;;  %v1201_v11 = vld [vmem:[%s22241_s1 + $0x1e8] sm:$0xff] }
 0x163   : > { %1477 = vmatpush2.msra.mxu1 %v16307_v7  ;;  %1399 = vmatprep.mubr.f32.mxu1 %v1191_v22  ;;  %v16343_v22 = vadd.f32 %v15925_v28, %v1071_v13 }
 0x164   : > { %v14710_v14 = vpop.f32.mrf.mxu0  ;;  %1478 = vmatprep.subr.mxu1 %v22185_v55  ;;  %22261 = vst [vmem:[#allocation24_spill] sm:$0xff] %v16338_v20 }
 0x165   : > { %1479 = vmatpush2.msra.mxu1 %v16327_v3  ;;  %22262 = vst [vmem:[#allocation25_spill] sm:$0xff] %v16343_v22 }
 0x166   : > { %v1111_v9 = vpop.f32.mrf.mxu0  ;;  %1400 = vmatmul.mubr.f32.gmra.mxu1 %v1190_v5  ;;  %1480 = vmatprep.subr.mxu1 %v22185_v55  ;;  %v16355_v5 = vadd.f32 %v16239_v15, %v15925_v28  ;;  %v16370_v15 = vadd.f32 %v16217_v19, %v15925_v28 }
 0x167   : > { %1481 = vmatpush2.msra.mxu1 %v16338_v20  ;;  %1404 = vmatprep.mubr.f32.mxu1 %v1196_v12  ;;  %v16361_v12 = vadd.f32 %v15925_v28, %v16250_v17 }
 0x168   : > { %v14713_v8 = vpop.f32.mrf.mxu0  ;;  %1482 = vmatprep.subr.mxu1 %v22185_v55  ;;  %22263 = vst [vmem:[#allocation26_spill] sm:$0xff] %v16355_v5  ;;  %22265 = vst [vmem:[#allocation28_spill] sm:$0xff] %v16370_v15 }
 0x169   : > { %1483 = vmatpush2.msra.mxu1 %v16343_v22  ;;  %22264 = vst [vmem:[#allocation27_spill] sm:$0xff] %v16361_v12 }
 0x16a   : > { %v1121_v13 = vpop.f32.mrf.mxu0  ;;  %1405 = vmatmul.mubr.f32.gmra.mxu1 %v1195_v10  ;;  %1484 = vmatprep.subr.mxu1 %v22185_v55 }
 0x16b   : > { %1485 = vmatpush2.msra.mxu1 %v16355_v5  ;;  %1409 = vmatprep.mubr.f32.mxu1 %v1201_v11  ;;  %v1206_v11 = vld [vmem:[%s22241_s1 + $0x210] sm:$0xff]  ;;  %v16382_v5 = vadd.f32 %v15925_v28, %v16228_v21  ;;  %v16400_v21 = vadd.f32 %v16195_v40, %v15925_v28 }
 0x16c   : > { %v14716_v4 = vpop.f32.mrf.mxu0  ;;  %1486 = vmatprep.subr.mxu1 %v22185_v55  ;;  %v1210_v40 = vld [vmem:[%s22241_s1 + $0x230] sm:$0xff] }
 0x16d   : > { %v16373_v10 = vadd.f32 %v14716_v4, %v15925_v28  ;;  %1487 = vmatpush2.msra.mxu1 %v16361_v12  ;;  %22267 = vst [vmem:[#allocation30_spill] sm:$0xff] %v16382_v5  ;;  %v1205_v4 = vld [vmem:[%s22241_s1 + $0x208] sm:$0xff]  ;;  %22270 = vst [vmem:[#allocation33_spill] sm:$0xff] %v16400_v21 }
 0x16e   : > { %v1131_v17 = vpop.f32.mrf.mxu0  ;;  %1410 = vmatmul.mubr.f32.gmra.mxu1 %v1200_v6  ;;  %1488 = vmatprep.subr.mxu1 %v22185_v55  ;;  %v16393_v6 = vadd.f32 %v14713_v8, %v15925_v28  ;;  %v1211_v8 = vld [vmem:[%s22241_s1 + $0x238] sm:$0xff] }
 0x16f   : > { %22266 = vst [vmem:[#allocation29_spill] sm:$0xff] %v16373_v10  ;;  %v16385_v19 = vadd.f32 %v15925_v28, %v1131_v17  ;;  %1489 = vmatpush2.msra.mxu1 %v16370_v15  ;;  %14717 = vmatprep.subr.mxu0 %v16373_v10  ;;  %v16404_v17 = vadd.f32 %v15925_v28, %v1121_v13 }
 0x170   : > { %22269 = vst [vmem:[#allocation32_spill] sm:$0xff] %v16393_v6  ;;  %1490 = vmatprep.subr.mxu1 %v22185_v55  ;;  %14718 = vmatpush3.msra.mxu0 %v16373_v10  ;;  %v16421_v13 = vadd.f32 %v14710_v14, %v15925_v28  ;;  %v1216_v14 = vld [vmem:[%s22241_s1 + $0x260] sm:$0xff] }
 0x171   : > { %22268 = vst [vmem:[#allocation31_spill] sm:$0xff] %v16385_v19  ;;  %1414 = vmatprep.mubr.f32.mxu1 %v1206_v11  ;;  %1491 = vmatpush2.msra.mxu1 %v16382_v5  ;;  %22271 = vst [vmem:[#allocation34_spill] sm:$0xff] %v16404_v17  ;;  %v16413_v11 = vadd.f32 %v15925_v28, %v16206_v25  ;;  %v16428_v25 = vadd.f32 %v16175_v61, %v15925_v28  ;;  %v1215_v61 = vld [vmem:[%s22241_s1 + $0x258] sm:$0xff] }
 0x172   : > { %14719 = vmatprep.subr.mxu0 %v16385_v19  ;;  %1415 = vmatmul.mubr.f32.gmra.mxu1 %v1205_v4  ;;  %22273 = vst [vmem:[#allocation36_spill] sm:$0xff] %v16421_v13  ;;  %v16432_v4 = vadd.f32 %v15925_v28, %v1111_v9  ;;  %v16450_v9 = vadd.f32 %v16316_v16, %v15925_v28  ;;  %v1221_v16 = vld [vmem:[%s22241_s1 + $0x288] sm:$0xff] }
 0x173   : > { %1492 = vmatprep.subr.mxu1 %v22185_v55  ;;  %14720 = vmatpush3.msra.mxu0 %v16385_v19  ;;  %22272 = vst [vmem:[#allocation35_spill] sm:$0xff] %v16413_v11  ;;  %22274 = vst [vmem:[#allocation37_spill] sm:$0xff] %v16428_v25 }
 0x174   : > { %1493 = vmatpush2.msra.mxu1 %v16400_v21  ;;  %14721 = vmatprep.subr.mxu0 %v16393_v6  ;;  %22275 = vst [vmem:[#allocation38_spill] sm:$0xff] %v16432_v4  ;;  %22277 = vst [vmem:[#allocation40_spill] sm:$0xff] %v16450_v9 }
 0x175   : > { %1494 = vmatprep.subr.mxu1 %v22185_v55  ;;  %14722 = vmatpush3.msra.mxu0 %v16393_v6 }
 0x176   : > { %1419 = vmatprep.mubr.f32.mxu1 %v1211_v8  ;;  %1495 = vmatpush2.msra.mxu1 %v16413_v11  ;;  %v16441_v8 = vadd.f32 %v15925_v28, %v16185_v27  ;;  %v16457_v27 = vadd.f32 %v16158_v50, %v15925_v28  ;;  %v1220_v50 = vld [vmem:[%s22241_s1 + $0x280] sm:$0xff] }
 0x177   : > { %14723 = vmatprep.subr.mxu0 %v16404_v17  ;;  %1420 = vmatmul.mubr.f32.gmra.mxu1 %v1210_v40  ;;  %v16462_v40 = vadd.f32 %v15925_v28, %v16323_v24  ;;  %v1226_v24 = vld [vmem:[%s22241_s1 + $0x2b0] sm:$0xff] }
 0x178   : > { %1496 = vmatprep.subr.mxu1 %v22185_v55  ;;  %14724 = vmatpush3.msra.mxu0 %v16404_v17  ;;  %22276 = vst [vmem:[#allocation39_spill] sm:$0xff] %v16441_v8  ;;  %22278 = vst [vmem:[#allocation41_spill] sm:$0xff] %v16457_v27 }
 0x179   : > { %1497 = vmatpush2.msra.mxu1 %v16428_v25  ;;  %14725 = vmatprep.subr.mxu0 %v16421_v13  ;;  %22279 = vst [vmem:[#allocation42_spill] sm:$0xff] %v16462_v40 }
 0x17a   : > { %1498 = vmatprep.subr.mxu1 %v22185_v55  ;;  %14726 = vmatpush3.msra.mxu0 %v16421_v13 }
 0x17b   : > { %1424 = vmatprep.mubr.f32.mxu1 %v1216_v14  ;;  %1499 = vmatpush2.msra.mxu1 %v16441_v8  ;;  %v16471_v14 = vadd.f32 %v15925_v28, %v16165_v54  ;;  %v1149_v28 = vld [vmem:[%s22241_s1 + $0x48] sm:$0xff] }
 0x17c   : > { %14727 = vmatprep.subr.mxu0 %v16432_v4  ;;  %1425 = vmatmul.mubr.f32.gmra.mxu1 %v1215_v61  ;;  %v1225_v54 = vld [vmem:[%s22241_s1 + $0x2a8] sm:$0xff]  ;;  %v1143_v61 = vld [vmem:[%s22241_s1 + $0x18] sm:$0xff] }
 0x17d   : > { %1500 = vmatprep.subr.mxu1 %v22185_v55  ;;  %14728 = vmatpush3.msra.mxu0 %v16432_v4  ;;  %22280 = vst [vmem:[#allocation43_spill] sm:$0xff] %v16471_v14 }
 0x17e   : > { %1501 = vmatpush2.msra.mxu1 %v16457_v27  ;;  %14729 = vmatprep.subr.mxu0 %v16450_v9 }
 0x17f   : > { %1502 = vmatprep.subr.mxu1 %v22185_v55  ;;  %14730 = vmatpush3.msra.mxu0 %v16450_v9 }
 0x180   : > { %1429 = vmatprep.mubr.f32.mxu1 %v1221_v16  ;;  %1503 = vmatpush2.msra.mxu1 %v16471_v14  ;;  %v1154_v16 = vld [vmem:[%s22241_s1 + $0x70] sm:$0xff] }
 0x181   : > { %14731 = vmatprep.subr.mxu0 %v16462_v40  ;;  %1430 = vmatmul.mubr.f32.gmra.mxu1 %v1220_v50  ;;  %v1142_v50 = vld [vmem:[%s22241_s1 + $0x10] sm:$0xff] }
 0x182   : > { %14732 = vmatpush3.msra.mxu0 %v16462_v40  ;;  %1434 = vmatprep.mubr.f32.mxu1 %v1226_v24  ;;  %v1148_v24 = vld [vmem:[%s22241_s1 + $0x40] sm:$0xff] }
 0x183   : > { %2050 = vmatprep.subr.mxu0 %v22185_v55  ;;  %14734 = vmatmul.mubr.msk.f32.vlgmr.msra.gmra.mxu0 %vm1230_vm2, %v1149_v28  ;;  %v1147_v28 = vld [vmem:[%s22241_s1 + $0x38] sm:$0xff] }
 0x184   : > { %2051 = vmatpush1.msra.mxu0 %v16144_v42  ;;  %1895 = vmatprep.subr.mxu1 %v22185_v55 }
 0x185   : > { %2052 = vmatprep.subr.mxu0 %v22185_v55  ;;  %1435 = vmatmul.mubr.f32.gmra.mxu1 %v1225_v54  ;;  %v1153_v54 = vld [vmem:[%s22241_s1 + $0x68] sm:$0xff] }
 0x186   : > { %2053 = vmatpush1.msra.mxu0 %v16152_v46  ;;  %1504 = vmatprep.mubr.f32.mxu1 %v1143_v61  ;;  %v1152_v61 = vld [vmem:[%s22241_s1 + $0x60] sm:$0xff] }
 0x187   : > { %2054 = vmatprep.subr.mxu0 %v22185_v55  ;;  %14736 = vmatprep.mubr.msk.f32.mxu0 %vm1230_vm2, %v1154_v16  ;;  %v1159_v16 = vld [vmem:[%s22241_s1 + $0x98] sm:$0xff] }
 0x188   : > { %2055 = vmatpush1.msra.mxu0 %v16149_v44 }
 0x189   : > { %2056 = vmatprep.subr.mxu0 %v22185_v55  ;;  %1505 = vmatmul.mubr.f32.vlgmr.msra.gmra.mxu1 %v1142_v50  ;;  %v1158_v50 = vld [vmem:[%s22241_s1 + $0x90] sm:$0xff] }
 0x18a   : > { %1896 = vmatpush1.msra.mxu1 %v15928_v30  ;;  %2057 = vmatpush1.msra.mxu0 %v16169_v57 }
 0x18b   : > { %1897 = vmatprep.subr.mxu1 %v22185_v55  ;;  %2058 = vmatprep.subr.mxu0 %v22185_v55 }
 0x18c   : > { %1898 = vmatpush1.msra.mxu1 %v15931_v32  ;;  %2059 = vmatpush1.msra.mxu0 %v16182_v1 }
 0x18d   : > { %1509 = vmatprep.mubr.f32.mxu1 %v1148_v24  ;;  %1899 = vmatprep.subr.mxu1 %v22185_v55  ;;  %v1157_v24 = vld [vmem:[%s22241_s1 + $0x88] sm:$0xff] }
 0x18e   : > { %2060 = vmatprep.subr.mxu0 %v22185_v55  ;;  %1510 = vmatmul.mubr.f32.gmra.mxu1 %v1147_v28  ;;  %v1163_v28 = vld [vmem:[%s22241_s1 + $0xb8] sm:$0xff] }
 0x18f   : > { %1900 = vmatpush1.msra.mxu1 %v15938_v34  ;;  %2061 = vmatpush1.msra.mxu0 %v16189_v31 }
 0x190   : > { %1901 = vmatprep.subr.mxu1 %v22185_v55  ;;  %2062 = vmatprep.subr.mxu0 %v22185_v55 }
 0x191   : > { %1902 = vmatpush1.msra.mxu1 %v15948_v37  ;;  %2063 = vmatpush1.msra.mxu0 %v16203_v33 }
 0x192   : > { %1514 = vmatprep.mubr.f32.mxu1 %v1153_v54  ;;  %1903 = vmatprep.subr.mxu1 %v22185_v55  ;;  %v1164_v54 = vld [vmem:[%s22241_s1 + $0xc0] sm:$0xff] }
 0x193   : > { %2064 = vmatprep.subr.mxu0 %v22185_v55  ;;  %1515 = vmatmul.mubr.f32.gmra.mxu1 %v1152_v61  ;;  %v1162_v61 = vld [vmem:[%s22241_s1 + $0xb0] sm:$0xff] }
 0x194   : > { %14737 = vmatmul.mubr.msk.f32.gmra.mxu0 %vm1230_vm2, %v1159_v16  ;;  %1904 = vmatpush1.msra.mxu1 %v15956_v39  ;;  %v1169_v16 = vld [vmem:[%s22241_s1 + $0xe8] sm:$0xff] }
 0x195   : > { %2065 = vmatpush1.msra.mxu0 %v16211_v35  ;;  %1905 = vmatprep.subr.mxu1 %v22185_v55 }
 0x196   : > { %2066 = vmatprep.subr.mxu0 %v22185_v55  ;;  %1906 = vmatpush1.msra.mxu1 %v15963_v41 }
 0x197   : > { %2067 = vmatpush1.msra.mxu0 %v16225_v59  ;;  %1519 = vmatprep.mubr.f32.mxu1 %v1158_v50  ;;  %v1168_v50 = vld [vmem:[%s22241_s1 + $0xe0] sm:$0xff] }
 0x198   : > { %1907 = vmatprep.subr.mxu1 %v22185_v55  ;;  %2068 = vmatprep.subr.mxu0 %v22185_v55 }
 0x199   : > { %1520 = vmatmul.mubr.f32.gmra.mxu1 %v1157_v24  ;;  %2069 = vmatpush1.msra.mxu0 %v16233_v63  ;;  %v1167_v24 = vld [vmem:[%s22241_s1 + $0xd8] sm:$0xff] }
 0x19a   : > { %1908 = vmatpush1.msra.mxu1 %v15970_v43  ;;  %2070 = vmatprep.subr.mxu0 %v22185_v55 }
 0x19b   : > { %1909 = vmatprep.subr.mxu1 %v22185_v55  ;;  %2071 = vmatpush1.msra.mxu0 %v16247_v48 }
 0x19c   : > { %1910 = vmatpush1.msra.mxu1 %v15977_v45  ;;  %1524 = vmatprep.mubr.f32.mxu1 %v1163_v28  ;;  %v1173_v28 = vld [vmem:[%s22241_s1 + $0x108] sm:$0xff] }
 0x19d   : > { %14739 = vmatprep.mubr.msk.f32.mxu0 %vm1230_vm2, %v1164_v54  ;;  %1911 = vmatprep.subr.mxu1 %v22185_v55  ;;  %v1174_v54 = vld [vmem:[%s22241_s1 + $0x110] sm:$0xff] }
 0x19e   : > { %2072 = vmatprep.subr.mxu0 %v22185_v55  ;;  %1525 = vmatmul.mubr.f32.gmra.mxu1 %v1162_v61  ;;  %v1172_v61 = vld [vmem:[%s22241_s1 + $0x100] sm:$0xff] }
 0x19f   : > { %14740 = vmatmul.mubr.msk.f32.gmra.mxu0 %vm1230_vm2, %v1169_v16  ;;  %1912 = vmatpush1.msra.mxu1 %v15984_v47  ;;  %v1179_v16 = vld [vmem:[%s22241_s1 + $0x138] sm:$0xff] }
 0x1a0   : > { %2073 = vmatpush1.msra.mxu0 %v16255_v52  ;;  %1913 = vmatprep.subr.mxu1 %v22185_v55 }
 0x1a1   : > { %2074 = vmatprep.subr.mxu0 %v22185_v55  ;;  %1914 = vmatpush1.msra.mxu1 %v15991_v49 }
 0x1a2   : > { %2075 = vmatpush1.msra.mxu0 %v16267_v29  ;;  %1529 = vmatprep.mubr.f32.mxu1 %v1168_v50  ;;  %v1178_v50 = vld [vmem:[%s22241_s1 + $0x130] sm:$0xff] }
 0x1a3   : > { %1915 = vmatprep.subr.mxu1 %v22185_v55  ;;  %2076 = vmatprep.subr.mxu0 %v22185_v55 }
 0x1a4   : > { %1530 = vmatmul.mubr.f32.gmra.mxu1 %v1167_v24  ;;  %2077 = vmatpush1.msra.mxu0 %v16273_v23  ;;  %v1177_v24 = vld [vmem:[%s22241_s1 + $0x128] sm:$0xff] }
 0x1a5   : > { %1916 = vmatpush1.msra.mxu1 %v15996_v51  ;;  %2078 = vmatprep.subr.mxu0 %v22185_v55 }
 0x1a6   : > { %1917 = vmatprep.subr.mxu1 %v22185_v55  ;;  %2079 = vmatpush1.msra.mxu0 %v16285_v36 }
 0x1a7   : > { %1918 = vmatpush1.msra.mxu1 %v16001_v53  ;;  %1534 = vmatprep.mubr.f32.mxu1 %v1173_v28  ;;  %v1183_v28 = vld [vmem:[%s22241_s1 + $0x158] sm:$0xff] }
 0x1a8   : > { %14742 = vmatprep.mubr.msk.f32.mxu0 %vm1230_vm2, %v1174_v54  ;;  %1919 = vmatprep.subr.mxu1 %v22185_v55  ;;  %v1184_v54 = vld [vmem:[%s22241_s1 + $0x160] sm:$0xff] }
 0x1a9   : > { %2080 = vmatprep.subr.mxu0 %v22185_v55  ;;  %1535 = vmatmul.mubr.f32.gmra.mxu1 %v1172_v61  ;;  %v1182_v61 = vld [vmem:[%s22241_s1 + $0x150] sm:$0xff] }
 0x1aa   : > { %14743 = vmatmul.mubr.msk.f32.gmra.mxu0 %vm1230_vm2, %v1179_v16  ;;  %1920 = vmatpush1.msra.mxu1 %v16007_v56  ;;  %v1189_v16 = vld [vmem:[%s22241_s1 + $0x188] sm:$0xff] }
 0x1ab   : > { %2081 = vmatpush1.msra.mxu0 %v16291_v38  ;;  %1921 = vmatprep.subr.mxu1 %v22185_v55 }
 0x1ac   : > { %2082 = vmatprep.subr.mxu0 %v22185_v55  ;;  %1922 = vmatpush1.msra.mxu1 %v16013_v58 }
 0x1ad   : > { %2083 = vmatpush2.msra.mxu0 %v16302_v26  ;;  %1539 = vmatprep.mubr.f32.mxu1 %v1178_v50  ;;  %v1188_v50 = vld [vmem:[%s22241_s1 + $0x180] sm:$0xff] }
 0x1ae   : > { %1923 = vmatprep.subr.mxu1 %v22185_v55  ;;  %2084 = vmatprep.subr.mxu0 %v22185_v55 }
 0x1af   : > { %1540 = vmatmul.mubr.f32.gmra.mxu1 %v1177_v24  ;;  %2085 = vmatpush2.msra.mxu0 %v16310_v18  ;;  %v1187_v24 = vld [vmem:[%s22241_s1 + $0x178] sm:$0xff] }
 0x1b0   : > { %1924 = vmatpush1.msra.mxu1 %v16019_v60  ;;  %2086 = vmatprep.subr.mxu0 %v22185_v55 }
 0x1b1   : > { %1925 = vmatprep.subr.mxu1 %v22185_v55  ;;  %2087 = vmatpush2.msra.mxu0 %v16307_v7 }
 0x1b2   : > { %1926 = vmatpush1.msra.mxu1 %v16025_v62  ;;  %1544 = vmatprep.mubr.f32.mxu1 %v1183_v28  ;;  %v1193_v28 = vld [vmem:[%s22241_s1 + $0x1a8] sm:$0xff] }
 0x1b3   : > { %14745 = vmatprep.mubr.msk.f32.mxu0 %vm1230_vm2, %v1184_v54  ;;  %1927 = vmatprep.subr.mxu1 %v22185_v55  ;;  %v22281_v54 = vld [vmem:[#allocation9_spill] sm:$0xff] }
 0x1b4   : > { %2088 = vmatprep.subr.mxu0 %v22185_v55  ;;  %1545 = vmatmul.mubr.f32.gmra.mxu1 %v1182_v61  ;;  %v1194_v61 = vld [vmem:[%s22241_s1 + $0x1b0] sm:$0xff] }
 0x1b5   : > { %14746 = vmatmul.mubr.msk.f32.gmra.mxu0 %vm1230_vm2, %v1189_v16  ;;  %1928 = vmatpush2.msra.mxu1 %v16030_v0  ;;  %v22282_v16 = vld [vmem:[#allocation26_spill] sm:$0xff] }
 0x1b6   : > { %2089 = vmatpush2.msra.mxu0 %v16327_v3  ;;  %1929 = vmatprep.subr.mxu1 %v22185_v55  ;;  %v1223_v3 = vld [vmem:[%s22241_s1 + $0x298] sm:$0xff] }
 0x1b7   : > { %2090 = vmatprep.subr.mxu0 %v22185_v55  ;;  %1930 = vmatpush2.msra.mxu1 %v16035_v2 }
 0x1b8   : > { %2091 = vmatpush2.msra.mxu0 %v16338_v20  ;;  %1549 = vmatprep.mubr.f32.mxu1 %v1188_v50  ;;  %v1192_v50 = vld [vmem:[%s22241_s1 + $0x1a0] sm:$0xff]  ;;  %v1198_v20 = vld [vmem:[%s22241_s1 + $0x1d0] sm:$0xff] }
 0x1b9   : > { %1931 = vmatprep.subr.mxu1 %v22185_v55  ;;  %2092 = vmatprep.subr.mxu0 %v22185_v55 }
 0x1ba   : > { %1550 = vmatmul.mubr.f32.gmra.mxu1 %v1187_v24  ;;  %2093 = vmatpush2.msra.mxu0 %v16343_v22  ;;  %v22283_v24 = vld [vmem:[#allocation10_spill] sm:$0xff]  ;;  %v1199_v22 = vld [vmem:[%s22241_s1 + $0x1d8] sm:$0xff] }
 0x1bb   : > { %1932 = vmatpush2.msra.mxu1 %v22281_v54  ;;  %2094 = vmatprep.subr.mxu0 %v22185_v55 }
 0x1bc   : > { %1933 = vmatprep.subr.mxu1 %v22185_v55  ;;  %2095 = vmatpush2.msra.mxu0 %v22282_v16  ;;  %v22284_v16 = vld [vmem:[#allocation11_spill] sm:$0xff] }
 0x1bd   : > { %1934 = vmatpush2.msra.mxu1 %v22283_v24  ;;  %1554 = vmatprep.mubr.f32.mxu1 %v1193_v28  ;;  %v22285_v28 = vld [vmem:[#allocation12_spill] sm:$0xff] }
 0x1be   : > { %14748 = vmatprep.mubr.msk.f32.mxu0 %vm1230_vm2, %v1194_v61  ;;  %1935 = vmatprep.subr.mxu1 %v22185_v55  ;;  %v1197_v61 = vld [vmem:[%s22241_s1 + $0x1c8] sm:$0xff] }
 0x1bf   : > { %2096 = vmatprep.subr.mxu0 %v22185_v55  ;;  %1555 = vmatmul.mubr.f32.gmra.mxu1 %v1192_v50  ;;  %v1209_v50 = vld [vmem:[%s22241_s1 + $0x228] sm:$0xff] }
 0x1c0   : > { %14749 = vmatmul.mubr.msk.f32.gmra.mxu0 %vm1230_vm2, %v1199_v22  ;;  %1936 = vmatpush2.msra.mxu1 %v22284_v16  ;;  %v1204_v22 = vld [vmem:[%s22241_s1 + $0x200] sm:$0xff] }
 0x1c1   : > { %2097 = vmatpush2.msra.mxu0 %v16361_v12  ;;  %1937 = vmatprep.subr.mxu1 %v22185_v55  ;;  %v22286_v12 = vld [vmem:[#allocation13_spill] sm:$0xff] }
 0x1c2   : > { %2098 = vmatprep.subr.mxu0 %v22185_v55  ;;  %1938 = vmatpush2.msra.mxu1 %v22285_v28 }
 0x1c3   : > { %2099 = vmatpush2.msra.mxu0 %v16370_v15  ;;  %1559 = vmatprep.mubr.f32.mxu1 %v1198_v20  ;;  %v1203_v15 = vld [vmem:[%s22241_s1 + $0x1f8] sm:$0xff]  ;;  %v22287_v20 = vld [vmem:[#allocation14_spill] sm:$0xff] }
 0x1c4   : > { %1939 = vmatprep.subr.mxu1 %v22185_v55  ;;  %2100 = vmatprep.subr.mxu0 %v22185_v55 }
 0x1c5   : > { %1560 = vmatmul.mubr.f32.gmra.mxu1 %v1197_v61  ;;  %14751 = vmatprep.mubr.msk.f32.mxu0 %vm1230_vm2, %v1204_v22  ;;  %v1202_v61 = vld [vmem:[%s22241_s1 + $0x1f0] sm:$0xff] }
 0x1c6   : > { %1940 = vmatpush2.msra.mxu1 %v22286_v12  ;;  %2101 = vmatpush2.msra.mxu0 %v16382_v5  ;;  %v1214_v22 = vld [vmem:[%s22241_s1 + $0x250] sm:$0xff] }
 0x1c7   : > { %14752 = vmatmul.mubr.msk.f32.gmra.mxu0 %vm1230_vm2, %v1209_v50  ;;  %1941 = vmatprep.subr.mxu1 %v22185_v55  ;;  %v1219_v50 = vld [vmem:[%s22241_s1 + $0x278] sm:$0xff] }
 0x1c8   : > { %2102 = vmatprep.subr.mxu0 %v22185_v55  ;;  %1942 = vmatpush2.msra.mxu1 %v22287_v20  ;;  %v22288_v5 = vld [vmem:[#allocation15_spill] sm:$0xff] }
 0x1c9   : > { %2103 = vmatpush2.msra.mxu0 %v16400_v21  ;;  %1564 = vmatprep.mubr.f32.mxu1 %v1203_v15  ;;  %v1208_v21 = vld [vmem:[%s22241_s1 + $0x220] sm:$0xff] }
 0x1ca   : > { %1943 = vmatprep.subr.mxu1 %v22185_v55  ;;  %2104 = vmatprep.subr.mxu0 %v22185_v55  ;;  %v22289_v15 = vld [vmem:[#allocation16_spill] sm:$0xff] }
 0x1cb   : > { %1565 = vmatmul.mubr.f32.gmra.mxu1 %v1202_v61  ;;  %14754 = vmatprep.mubr.msk.f32.mxu0 %vm1230_vm2, %v1214_v22  ;;  %v1207_v61 = vld [vmem:[%s22241_s1 + $0x218] sm:$0xff]  ;;  %v1224_v22 = vld [vmem:[%s22241_s1 + $0x2a0] sm:$0xff] }
 0x1cc   : > { %1944 = vmatpush2.msra.mxu1 %v22288_v5  ;;  %2105 = vmatpush2.msra.mxu0 %v16413_v11  ;;  %v22290_v11 = vld [vmem:[#allocation17_spill] sm:$0xff] }
 0x1cd   : > { %14755 = vmatmul.mubr.msk.f32.gmra.mxu0 %vm1230_vm2, %v1219_v50  ;;  %1945 = vmatprep.subr.mxu1 %v22185_v55  ;;  %v1229_v50 = vld [vmem:[%s22241_s1 + $0x2c8] sm:$0xff] }
 0x1ce   : > { %2106 = vmatprep.subr.mxu0 %v22185_v55  ;;  %1946 = vmatpush2.msra.mxu1 %v22289_v15 }
 0x1cf   : > { %2107 = vmatpush2.msra.mxu0 %v16428_v25  ;;  %1569 = vmatprep.mubr.f32.mxu1 %v1208_v21  ;;  %v1213_v25 = vld [vmem:[%s22241_s1 + $0x248] sm:$0xff] }
 0x1d0   : > { %1947 = vmatprep.subr.mxu1 %v22185_v55  ;;  %2108 = vmatprep.subr.mxu0 %v22185_v55  ;;  %v22291_v21 = vld [vmem:[#allocation18_spill] sm:$0xff] }
 0x1d1   : > { %1570 = vmatmul.mubr.f32.gmra.mxu1 %v1207_v61  ;;  %14757 = vmatprep.mubr.msk.f32.mxu0 %vm1230_vm2, %v1224_v22  ;;  %v1212_v61 = vld [vmem:[%s22241_s1 + $0x240] sm:$0xff]  ;;  %v12784_v22 = vld [vmem:[%s22241_s1 + $0x2e8] sm:$0xff] }
 0x1d2   : > { %1948 = vmatpush2.msra.mxu1 %v22290_v11  ;;  %2109 = vmatpush2.msra.mxu0 %v16441_v8  ;;  %v22292_v8 = vld [vmem:[#allocation19_spill] sm:$0xff] }
 0x1d3   : > { %14758 = vmatmul.mubr.msk.f32.gmra.mxu0 %vm1230_vm2, %v1229_v50  ;;  %1949 = vmatprep.subr.mxu1 %v22185_v55  ;;  %v12783_v50 = vld [vmem:[%s22241_s1 + $0x2e0] sm:$0xff] }
 0x1d4   : > { %2110 = vmatprep.subr.mxu0 %v22185_v55  ;;  %1950 = vmatpush2.msra.mxu1 %v22291_v21 }
 0x1d5   : > { %2111 = vmatpush2.msra.mxu0 %v16457_v27  ;;  %1574 = vmatprep.mubr.f32.mxu1 %v1213_v25  ;;  %v1218_v25 = vld [vmem:[%s22241_s1 + $0x270] sm:$0xff]  ;;  %v22293_v27 = vld [vmem:[#allocation20_spill] sm:$0xff] }
 0x1d6   : > { %1951 = vmatprep.subr.mxu1 %v22185_v55  ;;  %2112 = vmatprep.subr.mxu0 %v22185_v55 }
 0x1d7   : > { %1575 = vmatmul.mubr.f32.gmra.mxu1 %v1212_v61  ;;  %2113 = vmatpush2.msra.mxu0 %v16471_v14  ;;  %v1217_v61 = vld [vmem:[%s22241_s1 + $0x268] sm:$0xff]  ;;  %v12789_v14 = vld [vmem:[%s22241_s1 + $0x310] sm:$0xff] }
 0x1d8   : > { %1952 = vmatpush2.msra.mxu1 %v22292_v8  ;;  %2114 = vmatprep.mubr.f32.mxu0 %v12784_v22  ;;  %v12788_v22 = vld [vmem:[%s22241_s1 + $0x308] sm:$0xff] }
 0x1d9   : > { %1953 = vmatprep.subr.mxu1 %v22185_v55  ;;  %2115 = vmatmul.mubr.f32.vlgmr.msra.gmra.mxu0 %v12783_v50  ;;  %v22294_v50 = vld [vmem:[#allocation21_spill] sm:$0xff] }
 0x1da   : > { %2505 = vmatprep.subr.mxu0 %v22185_v55  ;;  %1954 = vmatpush2.msra.mxu1 %v22293_v27 }
 0x1db   : > { %2506 = vmatpush1.msra.mxu0 %v15928_v30  ;;  %1579 = vmatprep.mubr.f32.mxu1 %v1218_v25  ;;  %v22295_v25 = vld [vmem:[#allocation22_spill] sm:$0xff]  ;;  %v12799_v30 = vld [vmem:[%s22241_s1 + $0x360] sm:$0xff] }
 0x1dc   : > { %1955 = vmatprep.subr.mxu1 %v22185_v55  ;;  %2507 = vmatprep.subr.mxu0 %v22185_v55 }
 0x1dd   : > { %1580 = vmatmul.mubr.f32.gmra.mxu1 %v1217_v61  ;;  %2119 = vmatprep.mubr.f32.mxu0 %v12789_v14  ;;  %v1222_v61 = vld [vmem:[%s22241_s1 + $0x290] sm:$0xff]  ;;  %v12794_v14 = vld [vmem:[%s22241_s1 + $0x338] sm:$0xff] }
 0x1de   : > { %1956 = vmatpush2.msra.mxu1 %v22294_v50  ;;  %2508 = vmatpush1.msra.mxu0 %v15931_v32  ;;  %v1228_v32 = vld [vmem:[%s22241_s1 + $0x2c0] sm:$0xff] }
 0x1df   : > { %1957 = vmatprep.subr.mxu1 %v22185_v55  ;;  %2120 = vmatmul.mubr.f32.gmra.mxu0 %v12788_v22  ;;  %v12793_v22 = vld [vmem:[%s22241_s1 + $0x330] sm:$0xff] }
 0x1e0   : > { %2509 = vmatprep.subr.mxu0 %v22185_v55  ;;  %1958 = vmatpush2.msra.mxu1 %v22295_v25 }
 0x1e1   : > { %2510 = vmatpush1.msra.mxu0 %v15938_v34  ;;  %1584 = vmatprep.mubr.f32.mxu1 %v1223_v3  ;;  %v1227_v3 = vld [vmem:[%s22241_s1 + $0x2b8] sm:$0xff] }
 0x1e2   : > { %14760 = vmatprep.subr.mxu1 %v16373_v10  ;;  %2511 = vmatprep.subr.mxu0 %v22185_v55  ;;  %v12782_v34 = vld [vmem:[%s22241_s1 + $0x2d8] sm:$0xff] }
 0x1e3   : > { %1585 = vmatmul.mubr.f32.gmra.mxu1 %v1222_v61  ;;  %2124 = vmatprep.mubr.f32.mxu0 %v12794_v14  ;;  %v12798_v61 = vld [vmem:[%s22241_s1 + $0x358] sm:$0xff]  ;;  %v12781_v14 = vld [vmem:[%s22241_s1 + $0x2d0] sm:$0xff] }
 0x1e4   : > { %2512 = vmatpush1.msra.mxu0 %v15948_v37  ;;  %1589 = vmatprep.mubr.f32.mxu1 %v1228_v32  ;;  %v12804_v32 = vld [vmem:[%s22241_s1 + $0x388] sm:$0xff] }
 0x1e5   : > { %2125 = vmatmul.mubr.f32.gmra.mxu0 %v12793_v22  ;;  %2513 = vmatprep.subr.mxu0 %v22185_v55  ;;  %v12786_v22 = vld [vmem:[%s22241_s1 + $0x2f8] sm:$0xff] }
 0x1e6   : > { %2514 = vmatpush1.msra.mxu0 %v15956_v39  ;;  %2129 = vmatprep.mubr.f32.mxu0 %v12799_v30  ;;  %v12803_v30 = vld [vmem:[%s22241_s1 + $0x380] sm:$0xff] }
 0x1e7   : > { %2515 = vmatprep.subr.mxu0 %v22185_v55  ;;  %1590 = vmatmul.mubr.f32.gmra.mxu1 %v1227_v3  ;;  %v12809_v3 = vld [vmem:[%s22241_s1 + $0x3b0] sm:$0xff] }
 0x1e8   : > { %2516 = vmatpush1.msra.mxu0 %v15963_v41  ;;  %1959 = vmatprep.mubr.f32.mxu1 %v12782_v34  ;;  %v12787_v34 = vld [vmem:[%s22241_s1 + $0x300] sm:$0xff] }
 0x1e9   : > { %2130 = vmatmul.mubr.f32.gmra.mxu0 %v12798_v61  ;;  %2517 = vmatprep.subr.mxu0 %v22185_v55  ;;  %v12808_v61 = vld [vmem:[%s22241_s1 + $0x3a8] sm:$0xff] }
 0x1ea   : > { %2518 = vmatpush1.msra.mxu0 %v15970_v43  ;;  %2134 = vmatprep.mubr.f32.mxu0 %v12804_v32  ;;  %v12792_v32 = vld [vmem:[%s22241_s1 + $0x328] sm:$0xff] }
 0x1eb   : > { %2519 = vmatprep.subr.mxu0 %v22185_v55  ;;  %1960 = vmatmul.mubr.f32.vlgmr.msra.gmra.mxu1 %v12781_v14  ;;  %v12791_v14 = vld [vmem:[%s22241_s1 + $0x320] sm:$0xff] }
 0x1ec   : > { %14761 = vmatpush3.msra.mxu1 %v16373_v10  ;;  %2520 = vmatpush1.msra.mxu0 %v15977_v45 }
 0x1ed   : > { %2135 = vmatmul.mubr.f32.gmra.mxu0 %v12803_v30  ;;  %14762 = vmatprep.subr.mxu1 %v16385_v19  ;;  %v12814_v30 = vld [vmem:[%s22241_s1 + $0x3d8] sm:$0xff] }
 0x1ee   : > { %2521 = vmatprep.subr.mxu0 %v22185_v55  ;;  %14763 = vmatpush3.msra.mxu1 %v16385_v19 }
 0x1ef   : > { %2522 = vmatpush1.msra.mxu0 %v15984_v47  ;;  %1964 = vmatprep.mubr.f32.mxu1 %v12787_v34  ;;  %v12813_v34 = vld [vmem:[%s22241_s1 + $0x3d0] sm:$0xff] }
 0x1f0   : > { %14764 = vmatprep.subr.mxu1 %v16393_v6  ;;  %2523 = vmatprep.subr.mxu0 %v22185_v55 }
 0x1f1   : > { %1965 = vmatmul.mubr.f32.gmra.mxu1 %v12786_v22  ;;  %2139 = vmatprep.mubr.f32.mxu0 %v12809_v3  ;;  %v12797_v22 = vld [vmem:[%s22241_s1 + $0x350] sm:$0xff]  ;;  %v12796_v3 = vld [vmem:[%s22241_s1 + $0x348] sm:$0xff] }
 0x1f2   : > { %14765 = vmatpush3.msra.mxu1 %v16393_v6  ;;  %2524 = vmatpush1.msra.mxu0 %v15991_v49 }
 0x1f3   : > { %2140 = vmatmul.mubr.f32.gmra.mxu0 %v12808_v61  ;;  %14766 = vmatprep.subr.mxu1 %v16404_v17  ;;  %v12819_v61 = vld [vmem:[%s22241_s1 + $0x400] sm:$0xff] }
 0x1f4   : > { %2525 = vmatprep.subr.mxu0 %v22185_v55  ;;  %14767 = vmatpush3.msra.mxu1 %v16404_v17 }
 0x1f5   : > { %2526 = vmatpush1.msra.mxu0 %v15996_v51  ;;  %1969 = vmatprep.mubr.f32.mxu1 %v12792_v32  ;;  %v12818_v32 = vld [vmem:[%s22241_s1 + $0x3f8] sm:$0xff] }
 0x1f6   : > { %14768 = vmatprep.subr.mxu1 %v16421_v13  ;;  %2527 = vmatprep.subr.mxu0 %v22185_v55 }
 0x1f7   : > { %1970 = vmatmul.mubr.f32.gmra.mxu1 %v12791_v14  ;;  %2144 = vmatprep.mubr.f32.mxu0 %v12814_v30  ;;  %v12802_v14 = vld [vmem:[%s22241_s1 + $0x378] sm:$0xff] }
 0x1f8   : > { %14769 = vmatpush3.msra.mxu1 %v16421_v13  ;;  %2528 = vmatpush1.msra.mxu0 %v16001_v53 }
 0x1f9   : > { %2145 = vmatmul.mubr.f32.gmra.mxu0 %v12813_v34  ;;  %14770 = vmatprep.subr.mxu1 %v16432_v4  ;;  %v12801_v34 = vld [vmem:[%s22241_s1 + $0x370] sm:$0xff] }
 0x1fa   : > { %2529 = vmatprep.subr.mxu0 %v22185_v55  ;;  %14771 = vmatpush3.msra.mxu1 %v16432_v4 }
 0x1fb   : > { %2530 = vmatpush1.msra.mxu0 %v16007_v56  ;;  %1974 = vmatprep.mubr.f32.mxu1 %v12797_v22  ;;  %v12824_v22 = vld [vmem:[%s22241_s1 + $0x428] sm:$0xff] }
 0x1fc   : > { %14772 = vmatprep.subr.mxu1 %v16450_v9  ;;  %2531 = vmatprep.subr.mxu0 %v22185_v55 }
 0x1fd   : > { %1975 = vmatmul.mubr.f32.gmra.mxu1 %v12796_v3  ;;  %2149 = vmatprep.mubr.f32.mxu0 %v12819_v61  ;;  %v12823_v61 = vld [vmem:[%s22241_s1 + $0x420] sm:$0xff] }
 0x1fe   : > { %14773 = vmatpush3.msra.mxu1 %v16450_v9  ;;  %2532 = vmatpush1.msra.mxu0 %v16013_v58  ;;  %v16910_v30 = vpop.f32.mrf.mxu1 }
 0x1ff   : > { %22296 = vst [vmem:[#allocation9_spill] sm:$0xff] %v16910_v30  ;;  %2150 = vmatmul.mubr.f32.gmra.mxu0 %v12818_v32  ;;  %14774 = vmatprep.subr.mxu1 %v16462_v40  ;;  %v12807_v32 = vld [vmem:[%s22241_s1 + $0x3a0] sm:$0xff] }
 0x200   : > { %2533 = vmatprep.subr.mxu0 %v22185_v55  ;;  %14775 = vmatpush3.msra.mxu1 %v16462_v40  ;;  %v1353_v3 = vpop.f32.mrf.mxu1 }
 0x201   : > { %2534 = vmatpush1.msra.mxu0 %v16019_v60  ;;  %1979 = vmatprep.mubr.f32.mxu1 %v12802_v14  ;;  %v12806_v14 = vld [vmem:[%s22241_s1 + $0x398] sm:$0xff] }
 0x202   : > { %2535 = vmatprep.subr.mxu0 %v22185_v55  ;;  %1980 = vmatmul.mubr.f32.gmra.mxu1 %v12801_v34  ;;  %v16929_v30 = vpop.f32.mrf.mxu1  ;;  %v12829_v34 = vld [vmem:[%s22241_s1 + $0x450] sm:$0xff] }
 0x203   : > { %2154 = vmatprep.mubr.f32.mxu0 %v12824_v22  ;;  %2536 = vmatpush1.msra.mxu0 %v16025_v62  ;;  %v12828_v22 = vld [vmem:[%s22241_s1 + $0x448] sm:$0xff] }
 0x204   : > { %2155 = vmatmul.mubr.f32.gmra.mxu0 %v12823_v61  ;;  %2537 = vmatprep.subr.mxu0 %v22185_v55  ;;  %v1358_v3 = vpop.f32.mrf.mxu1  ;;  %v12812_v61 = vld [vmem:[%s22241_s1 + $0x3c8] sm:$0xff] }
 0x205   : > { %2538 = vmatpush2.msra.mxu0 %v16030_v0  ;;  %1984 = vmatprep.mubr.f32.mxu1 %v12807_v32  ;;  %v12811_v32 = vld [vmem:[%s22241_s1 + $0x3c0] sm:$0xff] }
 0x206   : > { %2539 = vmatprep.subr.mxu0 %v22185_v55  ;;  %1985 = vmatmul.mubr.f32.gmra.mxu1 %v12806_v14  ;;  %v16947_v62 = vpop.f32.mrf.mxu1  ;;  %v12834_v14 = vld [vmem:[%s22241_s1 + $0x478] sm:$0xff] }
 0x207   : > { %22297 = vst [vmem:[#allocation11_spill] sm:$0xff] %v16947_v62  ;;  %2159 = vmatprep.mubr.f32.mxu0 %v12829_v34  ;;  %2540 = vmatpush2.msra.mxu0 %v16035_v2  ;;  %v12833_v34 = vld [vmem:[%s22241_s1 + $0x470] sm:$0xff] }
 0x208   : > { %2160 = vmatmul.mubr.f32.gmra.mxu0 %v12828_v22  ;;  %2541 = vmatprep.subr.mxu0 %v22185_v55  ;;  %v1363_v3 = vpop.f32.mrf.mxu1  ;;  %v12817_v22 = vld [vmem:[%s22241_s1 + $0x3f0] sm:$0xff] }
 0x209   : > { %2542 = vmatpush2.msra.mxu0 %v22281_v54  ;;  %1989 = vmatprep.mubr.f32.mxu1 %v12812_v61  ;;  %v12816_v61 = vld [vmem:[%s22241_s1 + $0x3e8] sm:$0xff] }
 0x20a   : > { %2543 = vmatprep.subr.mxu0 %v22185_v55  ;;  %1990 = vmatmul.mubr.f32.gmra.mxu1 %v12811_v32  ;;  %v16965_v62 = vpop.f32.mrf.mxu1  ;;  %v12839_v32 = vld [vmem:[%s22241_s1 + $0x4a0] sm:$0xff] }
 0x20b   : > { %2164 = vmatprep.mubr.f32.mxu0 %v12834_v14  ;;  %2544 = vmatpush2.msra.mxu0 %v22283_v24  ;;  %v12838_v14 = vld [vmem:[%s22241_s1 + $0x498] sm:$0xff] }
 0x20c   : > { %2165 = vmatmul.mubr.f32.gmra.mxu0 %v12833_v34  ;;  %2545 = vmatprep.subr.mxu0 %v22185_v55  ;;  %v1368_v3 = vpop.f32.mrf.mxu1  ;;  %v12822_v34 = vld [vmem:[%s22241_s1 + $0x418] sm:$0xff] }
 0x20d   : > { %2546 = vmatpush2.msra.mxu0 %v22284_v16  ;;  %1994 = vmatprep.mubr.f32.mxu1 %v12817_v22  ;;  %v12821_v22 = vld [vmem:[%s22241_s1 + $0x410] sm:$0xff] }
 0x20e   : > { %2547 = vmatprep.subr.mxu0 %v22185_v55  ;;  %1995 = vmatmul.mubr.f32.gmra.mxu1 %v12816_v61  ;;  %v16983_v24 = vpop.f32.mrf.mxu1  ;;  %v12844_v61 = vld [vmem:[%s22241_s1 + $0x4c8] sm:$0xff] }
 0x20f   : > { %22298 = vst [vmem:[#allocation12_spill] sm:$0xff] %v16983_v24  ;;  %2169 = vmatprep.mubr.f32.mxu0 %v12839_v32  ;;  %2548 = vmatpush2.msra.mxu0 %v22285_v28  ;;  %v12843_v32 = vld [vmem:[%s22241_s1 + $0x4c0] sm:$0xff] }
 0x210   : > { %2170 = vmatmul.mubr.f32.gmra.mxu0 %v12838_v14  ;;  %2549 = vmatprep.subr.mxu0 %v22185_v55  ;;  %v1373_v3 = vpop.f32.mrf.mxu1  ;;  %v12827_v14 = vld [vmem:[%s22241_s1 + $0x440] sm:$0xff] }
 0x211   : > { %2550 = vmatpush2.msra.mxu0 %v22286_v12  ;;  %1999 = vmatprep.mubr.f32.mxu1 %v12822_v34  ;;  %v12826_v34 = vld [vmem:[%s22241_s1 + $0x438] sm:$0xff] }
 0x212   : > { %2551 = vmatprep.subr.mxu0 %v22185_v55  ;;  %2000 = vmatmul.mubr.f32.gmra.mxu1 %v12821_v22  ;;  %v17001_v24 = vpop.f32.mrf.mxu1  ;;  %v12849_v22 = vld [vmem:[%s22241_s1 + $0x4f0] sm:$0xff] }
 0x213   : > { %2174 = vmatprep.mubr.f32.mxu0 %v12844_v61  ;;  %2552 = vmatpush2.msra.mxu0 %v22287_v20  ;;  %v12848_v61 = vld [vmem:[%s22241_s1 + $0x4e8] sm:$0xff] }
 0x214   : > { %2175 = vmatmul.mubr.f32.gmra.mxu0 %v12843_v32  ;;  %2553 = vmatprep.subr.mxu0 %v22185_v55  ;;  %v1378_v3 = vpop.f32.mrf.mxu1  ;;  %v12832_v32 = vld [vmem:[%s22241_s1 + $0x468] sm:$0xff] }
 0x215   : > { %2554 = vmatpush2.msra.mxu0 %v22288_v5  ;;  %2004 = vmatprep.mubr.f32.mxu1 %v12827_v14  ;;  %v12831_v14 = vld [vmem:[%s22241_s1 + $0x460] sm:$0xff] }
 0x216   : > { %2555 = vmatprep.subr.mxu0 %v22185_v55  ;;  %2005 = vmatmul.mubr.f32.gmra.mxu1 %v12826_v34  ;;  %v17019_v20 = vpop.f32.mrf.mxu1  ;;  %v12854_v34 = vld [vmem:[%s22241_s1 + $0x518] sm:$0xff] }
 0x217   : > { %22299 = vst [vmem:[#allocation13_spill] sm:$0xff] %v17019_v20  ;;  %2179 = vmatprep.mubr.f32.mxu0 %v12849_v22  ;;  %2556 = vmatpush2.msra.mxu0 %v22289_v15  ;;  %v12853_v22 = vld [vmem:[%s22241_s1 + $0x510] sm:$0xff] }
 0x218   : > { %2180 = vmatmul.mubr.f32.gmra.mxu0 %v12848_v61  ;;  %2557 = vmatprep.subr.mxu0 %v22185_v55  ;;  %v1383_v3 = vpop.f32.mrf.mxu1  ;;  %v12837_v61 = vld [vmem:[%s22241_s1 + $0x490] sm:$0xff] }
 0x219   : > { %2558 = vmatpush2.msra.mxu0 %v22290_v11  ;;  %2009 = vmatprep.mubr.f32.mxu1 %v12832_v32  ;;  %v12836_v32 = vld [vmem:[%s22241_s1 + $0x488] sm:$0xff] }
 0x21a   : > { %2559 = vmatprep.subr.mxu0 %v22185_v55  ;;  %2010 = vmatmul.mubr.f32.gmra.mxu1 %v12831_v14  ;;  %v17037_v20 = vpop.f32.mrf.mxu1  ;;  %v12859_v14 = vld [vmem:[%s22241_s1 + $0x540] sm:$0xff] }
 0x21b   : > { %2184 = vmatprep.mubr.f32.mxu0 %v12854_v34  ;;  %2560 = vmatpush2.msra.mxu0 %v22291_v21  ;;  %v12858_v34 = vld [vmem:[%s22241_s1 + $0x538] sm:$0xff] }
 0x21c   : > { %2185 = vmatmul.mubr.f32.gmra.mxu0 %v12853_v22  ;;  %2561 = vmatprep.subr.mxu0 %v22185_v55  ;;  %v1388_v3 = vpop.f32.mrf.mxu1  ;;  %v12842_v22 = vld [vmem:[%s22241_s1 + $0x4b8] sm:$0xff] }
 0x21d   : > { %2562 = vmatpush2.msra.mxu0 %v22292_v8  ;;  %2014 = vmatprep.mubr.f32.mxu1 %v12837_v61  ;;  %v12841_v61 = vld [vmem:[%s22241_s1 + $0x4b0] sm:$0xff] }
 0x21e   : > { %2563 = vmatprep.subr.mxu0 %v22185_v55  ;;  %2015 = vmatmul.mubr.f32.gmra.mxu1 %v12836_v32  ;;  %v17055_v21 = vpop.f32.mrf.mxu1  ;;  %v12864_v32 = vld [vmem:[%s22241_s1 + $0x568] sm:$0xff] }
 0x21f   : > { %22300 = vst [vmem:[#allocation15_spill] sm:$0xff] %v17055_v21  ;;  %2189 = vmatprep.mubr.f32.mxu0 %v12859_v14  ;;  %2564 = vmatpush2.msra.mxu0 %v22293_v27  ;;  %v12863_v14 = vld [vmem:[%s22241_s1 + $0x560] sm:$0xff]  ;;  %v12869_v21 = vld [vmem:[%s22241_s1 + $0x590] sm:$0xff] }
 0x220   : > { %2190 = vmatmul.mubr.f32.gmra.mxu0 %v12858_v34  ;;  %2565 = vmatprep.subr.mxu0 %v22185_v55  ;;  %v1393_v3 = vpop.f32.mrf.mxu1  ;;  %v12847_v34 = vld [vmem:[%s22241_s1 + $0x4e0] sm:$0xff] }
 0x221   : > { %2566 = vmatpush2.msra.mxu0 %v22294_v50  ;;  %2019 = vmatprep.mubr.f32.mxu1 %v12842_v22  ;;  %v12846_v22 = vld [vmem:[%s22241_s1 + $0x4d8] sm:$0xff] }
 0x222   : > { %2567 = vmatprep.subr.mxu0 %v22185_v55  ;;  %2020 = vmatmul.mubr.f32.gmra.mxu1 %v12841_v61  ;;  %v17076_v27 = vpop.f32.mrf.mxu1  ;;  %v12852_v61 = vld [vmem:[%s22241_s1 + $0x508] sm:$0xff] }
 0x223   : > { %2194 = vmatprep.mubr.f32.mxu0 %v12864_v32  ;;  %2568 = vmatpush2.msra.mxu0 %v22295_v25  ;;  %v12868_v32 = vld [vmem:[%s22241_s1 + $0x588] sm:$0xff]  ;;  %v22301_v25 = vmov 0.0  }
 0x224   : > { %2195 = vmatmul.mubr.f32.gmra.mxu0 %v12863_v14  ;;  %14803 = vmatprep.subr.mxu0 %v16373_v10  ;;  %v1398_v3 = vpop.f32.mrf.mxu1  ;;  %v12890_v55 = vld [vmem:[%s22241_s1 + $0x5a8] sm:$0xff] }
 0x225   : > { %2024 = vmatprep.mubr.f32.mxu1 %v12847_v34  ;;  %2199 = vmatprep.mubr.f32.mxu0 %v12869_v21  ;;  %v12851_v3 = vld [vmem:[%s22241_s1 + $0x500] sm:$0xff]  ;;  %v12857_v21 = vld [vmem:[%s22241_s1 + $0x530] sm:$0xff] }
 0x226   : > { %2025 = vmatmul.mubr.f32.gmra.mxu1 %v12846_v22  ;;  %2660 = vmatprep.subr.mxu1 %v22301_v25  ;;  %v17093_v14 = vpop.f32.mrf.mxu1  ;;  %v12889_v22 = vld [vmem:[%s22241_s1 + $0x5a0] sm:$0xff] }
 0x227   : > { %22302 = vst [vmem:[#allocation16_spill] sm:$0xff] %v17093_v14  ;;  %2029 = vmatprep.mubr.f32.mxu1 %v12852_v61  ;;  %v12895_v61 = vld [vmem:[%s22241_s1 + $0x5d0] sm:$0xff] }
 0x228   : > { %2200 = vmatmul.mubr.f32.gmra.mxu0 %v12868_v32  ;;  %v1403_v34 = vpop.f32.mrf.mxu1  ;;  %v12856_v32 = vld [vmem:[%s22241_s1 + $0x528] sm:$0xff] }
 0x229   : > { %2569 = vmatprep.mubr.f32.mxu0 %v12890_v55  ;;  %v12862_v55 = vld [vmem:[%s22241_s1 + $0x558] sm:$0xff] }
 0x22a   : > { %2030 = vmatmul.mubr.f32.gmra.mxu1 %v12851_v3  ;;  %v17107_v14 = vpop.f32.mrf.mxu1  ;;  %v12894_v3 = vld [vmem:[%s22241_s1 + $0x5c8] sm:$0xff] }
 0x22b   : > { %2034 = vmatprep.mubr.f32.mxu1 %v12857_v21  ;;  %v12900_v21 = vld [vmem:[%s22241_s1 + $0x5f8] sm:$0xff] }
 0x22c   : > { %2570 = vmatmul.mubr.f32.vlgmr.msra.gmra.mxu0 %v12889_v22  ;;  %v1408_v34 = vpop.f32.mrf.mxu1 }
 0x22d   : > { %14804 = vmatpush3.msra.mxu0 %v16373_v10  ;;  %2574 = vmatprep.mubr.f32.mxu0 %v12895_v61  ;;  %v12861_v61 = vld [vmem:[%s22241_s1 + $0x550] sm:$0xff]  ;;  %v12898_v10 = vld [vmem:[%s22241_s1 + $0x5e8] sm:$0xff] }
 0x22e   : > { %14805 = vmatprep.subr.mxu0 %v16385_v19  ;;  %2035 = vmatmul.mubr.f32.gmra.mxu1 %v12856_v32  ;;  %v17123_v22 = vpop.f32.mrf.mxu1  ;;  %v12867_v32 = vld [vmem:[%s22241_s1 + $0x580] sm:$0xff] }
 0x22f   : > { %22303 = vst [vmem:[#allocation44_spill] sm:$0xff] %v17123_v22  ;;  %14806 = vmatpush3.msra.mxu0 %v16385_v19  ;;  %2039 = vmatprep.mubr.f32.mxu1 %v12862_v55  ;;  %v12899_v22 = vld [vmem:[%s22241_s1 + $0x5f0] sm:$0xff]  ;;  %v12905_v55 = vld [vmem:[%s22241_s1 + $0x620] sm:$0xff] }
 0x230   : > { %14807 = vmatprep.subr.mxu0 %v16393_v6  ;;  %2575 = vmatmul.mubr.f32.gmra.mxu0 %v12894_v3  ;;  %v1413_v34 = vpop.f32.mrf.mxu1 }
 0x231   : > { %14808 = vmatpush3.msra.mxu0 %v16393_v6  ;;  %2579 = vmatprep.mubr.f32.mxu0 %v12900_v21  ;;  %v12866_v21 = vld [vmem:[%s22241_s1 + $0x578] sm:$0xff] }
 0x232   : > { %14809 = vmatprep.subr.mxu0 %v16404_v17  ;;  %2040 = vmatmul.mubr.f32.gmra.mxu1 %v12861_v61  ;;  %v17141_v3 = vpop.f32.mrf.mxu1  ;;  %v12785_v61 = vld [vmem:[%s22241_s1 + $0x2f0] sm:$0xff] }
 0x233   : > { %14810 = vmatpush3.msra.mxu0 %v16404_v17  ;;  %2044 = vmatprep.mubr.f32.mxu1 %v12867_v32  ;;  %v12904_v17 = vld [vmem:[%s22241_s1 + $0x618] sm:$0xff]  ;;  %v12910_v32 = vld [vmem:[%s22241_s1 + $0x648] sm:$0xff] }
 0x234   : > { %14811 = vmatprep.subr.mxu0 %v16421_v13  ;;  %2580 = vmatmul.mubr.f32.gmra.mxu0 %v12899_v22  ;;  %v1418_v34 = vpop.f32.mrf.mxu1  ;;  %v12790_v22 = vld [vmem:[%s22241_s1 + $0x318] sm:$0xff] }
 0x235   : > { %14812 = vmatpush3.msra.mxu0 %v16421_v13  ;;  %2584 = vmatprep.mubr.f32.mxu0 %v12905_v55 }
 0x236   : > { %14813 = vmatprep.subr.mxu0 %v16432_v4  ;;  %2045 = vmatmul.mubr.f32.gmra.mxu1 %v12866_v21  ;;  %v12909_v21 = vld [vmem:[%s22241_s1 + $0x640] sm:$0xff] }
 0x237   : > { %14814 = vmatpush3.msra.mxu0 %v16432_v4  ;;  %14776 = vmatprep.mubr.msk.f32.mxu1 %vm1230_vm2, %v12785_v61  ;;  %v17164_v55 = vpop.f32.mrf.mxu1  ;;  %v12795_v61 = vld [vmem:[%s22241_s1 + $0x340] sm:$0xff] }
 0x238   : > { %22304 = vst [vmem:[#allocation45_spill] sm:$0xff] %v17164_v55  ;;  %14815 = vmatprep.subr.mxu0 %v16450_v9  ;;  %2585 = vmatmul.mubr.f32.gmra.mxu0 %v12904_v17  ;;  %v12800_v17 = vld [vmem:[%s22241_s1 + $0x368] sm:$0xff] }
 0x239   : > { %14816 = vmatpush3.msra.mxu0 %v16450_v9  ;;  %2589 = vmatprep.mubr.f32.mxu0 %v12910_v32  ;;  %v1423_v34 = vpop.f32.mrf.mxu1  ;;  %v12915_v32 = vld [vmem:[%s22241_s1 + $0x670] sm:$0xff]  ;;  %v12930_v9 = vld [vmem:[%s22241_s1 + $0x6e8] sm:$0xff] }
 0x23a   : > { %14817 = vmatprep.subr.mxu0 %v16462_v40  ;;  %14777 = vmatmul.mubr.msk.f32.vlgmr.msra.gmra.mxu1 %vm1230_vm2, %v12790_v22  ;;  %v12914_v34 = vld [vmem:[%s22241_s1 + $0x668] sm:$0xff] }
 0x23b   : > { %14818 = vmatpush3.msra.mxu0 %v16462_v40  ;;  %2661 = vmatpush1.msra.mxu1 %v16144_v42  ;;  %v12920_v40 = vld [vmem:[%s22241_s1 + $0x698] sm:$0xff] }
 0x23c   : > { %2590 = vmatmul.mubr.f32.gmra.mxu0 %v12909_v21  ;;  %2662 = vmatprep.subr.mxu1 %v22301_v25  ;;  %v17185_v22 = vpop.f32.mrf.mxu1  ;;  %v12805_v21 = vld [vmem:[%s22241_s1 + $0x390] sm:$0xff] }
 0x23d   : > { %2663 = vmatpush1.msra.mxu1 %v16152_v46  ;;  %14779 = vmatprep.mubr.msk.f32.mxu1 %vm1230_vm2, %v12795_v61  ;;  %v12810_v61 = vld [vmem:[%s22241_s1 + $0x3b8] sm:$0xff] }
 0x23e   : > { %2664 = vmatprep.subr.mxu1 %v22301_v25  ;;  %14780 = vmatmul.mubr.msk.f32.gmra.mxu1 %vm1230_vm2, %v12800_v17  ;;  %v1428_v55 = vpop.f32.mrf.mxu1 }
 0x23f   : > { %2594 = vmatprep.mubr.f32.mxu0 %v12915_v32  ;;  %2665 = vmatpush1.msra.mxu1 %v16149_v44  ;;  %v12919_v55 = vld [vmem:[%s22241_s1 + $0x690] sm:$0xff]  ;;  %v12815_v32 = vld [vmem:[%s22241_s1 + $0x3e0] sm:$0xff] }
 0x240   : > { %2595 = vmatmul.mubr.f32.gmra.mxu0 %v12914_v34  ;;  %2666 = vmatprep.subr.mxu1 %v22301_v25  ;;  %v12820_v34 = vld [vmem:[%s22241_s1 + $0x408] sm:$0xff] }
 0x241   : > { %2667 = vmatpush1.msra.mxu1 %v16169_v57  ;;  %14782 = vmatprep.mubr.msk.f32.mxu1 %vm1230_vm2, %v12805_v21  ;;  %v17210_v17 = vpop.f32.mrf.mxu1 }
 0x242   : > { %22305 = vst [vmem:[#allocation46_spill] sm:$0xff] %v17210_v17  ;;  %2668 = vmatprep.subr.mxu1 %v22301_v25  ;;  %14783 = vmatmul.mubr.msk.f32.gmra.mxu1 %vm1230_vm2, %v12810_v61  ;;  %v12925_v17 = vld [vmem:[%s22241_s1 + $0x6c0] sm:$0xff] }
 0x243   : > { %2599 = vmatprep.mubr.f32.mxu0 %v12920_v40  ;;  %2669 = vmatpush1.msra.mxu1 %v16182_v1  ;;  %v1433_v21 = vpop.f32.mrf.mxu1  ;;  %v12924_v40 = vld [vmem:[%s22241_s1 + $0x6b8] sm:$0xff]  ;;  %v14735_v4 = vpop.f32.mrf.mxu0 }
 0x244   : > { %2600 = vmatmul.mubr.f32.gmra.mxu0 %v12919_v55  ;;  %2670 = vmatprep.subr.mxu1 %v22301_v25  ;;  %v12825_v55 = vld [vmem:[%s22241_s1 + $0x430] sm:$0xff] }
 0x245   : > { %2671 = vmatpush1.msra.mxu1 %v16189_v31  ;;  %14785 = vmatprep.mubr.msk.f32.mxu1 %vm1230_vm2, %v12815_v32  ;;  %v17230_v61 = vpop.f32.mrf.mxu1  ;;  %v12830_v32 = vld [vmem:[%s22241_s1 + $0x458] sm:$0xff] }
 0x246   : > { %2672 = vmatprep.subr.mxu1 %v22301_v25  ;;  %14786 = vmatmul.mubr.msk.f32.gmra.mxu1 %vm1230_vm2, %v12820_v34 }
 0x247   : > { %2604 = vmatprep.mubr.f32.mxu0 %v12925_v17  ;;  %2673 = vmatpush1.msra.mxu1 %v16203_v33  ;;  %v1438_v21 = vpop.f32.mrf.mxu1  ;;  %v12929_v17 = vld [vmem:[%s22241_s1 + $0x6e0] sm:$0xff] }
 0x248   : > { %2605 = vmatmul.mubr.f32.gmra.mxu0 %v12924_v40  ;;  %2674 = vmatprep.subr.mxu1 %v22301_v25  ;;  %v12835_v40 = vld [vmem:[%s22241_s1 + $0x480] sm:$0xff] }
 0x249   : > { %2675 = vmatpush1.msra.mxu1 %v16211_v35  ;;  %14788 = vmatprep.mubr.msk.f32.mxu1 %vm1230_vm2, %v12825_v55  ;;  %v17250_v34 = vpop.f32.mrf.mxu1  ;;  %v12840_v55 = vld [vmem:[%s22241_s1 + $0x4a8] sm:$0xff] }
 0x24a   : > { %22306 = vst [vmem:[#allocation47_spill] sm:$0xff] %v17250_v34  ;;  %2676 = vmatprep.subr.mxu1 %v22301_v25  ;;  %14789 = vmatmul.mubr.msk.f32.gmra.mxu1 %vm1230_vm2, %v12830_v32  ;;  %v12935_v34 = vld [vmem:[%s22241_s1 + $0x710] sm:$0xff] }
 0x24b   : > { %2609 = vmatprep.mubr.f32.mxu0 %v12930_v9  ;;  %2677 = vmatpush1.msra.mxu1 %v16225_v59  ;;  %v1508_v21 = vpop.f32.mrf.mxu1  ;;  %v12934_v9 = vld [vmem:[%s22241_s1 + $0x708] sm:$0xff]  ;;  %v12845_v32 = vld [vmem:[%s22241_s1 + $0x4d0] sm:$0xff] }
 0x24c   : > { %2610 = vmatmul.mubr.f32.gmra.mxu0 %v12929_v17  ;;  %2678 = vmatprep.subr.mxu1 %v22301_v25 }
 0x24d   : > { %2679 = vmatpush1.msra.mxu1 %v16233_v63  ;;  %14791 = vmatprep.mubr.msk.f32.mxu1 %vm1230_vm2, %v12835_v40  ;;  %v12850_v40 = vld [vmem:[%s22241_s1 + $0x4f8] sm:$0xff] }
 0x24e   : > { %2680 = vmatprep.subr.mxu1 %v22301_v25  ;;  %14792 = vmatmul.mubr.msk.f32.gmra.mxu1 %vm1230_vm2, %v12840_v55  ;;  %v1511_v17 = vpop.f32.mrf.mxu1  ;;  %v12940_v55 = vld [vmem:[%s22241_s1 + $0x738] sm:$0xff] }
 0x24f   : > { %2614 = vmatprep.mubr.f32.mxu0 %v12935_v34  ;;  %2681 = vmatpush1.msra.mxu1 %v16247_v48  ;;  %v1512_v21 = vadd.f32 %v1511_v17, %v16929_v30  ;;  %v12939_v34 = vld [vmem:[%s22241_s1 + $0x730] sm:$0xff]  ;;  %v12855_v30 = vld [vmem:[%s22241_s1 + $0x520] sm:$0xff] }
 0x250   : > { %2615 = vmatmul.mubr.f32.gmra.mxu0 %v12934_v9  ;;  %2682 = vmatprep.subr.mxu1 %v22301_v25  ;;  %v1513_v13 = vpop.f32.mrf.mxu1 }
 0x251   : > { %2683 = vmatpush1.msra.mxu1 %v16255_v52  ;;  %14794 = vmatprep.mubr.msk.f32.mxu1 %vm1230_vm2, %v12845_v32  ;;  %v17289_v6 = vadd.f32 %v14735_v4, %v1512_v21  ;;  %v12860_v13 = vld [vmem:[%s22241_s1 + $0x548] sm:$0xff]  ;;  %v12945_v4 = vld [vmem:[%s22241_s1 + $0x760] sm:$0xff]  ;;  %v12944_v32 = vld [vmem:[%s22241_s1 + $0x758] sm:$0xff] }
 0x252   : > { %2684 = vmatprep.subr.mxu1 %v22301_v25  ;;  %14795 = vmatmul.mubr.msk.f32.gmra.mxu1 %vm1230_vm2, %v12850_v40  ;;  %v12865_v40 = vld [vmem:[%s22241_s1 + $0x570] sm:$0xff]  ;;  %v12870_v21 = vld [vmem:[%s22241_s1 + $0x598] sm:$0xff] }
 0x253   : > { %22307 = vst [vmem:[#allocation48_spill] sm:$0xff] %v17289_v6  ;;  %2619 = vmatprep.mubr.f32.mxu0 %v12940_v55  ;;  %2685 = vmatpush1.msra.mxu1 %v16267_v29  ;;  %v17300_v9 = vpop.f32.mrf.mxu1  ;;  %v12950_v55 = vld [vmem:[%s22241_s1 + $0x788] sm:$0xff] }
 0x254   : > { %22308 = vst [vmem:[#allocation49_spill] sm:$0xff] %v17300_v9  ;;  %2620 = vmatmul.mubr.f32.gmra.mxu0 %v12939_v34  ;;  %2686 = vmatprep.subr.mxu1 %v22301_v25  ;;  %v12949_v34 = vld [vmem:[%s22241_s1 + $0x780] sm:$0xff] }
 0x255   : > { %2687 = vmatpush1.msra.mxu1 %v16273_v23  ;;  %14797 = vmatprep.mubr.msk.f32.mxu1 %vm1230_vm2, %v12855_v30  ;;  %v1518_v17 = vpop.f32.mrf.mxu1  ;;  %v17329_v30 = vpop.f32.mrf.mxu0 }
 0x256   : > { %2688 = vmatprep.subr.mxu1 %v22301_v25  ;;  %14798 = vmatmul.mubr.msk.f32.gmra.mxu1 %vm1230_vm2, %v12860_v13  ;;  %22309 = vst [vmem:[#allocation50_spill] sm:$0xff] %v17329_v30  ;;  %v22316_v30 = vld [vmem:[#allocation26_spill] sm:$0xff] }
 0x257   : > { %2624 = vmatprep.mubr.f32.mxu0 %v12945_v4  ;;  %2689 = vmatpush1.msra.mxu1 %v16285_v36  ;;  %v12955_v4 = vld [vmem:[%s22241_s1 + $0x7b0] sm:$0xff]  ;;  %v14738_v17 = vpop.f32.mrf.mxu0 }
 0x258   : > { %2625 = vmatmul.mubr.f32.gmra.mxu0 %v12944_v32  ;;  %2690 = vmatprep.subr.mxu1 %v22301_v25 }
 0x259   : > { %2691 = vmatpush1.msra.mxu1 %v16291_v38  ;;  %14800 = vmatprep.mubr.msk.f32.mxu1 %vm1230_vm2, %v12865_v40  ;;  %v1521_v13 = vpop.f32.mrf.mxu1 }
 0x25a   : > { %2692 = vmatprep.subr.mxu1 %v22301_v25  ;;  %14801 = vmatmul.mubr.msk.f32.gmra.mxu1 %vm1230_vm2, %v12870_v21  ;;  %v1522_v32 = vadd.f32 %v1521_v13, %v16965_v62  ;;  %v12892_v21 = vld [vmem:[%s22241_s1 + $0x5b8] sm:$0xff]  ;;  %v12954_v62 = vld [vmem:[%s22241_s1 + $0x7a8] sm:$0xff] }
 0x25b   : > { %2629 = vmatprep.mubr.f32.mxu0 %v12950_v55  ;;  %2693 = vmatpush2.msra.mxu1 %v16302_v26  ;;  %v1523_v40 = vpop.f32.mrf.mxu1  ;;  %v12960_v55 = vld [vmem:[%s22241_s1 + $0x7d8] sm:$0xff] }
 0x25c   : > { %2630 = vmatmul.mubr.f32.gmra.mxu0 %v12949_v34  ;;  %2694 = vmatprep.subr.mxu1 %v22301_v25  ;;  %v17339_v6 = vadd.f32 %v14738_v17, %v1522_v32  ;;  %v12959_v32 = vld [vmem:[%s22241_s1 + $0x7d0] sm:$0xff]  ;;  %v12965_v17 = vld [vmem:[%s22241_s1 + $0x800] sm:$0xff] }
 0x25d   : > { %2695 = vmatpush2.msra.mxu1 %v16310_v18  ;;  %2634 = vmatprep.mubr.f32.mxu0 %v12955_v4  ;;  %v22312_v4 = vld [vmem:[#allocation23_spill] sm:$0xff]  ;;  %v22313_v40 = vld [vmem:[#allocation24_spill] sm:$0xff] }
 0x25e   : > { %22310 = vst [vmem:[#allocation51_spill] sm:$0xff] %v17339_v6  ;;  %2696 = vmatprep.subr.mxu1 %v22301_v25  ;;  %3270 = vmatprep.subr.mxu0 %v22301_v25  ;;  %v17353_v34 = vpop.f32.mrf.mxu1 }
 0x25f   : > { %22311 = vst [vmem:[#allocation52_spill] sm:$0xff] %v17353_v34  ;;  %2697 = vmatpush2.msra.mxu1 %v16307_v7  ;;  %2724 = vmatprep.mubr.f32.mxu1 %v12892_v21  ;;  %v17367_v21 = vpop.f32.mrf.mxu0 }
 0x260   : > { %2635 = vmatmul.mubr.f32.gmra.mxu0 %v12954_v62  ;;  %2698 = vmatprep.subr.mxu1 %v22301_v25  ;;  %v1528_v13 = vpop.f32.mrf.mxu1  ;;  %22314 = vst [vmem:[#allocation23_spill] sm:$0xff] %v17367_v21 }
 0x261   : > { %2699 = vmatpush2.msra.mxu1 %v22312_v4  ;;  %2639 = vmatprep.mubr.f32.mxu0 %v12960_v55  ;;  %v22315_v13 = vld [vmem:[#allocation25_spill] sm:$0xff]  ;;  %v12964_v55 = vld [vmem:[%s22241_s1 + $0x7f8] sm:$0xff]  ;;  %v14741_v34 = vpop.f32.mrf.mxu0 }
 0x262   : > { %2700 = vmatprep.subr.mxu1 %v22301_v25 }
 0x263   : > { %2701 = vmatpush2.msra.mxu1 %v22313_v40  ;;  %v17403_v19 = vpop.f32.mrf.mxu0 }
 0x264   : > { %2640 = vmatmul.mubr.f32.gmra.mxu0 %v12959_v32  ;;  %2702 = vmatprep.subr.mxu1 %v22301_v25  ;;  %v1531_v62 = vpop.f32.mrf.mxu1  ;;  %v12970_v32 = vld [vmem:[%s22241_s1 + $0x828] sm:$0xff]  ;;  %22323 = vst [vmem:[#allocation26_spill] sm:$0xff] %v17403_v19 }
 0x265   : > { %2703 = vmatpush2.msra.mxu1 %v22315_v13  ;;  %2644 = vmatprep.mubr.f32.mxu0 %v12965_v17  ;;  %v1532_v6 = vadd.f32 %v1531_v62, %v17001_v24  ;;  %v22318_v17 = vld [vmem:[#allocation27_spill] sm:$0xff]  ;;  %v12969_v24 = vld [vmem:[%s22241_s1 + $0x820] sm:$0xff] }
 0x266   : > { %2704 = vmatprep.subr.mxu1 %v22301_v25  ;;  %v1533_v9 = vpop.f32.mrf.mxu1  ;;  %v22326_v19 = vld [vmem:[#allocation37_spill] sm:$0xff] }
 0x267   : > { %2705 = vmatpush2.msra.mxu1 %v22316_v30  ;;  %v17379_v21 = vadd.f32 %v14741_v34, %v1532_v6  ;;  %v12975_v9 = vld [vmem:[%s22241_s1 + $0x850] sm:$0xff]  ;;  %v22320_v6 = vld [vmem:[#allocation28_spill] sm:$0xff] }
 0x268   : > { %2645 = vmatmul.mubr.f32.gmra.mxu0 %v12964_v55  ;;  %2706 = vmatprep.subr.mxu1 %v22301_v25  ;;  %v22321_v55 = vld [vmem:[#allocation30_spill] sm:$0xff] }
 0x269   : > { %22317 = vst [vmem:[#allocation24_spill] sm:$0xff] %v17379_v21  ;;  %2707 = vmatpush2.msra.mxu1 %v22318_v17  ;;  %2649 = vmatprep.mubr.f32.mxu0 %v12970_v32  ;;  %v17386_v62 = vpop.f32.mrf.mxu1  ;;  %v12974_v32 = vld [vmem:[%s22241_s1 + $0x848] sm:$0xff]  ;;  %v12893_v21 = vld [vmem:[%s22241_s1 + $0x5c0] sm:$0xff] }
 0x26a   : > { %22319 = vst [vmem:[#allocation25_spill] sm:$0xff] %v17386_v62  ;;  %2708 = vmatprep.subr.mxu1 %v22301_v25  ;;  %v22322_v62 = vld [vmem:[#allocation33_spill] sm:$0xff]  ;;  %v14744_v50 = vpop.f32.mrf.mxu0 }
 0x26b   : > { %2709 = vmatpush2.msra.mxu1 %v22320_v6  ;;  %v1538_v34 = vpop.f32.mrf.mxu1 }
 0x26c   : > { %2650 = vmatmul.mubr.f32.gmra.mxu0 %v12969_v24  ;;  %2710 = vmatprep.subr.mxu1 %v22301_v25  ;;  %v22324_v34 = vld [vmem:[#allocation35_spill] sm:$0xff] }
 0x26d   : > { %2711 = vmatpush2.msra.mxu1 %v22321_v55  ;;  %2654 = vmatprep.mubr.f32.mxu0 %v12975_v9 }
 0x26e   : > { %2712 = vmatprep.subr.mxu1 %v22301_v25 }
 0x26f   : > { %2713 = vmatpush2.msra.mxu1 %v22322_v62  ;;  %v1541_v24 = vpop.f32.mrf.mxu1 }
 0x270   : > { %2655 = vmatmul.mubr.f32.gmra.mxu0 %v12974_v32  ;;  %2714 = vmatprep.subr.mxu1 %v22301_v25  ;;  %v1542_v9 = vadd.f32 %v1541_v24, %v17037_v20  ;;  %v12891_v32 = vld [vmem:[%s22241_s1 + $0x5b0] sm:$0xff]  ;;  %v12897_v24 = vld [vmem:[%s22241_s1 + $0x5e0] sm:$0xff] }
 0x271   : > { %2715 = vmatpush2.msra.mxu1 %v22324_v34  ;;  %14819 = vmatprep.mubr.msk.f32.mxu0 %vm1230_vm2, %v12893_v21  ;;  %v1543_v8 = vpop.f32.mrf.mxu1  ;;  %v22328_v21 = vld [vmem:[#allocation39_spill] sm:$0xff] }
 0x272   : > { %2716 = vmatprep.subr.mxu1 %v22301_v25  ;;  %v17413_v11 = vadd.f32 %v14744_v50, %v1542_v9  ;;  %v22329_v50 = vld [vmem:[#allocation41_spill] sm:$0xff] }
 0x273   : > { %2717 = vmatpush2.msra.mxu1 %v22326_v19 }
 0x274   : > { %22325 = vst [vmem:[#allocation27_spill] sm:$0xff] %v17413_v11  ;;  %2718 = vmatprep.subr.mxu1 %v22301_v25  ;;  %14820 = vmatmul.mubr.msk.f32.vlgmr.msra.gmra.mxu0 %vm1230_vm2, %v12898_v10  ;;  %v17418_v20 = vpop.f32.mrf.mxu1  ;;  %v17433_v10 = vpop.f32.mrf.mxu0 }
 0x275   : > { %22327 = vst [vmem:[#allocation28_spill] sm:$0xff] %v17418_v20  ;;  %3271 = vmatpush1.msra.mxu0 %v16144_v42  ;;  %2719 = vmatpush2.msra.mxu1 %v22328_v21  ;;  %v22330_v42 = vld [vmem:[#allocation43_spill] sm:$0xff]  ;;  %v22333_v20 = vld [vmem:[#allocation6_spill] sm:$0xff] }
 0x276   : > { %3272 = vmatprep.subr.mxu0 %v22301_v25  ;;  %2720 = vmatprep.subr.mxu1 %v22301_v25  ;;  %v1548_v8 = vpop.f32.mrf.mxu1  ;;  %v14747_v9 = vpop.f32.mrf.mxu0 }
 0x277   : > { %3273 = vmatpush1.msra.mxu0 %v16152_v46  ;;  %2721 = vmatpush2.msra.mxu1 %v22329_v50 }
 0x278   : > { %3274 = vmatprep.subr.mxu0 %v22301_v25  ;;  %2722 = vmatprep.subr.mxu1 %v22301_v25 }
 0x279   : > { %3275 = vmatpush1.msra.mxu0 %v16149_v44  ;;  %2723 = vmatpush2.msra.mxu1 %v22330_v42  ;;  %v22331_v44 = vld [vmem:[#allocation5_spill] sm:$0xff] }
 0x27a   : > { %3276 = vmatprep.subr.mxu0 %v22301_v25  ;;  %2725 = vmatmul.mubr.f32.vlgmr.msra.gmra.mxu1 %v12891_v32  ;;  %v1551_v46 = vpop.f32.mrf.mxu1  ;;  %v12896_v32 = vld [vmem:[%s22241_s1 + $0x5d8] sm:$0xff] }
 0x27b   : > { %3115 = vmatprep.subr.mxu1 %v22301_v25  ;;  %3277 = vmatpush1.msra.mxu0 %v16169_v57  ;;  %v1552_v8 = vadd.f32 %v1551_v46, %v17076_v27  ;;  %v17453_v27 = vpop.f32.mrf.mxu0 }
 0x27c   : > { %3116 = vmatpush1.msra.mxu1 %v22331_v44  ;;  %3278 = vmatprep.subr.mxu0 %v22301_v25  ;;  %v1553_v11 = vpop.f32.mrf.mxu1 }
 0x27d   : > { %3117 = vmatprep.subr.mxu1 %v22301_v25  ;;  %3279 = vmatpush1.msra.mxu0 %v16182_v1  ;;  %v17449_v57 = vadd.f32 %v14747_v9, %v1552_v8  ;;  %v12902_v1 = vld [vmem:[%s22241_s1 + $0x608] sm:$0xff]  ;;  %v22334_v11 = vld [vmem:[#allocation7_spill] sm:$0xff] }
 0x27e   : > { %2729 = vmatprep.mubr.f32.mxu1 %v12897_v24  ;;  %3118 = vmatpush1.msra.mxu1 %v22333_v20  ;;  %v12901_v20 = vld [vmem:[%s22241_s1 + $0x600] sm:$0xff] }
 0x27f   : > { %22332 = vst [vmem:[#allocation30_spill] sm:$0xff] %v17449_v57  ;;  %3280 = vmatprep.subr.mxu0 %v22301_v25  ;;  %2730 = vmatmul.mubr.f32.gmra.mxu1 %v12896_v32  ;;  %v17455_v46 = vpop.f32.mrf.mxu1 }
 0x280   : > { %3119 = vmatprep.subr.mxu1 %v22301_v25  ;;  %3281 = vmatpush1.msra.mxu0 %v16189_v31  ;;  %v14750_v24 = vpop.f32.mrf.mxu0  ;;  %v12907_v31 = vld [vmem:[%s22241_s1 + $0x630] sm:$0xff] }
 0x281   : > { %3120 = vmatpush1.msra.mxu1 %v22334_v11  ;;  %3282 = vmatprep.subr.mxu0 %v22301_v25  ;;  %v1558_v9 = vpop.f32.mrf.mxu1 }
 0x282   : > { %3121 = vmatprep.subr.mxu1 %v22301_v25  ;;  %3283 = vmatpush1.msra.mxu0 %v16203_v33  ;;  %v17476_v8 = vpop.f32.mrf.mxu0 }
 0x283   : > { %2734 = vmatprep.mubr.f32.mxu1 %v12902_v1  ;;  %3122 = vmatpush1.msra.mxu1 %v15948_v37  ;;  %v12906_v37 = vld [vmem:[%s22241_s1 + $0x628] sm:$0xff] }
 0x284   : > { %3284 = vmatprep.subr.mxu0 %v22301_v25  ;;  %2735 = vmatmul.mubr.f32.gmra.mxu1 %v12901_v20 }
 0x285   : > { %3123 = vmatprep.subr.mxu1 %v22301_v25  ;;  %3285 = vmatpush1.msra.mxu0 %v16211_v35  ;;  %v1561_v44 = vpop.f32.mrf.mxu1 }
 0x286   : > { %3124 = vmatpush1.msra.mxu1 %v15956_v39  ;;  %3286 = vmatprep.subr.mxu0 %v22301_v25  ;;  %v1562_v33 = vadd.f32 %v1561_v44, %v17107_v14  ;;  %v12912_v39 = vld [vmem:[%s22241_s1 + $0x658] sm:$0xff] }
 0x287   : > { %3125 = vmatprep.subr.mxu1 %v22301_v25  ;;  %3287 = vmatpush1.msra.mxu0 %v16225_v59  ;;  %v1563_v35 = vpop.f32.mrf.mxu1  ;;  %v14753_v32 = vpop.f32.mrf.mxu0 }
 0x288   : > { %2739 = vmatprep.mubr.f32.mxu1 %v12907_v31  ;;  %3126 = vmatpush1.msra.mxu1 %v15963_v41  ;;  %v17487_v1 = vadd.f32 %v14750_v24, %v1562_v33  ;;  %v12911_v41 = vld [vmem:[%s22241_s1 + $0x650] sm:$0xff]  ;;  %v12908_v24 = vld [vmem:[%s22241_s1 + $0x638] sm:$0xff] }
 0x289   : > { %3288 = vmatprep.subr.mxu0 %v22301_v25  ;;  %2740 = vmatmul.mubr.f32.gmra.mxu1 %v12906_v37  ;;  %v17502_v14 = vpop.f32.mrf.mxu0  ;;  %v12927_v33 = vld [vmem:[%s22241_s1 + $0x6d0] sm:$0xff] }
 0x28a   : > { %22335 = vst [vmem:[#allocation33_spill] sm:$0xff] %v17487_v1  ;;  %3127 = vmatprep.subr.mxu1 %v22301_v25  ;;  %3289 = vmatpush1.msra.mxu0 %v16233_v63 }
 0x28b   : > { %3128 = vmatpush1.msra.mxu1 %v15970_v43  ;;  %3290 = vmatprep.subr.mxu0 %v22301_v25  ;;  %v17500_v59 = vpop.f32.mrf.mxu1  ;;  %v12917_v43 = vld [vmem:[%s22241_s1 + $0x680] sm:$0xff] }
 0x28c   : > { %3129 = vmatprep.subr.mxu1 %v22301_v25  ;;  %3291 = vmatpush1.msra.mxu0 %v16247_v48 }
 0x28d   : > { %2744 = vmatprep.mubr.f32.mxu1 %v12912_v39  ;;  %3130 = vmatpush1.msra.mxu1 %v15977_v45  ;;  %v1568_v63 = vpop.f32.mrf.mxu1  ;;  %v17507_v11 = vpop.f32.mrf.mxu0  ;;  %v12916_v45 = vld [vmem:[%s22241_s1 + $0x678] sm:$0xff] }
 0x28e   : > { %3292 = vmatprep.subr.mxu0 %v22301_v25  ;;  %2745 = vmatmul.mubr.f32.gmra.mxu1 %v12911_v41  ;;  %v12932_v39 = vld [vmem:[%s22241_s1 + $0x6f8] sm:$0xff] }
 0x28f   : > { %3131 = vmatprep.subr.mxu1 %v22301_v25  ;;  %3293 = vmatpush1.msra.mxu0 %v16255_v52  ;;  %v17515_v20 = vpop.f32.mrf.mxu0  ;;  %v12903_v52 = vld [vmem:[%s22241_s1 + $0x610] sm:$0xff] }
 0x290   : > { %3132 = vmatpush1.msra.mxu1 %v15984_v47  ;;  %3294 = vmatprep.subr.mxu0 %v22301_v25 }
 0x291   : > { %3133 = vmatprep.subr.mxu1 %v22301_v25  ;;  %3295 = vmatpush1.msra.mxu0 %v16267_v29  ;;  %v1571_v48 = vpop.f32.mrf.mxu1  ;;  %v12922_v29 = vld [vmem:[%s22241_s1 + $0x6a8] sm:$0xff] }
 0x292   : > { %2749 = vmatprep.mubr.f32.mxu1 %v12917_v43  ;;  %3134 = vmatpush1.msra.mxu1 %v15991_v49  ;;  %v1572_v47 = vadd.f32 %v1571_v48, %v17141_v3 }
 0x293   : > { %3296 = vmatprep.subr.mxu0 %v22301_v25  ;;  %2750 = vmatmul.mubr.f32.gmra.mxu1 %v12916_v45  ;;  %v1573_v9 = vpop.f32.mrf.mxu1  ;;  %v17533_v31 = vpop.f32.mrf.mxu0 }
 0x294   : > { %3135 = vmatprep.subr.mxu1 %v22301_v25  ;;  %3297 = vmatpush1.msra.mxu0 %v16273_v23  ;;  %v17537_v49 = vadd.f32 %v14753_v32, %v1572_v47  ;;  %v12921_v23 = vld [vmem:[%s22241_s1 + $0x6a0] sm:$0xff]  ;;  %v12928_v47 = vld [vmem:[%s22241_s1 + $0x6d8] sm:$0xff] }
 0x295   : > { %14822 = vmatprep.mubr.msk.f32.mxu0 %vm1230_vm2, %v12903_v52  ;;  %3136 = vmatpush1.msra.mxu1 %v15996_v51  ;;  %v17544_v3 = vpop.f32.mrf.mxu0  ;;  %v12923_v52 = vld [vmem:[%s22241_s1 + $0x6b0] sm:$0xff] }
 0x296   : > { %22336 = vst [vmem:[#allocation35_spill] sm:$0xff] %v17537_v49  ;;  %3298 = vmatprep.subr.mxu0 %v22301_v25  ;;  %14823 = vmatmul.mubr.msk.f32.gmra.mxu0 %vm1230_vm2, %v12908_v24 }
 0x297   : > { %3137 = vmatprep.subr.mxu1 %v22301_v25  ;;  %3299 = vmatpush1.msra.mxu0 %v16285_v36  ;;  %v17553_v44 = vpop.f32.mrf.mxu1 }
 0x298   : > { %2754 = vmatprep.mubr.f32.mxu1 %v12922_v29  ;;  %3138 = vmatpush1.msra.mxu1 %v16001_v53  ;;  %v12926_v53 = vld [vmem:[%s22241_s1 + $0x6c8] sm:$0xff] }
 0x299   : > { %3300 = vmatprep.subr.mxu0 %v22301_v25  ;;  %2755 = vmatmul.mubr.f32.gmra.mxu1 %v12921_v23  ;;  %v1578_v51 = vpop.f32.mrf.mxu1  ;;  %v17557_v37 = vpop.f32.mrf.mxu0 }
 0x29a   : > { %3139 = vmatprep.subr.mxu1 %v22301_v25  ;;  %3301 = vmatpush1.msra.mxu0 %v16291_v38  ;;  %v12913_v38 = vld [vmem:[%s22241_s1 + $0x660] sm:$0xff]  ;;  %v22340_v51 = vld [vmem:[#allocation10_spill] sm:$0xff] }
 0x29b   : > { %3140 = vmatpush1.msra.mxu1 %v16007_v56  ;;  %3302 = vmatprep.subr.mxu0 %v22301_v25  ;;  %v2118_v36 = vpop.f32.mrf.mxu0  ;;  %v12918_v56 = vld [vmem:[%s22241_s1 + $0x688] sm:$0xff] }
 0x29c   : > { %3141 = vmatprep.subr.mxu1 %v22301_v25  ;;  %3303 = vmatpush2.msra.mxu0 %v16302_v26 }
 0x29d   : > { %2759 = vmatprep.mubr.f32.mxu1 %v12927_v33  ;;  %3142 = vmatpush1.msra.mxu1 %v16013_v58  ;;  %v1581_v35 = vpop.f32.mrf.mxu1 }
 0x29e   : > { %3304 = vmatprep.subr.mxu0 %v22301_v25  ;;  %2760 = vmatmul.mubr.f32.gmra.mxu1 %v12926_v53  ;;  %v1582_v32 = vadd.f32 %v1581_v35, %v17185_v22 }
 0x29f   : > { %3143 = vmatprep.subr.mxu1 %v22301_v25  ;;  %3305 = vmatpush2.msra.mxu0 %v16310_v18  ;;  %v1583_v26 = vpop.f32.mrf.mxu1  ;;  %v17582_v58 = vpop.f32.mrf.mxu0  ;;  %v12931_v18 = vld [vmem:[%s22241_s1 + $0x6f0] sm:$0xff] }
 0x2a0   : > { %14825 = vmatprep.mubr.msk.f32.mxu0 %vm1230_vm2, %v12913_v38  ;;  %3144 = vmatpush1.msra.mxu1 %v16019_v60  ;;  %v17590_v41 = vadd.f32 %v17507_v11, %v1582_v32  ;;  %v22338_v60 = vld [vmem:[#allocation8_spill] sm:$0xff] }
 0x2a1   : > { %3306 = vmatprep.subr.mxu0 %v22301_v25  ;;  %14826 = vmatmul.mubr.msk.f32.gmra.mxu0 %vm1230_vm2, %v12918_v56  ;;  %v2123_v22 = vpop.f32.mrf.mxu0  ;;  %v12937_v11 = vld [vmem:[%s22241_s1 + $0x720] sm:$0xff]  ;;  %v12951_v56 = vld [vmem:[%s22241_s1 + $0x790] sm:$0xff] }
 0x2a2   : > { %22337 = vst [vmem:[#allocation37_spill] sm:$0xff] %v17590_v41  ;;  %3145 = vmatprep.subr.mxu1 %v22301_v25  ;;  %3307 = vmatpush2.msra.mxu0 %v16307_v7  ;;  %v12936_v7 = vld [vmem:[%s22241_s1 + $0x718] sm:$0xff] }
 0x2a3   : > { %2764 = vmatprep.mubr.f32.mxu1 %v12932_v39  ;;  %3146 = vmatpush1.msra.mxu1 %v22338_v60  ;;  %v17600_v63 = vpop.f32.mrf.mxu1  ;;  %v12948_v60 = vld [vmem:[%s22241_s1 + $0x778] sm:$0xff] }
 0x2a4   : > { %3308 = vmatprep.subr.mxu0 %v22301_v25  ;;  %2765 = vmatmul.mubr.f32.gmra.mxu1 %v12931_v18  ;;  %v12956_v18 = vld [vmem:[%s22241_s1 + $0x7b8] sm:$0xff] }
 0x2a5   : > { %3147 = vmatprep.subr.mxu1 %v22301_v25  ;;  %3309 = vmatpush2.msra.mxu0 %v22312_v4  ;;  %v1588_v43 = vpop.f32.mrf.mxu1  ;;  %v17608_v45 = vpop.f32.mrf.mxu0 }
 0x2a6   : > { %3148 = vmatpush2.msra.mxu1 %v16030_v0  ;;  %3310 = vmatprep.subr.mxu0 %v22301_v25  ;;  %v12962_v43 = vld [vmem:[%s22241_s1 + $0x7e8] sm:$0xff] }
 0x2a7   : > { %3149 = vmatprep.subr.mxu1 %v22301_v25  ;;  %3311 = vmatpush2.msra.mxu0 %v22313_v40  ;;  %v1591_v4 = vpop.f32.mrf.mxu1  ;;  %v2128_v48 = vpop.f32.mrf.mxu0 }
 0x2a8   : > { %2769 = vmatprep.mubr.f32.mxu1 %v12937_v11  ;;  %3150 = vmatpush2.msra.mxu1 %v16035_v2  ;;  %v1592_v0 = vadd.f32 %v1591_v4, %v17230_v61  ;;  %v12942_v61 = vld [vmem:[%s22241_s1 + $0x748] sm:$0xff] }
 0x2a9   : > { %3312 = vmatprep.subr.mxu0 %v22301_v25  ;;  %2770 = vmatmul.mubr.f32.gmra.mxu1 %v12936_v7  ;;  %v1593_v24 = vpop.f32.mrf.mxu1  ;;  %v17626_v40 = vpop.f32.mrf.mxu0  ;;  %v12961_v7 = vld [vmem:[%s22241_s1 + $0x7e0] sm:$0xff]  ;;  %v22343_v48 = vld [vmem:[#allocation18_spill] sm:$0xff] }
 0x2aa   : > { %3151 = vmatprep.subr.mxu1 %v22301_v25  ;;  %3313 = vmatpush2.msra.mxu0 %v22315_v13  ;;  %v17631_v2 = vadd.f32 %v17533_v31, %v1592_v0  ;;  %v12941_v13 = vld [vmem:[%s22241_s1 + $0x740] sm:$0xff] }
 0x2ab   : > { %14828 = vmatprep.mubr.msk.f32.mxu0 %vm1230_vm2, %v12923_v52  ;;  %3152 = vmatpush2.msra.mxu1 %v22281_v54  ;;  %v1961_v9 = vpop.f32.mrf.mxu1  ;;  %v2133_v29 = vpop.f32.mrf.mxu0  ;;  %v12967_v52 = vld [vmem:[%s22241_s1 + $0x810] sm:$0xff]  ;;  %v12953_v24 = vld [vmem:[%s22241_s1 + $0x7a0] sm:$0xff] }
 0x2ac   : > { %22339 = vst [vmem:[#allocation39_spill] sm:$0xff] %v17631_v2  ;;  %3314 = vmatprep.subr.mxu0 %v22301_v25  ;;  %14829 = vmatmul.mubr.msk.f32.gmra.mxu0 %vm1230_vm2, %v12928_v47  ;;  %v17644_v31 = vadd.f32 %v17557_v37, %v1961_v9  ;;  %v12947_v37 = vld [vmem:[%s22241_s1 + $0x770] sm:$0xff]  ;;  %v12966_v29 = vld [vmem:[%s22241_s1 + $0x808] sm:$0xff] }
 0x2ad   : > { %3153 = vmatprep.subr.mxu1 %v22301_v25  ;;  %3315 = vmatpush2.msra.mxu0 %v22316_v30  ;;  %v1963_v54 = vpop.f32.mrf.mxu1  ;;  %v17648_v23 = vpop.f32.mrf.mxu0  ;;  %v12946_v30 = vld [vmem:[%s22241_s1 + $0x768] sm:$0xff]  ;;  %v22344_v9 = vld [vmem:[#allocation19_spill] sm:$0xff] }
 0x2ae   : > { %2774 = vmatprep.mubr.f32.mxu1 %v12942_v61  ;;  %3154 = vmatpush2.msra.mxu1 %v22340_v51  ;;  %v22345_v51 = vld [vmem:[#allocation20_spill] sm:$0xff] }
 0x2af   : > { %3316 = vmatprep.subr.mxu0 %v22301_v25  ;;  %2775 = vmatmul.mubr.f32.gmra.mxu1 %v12941_v13  ;;  %v2138_v33 = vpop.f32.mrf.mxu0 }
 0x2b0   : > { %3155 = vmatprep.subr.mxu1 %v22301_v25  ;;  %3317 = vmatpush2.msra.mxu0 %v22318_v17  ;;  %v12963_v33 = vld [vmem:[%s22241_s1 + $0x7f0] sm:$0xff] }
 0x2b1   : > { %3156 = vmatpush2.msra.mxu1 %v22284_v16  ;;  %3318 = vmatprep.subr.mxu0 %v22301_v25  ;;  %v1966_v53 = vpop.f32.mrf.mxu1  ;;  %v12933_v16 = vld [vmem:[%s22241_s1 + $0x700] sm:$0xff] }
 0x2b2   : > { %3157 = vmatprep.subr.mxu1 %v22301_v25  ;;  %3319 = vmatpush2.msra.mxu0 %v22320_v6  ;;  %v17665_v36 = vadd.f32 %v17582_v58, %v1966_v53  ;;  %v12938_v6 = vld [vmem:[%s22241_s1 + $0x728] sm:$0xff] }
 0x2b3   : > { %2779 = vmatprep.mubr.f32.mxu1 %v12947_v37  ;;  %3158 = vmatpush2.msra.mxu1 %v22285_v28  ;;  %v1968_v17 = vpop.f32.mrf.mxu1  ;;  %v17671_v38 = vpop.f32.mrf.mxu0  ;;  %v12952_v28 = vld [vmem:[%s22241_s1 + $0x798] sm:$0xff] }
 0x2b4   : > { %3320 = vmatprep.subr.mxu0 %v22301_v25  ;;  %2780 = vmatmul.mubr.f32.gmra.mxu1 %v12946_v30  ;;  %v12968_v37 = vld [vmem:[%s22241_s1 + $0x818] sm:$0xff]  ;;  %v12971_v17 = vld [vmem:[%s22241_s1 + $0x830] sm:$0xff] }
 0x2b5   : > { %3159 = vmatprep.subr.mxu1 %v22301_v25  ;;  %3321 = vmatpush2.msra.mxu0 %v22321_v55  ;;  %v2143_v35 = vpop.f32.mrf.mxu0 }
 0x2b6   : > { %14831 = vmatprep.mubr.msk.f32.mxu0 %vm1230_vm2, %v12933_v16  ;;  %3160 = vmatpush2.msra.mxu1 %v22286_v12  ;;  %v22341_v12 = vld [vmem:[#allocation14_spill] sm:$0xff]  ;;  %v22346_v16 = vld [vmem:[#allocation21_spill] sm:$0xff] }
 0x2b7   : > { %3322 = vmatprep.subr.mxu0 %v22301_v25  ;;  %14832 = vmatmul.mubr.msk.f32.gmra.mxu0 %vm1230_vm2, %v12938_v6  ;;  %v1971_v32 = vpop.f32.mrf.mxu1  ;;  %v12977_v6 = vld [vmem:[%s22241_s1 + $0x860] sm:$0xff] }
 0x2b8   : > { %3161 = vmatprep.subr.mxu1 %v22301_v25  ;;  %3323 = vmatpush2.msra.mxu0 %v22322_v62  ;;  %v17692_v55 = vadd.f32 %v17608_v45, %v1971_v32  ;;  %v12957_v62 = vld [vmem:[%s22241_s1 + $0x7c0] sm:$0xff]  ;;  %v22347_v32 = vld [vmem:[#allocation22_spill] sm:$0xff] }
 0x2b9   : > { %2784 = vmatprep.mubr.f32.mxu1 %v12952_v28  ;;  %3162 = vmatpush2.msra.mxu1 %v22341_v12  ;;  %v1973_v26 = vpop.f32.mrf.mxu1  ;;  %v17695_v58 = vpop.f32.mrf.mxu0  ;;  %v12973_v35 = vld [vmem:[%s22241_s1 + $0x840] sm:$0xff] }
 0x2ba   : > { %3324 = vmatprep.subr.mxu0 %v22301_v25  ;;  %2785 = vmatmul.mubr.f32.gmra.mxu1 %v12951_v56  ;;  %v22348_v12 = vld [vmem:[#allocation29_spill] sm:$0xff] }
 0x2bb   : > { %3163 = vmatprep.subr.mxu1 %v22301_v25  ;;  %3325 = vmatpush2.msra.mxu0 %v22324_v34  ;;  %v2148_v39 = vpop.f32.mrf.mxu0  ;;  %v12943_v34 = vld [vmem:[%s22241_s1 + $0x750] sm:$0xff]  ;;  %v12978_v26 = vld [vmem:[%s22241_s1 + $0x868] sm:$0xff] }
 0x2bc   : > { %3164 = vmatpush2.msra.mxu1 %v22288_v5  ;;  %3326 = vmatprep.subr.mxu0 %v22301_v25  ;;  %v12976_v39 = vld [vmem:[%s22241_s1 + $0x858] sm:$0xff] }
 0x2bd   : > { %3165 = vmatprep.subr.mxu1 %v22301_v25  ;;  %3327 = vmatpush2.msra.mxu0 %v22326_v19  ;;  %v1976_v22 = vpop.f32.mrf.mxu1 }
 0x2be   : > { %2789 = vmatprep.mubr.f32.mxu1 %v12957_v62  ;;  %3166 = vmatpush2.msra.mxu1 %v22289_v15  ;;  %v17715_v5 = vadd.f32 %v17626_v40, %v1976_v22  ;;  %v22342_v15 = vld [vmem:[#allocation17_spill] sm:$0xff] }
 0x2bf   : > { %3328 = vmatprep.subr.mxu0 %v22301_v25  ;;  %2790 = vmatmul.mubr.f32.gmra.mxu1 %v12956_v18  ;;  %v1978_v11 = vpop.f32.mrf.mxu1  ;;  %v17721_v19 = vpop.f32.mrf.mxu0  ;;  %v13000_v22 = vld [vmem:[%s22241_s1 + $0x888] sm:$0xff] }
 0x2c0   : > { %3167 = vmatprep.subr.mxu1 %v22301_v25  ;;  %3329 = vmatpush2.msra.mxu0 %v22328_v21 }
 0x2c1   : > { %14834 = vmatprep.mubr.msk.f32.mxu0 %vm1230_vm2, %v12943_v34  ;;  %3168 = vmatpush2.msra.mxu1 %v22342_v15  ;;  %v2153_v45 = vpop.f32.mrf.mxu0  ;;  %v12998_v34 = vld [vmem:[%s22241_s1 + $0x878] sm:$0xff] }
 0x2c2   : > { %3330 = vmatprep.subr.mxu0 %v22301_v25  ;;  %14835 = vmatmul.mubr.msk.f32.gmra.mxu0 %vm1230_vm2, %v12948_v60  ;;  %v1981_v4 = vpop.f32.mrf.mxu1  ;;  %v12997_v45 = vld [vmem:[%s22241_s1 + $0x870] sm:$0xff] }
 0x2c3   : > { %3169 = vmatprep.subr.mxu1 %v22301_v25  ;;  %3331 = vmatpush2.msra.mxu0 %v22329_v50  ;;  %v17738_v21 = vadd.f32 %v17648_v23, %v1981_v4  ;;  %v12958_v50 = vld [vmem:[%s22241_s1 + $0x7c8] sm:$0xff]  ;;  %v13005_v4 = vld [vmem:[%s22241_s1 + $0x8b0] sm:$0xff] }
 0x2c4   : > { %2794 = vmatprep.mubr.f32.mxu1 %v12962_v43  ;;  %3170 = vmatpush2.msra.mxu1 %v22343_v48  ;;  %v1983_v0 = vpop.f32.mrf.mxu1  ;;  %v2156_v47 = vpop.f32.mrf.mxu0  ;;  %v13003_v48 = vld [vmem:[%s22241_s1 + $0x8a0] sm:$0xff] }
 0x2c5   : > { %3332 = vmatprep.subr.mxu0 %v22301_v25  ;;  %2795 = vmatmul.mubr.f32.gmra.mxu1 %v12961_v7 }
 0x2c6   : > { %3171 = vmatprep.subr.mxu1 %v22301_v25  ;;  %3333 = vmatpush2.msra.mxu0 %v22330_v42  ;;  %v1986_v40 = vpop.f32.mrf.mxu1  ;;  %v2158_v61 = vpop.f32.mrf.mxu0  ;;  %v12972_v42 = vld [vmem:[%s22241_s1 + $0x838] sm:$0xff] }
 0x2c7   : > { %3172 = vmatpush2.msra.mxu1 %v22344_v9  ;;  %2799 = vmatprep.mubr.f32.mxu1 %v12967_v52  ;;  %v17758_v13 = vadd.f32 %v17671_v38, %v1986_v40  ;;  %v13002_v40 = vld [vmem:[%s22241_s1 + $0x898] sm:$0xff] }
 0x2c8   : > { %3173 = vmatprep.subr.mxu1 %v22301_v25  ;;  %14837 = vmatprep.mubr.msk.f32.mxu0 %vm1230_vm2, %v12953_v24  ;;  %v1988_v54 = vpop.f32.mrf.mxu1  ;;  %v2161_v23 = vpop.f32.mrf.mxu0  ;;  %v22349_v9 = vld [vmem:[#allocation31_spill] sm:$0xff] }
 0x2c9   : > { %3174 = vmatpush2.msra.mxu1 %v22345_v51  ;;  %14838 = vmatmul.mubr.msk.f32.gmra.mxu0 %vm1230_vm2, %v12958_v50  ;;  %v13004_v50 = vld [vmem:[%s22241_s1 + $0x8a8] sm:$0xff]  ;;  %v13010_v51 = vld [vmem:[%s22241_s1 + $0x8d8] sm:$0xff] }
 0x2ca   : > { %2800 = vmatmul.mubr.f32.gmra.mxu1 %v12966_v29  ;;  %3175 = vmatprep.subr.mxu1 %v22301_v25  ;;  %v1991_v30 = vpop.f32.mrf.mxu1  ;;  %v2163_v53 = vpop.f32.mrf.mxu0  ;;  %v13008_v29 = vld [vmem:[%s22241_s1 + $0x8c8] sm:$0xff] }
 0x2cb   : > { %3176 = vmatpush2.msra.mxu1 %v22346_v16  ;;  %2804 = vmatprep.mubr.f32.mxu1 %v12972_v42  ;;  %v17779_v38 = vadd.f32 %v17695_v58, %v1991_v30  ;;  %v13007_v53 = vld [vmem:[%s22241_s1 + $0x8c0] sm:$0xff] }
 0x2cc   : > { %3177 = vmatprep.subr.mxu1 %v22301_v25  ;;  %14840 = vmatprep.mubr.msk.f32.mxu0 %vm1230_vm2, %v12963_v33  ;;  %v1993_v28 = vpop.f32.mrf.mxu1  ;;  %v2166_v56 = vpop.f32.mrf.mxu0  ;;  %v22350_v33 = vld [vmem:[#allocation32_spill] sm:$0xff] }
 0x2cd   : > { %3178 = vmatpush2.msra.mxu1 %v22347_v32  ;;  %14841 = vmatmul.mubr.msk.f32.gmra.mxu0 %vm1230_vm2, %v12968_v37  ;;  %v13009_v37 = vld [vmem:[%s22241_s1 + $0x8d0] sm:$0xff]  ;;  %v13015_v32 = vld [vmem:[%s22241_s1 + $0x900] sm:$0xff] }
 0x2ce   : > { %2805 = vmatmul.mubr.f32.gmra.mxu1 %v12971_v17  ;;  %14846 = vmatprep.subr.mxu1 %v22348_v12  ;;  %v1996_v58 = vpop.f32.mrf.mxu1  ;;  %v2168_v62 = vpop.f32.mrf.mxu0  ;;  %v22351_v17 = vld [vmem:[#allocation34_spill] sm:$0xff] }
 0x2cf   : > { %2809 = vmatprep.mubr.f32.mxu1 %v12977_v6  ;;  %14843 = vmatprep.mubr.msk.f32.mxu0 %vm1230_vm2, %v12973_v35  ;;  %v17800_v18 = vadd.f32 %v17721_v19, %v1996_v58  ;;  %v12999_v19 = vld [vmem:[%s22241_s1 + $0x880] sm:$0xff]  ;;  %v13013_v6 = vld [vmem:[%s22241_s1 + $0x8f0] sm:$0xff]  ;;  %v13012_v62 = vld [vmem:[%s22241_s1 + $0x8e8] sm:$0xff] }
 0x2d0   : > { %v1998_v60 = vpop.f32.mrf.mxu1  ;;  %v2171_v11 = vpop.f32.mrf.mxu0  ;;  %3701 = vmatprep.subr.mxu0 %v22301_v25 }
 0x2d1   : > { %14844 = vmatmul.mubr.msk.f32.gmra.mxu0 %vm1230_vm2, %v12978_v26  ;;  %v13014_v26 = vld [vmem:[%s22241_s1 + $0x8f8] sm:$0xff] }
 0x2d2   : > { %2810 = vmatmul.mubr.f32.gmra.mxu1 %v12976_v39  ;;  %v2001_v15 = vpop.f32.mrf.mxu1  ;;  %3334 = vmatprep.mubr.f32.mxu0 %v13000_v22  ;;  %v2173_v43 = vpop.f32.mrf.mxu0  ;;  %v22353_v22 = vld [vmem:[#allocation38_spill] sm:$0xff] }
 0x2d3   : > { %3179 = vmatprep.mubr.f32.mxu1 %v12998_v34  ;;  %v17816_v7 = vadd.f32 %v2156_v47, %v2001_v15  ;;  %v13018_v34 = vld [vmem:[%s22241_s1 + $0x918] sm:$0xff] }
 0x2d4   : > { %v2003_v52 = vpop.f32.mrf.mxu1  ;;  %v2176_v0 = vpop.f32.mrf.mxu0  ;;  %v22354_v43 = vld [vmem:[#allocation40_spill] sm:$0xff] }
 0x2d5   : > { %3335 = vmatmul.mubr.f32.vlgmr.msra.gmra.mxu0 %v12999_v19  ;;  %v13020_v19 = vld [vmem:[%s22241_s1 + $0x928] sm:$0xff] }
 0x2d6   : > { %3180 = vmatmul.mubr.f32.vlgmr.msra.gmra.mxu1 %v12997_v45  ;;  %v2006_v24 = vpop.f32.mrf.mxu1  ;;  %3339 = vmatprep.mubr.f32.mxu0 %v13005_v4  ;;  %v2178_v47 = vpop.f32.mrf.mxu0  ;;  %v13019_v45 = vld [vmem:[%s22241_s1 + $0x920] sm:$0xff] }
 0x2d7   : > { %14847 = vmatpush3.msra.mxu1 %v22348_v12  ;;  %3184 = vmatprep.mubr.f32.mxu1 %v13003_v48  ;;  %v17831_v61 = vadd.f32 %v2161_v23, %v2006_v24  ;;  %v22352_v12 = vld [vmem:[#allocation36_spill] sm:$0xff]  ;;  %v13017_v48 = vld [vmem:[%s22241_s1 + $0x910] sm:$0xff] }
 0x2d8   : > { %14848 = vmatprep.subr.mxu1 %v22349_v9  ;;  %v2008_v42 = vpop.f32.mrf.mxu1  ;;  %v2181_v54 = vpop.f32.mrf.mxu0  ;;  %v13025_v24 = vld [vmem:[%s22241_s1 + $0x950] sm:$0xff]  ;;  %v13023_v47 = vld [vmem:[%s22241_s1 + $0x940] sm:$0xff] }
 0x2d9   : > { %14849 = vmatpush3.msra.mxu1 %v22349_v9  ;;  %3340 = vmatmul.mubr.f32.gmra.mxu0 %v13004_v50  ;;  %v22355_v50 = vld [vmem:[#allocation42_spill] sm:$0xff] }
 0x2da   : > { %14850 = vmatprep.subr.mxu1 %v22350_v33  ;;  %3185 = vmatmul.mubr.f32.gmra.mxu1 %v13002_v40  ;;  %v2011_v23 = vpop.f32.mrf.mxu1  ;;  %v2183_v30 = vpop.f32.mrf.mxu0 }
 0x2db   : > { %14851 = vmatpush3.msra.mxu1 %v22350_v33  ;;  %3189 = vmatprep.mubr.f32.mxu1 %v13008_v29  ;;  %v17849_v16 = vadd.f32 %v2166_v56, %v2011_v23  ;;  %v13030_v23 = vld [vmem:[%s22241_s1 + $0x978] sm:$0xff] }
 0x2dc   : > { %14852 = vmatprep.subr.mxu1 %v22351_v17  ;;  %v2013_v35 = vpop.f32.mrf.mxu1  ;;  %3344 = vmatprep.mubr.f32.mxu0 %v13010_v51  ;;  %v2186_v28 = vpop.f32.mrf.mxu0  ;;  %v13022_v51 = vld [vmem:[%s22241_s1 + $0x938] sm:$0xff] }
 0x2dd   : > { %14853 = vmatpush3.msra.mxu1 %v22351_v17  ;;  %3345 = vmatmul.mubr.f32.gmra.mxu0 %v13009_v37  ;;  %v13028_v37 = vld [vmem:[%s22241_s1 + $0x968] sm:$0xff]  ;;  %v13027_v35 = vld [vmem:[%s22241_s1 + $0x960] sm:$0xff] }
 0x2de   : > { %14854 = vmatprep.subr.mxu1 %v22352_v12  ;;  %3190 = vmatmul.mubr.f32.gmra.mxu1 %v13007_v53  ;;  %v2016_v56 = vpop.f32.mrf.mxu1  ;;  %v2188_v58 = vpop.f32.mrf.mxu0 }
 0x2df   : > { %14855 = vmatpush3.msra.mxu1 %v22352_v12  ;;  %3194 = vmatprep.mubr.f32.mxu1 %v13013_v6  ;;  %v17867_v39 = vadd.f32 %v2171_v11, %v2016_v56  ;;  %v13029_v6 = vld [vmem:[%s22241_s1 + $0x970] sm:$0xff]  ;;  %v13035_v12 = vld [vmem:[%s22241_s1 + $0x9a0] sm:$0xff] }
 0x2e0   : > { %14856 = vmatprep.subr.mxu1 %v22353_v22  ;;  %v2018_v60 = vpop.f32.mrf.mxu1  ;;  %3349 = vmatprep.mubr.f32.mxu0 %v13015_v32  ;;  %v2191_v15 = vpop.f32.mrf.mxu0  ;;  %v13033_v56 = vld [vmem:[%s22241_s1 + $0x990] sm:$0xff] }
 0x2e1   : > { %14857 = vmatpush3.msra.mxu1 %v22353_v22  ;;  %3350 = vmatmul.mubr.f32.gmra.mxu0 %v13014_v26 }
 0x2e2   : > { %14858 = vmatprep.subr.mxu1 %v22354_v43  ;;  %3195 = vmatmul.mubr.f32.gmra.mxu1 %v13012_v62  ;;  %v2021_v11 = vpop.f32.mrf.mxu1  ;;  %v2193_v4 = vpop.f32.mrf.mxu0 }
 0x2e3   : > { %14859 = vmatpush3.msra.mxu1 %v22354_v43  ;;  %3199 = vmatprep.mubr.f32.mxu1 %v13018_v34  ;;  %v17885_v52 = vadd.f32 %v2176_v0, %v2021_v11  ;;  %v13024_v0 = vld [vmem:[%s22241_s1 + $0x948] sm:$0xff]  ;;  %v13038_v43 = vld [vmem:[%s22241_s1 + $0x9b8] sm:$0xff] }
 0x2e4   : > { %14860 = vmatprep.subr.mxu1 %v22355_v50  ;;  %v2023_v40 = vpop.f32.mrf.mxu1  ;;  %3354 = vmatprep.mubr.f32.mxu0 %v13020_v19  ;;  %v2196_v9 = vpop.f32.mrf.mxu0  ;;  %v13032_v34 = vld [vmem:[%s22241_s1 + $0x988] sm:$0xff] }
 0x2e5   : > { %14861 = vmatpush3.msra.mxu1 %v22355_v50  ;;  %3355 = vmatmul.mubr.f32.gmra.mxu0 %v13019_v45  ;;  %v13040_v19 = vld [vmem:[%s22241_s1 + $0x9c8] sm:$0xff]  ;;  %v13043_v40 = vld [vmem:[%s22241_s1 + $0x9e0] sm:$0xff] }
 0x2e6   : > { %3200 = vmatmul.mubr.f32.gmra.mxu1 %v13017_v48  ;;  %v2026_v29 = vpop.f32.mrf.mxu1  ;;  %3359 = vmatprep.mubr.f32.mxu0 %v13025_v24  ;;  %v2198_v42 = vpop.f32.mrf.mxu0  ;;  %v13037_v24 = vld [vmem:[%s22241_s1 + $0x9b0] sm:$0xff] }
 0x2e7   : > { %3204 = vmatprep.mubr.f32.mxu1 %v13023_v47  ;;  %v17901_v33 = vadd.f32 %v2181_v54, %v2026_v29  ;;  %v13045_v47 = vld [vmem:[%s22241_s1 + $0x9f0] sm:$0xff] }
 0x2e8   : > { %v2028_v30 = vpop.f32.mrf.mxu1  ;;  %v2201_v53 = vpop.f32.mrf.mxu0 }
 0x2e9   : > { %3360 = vmatmul.mubr.f32.gmra.mxu0 %v13024_v0  ;;  %v13050_v30 = vld [vmem:[%s22241_s1 + $0xa18] sm:$0xff] }
 0x2ea   : > { %3205 = vmatmul.mubr.f32.gmra.mxu1 %v13022_v51  ;;  %v2031_v17 = vpop.f32.mrf.mxu1  ;;  %3364 = vmatprep.mubr.f32.mxu0 %v13030_v23  ;;  %v2203_v54 = vpop.f32.mrf.mxu0  ;;  %v13042_v23 = vld [vmem:[%s22241_s1 + $0x9d8] sm:$0xff] }
 0x2eb   : > { %3209 = vmatprep.mubr.f32.mxu1 %v13028_v37  ;;  %v17915_v32 = vadd.f32 %v2186_v28, %v2031_v17  ;;  %v13034_v28 = vld [vmem:[%s22241_s1 + $0x998] sm:$0xff]  ;;  %v13048_v17 = vld [vmem:[%s22241_s1 + $0xa08] sm:$0xff] }
 0x2ec   : > { %v2033_v26 = vpop.f32.mrf.mxu1  ;;  %v17923_v58 = vpop.f32.mrf.mxu0 }
 0x2ed   : > { %3365 = vmatmul.mubr.f32.gmra.mxu0 %v13029_v6 }
 0x2ee   : > { %3210 = vmatmul.mubr.f32.gmra.mxu1 %v13027_v35  ;;  %v2036_v62 = vpop.f32.mrf.mxu1  ;;  %3369 = vmatprep.mubr.f32.mxu0 %v13035_v12  ;;  %v2573_v22 = vpop.f32.mrf.mxu0  ;;  %v22356_v35 = vld [vmem:[#allocation9_spill] sm:$0xff]  ;;  %v22357_v12 = vld [vmem:[#allocation47_spill] sm:$0xff] }
 0x2ef   : > { %3214 = vmatprep.mubr.f32.mxu1 %v13033_v56  ;;  %v17931_v60 = vadd.f32 %v2191_v15, %v2036_v62  ;;  %v13039_v15 = vld [vmem:[%s22241_s1 + $0x9c0] sm:$0xff]  ;;  %v1507_v56 = vadd.f32 %v22357_v12, %v22356_v35 }
 0x2f0   : > { %v2038_v11 = vpop.f32.mrf.mxu1  ;;  %v17939_v45 = vpop.f32.mrf.mxu0 }
 0x2f1   : > { %3370 = vmatmul.mubr.f32.gmra.mxu0 %v13034_v28  ;;  %v13047_v28 = vld [vmem:[%s22241_s1 + $0xa00] sm:$0xff] }
 0x2f2   : > { %3215 = vmatmul.mubr.f32.gmra.mxu1 %v13032_v34  ;;  %v2041_v4 = vpop.f32.mrf.mxu1  ;;  %3374 = vmatprep.mubr.f32.mxu0 %v13040_v19  ;;  %v2578_v48 = vpop.f32.mrf.mxu0  ;;  %v13055_v34 = vld [vmem:[%s22241_s1 + $0xa40] sm:$0xff]  ;;  %v13053_v19 = vld [vmem:[%s22241_s1 + $0xa30] sm:$0xff] }
 0x2f3   : > { %3219 = vmatprep.mubr.f32.mxu1 %v13038_v43  ;;  %v17947_v50 = vadd.f32 %v2196_v9, %v2041_v4  ;;  %v13044_v9 = vld [vmem:[%s22241_s1 + $0x9e8] sm:$0xff]  ;;  %v22359_v48 = vld [vmem:[#allocation11_spill] sm:$0xff] }
 0x2f4   : > { %v2043_v29 = vpop.f32.mrf.mxu1  ;;  %v17955_v0 = vpop.f32.mrf.mxu0  ;;  %v22358_v4 = vld [vmem:[#allocation50_spill] sm:$0xff] }
 0x2f5   : > { %3375 = vmatmul.mubr.f32.gmra.mxu0 %v13039_v15  ;;  %v17993_v15 = vadd.f32 %v22358_v4, %v1507_v56  ;;  %v22362_v56 = vld [vmem:[#allocation23_spill] sm:$0xff]  ;;  %v13059_v4 = vld [vmem:[%s22241_s1 + $0xa60] sm:$0xff] }
 0x2f6   : > { %3220 = vmatmul.mubr.f32.gmra.mxu1 %v13037_v24  ;;  %v2046_v42 = vpop.f32.mrf.mxu1  ;;  %3379 = vmatprep.mubr.f32.mxu0 %v13045_v47  ;;  %v2583_v51 = vpop.f32.mrf.mxu0  ;;  %v22360_v24 = vld [vmem:[#allocation49_spill] sm:$0xff] }
 0x2f7   : > { %3224 = vmatprep.mubr.f32.mxu1 %v13043_v40  ;;  %v17963_v37 = vadd.f32 %v2201_v53, %v2046_v42  ;;  %v13049_v53 = vld [vmem:[%s22241_s1 + $0xa10] sm:$0xff]  ;;  %v1517_v47 = vadd.f32 %v22360_v24, %v22359_v48 }
 0x2f8   : > { %v2048_v6 = vpop.f32.mrf.mxu1  ;;  %v17971_v54 = vpop.f32.mrf.mxu0  ;;  %v13057_v24 = vld [vmem:[%s22241_s1 + $0xa50] sm:$0xff] }
 0x2f9   : > { %3380 = vmatmul.mubr.f32.gmra.mxu0 %v13044_v9  ;;  %v13054_v9 = vld [vmem:[%s22241_s1 + $0xa38] sm:$0xff] }
 0x2fa   : > { %3225 = vmatmul.mubr.f32.gmra.mxu1 %v13042_v23  ;;  %v14778_v26 = vpop.f32.mrf.mxu1  ;;  %3384 = vmatprep.mubr.f32.mxu0 %v13050_v30  ;;  %v2588_v62 = vpop.f32.mrf.mxu0  ;;  %v13052_v23 = vld [vmem:[%s22241_s1 + $0xa28] sm:$0xff]  ;;  %v13058_v6 = vld [vmem:[%s22241_s1 + $0xa58] sm:$0xff]  ;;  %v13069_v30 = vld [vmem:[%s22241_s1 + $0xab0] sm:$0xff] }
 0x2fb   : > { %3229 = vmatprep.mubr.f32.mxu1 %v13048_v17  ;;  %v17982_v22 = vadd.f32 %v14778_v26, %v17665_v36  ;;  %v22361_v36 = vld [vmem:[#allocation48_spill] sm:$0xff]  ;;  %v13060_v17 = vld [vmem:[%s22241_s1 + $0xa68] sm:$0xff]  ;;  %v18022_v26 = vadd.f32 %v22362_v56, %v1517_v47 }
 0x2fc   : > { %v2271_v43 = vpop.f32.mrf.mxu1  ;;  %v17990_v11 = vpop.f32.mrf.mxu0  ;;  %v22364_v62 = vld [vmem:[#allocation52_spill] sm:$0xff]  ;;  %v22368_v56 = vld [vmem:[#allocation25_spill] sm:$0xff] }
 0x2fd   : > { %v18000_v29 = vadd.f32 %v2271_v43, %v17644_v31  ;;  %3385 = vmatmul.mubr.f32.gmra.mxu0 %v13049_v53  ;;  %v22363_v53 = vld [vmem:[#allocation12_spill] sm:$0xff]  ;;  %v13064_v47 = vld [vmem:[%s22241_s1 + $0xa88] sm:$0xff] }
 0x2fe   : > { %3230 = vmatmul.mubr.f32.gmra.mxu1 %v13047_v28  ;;  %v14781_v42 = vpop.f32.mrf.mxu1  ;;  %3389 = vmatprep.mubr.f32.mxu0 %v13055_v34  ;;  %v2593_v51 = vpop.f32.mrf.mxu0  ;;  %v1527_v28 = vadd.f32 %v22364_v62, %v22363_v53 }
 0x2ff   : > { %3234 = vmatprep.mubr.f32.mxu1 %v13053_v19  ;;  %v18011_v31 = vadd.f32 %v14781_v42, %v17715_v5  ;;  %v22365_v5 = vld [vmem:[#allocation51_spill] sm:$0xff] }
 0x300   : > { %v2281_v35 = vpop.f32.mrf.mxu1  ;;  %v18019_v12 = vpop.f32.mrf.mxu0  ;;  %v13065_v42 = vld [vmem:[%s22241_s1 + $0xa90] sm:$0xff] }
 0x301   : > { %v18029_v19 = vadd.f32 %v2281_v35, %v17692_v55  ;;  %3390 = vmatmul.mubr.f32.gmra.mxu0 %v13054_v9  ;;  %v13063_v9 = vld [vmem:[%s22241_s1 + $0xa80] sm:$0xff] }
 0x302   : > { %3235 = vmatmul.mubr.f32.gmra.mxu1 %v13052_v23  ;;  %v14784_v43 = vpop.f32.mrf.mxu1  ;;  %3394 = vmatprep.mubr.f32.mxu0 %v13060_v17  ;;  %v2598_v48 = vpop.f32.mrf.mxu0  ;;  %v22366_v17 = vld [vmem:[#allocation26_spill] sm:$0xff]  ;;  %v22367_v35 = vld [vmem:[#allocation13_spill] sm:$0xff] }
 0x303   : > { %3239 = vmatprep.mubr.f32.mxu1 %v13058_v6  ;;  %v18040_v55 = vadd.f32 %v14784_v43, %v17758_v13  ;;  %v18051_v6 = vadd.f32 %v22366_v17, %v1527_v28  ;;  %v1537_v53 = vadd.f32 %v22368_v56, %v22367_v35  ;;  %v22369_v13 = vld [vmem:[#allocation24_spill] sm:$0xff] }
 0x304   : > { %v2291_v51 = vpop.f32.mrf.mxu1  ;;  %v18048_v23 = vpop.f32.mrf.mxu0  ;;  %v13062_v28 = vld [vmem:[%s22241_s1 + $0xa78] sm:$0xff] }
 0x305   : > { %v18058_v43 = vadd.f32 %v2291_v51, %v17738_v21  ;;  %3395 = vmatmul.mubr.f32.gmra.mxu0 %v13059_v4  ;;  %v13070_v4 = vld [vmem:[%s22241_s1 + $0xab8] sm:$0xff] }
 0x306   : > { %3240 = vmatmul.mubr.f32.gmra.mxu1 %v13057_v24  ;;  %v14787_v48 = vpop.f32.mrf.mxu1  ;;  %3399 = vmatprep.mubr.f32.mxu0 %v13065_v42  ;;  %v2603_v34 = vpop.f32.mrf.mxu0  ;;  %v13068_v24 = vld [vmem:[%s22241_s1 + $0xaa8] sm:$0xff]  ;;  %v22370_v51 = vld [vmem:[#allocation15_spill] sm:$0xff]  ;;  %v22371_v35 = vld [vmem:[#allocation28_spill] sm:$0xff] }
 0x307   : > { %3244 = vmatprep.mubr.f32.mxu1 %v13063_v9  ;;  %v18069_v21 = vadd.f32 %v14787_v48, %v17800_v18  ;;  %v18080_v9 = vadd.f32 %v17433_v10, %v1537_v53  ;;  %v1547_v56 = vadd.f32 %v22371_v35, %v22370_v51  ;;  %v22372_v18 = vld [vmem:[#allocation27_spill] sm:$0xff]  ;;  %v13067_v10 = vld [vmem:[%s22241_s1 + $0xaa0] sm:$0xff] }
 0x308   : > { %v2301_v34 = vpop.f32.mrf.mxu1  ;;  %v18077_v42 = vpop.f32.mrf.mxu0  ;;  %v13074_v53 = vld [vmem:[%s22241_s1 + $0xad8] sm:$0xff] }
 0x309   : > { %v18087_v17 = vadd.f32 %v2301_v34, %v17779_v38  ;;  %3400 = vmatmul.mubr.f32.gmra.mxu0 %v13064_v47  ;;  %v13075_v47 = vld [vmem:[%s22241_s1 + $0xae0] sm:$0xff] }
 0x30a   : > { %3245 = vmatmul.mubr.f32.gmra.mxu1 %v13062_v28  ;;  %v14790_v62 = vpop.f32.mrf.mxu1  ;;  %3404 = vmatprep.mubr.f32.mxu0 %v13070_v4  ;;  %v2608_v40 = vpop.f32.mrf.mxu0  ;;  %v13073_v28 = vld [vmem:[%s22241_s1 + $0xad0] sm:$0xff]  ;;  %v22375_v34 = vld [vmem:[#allocation16_spill] sm:$0xff] }
 0x30b   : > { %3249 = vmatprep.mubr.f32.mxu1 %v13068_v24  ;;  %v18098_v38 = vadd.f32 %v14790_v62, %v17831_v61  ;;  %v18109_v24 = vadd.f32 %v17453_v27, %v1547_v56  ;;  %v1557_v51 = vadd.f32 %v17455_v46, %v22375_v34  ;;  %v13072_v27 = vld [vmem:[%s22241_s1 + $0xac8] sm:$0xff]  ;;  %v13078_v56 = vld [vmem:[%s22241_s1 + $0xaf8] sm:$0xff]  ;;  %v13079_v46 = vld [vmem:[%s22241_s1 + $0xb00] sm:$0xff] }
 0x30c   : > { %v2311_v40 = vpop.f32.mrf.mxu1  ;;  %v18106_v4 = vpop.f32.mrf.mxu0 }
 0x30d   : > { %22373 = vst [vmem:[#allocation41_spill] sm:$0xff] %v18098_v38  ;;  %22374 = vst [vmem:[#allocation43_spill] sm:$0xff] %v18109_v24  ;;  %v18116_v62 = vadd.f32 %v2311_v40, %v17816_v7  ;;  %3405 = vmatmul.mubr.f32.gmra.mxu0 %v13069_v30  ;;  %v13080_v30 = vld [vmem:[%s22241_s1 + $0xb08] sm:$0xff] }
 0x30e   : > { %3250 = vmatmul.mubr.f32.gmra.mxu1 %v13067_v10  ;;  %v14793_v35 = vpop.f32.mrf.mxu1  ;;  %3409 = vmatprep.mubr.f32.mxu0 %v13075_v47  ;;  %v2613_v48 = vpop.f32.mrf.mxu0  ;;  %v18138_v47 = vadd.f32 %v17476_v8, %v1557_v51  ;;  %v13077_v8 = vld [vmem:[%s22241_s1 + $0xaf0] sm:$0xff]  ;;  %v13083_v51 = vld [vmem:[%s22241_s1 + $0xb20] sm:$0xff] }
 0x30f   : > { %22376 = vst [vmem:[#allocation5_spill] sm:$0xff] %v18116_v62  ;;  %3254 = vmatprep.mubr.f32.mxu1 %v13073_v28  ;;  %v18127_v7 = vadd.f32 %v14793_v35, %v17867_v39  ;;  %v22379_v28 = vld [vmem:[#allocation44_spill] sm:$0xff] }
 0x310   : > { %v2321_v48 = vpop.f32.mrf.mxu1  ;;  %v18135_v10 = vpop.f32.mrf.mxu0  ;;  %22378 = vst [vmem:[#allocation7_spill] sm:$0xff] %v18138_v47  ;;  %v1567_v40 = vadd.f32 %v17500_v59, %v22379_v28  ;;  %v13084_v59 = vld [vmem:[%s22241_s1 + $0xb28] sm:$0xff] }
 0x311   : > { %22377 = vst [vmem:[#allocation6_spill] sm:$0xff] %v18127_v7  ;;  %v18145_v34 = vadd.f32 %v2321_v48, %v17849_v16  ;;  %3410 = vmatmul.mubr.f32.gmra.mxu0 %v13074_v53  ;;  %v13085_v53 = vld [vmem:[%s22241_s1 + $0xb30] sm:$0xff] }
 0x312   : > { %3255 = vmatmul.mubr.f32.gmra.mxu1 %v13072_v27  ;;  %v14796_v35 = vpop.f32.mrf.mxu1  ;;  %3414 = vmatprep.mubr.f32.mxu0 %v13080_v30  ;;  %v2618_v61 = vpop.f32.mrf.mxu0  ;;  %v18167_v30 = vadd.f32 %v17502_v14, %v1567_v40  ;;  %v13082_v14 = vld [vmem:[%s22241_s1 + $0xb18] sm:$0xff] }
 0x313   : > { %22380 = vst [vmem:[#allocation8_spill] sm:$0xff] %v18145_v34  ;;  %3259 = vmatprep.mubr.f32.mxu1 %v13078_v56  ;;  %v18156_v16 = vadd.f32 %v14796_v35, %v17901_v33  ;;  %v22383_v56 = vld [vmem:[#allocation45_spill] sm:$0xff] }
 0x314   : > { %v2331_v61 = vpop.f32.mrf.mxu1  ;;  %v18164_v27 = vpop.f32.mrf.mxu0  ;;  %22382 = vst [vmem:[#allocation14_spill] sm:$0xff] %v18167_v30  ;;  %v1577_v48 = vadd.f32 %v17553_v44, %v22383_v56 }
 0x315   : > { %22381 = vst [vmem:[#allocation10_spill] sm:$0xff] %v18156_v16  ;;  %v18174_v28 = vadd.f32 %v2331_v61, %v17885_v52  ;;  %3415 = vmatmul.mubr.f32.gmra.mxu0 %v13079_v46  ;;  %v13001_v46 = vld [vmem:[%s22241_s1 + $0x890] sm:$0xff] }
 0x316   : > { %3260 = vmatmul.mubr.f32.gmra.mxu1 %v13077_v8  ;;  %v14799_v35 = vpop.f32.mrf.mxu1  ;;  %3419 = vmatprep.mubr.f32.mxu0 %v13085_v53  ;;  %v2623_v39 = vpop.f32.mrf.mxu0  ;;  %v22387_v53 = vld [vmem:[#allocation46_spill] sm:$0xff] }
 0x317   : > { %22384 = vst [vmem:[#allocation17_spill] sm:$0xff] %v18174_v28  ;;  %3264 = vmatprep.mubr.f32.mxu1 %v13083_v51  ;;  %v18185_v52 = vadd.f32 %v14799_v35, %v17931_v60  ;;  %v18193_v39 = vadd.f32 %v17515_v20, %v1577_v48  ;;  %v1587_v51 = vadd.f32 %v17600_v63, %v22387_v53  ;;  %v13006_v20 = vld [vmem:[%s22241_s1 + $0x8b8] sm:$0xff] }
 0x318   : > { %v2341_v40 = vpop.f32.mrf.mxu1  ;;  %v18190_v8 = vpop.f32.mrf.mxu0 }
 0x319   : > { %22385 = vst [vmem:[#allocation18_spill] sm:$0xff] %v18185_v52  ;;  %22386 = vst [vmem:[#allocation19_spill] sm:$0xff] %v18193_v39  ;;  %v18200_v56 = vadd.f32 %v2341_v40, %v17915_v32  ;;  %3420 = vmatmul.mubr.f32.gmra.mxu0 %v13084_v59  ;;  %v13011_v32 = vld [vmem:[%s22241_s1 + $0x8e0] sm:$0xff]  ;;  %v18217_v40 = vadd.f32 %v17544_v3, %v1587_v51  ;;  %v13021_v3 = vld [vmem:[%s22241_s1 + $0x930] sm:$0xff] }
 0x31a   : > { %3265 = vmatmul.mubr.f32.gmra.mxu1 %v13082_v14  ;;  %v14802_v60 = vpop.f32.mrf.mxu1  ;;  %v2628_v35 = vpop.f32.mrf.mxu0 }
 0x31b   : > { %22388 = vst [vmem:[#allocation20_spill] sm:$0xff] %v18200_v56  ;;  %14862 = vmatprep.mubr.msk.f32.mxu1 %vm1230_vm2, %v13001_v46  ;;  %v18209_v63 = vadd.f32 %v14802_v60, %v17963_v37  ;;  %22391 = vst [vmem:[#allocation29_spill] sm:$0xff] %v18217_v40  ;;  %v13016_v60 = vld [vmem:[%s22241_s1 + $0x908] sm:$0xff] }
 0x31c   : > { %v2351_v59 = vpop.f32.mrf.mxu1  ;;  %v18214_v14 = vpop.f32.mrf.mxu0 }
 0x31d   : > { %22389 = vst [vmem:[#allocation21_spill] sm:$0xff] %v18209_v63  ;;  %22390 = vst [vmem:[#allocation22_spill] sm:$0xff] %v18214_v14  ;;  %v18222_v53 = vadd.f32 %v2351_v59, %v17947_v50 }
 0x31e   : > { %14863 = vmatmul.mubr.msk.f32.vlgmr.msra.gmra.mxu1 %vm1230_vm2, %v13006_v20  ;;  %v2633_v37 = vpop.f32.mrf.mxu0  ;;  %v13026_v20 = vld [vmem:[%s22241_s1 + $0x958] sm:$0xff] }
 0x31f   : > { %22392 = vst [vmem:[#allocation31_spill] sm:$0xff] %v18222_v53  ;;  %14865 = vmatprep.mubr.msk.f32.mxu1 %vm1230_vm2, %v13011_v32  ;;  %v13031_v32 = vld [vmem:[%s22241_s1 + $0x980] sm:$0xff] }
 0x320   : > { %v18234_v51 = vpop.f32.mrf.mxu0 }
 0x322   : > { %14866 = vmatmul.mubr.msk.f32.gmra.mxu1 %vm1230_vm2, %v13016_v60  ;;  %v2638_v50 = vpop.f32.mrf.mxu0  ;;  %v13036_v60 = vld [vmem:[%s22241_s1 + $0x9a8] sm:$0xff] }
 0x323   : > { %14868 = vmatprep.mubr.msk.f32.mxu1 %vm1230_vm2, %v13021_v3  ;;  %v13041_v3 = vld [vmem:[%s22241_s1 + $0x9d0] sm:$0xff] }
 0x324   : > { %v18244_v59 = vpop.f32.mrf.mxu0 }
 0x325   : > { %22393 = vst [vmem:[#allocation32_spill] sm:$0xff] %v18244_v59 }
 0x326   : > { %14869 = vmatmul.mubr.msk.f32.gmra.mxu1 %vm1230_vm2, %v13026_v20  ;;  %v2643_v37 = vpop.f32.mrf.mxu0  ;;  %v13046_v20 = vld [vmem:[%s22241_s1 + $0x9f8] sm:$0xff] }
 0x327   : > { %14871 = vmatprep.mubr.msk.f32.mxu1 %vm1230_vm2, %v13031_v32  ;;  %v13051_v32 = vld [vmem:[%s22241_s1 + $0xa20] sm:$0xff] }
 0x328   : > { %v18254_v50 = vpop.f32.mrf.mxu0 }
 0x32a   : > { %14872 = vmatmul.mubr.msk.f32.gmra.mxu1 %vm1230_vm2, %v13036_v60  ;;  %v2648_v35 = vpop.f32.mrf.mxu0  ;;  %v13061_v60 = vld [vmem:[%s22241_s1 + $0xa70] sm:$0xff] }
 0x32b   : > { %14874 = vmatprep.mubr.msk.f32.mxu1 %vm1230_vm2, %v13041_v3  ;;  %v13056_v35 = vld [vmem:[%s22241_s1 + $0xa48] sm:$0xff] }
 0x32c   : > { %v18264_v37 = vpop.f32.mrf.mxu0 }
 0x32d   : > { %22394 = vst [vmem:[#allocation34_spill] sm:$0xff] %v18264_v37 }
 0x32e   : > { %14875 = vmatmul.mubr.msk.f32.gmra.mxu1 %vm1230_vm2, %v13046_v20  ;;  %v2653_v46 = vpop.f32.mrf.mxu0  ;;  %v13071_v20 = vld [vmem:[%s22241_s1 + $0xac0] sm:$0xff] }
 0x32f   : > { %14877 = vmatprep.mubr.msk.f32.mxu1 %vm1230_vm2, %v13051_v32  ;;  %v13066_v46 = vld [vmem:[%s22241_s1 + $0xa98] sm:$0xff]  ;;  %v13076_v32 = vld [vmem:[%s22241_s1 + $0xae8] sm:$0xff] }
 0x330   : > { %v18274_v3 = vpop.f32.mrf.mxu0 }
 0x332   : > { %14878 = vmatmul.mubr.msk.f32.gmra.mxu1 %vm1230_vm2, %v13056_v35  ;;  %v2658_v48 = vpop.f32.mrf.mxu0 }
 0x333   : > { %14880 = vmatprep.mubr.msk.f32.mxu1 %vm1230_vm2, %v13061_v60  ;;  %v13081_v48 = vld [vmem:[%s22241_s1 + $0xb10] sm:$0xff]  ;;  %v13086_v60 = vld [vmem:[%s22241_s1 + $0xb38] sm:$0xff]  ;;  %s15569_s1 = scalar_lea.vmem %s12630_s16, 16 }
 0x334   : > { %v14821_v33 = vpop.f32.mrf.mxu0  ;;  %p15570_p11 = scmp.ne.s32.totalorder %s12630_s16, %s15569_s1  ;;  %p15577_p1 = scmp.lt.s32.totalorder %s15575_s29, %s15569_s1 }
 0x336   : > { %14881 = vmatmul.mubr.msk.f32.gmra.mxu1 %vm1230_vm2, %v13066_v46  ;;  %v18308_v39 = vpop.f32.mrf.mxu0  ;;  %p15571_p12 = pnand %p15570_p11, %p15737_p5  ;;  %p15578_p2 = por %p15577_p1, %p15576_p0 }
 0x337   : > { %14883 = vmatprep.mubr.msk.f32.mxu1 %vm1230_vm2, %v13071_v20 }
 0x338   : > { %p15572_p13 = pneg %p15571_p12 }
 0x33a   : > { %14884 = vmatmul.mubr.msk.f32.gmra.mxu1 %vm1230_vm2, %v13076_v32  ;;  %v18293_v35 = vpop.f32.mrf.mxu1  ;;  %p15579_p3 = pnand %p15578_p2, %p15572_p13 }
 0x33b   : > { %14886 = vmatprep.mubr.msk.f32.mxu1 %vm1230_vm2, %v13081_v48 }
 0x33c   : > { %v2728_v46 = vpop.f32.mrf.mxu1 }
 0x33e   : > { %14887 = vmatmul.mubr.msk.f32.gmra.mxu1 %vm1230_vm2, %v13086_v60 }
 0x33f   : > { %v2731_v20 = vpop.f32.mrf.mxu1 }
 0x340   : > { %v2732_v61 = vadd.f32 %v2731_v20, %v17939_v45 }
 0x341   : > { %v2733_v44 = vpop.f32.mrf.mxu1 }
 0x342   : > { %v18301_v53 = vadd.f32 %v14821_v33, %v2732_v61 }
 0x344   : > { %v18303_v40 = vpop.f32.mrf.mxu1 }
 0x346   : > { %v2738_v32 = vpop.f32.mrf.mxu1 }
 0x349   : > { %v2741_v25 = vpop.f32.mrf.mxu1 }
 0x34a   : > { %v2742_v56 = vadd.f32 %v2741_v25, %v17971_v54 }
 0x34b   : > { %v2743_v63 = vpop.f32.mrf.mxu1 }
 0x34e   : > { %v18305_v48 = vpop.f32.mrf.mxu1 }
 0x350   : > { %v2748_v2 = vpop.f32.mrf.mxu1 }
 0x353   : > { %v2751_v46 = vpop.f32.mrf.mxu1 }
 0x354   : > { %v2752_v61 = vadd.f32 %v2751_v46, %v18019_v12 }
 0x355   : > { %v2753_v60 = vpop.f32.mrf.mxu1 }
 0x356   : > { %v14824_v52 = vpop.f32.mrf.mxu0 }
 0x357   : > { %v18310_v45 = vadd.f32 %v14824_v52, %v2742_v56 }
 0x358   : > { %v18315_v32 = vpop.f32.mrf.mxu0 }
 0x359   : > { %v18312_v44 = vpop.f32.mrf.mxu1 }
 0x35b   : > { %v2758_v33 = vpop.f32.mrf.mxu1 }
 0x35e   : > { %v2761_v20 = vpop.f32.mrf.mxu1 }
 0x35f   : > { %v2762_v60 = vadd.f32 %v2761_v20, %v18077_v42 }
 0x360   : > { %v2763_v63 = vpop.f32.mrf.mxu1 }
 0x361   : > { %v14827_v41 = vpop.f32.mrf.mxu0 }
 0x362   : > { %v18317_v2 = vadd.f32 %v14827_v41, %v2752_v61 }
 0x363   : > { %v18322_v52 = vpop.f32.mrf.mxu0 }
 0x364   : > { %v18319_v25 = vpop.f32.mrf.mxu1 }
 0x366   : > { %v2768_v54 = vpop.f32.mrf.mxu1 }
 0x369   : > { %v2771_v28 = vpop.f32.mrf.mxu1 }
 0x36a   : > { %v2772_v63 = vadd.f32 %v2771_v28, %v18135_v10 }
 0x36b   : > { %v2773_v56 = vpop.f32.mrf.mxu1 }
 0x36c   : > { %v14830_v30 = vpop.f32.mrf.mxu0 }
 0x36d   : > { %v18324_v33 = vadd.f32 %v14830_v30, %v2762_v60 }
 0x36e   : > { %v18329_v41 = vpop.f32.mrf.mxu0 }
 0x36f   : > { %v18326_v12 = vpop.f32.mrf.mxu1 }
 0x371   : > { %v2778_v46 = vpop.f32.mrf.mxu1 }
 0x374   : > { %v2781_v37 = vpop.f32.mrf.mxu1 }
 0x375   : > { %v2782_v56 = vadd.f32 %v2781_v37, %v18190_v8 }
 0x376   : > { %v2783_v61 = vpop.f32.mrf.mxu1 }
 0x377   : > { %v14833_v16 = vpop.f32.mrf.mxu0 }
 0x378   : > { %v18331_v54 = vadd.f32 %v14833_v16, %v2772_v63 }
 0x379   : > { %v18336_v30 = vpop.f32.mrf.mxu0 }
 0x37a   : > { %v18333_v42 = vpop.f32.mrf.mxu1 }
 0x37b   : > { %22395 = vst [vmem:[#allocation36_spill] sm:$0xff] %v18333_v42 }
 0x37c   : > { %v2788_v20 = vpop.f32.mrf.mxu1 }
 0x37f   : > { %v2791_v49 = vpop.f32.mrf.mxu1 }
 0x380   : > { %v2792_v28 = vadd.f32 %v2791_v49, %v18234_v51 }
 0x381   : > { %v2793_v60 = vpop.f32.mrf.mxu1 }
 0x382   : > { %v14836_v34 = vpop.f32.mrf.mxu0 }
 0x383   : > { %v18338_v46 = vadd.f32 %v14836_v34, %v2782_v56 }
 0x384   : > { %v18343_v61 = vpop.f32.mrf.mxu0 }
 0x385   : > { %22396 = vst [vmem:[#allocation38_spill] sm:$0xff] %v18338_v46  ;;  %v18340_v10 = vpop.f32.mrf.mxu1  ;;  %22398 = vst [vmem:[#allocation42_spill] sm:$0xff] %v18343_v61 }
 0x386   : > { %22397 = vst [vmem:[#allocation40_spill] sm:$0xff] %v18340_v10 }
 0x387   : > { %v2798_v16 = vpop.f32.mrf.mxu1 }
 0x389   : > { %v14839_v63 = vpop.f32.mrf.mxu0 }
 0x38a   : > { %v2801_v47 = vpop.f32.mrf.mxu1  ;;  %v18345_v59 = vadd.f32 %v14839_v63, %v2792_v28 }
 0x38b   : > { %v2802_v8 = vadd.f32 %v2801_v47, %v18254_v50  ;;  %v18348_v37 = vpop.f32.mrf.mxu0 }
 0x38c   : > { %22399 = vst [vmem:[#allocation9_spill] sm:$0xff] %v18345_v59  ;;  %22400 = vst [vmem:[#allocation47_spill] sm:$0xff] %v18348_v37  ;;  %v2803_v20 = vpop.f32.mrf.mxu1 }
 0x38d   : > { %v14842_v60 = vpop.f32.mrf.mxu0 }
 0x38e   : > { %v18350_v7 = vpop.f32.mrf.mxu1  ;;  %v18352_v34 = vadd.f32 %v14842_v60, %v2802_v8 }
 0x38f   : > { %22401 = vst [vmem:[#allocation50_spill] sm:$0xff] %v18350_v7  ;;  %v18354_v56 = vpop.f32.mrf.mxu0 }
 0x390   : > { %22402 = vst [vmem:[#allocation11_spill] sm:$0xff] %v18352_v34  ;;  %22403 = vst [vmem:[#allocation49_spill] sm:$0xff] %v18354_v56  ;;  %v2808_v49 = vpop.f32.mrf.mxu1 }
 0x391   : > { %v14845_v51 = vpop.f32.mrf.mxu0 }
 0x392   : > { %v2811_v10 = vpop.f32.mrf.mxu1 }
 0x393   : > { %v2812_v16 = vadd.f32 %v2811_v10, %v18274_v3  ;;  %v18357_v1 = vpop.f32.mrf.mxu0 }
 0x394   : > { %22404 = vst [vmem:[#allocation48_spill] sm:$0xff] %v18357_v1  ;;  %v2813_v28 = vpop.f32.mrf.mxu1 }
 0x395   : > { %v18359_v63 = vadd.f32 %v14845_v51, %v2812_v16  ;;  %v3336_v47 = vpop.f32.mrf.mxu0 }
 0x396   : > { %v3181_v50 = vpop.f32.mrf.mxu1 }
 0x397   : > { %22405 = vst [vmem:[#allocation23_spill] sm:$0xff] %v18359_v63  ;;  %v18361_v20 = vadd.f32 %v3336_v47, %v3181_v50  ;;  %v3338_v59 = vpop.f32.mrf.mxu0 }
 0x398   : > { %v3183_v7 = vpop.f32.mrf.mxu1 }
 0x399   : > { %v3341_v8 = vpop.f32.mrf.mxu0  ;;  %v3661_v7 = vld [vmem:[%s22112_s2 + $0x8] sm:$0xff] }
 0x39a   : > { %v3186_v60 = vpop.f32.mrf.mxu1  ;;  %13106 = vmatprep.mubr.msk.f32.mxu0 %vm3676_vm3, %v3661_v7 }
 0x39b   : > { %v18363_v34 = vadd.f32 %v3341_v8, %v3186_v60  ;;  %v3343_v49 = vpop.f32.mrf.mxu0 }
 0x39c   : > { %v3188_v56 = vpop.f32.mrf.mxu1 }
 0x39d   : > { %v3346_v37 = vpop.f32.mrf.mxu0 }
 0x39e   : > { %v3191_v46 = vpop.f32.mrf.mxu1 }
 0x39f   : > { %v18365_v3 = vadd.f32 %v3346_v37, %v3191_v46  ;;  %v3348_v10 = vpop.f32.mrf.mxu0 }
 0x3a0   : > { %v3193_v28 = vpop.f32.mrf.mxu1 }
 0x3a1   : > { %v3351_v51 = vpop.f32.mrf.mxu0 }
 0x3a2   : > { %v3196_v16 = vpop.f32.mrf.mxu1 }
 0x3a3   : > { %v18367_v63 = vadd.f32 %v3351_v51, %v3196_v16  ;;  %v3353_v47 = vpop.f32.mrf.mxu0 }
 0x3a4   : > { %v3198_v50 = vpop.f32.mrf.mxu1 }
 0x3a5   : > { %v3356_v59 = vpop.f32.mrf.mxu0 }
 0x3a6   : > { %v3201_v8 = vpop.f32.mrf.mxu1 }
 0x3a7   : > { %v18373_v56 = vadd.f32 %v3356_v59, %v3201_v8  ;;  %v3358_v46 = vpop.f32.mrf.mxu0 }
 0x3a8   : > { %v3203_v37 = vpop.f32.mrf.mxu1 }
 0x3a9   : > { %v3361_v60 = vpop.f32.mrf.mxu0 }
 0x3aa   : > { %v3206_v49 = vpop.f32.mrf.mxu1 }
 0x3ab   : > { %v18375_v10 = vadd.f32 %v3361_v60, %v3206_v49  ;;  %v3363_v28 = vpop.f32.mrf.mxu0 }
 0x3ac   : > { %v3208_v51 = vpop.f32.mrf.mxu1 }
 0x3ad   : > { %v3366_v16 = vpop.f32.mrf.mxu0 }
 0x3ae   : > { %v3211_v47 = vpop.f32.mrf.mxu1 }
 0x3af   : > { %v18377_v50 = vadd.f32 %v3366_v16, %v3211_v47  ;;  %v3368_v1 = vpop.f32.mrf.mxu0 }
 0x3b0   : > { %v3213_v62 = vpop.f32.mrf.mxu1 }
 0x3b1   : > { %v3371_v24 = vpop.f32.mrf.mxu0 }
 0x3b2   : > { %v3216_v61 = vpop.f32.mrf.mxu1 }
 0x3b3   : > { %v18379_v42 = vadd.f32 %v3371_v24, %v3216_v61  ;;  %v3373_v59 = vpop.f32.mrf.mxu0 }
 0x3b4   : > { %v3218_v7 = vpop.f32.mrf.mxu1 }
 0x3b5   : > { %v3376_v8 = vpop.f32.mrf.mxu0 }
 0x3b6   : > { %v3221_v46 = vpop.f32.mrf.mxu1 }
 0x3b7   : > { %v18381_v37 = vadd.f32 %v3376_v8, %v3221_v46  ;;  %v3378_v60 = vpop.f32.mrf.mxu0 }
 0x3b8   : > { %v3223_v49 = vpop.f32.mrf.mxu1 }
 0x3b9   : > { %22406 = vst [vmem:[#allocation12_spill] sm:$0xff] %v18381_v37  ;;  %v3381_v28 = vpop.f32.mrf.mxu0 }
 0x3ba   : > { %v3226_v51 = vpop.f32.mrf.mxu1 }
 0x3bb   : > { %v18383_v14 = vadd.f32 %v3381_v28, %v3226_v51  ;;  %v3383_v16 = vpop.f32.mrf.mxu0 }
 0x3bc   : > { %v3228_v47 = vpop.f32.mrf.mxu1 }
 0x3bd   : > { %v3386_v1 = vpop.f32.mrf.mxu0 }
 0x3be   : > { %v3231_v62 = vpop.f32.mrf.mxu1 }
 0x3bf   : > { %v18385_v38 = vadd.f32 %v3386_v1, %v3231_v62  ;;  %v3388_v24 = vpop.f32.mrf.mxu0 }
 0x3c0   : > { %v3233_v61 = vpop.f32.mrf.mxu1 }
 0x3c1   : > { %22407 = vst [vmem:[#allocation52_spill] sm:$0xff] %v18385_v38  ;;  %v18387_v59 = vpop.f32.mrf.mxu0 }
 0x3c2   : > { %v18389_v7 = vpop.f32.mrf.mxu1 }
 0x3c3   : > { %v3393_v8 = vpop.f32.mrf.mxu0 }
 0x3c4   : > { %v3238_v46 = vpop.f32.mrf.mxu1 }
 0x3c5   : > { %v18391_v60 = vpop.f32.mrf.mxu0 }
 0x3c6   : > { %22408 = vst [vmem:[#allocation51_spill] sm:$0xff] %v18391_v60  ;;  %v18393_v49 = vpop.f32.mrf.mxu1 }
 0x3c7   : > { %22409 = vst [vmem:[#allocation26_spill] sm:$0xff] %v18393_v49  ;;  %v3398_v28 = vpop.f32.mrf.mxu0 }
 0x3c8   : > { %v3243_v51 = vpop.f32.mrf.mxu1 }
 0x3c9   : > { %v18395_v16 = vpop.f32.mrf.mxu0 }
 0x3ca   : > { %22410 = vst [vmem:[#allocation13_spill] sm:$0xff] %v18395_v16  ;;  %v18397_v47 = vpop.f32.mrf.mxu1 }
 0x3cb   : > { %22411 = vst [vmem:[#allocation25_spill] sm:$0xff] %v18397_v47  ;;  %v3403_v1 = vpop.f32.mrf.mxu0 }
 0x3cc   : > { %v3248_v62 = vpop.f32.mrf.mxu1 }
 0x3cd   : > { %v18399_v24 = vpop.f32.mrf.mxu0 }
 0x3ce   : > { %22412 = vst [vmem:[#allocation24_spill] sm:$0xff] %v18399_v24  ;;  %v18401_v61 = vpop.f32.mrf.mxu1 }
 0x3cf   : > { %22413 = vst [vmem:[#allocation15_spill] sm:$0xff] %v18401_v61  ;;  %v3408_v38 = vpop.f32.mrf.mxu0 }
 0x3d0   : > { %v3253_v57 = vpop.f32.mrf.mxu1 }
 0x3d1   : > { %v18403_v8 = vpop.f32.mrf.mxu0  ;;  %v2727_v57 = vadd.f32 %v18293_v35, %v17923_v58 }
 0x3d2   : > { %22414 = vst [vmem:[#allocation28_spill] sm:$0xff] %v18403_v8  ;;  %v18405_v46 = vpop.f32.mrf.mxu1 }
 0x3d3   : > { %v3413_v60 = vpop.f32.mrf.mxu0 }
 0x3d4   : > { %v3258_v49 = vpop.f32.mrf.mxu1 }
 0x3d5   : > { %v3416_v28 = vpop.f32.mrf.mxu0  ;;  %v2737_v49 = vadd.f32 %v18303_v40, %v17955_v0 }
 0x3d6   : > { %v3261_v51 = vpop.f32.mrf.mxu1 }
 0x3d7   : > { %v18407_v37 = vadd.f32 %v3416_v28, %v3261_v51  ;;  %v3418_v16 = vpop.f32.mrf.mxu0  ;;  %v2882_v28 = vadd.f32 %v18308_v39, %v2727_v57  ;;  %v2892_v0 = vadd.f32 %v18315_v32, %v2737_v49  ;;  %v22416_v39 = vmax.f32 %v17993_v15, %v18000_v29 }
 0x3d8   : > { %v3263_v47 = vpop.f32.mrf.mxu1  ;;  %v22418_v29 = vmax.f32 %v18022_v26, %v18029_v19  ;;  %v22419_v57 = vmax.f32 %v22369_v13, %v18040_v55  ;;  %v22420_v19 = vmax.f32 %v18051_v6, %v18058_v43  ;;  %v22421_v49 = vmax.f32 %v22372_v18, %v18069_v21  ;;  %v22423_v18 = vld [vmem:[#allocation12_spill] sm:$0xff] }
 0x3d9   : > { %v18409_v1 = vpop.f32.mrf.mxu0 }
 0x3da   : > { %v18411_v62 = vpop.f32.mrf.mxu1 }
 0x3db   : > { %v3423_v24 = vpop.f32.mrf.mxu0 }
 0x3dc   : > { %v3268_v61 = vpop.f32.mrf.mxu1  ;;  %v22415_v24 = vmax.f32 %v22361_v36, %v17982_v22 }
 0x3de   : > { %v14864_v38 = vpop.f32.mrf.mxu1 }
 0x3df   : > { %v3497_v8 = vadd.f32 %v14864_v38, %v18363_v34  ;;  %v2747_v34 = vadd.f32 %v18305_v48, %v17990_v11  ;;  %v2757_v48 = vadd.f32 %v18312_v44, %v18048_v23  ;;  %v2767_v44 = vadd.f32 %v18319_v25, %v18106_v4 }
 0x3e0   : > { %v3491_v60 = vpop.f32.mrf.mxu1  ;;  %v2777_v25 = vadd.f32 %v18326_v12, %v18164_v27 }
 0x3e1   : > { %v3599_v16 = vmax.f32 %v18301_v53, %v3497_v8  ;;  %v3492_v47 = vadd.f32 %v3491_v60, %v18361_v20  ;;  %v22417_v20 = vmax.f32 %v22365_v5, %v18011_v31  ;;  %v2902_v15 = vadd.f32 %v18322_v52, %v2747_v34 }
 0x3e2   : > { %v14867_v51 = vpop.f32.mrf.mxu1  ;;  %v2912_v26 = vadd.f32 %v18329_v41, %v2757_v48  ;;  %v2922_v6 = vadd.f32 %v18336_v30, %v2767_v44  ;;  %v22422_v41 = vmax.f32 %v18080_v9, %v18087_v17  ;;  %v22430_v17 = vld [vmem:[#allocation25_spill] sm:$0xff]  ;;  %v22442_v44 = vld [vmem:[#allocation32_spill] sm:$0xff] }
 0x3e3   : > { %v18424_v61 = vmax.f32 %v22415_v24, %v3599_v16  ;;  %v3598_v58 = vmax.f32 %v2882_v28, %v3492_v47  ;;  %v3507_v35 = vadd.f32 %v14867_v51, %v18367_v63  ;;  %v22425_v51 = vld [vmem:[#allocation41_spill] sm:$0xff] }
 0x3e4   : > { %v3501_v38 = vpop.f32.mrf.mxu1  ;;  %v22431_v9 = vld [vmem:[#allocation13_spill] sm:$0xff] }
 0x3e5   : > { %v18433_v40 = vmax.f32 %v22416_v39, %v3598_v58  ;;  %v3601_v53 = vmax.f32 %v18310_v45, %v3507_v35  ;;  %v3502_v22 = vadd.f32 %v3501_v38, %v18365_v3  ;;  %v22427_v58 = vld [vmem:[#allocation22_spill] sm:$0xff]  ;;  %v22428_v35 = vld [vmem:[#allocation36_spill] sm:$0xff]  ;;  %v22432_v39 = vld [vmem:[#allocation43_spill] sm:$0xff] }
 0x3e6   : > { %v14870_v36 = vpop.f32.mrf.mxu1  ;;  %v2787_v34 = vadd.f32 %v22428_v35, %v22427_v58  ;;  %v22455_v35 = vld [vmem:[#allocation34_spill] sm:$0xff] }
 0x3e7   : > { %v18440_v63 = vmax.f32 %v22417_v20, %v3601_v53  ;;  %v3600_v8 = vmax.f32 %v2892_v0, %v3502_v22  ;;  %v3517_v11 = vadd.f32 %v14870_v36, %v18375_v10  ;;  %v3402_v0 = vadd.f32 %v22431_v9, %v22430_v17  ;;  %v22435_v36 = vld [vmem:[#allocation38_spill] sm:$0xff]  ;;  %v22459_v9 = vld [vmem:[#allocation17_spill] sm:$0xff] }
 0x3e8   : > { %v3511_v32 = vpop.f32.mrf.mxu1  ;;  %v22458_v17 = vld [vmem:[#allocation14_spill] sm:$0xff] }
 0x3e9   : > { %v18449_v45 = vmax.f32 %v22418_v29, %v3600_v8  ;;  %v3603_v3 = vmax.f32 %v18317_v2, %v3517_v11  ;;  %v3512_v31 = vadd.f32 %v3511_v32, %v18373_v56  ;;  %v22436_v8 = vld [vmem:[#allocation52_spill] sm:$0xff]  ;;  %v22437_v32 = vld [vmem:[#allocation26_spill] sm:$0xff] }
 0x3ea   : > { %v14873_v5 = vpop.f32.mrf.mxu1 }
 0x3eb   : > { %v18456_v10 = vmax.f32 %v22419_v57, %v3603_v3  ;;  %v3602_v60 = vmax.f32 %v2902_v15, %v3512_v31  ;;  %v3527_v23 = vadd.f32 %v14873_v5, %v18379_v42  ;;  %v22438_v15 = vld [vmem:[#allocation51_spill] sm:$0xff]  ;;  %v22439_v3 = vld [vmem:[#allocation33_spill] sm:$0xff]  ;;  %v22440_v31 = vld [vmem:[#allocation6_spill] sm:$0xff] }
 0x3ec   : > { %v3521_v52 = vpop.f32.mrf.mxu1  ;;  %v3397_v29 = vadd.f32 %v22438_v15, %v22437_v32  ;;  %v22441_v5 = vmax.f32 %v22439_v3, %v22440_v31  ;;  %v22465_v31 = vld [vmem:[#allocation48_spill] sm:$0xff] }
 0x3ed   : > { %v18465_v2 = vmax.f32 %v22420_v19, %v3602_v60  ;;  %v3605_v56 = vmax.f32 %v18324_v33, %v3527_v23  ;;  %v3522_v55 = vadd.f32 %v3521_v52, %v18377_v50  ;;  %v3392_v33 = vadd.f32 %v18387_v59, %v18389_v7  ;;  %v22429_v59 = vld [vmem:[#allocation42_spill] sm:$0xff]  ;;  %v22443_v52 = vld [vmem:[#allocation40_spill] sm:$0xff]  ;;  %v22444_v19 = vld [vmem:[#allocation47_spill] sm:$0xff] }
 0x3ee   : > { %v14876_v13 = vpop.f32.mrf.mxu1  ;;  %v2932_v7 = vadd.f32 %v22429_v59, %v2777_v25  ;;  %v22457_v59 = vld [vmem:[#allocation49_spill] sm:$0xff] }
 0x3ef   : > { %v18472_v42 = vmax.f32 %v22421_v49, %v3605_v56  ;;  %v3604_v28 = vmax.f32 %v2912_v26, %v3522_v55  ;;  %v3537_v4 = vadd.f32 %v14876_v13, %v18383_v14  ;;  %v22424_v14 = vld [vmem:[#allocation30_spill] sm:$0xff]  ;;  %v2797_v26 = vadd.f32 %v22443_v52, %v22442_v44  ;;  %v22445_v13 = vld [vmem:[#allocation28_spill] sm:$0xff]  ;;  %v22466_v44 = vld [vmem:[#allocation19_spill] sm:$0xff] }
 0x3f0   : > { %v3531_v43 = vpop.f32.mrf.mxu1  ;;  %v22426_v24 = vmax.f32 %v22424_v14, %v22425_v51  ;;  %v2942_v56 = vadd.f32 %v22444_v19, %v2787_v34  ;;  %v3412_v49 = vadd.f32 %v22445_v13, %v18405_v46  ;;  %v22452_v14 = vld [vmem:[#allocation35_spill] sm:$0xff]  ;;  %v22453_v51 = vld [vmem:[#allocation10_spill] sm:$0xff]  ;;  %v22467_v52 = vld [vmem:[#allocation20_spill] sm:$0xff] }
 0x3f1   : > { %v18483_v50 = vmax.f32 %v22422_v41, %v3604_v28  ;;  %v3607_v21 = vmax.f32 %v18331_v54, %v3537_v4  ;;  %v3532_v16 = vadd.f32 %v3531_v43, %v22423_v18  ;;  %v22433_v54 = vld [vmem:[#allocation5_spill] sm:$0xff]  ;;  %v22446_v28 = vld [vmem:[#allocation7_spill] sm:$0xff]  ;;  %v22447_v4 = vld [vmem:[#allocation8_spill] sm:$0xff] }
 0x3f2   : > { %v14879_v47 = vpop.f32.mrf.mxu1  ;;  %v22434_v53 = vmax.f32 %v22432_v39, %v22433_v54  ;;  %v22448_v25 = vmax.f32 %v22446_v28, %v22447_v4  ;;  %v22449_v43 = vld [vmem:[#allocation9_spill] sm:$0xff]  ;;  %v22450_v18 = vld [vmem:[#allocation15_spill] sm:$0xff]  ;;  %v22456_v34 = vld [vmem:[#allocation50_spill] sm:$0xff] }
 0x3f3   : > { %v3625_v27 = vmax.f32 %v22426_v24, %v3607_v21  ;;  %v3606_v12 = vmax.f32 %v2922_v6, %v3532_v16  ;;  %v3547_v30 = vadd.f32 %v14879_v47, %v3392_v33  ;;  %v22451_v16 = vld [vmem:[#allocation24_spill] sm:$0xff]  ;;  %v22454_v24 = vmax.f32 %v22452_v14, %v22453_v51  ;;  %v22461_v54 = vld [vmem:[#allocation11_spill] sm:$0xff] }
 0x3f4   : > { %v3541_v38 = vpop.f32.mrf.mxu1  ;;  %v3407_v47 = vadd.f32 %v22451_v16, %v22450_v18  ;;  %v2807_v46 = vadd.f32 %v22456_v34, %v22455_v35  ;;  %v22470_v13 = vld [vmem:[#allocation39_spill] sm:$0xff] }
 0x3f5   : > { %v3624_v22 = vmax.f32 %v22434_v53, %v3606_v12  ;;  %v3609_v20 = vmax.f32 %v22435_v36, %v3547_v30  ;;  %v3542_v11 = vadd.f32 %v3541_v38, %v22436_v8  ;;  %v3422_v36 = vadd.f32 %v18409_v1, %v18411_v62  ;;  %v3667_v35 = vld [vmem:[%s22112_s2 + $0x38] sm:$0xff]  ;;  %v3666_v34 = vld [vmem:[%s22112_s2 + $0x30] sm:$0xff] }
 0x3f6   : > { %v14882_v48 = vpop.f32.mrf.mxu1  ;;  %v18565_v51 = vmax.f32 %v3625_v27, 0.0  ;;  %v18579_v27 = vmax.f32 %v18483_v50, 0.0  ;;  %v18594_v50 = vmax.f32 %v18440_v63, 0.0  ;;  %v18609_v63 = vmax.f32 %v18433_v40, 0.0  ;;  %v3663_v40 = vld [vmem:[%s22112_s2 + $0x18] sm:$0xff] }
 0x3f7   : > { %v3627_v57 = vmax.f32 %v22441_v5, %v3609_v20  ;;  %v3608_v60 = vmax.f32 %v2932_v7, %v3542_v11  ;;  %v3557_v23 = vadd.f32 %v14882_v48, %v3402_v0  ;;  %v2952_v7 = vadd.f32 %v22457_v59, %v2797_v26  ;;  %v22462_v11 = vld [vmem:[#allocation37_spill] sm:$0xff]  ;;  %v22463_v48 = vld [vmem:[#allocation18_spill] sm:$0xff] }
 0x3f8   : > { %v3551_v55 = vpop.f32.mrf.mxu1  ;;  %v22460_v0 = vmax.f32 %v22458_v17, %v22459_v9  ;;  %v22464_v32 = vmax.f32 %v22462_v11, %v22463_v48  ;;  %v2962_v5 = vadd.f32 %v22465_v31, %v2807_v46  ;;  %v22468_v26 = vmax.f32 %v22466_v44, %v22467_v52  ;;  %v3669_v46 = vld [vmem:[%s22112_s2 + $0x48] sm:$0xff]  ;;  %v3668_v59 = vld [vmem:[%s22112_s2 + $0x40] sm:$0xff]  ;;  %v13130_v48 = vld [vmem:[%s22112_s2 + $0xb8] sm:$0xff] }
 0x3f9   : > { %v3626_v6 = vmax.f32 %v22448_v25, %v3608_v60  ;;  %v3611_v33 = vmax.f32 %v22449_v43, %v3557_v23  ;;  %v3552_v41 = vadd.f32 %v3551_v55, %v3397_v29  ;;  %v22473_v43 = vmov 0.0   ;;  %v3673_v17 = vld [vmem:[%s22112_s2 + $0x68] sm:$0xff]  ;;  %v3672_v9 = vld [vmem:[%s22112_s2 + $0x60] sm:$0xff]  ;;  %v13133_v31 = vld [vmem:[%s22112_s2 + $0xd0] sm:$0xff] }
 0x3fa   : > { %v14885_v21 = vpop.f32.mrf.mxu1  ;;  %v13127_v11 = vld [vmem:[%s22112_s2 + $0xa0] sm:$0xff]  ;;  %v13138_v44 = vld [vmem:[%s22112_s2 + $0xf8] sm:$0xff]  ;;  %v13137_v52 = vld [vmem:[%s22112_s2 + $0xf0] sm:$0xff] }
 0x3fb   : > { %v3629_v12 = vmax.f32 %v22454_v24, %v3611_v33  ;;  %v3610_v30 = vmax.f32 %v2942_v56, %v3552_v41  ;;  %v3567_v58 = vadd.f32 %v14885_v21, %v3412_v49  ;;  %v22469_v56 = vld [vmem:[#allocation23_spill] sm:$0xff]  ;;  %v22471_v49 = vld [vmem:[#allocation21_spill] sm:$0xff]  ;;  %v18561_v14 = vmax.f32 %v3626_v6, 0.0 }
 0x3fc   : > { %v3561_v38 = vpop.f32.mrf.mxu1  ;;  %v22472_v28 = vmax.f32 %v22470_v13, %v22471_v49  ;;  %v22474_v41 = vld [vmem:[#allocation29_spill] sm:$0xff]  ;;  %v22475_v21 = vld [vmem:[#allocation31_spill] sm:$0xff]  ;;  %v18569_v24 = vmax.f32 %v3624_v22, 0.0  ;;  %v18584_v22 = vmax.f32 %v18456_v10, 0.0  ;;  %v18599_v10 = vmax.f32 %v18449_v45, 0.0 }
 0x3fd   : > { %v3628_v39 = vmax.f32 %v22460_v0, %v3610_v30  ;;  %v3613_v53 = vmax.f32 %v22461_v54, %v3567_v58  ;;  %v3562_v20 = vadd.f32 %v3561_v38, %v3407_v47  ;;  %v18546_v33 = vmax.f32 %v3629_v12, 0.0  ;;  %v3662_v12 = vld [vmem:[%s22112_s2 + $0x10] sm:$0xff]  ;;  %v3665_v30 = vld [vmem:[%s22112_s2 + $0x28] sm:$0xff]  ;;  %v3664_v58 = vld [vmem:[%s22112_s2 + $0x20] sm:$0xff] }
 0x3fe   : > { %v14888_v8 = vpop.f32.mrf.mxu1  ;;  %v22476_v18 = vmax.f32 %v22474_v41, %v22475_v21  ;;  %v18557_v47 = vmax.f32 %v3627_v57, 0.0  ;;  %v18574_v57 = vmax.f32 %v18472_v42, 0.0  ;;  %v18589_v42 = vmax.f32 %v18465_v2, 0.0  ;;  %v3670_v38 = vld [vmem:[%s22112_s2 + $0x50] sm:$0xff]  ;;  %v3675_v0 = vld [vmem:[%s22112_s2 + $0x78] sm:$0xff]  ;;  %v13124_v54 = vld [vmem:[%s22112_s2 + $0x88] sm:$0xff] }
 0x3ff   : > { %v3631_v15 = vmax.f32 %v22464_v32, %v3613_v53  ;;  %v3612_v29 = vmax.f32 %v2952_v7, %v3562_v20  ;;  %v3577_v3 = vadd.f32 %v14888_v8, %v3422_v36  ;;  %v18604_v2 = vmax.f32 %v18424_v61, 0.0  ;;  %v3660_v61 = vld [vmem:[%s22112_s2] sm:$0xff]  ;;  %v3671_v7 = vld [vmem:[%s22112_s2 + $0x58] sm:$0xff]  ;;  %v13125_v20 = vld [vmem:[%s22112_s2 + $0x90] sm:$0xff] }
 0x400   : > { %v3571_v60 = vpop.f32.mrf.mxu1  ;;  %v13123_v53 = vld [vmem:[%s22112_s2 + $0x80] sm:$0xff]  ;;  %v13126_v36 = vld [vmem:[%s22112_s2 + $0x98] sm:$0xff]  ;;  %v13128_v8 = vld [vmem:[%s22112_s2 + $0xa8] sm:$0xff] }
 0x401   : > { %v18532_v23 = vmax.f32 %v3631_v15, 0.0  ;;  %v3630_v19 = vmax.f32 %v22468_v26, %v3612_v29  ;;  %v3615_v55 = vmax.f32 %v22469_v56, %v3577_v3  ;;  %v3572_v1 = vadd.f32 %v3571_v60, %v18407_v37  ;;  %v13129_v32 = vld [vmem:[%s22112_s2 + $0xb0] sm:$0xff]  ;;  %v13132_v15 = vld [vmem:[%s22112_s2 + $0xc8] sm:$0xff]  ;;  %v13131_v29 = vld [vmem:[%s22112_s2 + $0xc0] sm:$0xff] }
 0x402   : > { %v18553_v37 = vmax.f32 %v3628_v39, 0.0  ;;  %v3674_v39 = vld [vmem:[%s22112_s2 + $0x70] sm:$0xff]  ;;  %v13134_v3 = vld [vmem:[%s22112_s2 + $0xd8] sm:$0xff]  ;;  %v13135_v60 = vld [vmem:[%s22112_s2 + $0xe0] sm:$0xff] }
 0x403   : > { %v18539_v62 = vmax.f32 %v3630_v19, 0.0  ;;  %v3633_v4 = vmax.f32 %v22472_v28, %v3615_v55  ;;  %v3614_v25 = vmax.f32 %v2962_v5, %v3572_v1  ;;  %3702 = vmatpush1.msra.mxu0 %v18532_v23  ;;  %v13136_v5 = vld [vmem:[%s22112_s2 + $0xe8] sm:$0xff]  ;;  %v13158_v19 = vld [vmem:[%s22112_s2 + $0x100] sm:$0xff]  ;;  %v13161_v56 = vld [vmem:[%s22112_s2 + $0x118] sm:$0xff] }
 0x404   : > { %3703 = vmatprep.subr.mxu0 %v22473_v43  ;;  %v13159_v26 = vld [vmem:[%s22112_s2 + $0x108] sm:$0xff]  ;;  %v13160_v55 = vld [vmem:[%s22112_s2 + $0x110] sm:$0xff]  ;;  %v13162_v13 = vld [vmem:[%s22112_s2 + $0x120] sm:$0xff] }
 0x405   : > { %v3632_v16 = vmax.f32 %v22476_v18, %v3614_v25  ;;  %3704 = vmatpush1.msra.mxu0 %v18539_v62  ;;  %v18613_v45 = vmax.f32 %v3633_v4, 0.0  ;;  %v13163_v1 = vld [vmem:[%s22112_s2 + $0x128] sm:$0xff]  ;;  %v13165_v49 = vld [vmem:[%s22112_s2 + $0x138] sm:$0xff]  ;;  %v13164_v4 = vld [vmem:[%s22112_s2 + $0x130] sm:$0xff] }
 0x406   : > { %3705 = vmatprep.subr.mxu0 %v22473_v43  ;;  %v3807_v28 = vld [vmem:[%s22116_s6 + $0x8] sm:$0x3]  ;;  %v3806_v25 = vld [vmem:[%s22116_s6] sm:$0xff]  ;;  %v13169_v18 = vld [vmem:[%s22112_s2 + $0x158] sm:$0xff] }
 0x407   : > { %3706 = vmatpush1.msra.mxu0 %v18546_v33  ;;  %22477 = vst [vmem:[#allocation27_spill] sm:$0xff] %v18613_v45  ;;  %v18617_v6 = vmax.f32 %v3632_v16, 0.0  ;;  %14889 = vmatprep.subr.msk.mxu1 %vm3833_vm4, %v3807_v28  ;;  %v13167_v41 = vld [vmem:[%s22112_s2 + $0x148] sm:$0xff]  ;;  %v13166_v21 = vld [vmem:[%s22112_s2 + $0x140] sm:$0xff]  ;;  %v13168_v16 = vld [vmem:[%s22112_s2 + $0x150] sm:$0xff] }
 0x408   : > { %3707 = vmatprep.subr.mxu0 %v22473_v43  ;;  %14890 = vmatpush3.msk.msra.mxu1 %vm3833_vm4, %v3807_v28 }
 0x409   : > { %3708 = vmatpush1.msra.mxu0 %v18553_v37  ;;  %22478 = vst [vmem:[#allocation16_spill] sm:$0xff] %v18617_v6  ;;  %14891 = vmatprep.subr.mxu1 %v3806_v25 }
 0x40a   : > { %3709 = vmatprep.subr.mxu0 %v22473_v43  ;;  %14892 = vmatpush3.msra.mxu1 %v3806_v25 }
 0x40b   : > { %3710 = vmatpush1.msra.mxu0 %v18557_v47 }
 0x40c   : > { %3711 = vmatprep.subr.mxu0 %v22473_v43 }
 0x40d   : > { %3712 = vmatpush1.msra.mxu0 %v18561_v14 }
 0x40e   : > { %3713 = vmatprep.subr.mxu0 %v22473_v43 }
 0x40f   : > { %3714 = vmatpush1.msra.mxu0 %v18565_v51 }
 0x410   : > { %3715 = vmatprep.subr.mxu0 %v22473_v43 }
 0x411   : > { %3716 = vmatpush1.msra.mxu0 %v18569_v24 }
 0x412   : > { %3717 = vmatprep.subr.mxu0 %v22473_v43 }
 0x413   : > { %3718 = vmatpush1.msra.mxu0 %v18574_v57 }
 0x414   : > { %3719 = vmatprep.subr.mxu0 %v22473_v43 }
 0x415   : > { %3720 = vmatpush1.msra.mxu0 %v18579_v27 }
 0x416   : > { %3721 = vmatprep.subr.mxu0 %v22473_v43 }
 0x417   : > { %3722 = vmatpush1.msra.mxu0 %v18584_v22 }
 0x418   : > { %3723 = vmatprep.subr.mxu0 %v22473_v43 }
 0x419   : > { %3724 = vmatpush1.msra.mxu0 %v18589_v42 }
 0x41a   : > { %3725 = vmatprep.subr.mxu0 %v22473_v43 }
 0x41b   : > { %3726 = vmatpush1.msra.mxu0 %v18594_v50 }
 0x41c   : > { %3727 = vmatprep.subr.mxu0 %v22473_v43 }
 0x41d   : > { %3728 = vmatpush1.msra.mxu0 %v18599_v10 }
 0x41e   : > { %3729 = vmatprep.subr.mxu0 %v22473_v43 }
 0x41f   : > { %3730 = vmatpush1.msra.mxu0 %v18604_v2 }
 0x420   : > { %3731 = vmatprep.subr.mxu0 %v22473_v43 }
 0x421   : > { %3732 = vmatpush1.msra.mxu0 %v18609_v63 }
 0x422   : > { %3761 = vmatprep.subr.mxu0 %v22473_v43 }
 0x423   : > { %3762 = vmatpush2.msra.mxu0 %v18613_v45 }
 0x424   : > { %3763 = vmatprep.subr.mxu0 %v22473_v43 }
 0x425   : > { %3764 = vmatpush2.msra.mxu0 %v18617_v6 }
 0x426   : > { %3991 = vmatprep.subr.mxu0 %v22473_v43  ;;  %3766 = vmatmul.mubr.f32.vlgmr.msra.gmra.mxu0 %v3660_v61  ;;  %v13171_v61 = vld [vmem:[%s22112_s2 + $0x168] sm:$0xff] }
 0x427   : > { %3992 = vmatpush1.msra.mxu0 %v18532_v23  ;;  %13107 = vmatprep.mubr.msk.f32.mxu0 %vm3676_vm3, %v3663_v40  ;;  %v13170_v40 = vld [vmem:[%s22112_s2 + $0x160] sm:$0xff] }
 0x428   : > { %3993 = vmatprep.subr.mxu0 %v22473_v43 }
 0x429   : > { %3994 = vmatpush1.msra.mxu0 %v18539_v62 }
 0x42a   : > { %3995 = vmatprep.subr.mxu0 %v22473_v43  ;;  %3771 = vmatmul.mubr.f32.gmra.mxu0 %v3662_v12  ;;  %v13173_v12 = vld [vmem:[%s22112_s2 + $0x178] sm:$0xff] }
 0x42b   : > { %3996 = vmatpush1.msra.mxu0 %v18546_v33  ;;  %13108 = vmatprep.mubr.msk.f32.mxu0 %vm3676_vm3, %v3665_v30  ;;  %v13172_v30 = vld [vmem:[%s22112_s2 + $0x170] sm:$0xff] }
 0x42c   : > { %3997 = vmatprep.subr.mxu0 %v22473_v43 }
 0x42d   : > { %3998 = vmatpush1.msra.mxu0 %v18553_v37 }
 0x42e   : > { %3999 = vmatprep.subr.mxu0 %v22473_v43  ;;  %3776 = vmatmul.mubr.f32.gmra.mxu0 %v3664_v58  ;;  %v13148_v58 = vld [vmem:[%s22116_s6 + $0x18] sm:$0x3] }
 0x42f   : > { %4000 = vmatpush1.msra.mxu0 %v18557_v47  ;;  %13109 = vmatprep.mubr.msk.f32.mxu0 %vm3676_vm3, %v3667_v35 }
 0x430   : > { %4001 = vmatprep.subr.mxu0 %v22473_v43  ;;  %14905 = vmatprep.subr.msk.mxu1 %vm3833_vm4, %v13148_v58 }
 0x431   : > { %4002 = vmatpush1.msra.mxu0 %v18561_v14 }
 0x432   : > { %4003 = vmatprep.subr.mxu0 %v22473_v43  ;;  %3781 = vmatmul.mubr.f32.gmra.mxu0 %v3666_v34 }
 0x433   : > { %4004 = vmatpush1.msra.mxu0 %v18565_v51  ;;  %13110 = vmatprep.mubr.msk.f32.mxu0 %vm3676_vm3, %v3669_v46 }
 0x434   : > { %4005 = vmatprep.subr.mxu0 %v22473_v43 }
 0x435   : > { %4006 = vmatpush1.msra.mxu0 %v18569_v24 }
 0x436   : > { %4007 = vmatprep.subr.mxu0 %v22473_v43  ;;  %3786 = vmatmul.mubr.f32.gmra.mxu0 %v3668_v59  ;;  %v13147_v59 = vld [vmem:[%s22116_s6 + $0x10] sm:$0xff] }
 0x437   : > { %4008 = vmatpush1.msra.mxu0 %v18574_v57  ;;  %13111 = vmatprep.mubr.msk.f32.mxu0 %vm3676_vm3, %v3671_v7 }
 0x438   : > { %4009 = vmatprep.subr.mxu0 %v22473_v43 }
 0x439   : > { %4010 = vmatpush1.msra.mxu0 %v18579_v27 }
 0x43a   : > { %4011 = vmatprep.subr.mxu0 %v22473_v43  ;;  %3791 = vmatmul.mubr.f32.gmra.mxu0 %v3670_v38  ;;  %v13183_v38 = vld [vmem:[%s22116_s6 + $0x28] sm:$0x3] }
 0x43b   : > { %4012 = vmatpush1.msra.mxu0 %v18584_v22  ;;  %13112 = vmatprep.mubr.msk.f32.mxu0 %vm3676_vm3, %v3673_v17 }
 0x43c   : > { %4013 = vmatprep.subr.mxu0 %v22473_v43 }
 0x43d   : > { %4014 = vmatpush1.msra.mxu0 %v18589_v42 }
 0x43e   : > { %4015 = vmatprep.subr.mxu0 %v22473_v43  ;;  %3796 = vmatmul.mubr.f32.gmra.mxu0 %v3672_v9 }
 0x43f   : > { %4016 = vmatpush1.msra.mxu0 %v18594_v50  ;;  %13113 = vmatprep.mubr.msk.f32.mxu0 %vm3676_vm3, %v3675_v0 }
 0x440   : > { %4017 = vmatprep.subr.mxu0 %v22473_v43 }
 0x441   : > { %4018 = vmatpush1.msra.mxu0 %v18599_v10 }
 0x442   : > { %4019 = vmatprep.subr.mxu0 %v22473_v43  ;;  %3801 = vmatmul.mubr.f32.gmra.mxu0 %v3674_v39 }
 0x443   : > { %4020 = vmatpush1.msra.mxu0 %v18604_v2  ;;  %13139 = vmatprep.mubr.msk.f32.mxu0 %vm3676_vm3, %v13124_v54 }
 0x444   : > { %4021 = vmatprep.subr.mxu0 %v22473_v43 }
 0x445   : > { %4022 = vmatpush1.msra.mxu0 %v18609_v63 }
 0x446   : > { %4051 = vmatprep.subr.mxu0 %v22473_v43 }
 0x447   : > { %4052 = vmatpush2.msra.mxu0 %v18613_v45 }
 0x448   : > { %4053 = vmatprep.subr.mxu0 %v22473_v43 }
 0x449   : > { %4054 = vmatpush2.msra.mxu0 %v18617_v6 }
 0x44a   : > { %4280 = vmatprep.subr.mxu0 %v22473_v43  ;;  %4056 = vmatmul.mubr.f32.vlgmr.msra.gmra.mxu0 %v13123_v53 }
 0x44b   : > { %4281 = vmatpush1.msra.mxu0 %v18532_v23  ;;  %13140 = vmatprep.mubr.msk.f32.mxu0 %vm3676_vm3, %v13126_v36 }
 0x44c   : > { %4282 = vmatprep.subr.mxu0 %v22473_v43 }
 0x44d   : > { %4283 = vmatpush1.msra.mxu0 %v18539_v62 }
 0x44e   : > { %4284 = vmatprep.subr.mxu0 %v22473_v43  ;;  %4061 = vmatmul.mubr.f32.gmra.mxu0 %v13125_v20 }
 0x44f   : > { %4285 = vmatpush1.msra.mxu0 %v18546_v33  ;;  %13141 = vmatprep.mubr.msk.f32.mxu0 %vm3676_vm3, %v13128_v8 }
 0x450   : > { %4286 = vmatprep.subr.mxu0 %v22473_v43 }
 0x451   : > { %4287 = vmatpush1.msra.mxu0 %v18553_v37 }
 0x452   : > { %4288 = vmatprep.subr.mxu0 %v22473_v43  ;;  %4066 = vmatmul.mubr.f32.gmra.mxu0 %v13127_v11 }
 0x453   : > { %4289 = vmatpush1.msra.mxu0 %v18557_v47  ;;  %13142 = vmatprep.mubr.msk.f32.mxu0 %vm3676_vm3, %v13130_v48 }
 0x454   : > { %4290 = vmatprep.subr.mxu0 %v22473_v43 }
 0x455   : > { %4291 = vmatpush1.msra.mxu0 %v18561_v14 }
 0x456   : > { %4292 = vmatprep.subr.mxu0 %v22473_v43  ;;  %4071 = vmatmul.mubr.f32.gmra.mxu0 %v13129_v32 }
 0x457   : > { %4293 = vmatpush1.msra.mxu0 %v18565_v51  ;;  %13143 = vmatprep.mubr.msk.f32.mxu0 %vm3676_vm3, %v13132_v15 }
 0x458   : > { %4294 = vmatprep.subr.mxu0 %v22473_v43 }
 0x459   : > { %4295 = vmatpush1.msra.mxu0 %v18569_v24 }
 0x45a   : > { %4296 = vmatprep.subr.mxu0 %v22473_v43  ;;  %4076 = vmatmul.mubr.f32.gmra.mxu0 %v13131_v29 }
 0x45b   : > { %4297 = vmatpush1.msra.mxu0 %v18574_v57  ;;  %13144 = vmatprep.mubr.msk.f32.mxu0 %vm3676_vm3, %v13134_v3 }
 0x45c   : > { %4298 = vmatprep.subr.mxu0 %v22473_v43 }
 0x45d   : > { %4299 = vmatpush1.msra.mxu0 %v18579_v27 }
 0x45e   : > { %4300 = vmatprep.subr.mxu0 %v22473_v43  ;;  %4081 = vmatmul.mubr.f32.gmra.mxu0 %v13133_v31  ;;  %v13182_v31 = vld [vmem:[%s22116_s6 + $0x20] sm:$0xff] }
 0x45f   : > { %4301 = vmatpush1.msra.mxu0 %v18584_v22  ;;  %13145 = vmatprep.mubr.msk.f32.mxu0 %vm3676_vm3, %v13136_v5 }
 0x460   : > { %4302 = vmatprep.subr.mxu0 %v22473_v43 }
 0x461   : > { %4303 = vmatpush1.msra.mxu0 %v18589_v42 }
 0x462   : > { %4304 = vmatprep.subr.mxu0 %v22473_v43  ;;  %4086 = vmatmul.mubr.f32.gmra.mxu0 %v13135_v60 }
 0x463   : > { %4305 = vmatpush1.msra.mxu0 %v18594_v50  ;;  %13146 = vmatprep.mubr.msk.f32.mxu0 %vm3676_vm3, %v13138_v44 }
 0x464   : > { %4306 = vmatprep.subr.mxu0 %v22473_v43 }
 0x465   : > { %4307 = vmatpush1.msra.mxu0 %v18599_v10 }
 0x466   : > { %4308 = vmatprep.subr.mxu0 %v22473_v43  ;;  %4091 = vmatmul.mubr.f32.gmra.mxu0 %v13137_v52 }
 0x467   : > { %4309 = vmatpush1.msra.mxu0 %v18604_v2  ;;  %13174 = vmatprep.mubr.msk.f32.mxu0 %vm3676_vm3, %v13159_v26 }
 0x468   : > { %4310 = vmatprep.subr.mxu0 %v22473_v43 }
 0x469   : > { %4311 = vmatpush1.msra.mxu0 %v18609_v63 }
 0x46a   : > { %4340 = vmatprep.subr.mxu0 %v22473_v43 }
 0x46b   : > { %4341 = vmatpush2.msra.mxu0 %v18613_v45 }
 0x46c   : > { %4342 = vmatprep.subr.mxu0 %v22473_v43 }
 0x46d   : > { %4343 = vmatpush2.msra.mxu0 %v18617_v6 }
 0x46e   : > { %4345 = vmatmul.mubr.f32.vlgmr.msra.gmra.mxu0 %v13158_v19 }
 0x46f   : > { %13175 = vmatprep.mubr.msk.f32.mxu0 %vm3676_vm3, %v13161_v56 }
 0x472   : > { %4350 = vmatmul.mubr.f32.gmra.mxu0 %v13160_v55 }
 0x473   : > { %13176 = vmatprep.mubr.msk.f32.mxu0 %vm3676_vm3, %v13163_v1 }
 0x476   : > { %4355 = vmatmul.mubr.f32.gmra.mxu0 %v13162_v13 }
 0x477   : > { %13177 = vmatprep.mubr.msk.f32.mxu0 %vm3676_vm3, %v13165_v49 }
 0x47a   : > { %4360 = vmatmul.mubr.f32.gmra.mxu0 %v13164_v4 }
 0x47b   : > { %13178 = vmatprep.mubr.msk.f32.mxu0 %vm3676_vm3, %v13167_v41 }
 0x47e   : > { %4365 = vmatmul.mubr.f32.gmra.mxu0 %v13166_v21 }
 0x47f   : > { %13179 = vmatprep.mubr.msk.f32.mxu0 %vm3676_vm3, %v13169_v18 }
 0x482   : > { %4370 = vmatmul.mubr.f32.gmra.mxu0 %v13168_v16 }
 0x483   : > { %13180 = vmatprep.mubr.msk.f32.mxu0 %vm3676_vm3, %v13171_v61 }
 0x486   : > { %4375 = vmatmul.mubr.f32.gmra.mxu0 %v13170_v40 }
 0x487   : > { %13181 = vmatprep.mubr.msk.f32.mxu0 %vm3676_vm3, %v13173_v12 }
 0x48a   : > { %4380 = vmatmul.mubr.f32.gmra.mxu0 %v13172_v30 }
 0x4e6   : > { %v3767_v35 = vpop.f32.mrf.mxu0 }
 0x4e7   : > { %14893 = vmatprep.mubr.msk.f32.mxu1 %vm3808_vm5, %v3767_v35 }
 0x4e8   : > { %v3769_v34 = vpop.f32.mrf.mxu0 }
 0x4ea   : > { %v3772_v46 = vpop.f32.mrf.mxu0 }
 0x4eb   : > { %14894 = vmatmul.mubr.msk.f32.vlgmr.msra.gmra.mxu1 %vm3808_vm5, %v3772_v46 }
 0x4ec   : > { %v3774_v7 = vpop.f32.mrf.mxu0  ;;  %14906 = vmatpush3.msk.msra.mxu1 %vm3833_vm4, %v13148_v58 }
 0x4ed   : > { %14907 = vmatprep.subr.mxu1 %v13147_v59  ;;  %v13194_v7 = vld [vmem:[%s22112_s2 + $0x188] sm:$0xff] }
 0x4ee   : > { %v3777_v17 = vpop.f32.mrf.mxu0  ;;  %14908 = vmatpush3.msra.mxu1 %v13147_v59 }
 0x4ef   : > { %14896 = vmatprep.mubr.msk.f32.mxu1 %vm3808_vm5, %v3777_v17  ;;  %14921 = vmatprep.subr.msk.mxu1 %vm3833_vm4, %v13183_v38 }
 0x4f0   : > { %v3779_v9 = vpop.f32.mrf.mxu0 }
 0x4f1   : > { %v13193_v9 = vld [vmem:[%s22112_s2 + $0x180] sm:$0xff] }
 0x4f2   : > { %v3782_v0 = vpop.f32.mrf.mxu0 }
 0x4f3   : > { %14897 = vmatmul.mubr.msk.f32.gmra.mxu1 %vm3808_vm5, %v3782_v0  ;;  %v13196_v0 = vld [vmem:[%s22112_s2 + $0x198] sm:$0xff] }
 0x4f4   : > { %v3784_v39 = vpop.f32.mrf.mxu0 }
 0x4f5   : > { %v13195_v39 = vld [vmem:[%s22112_s2 + $0x190] sm:$0xff] }
 0x4f6   : > { %v3787_v54 = vpop.f32.mrf.mxu0 }
 0x4f7   : > { %14899 = vmatprep.mubr.msk.f32.mxu1 %vm3808_vm5, %v3787_v54  ;;  %v13198_v54 = vld [vmem:[%s22112_s2 + $0x1a8] sm:$0xff] }
 0x4f8   : > { %v3789_v53 = vpop.f32.mrf.mxu0 }
 0x4f9   : > { %v13197_v53 = vld [vmem:[%s22112_s2 + $0x1a0] sm:$0xff] }
 0x4fa   : > { %v3792_v36 = vpop.f32.mrf.mxu0 }
 0x4fb   : > { %14900 = vmatmul.mubr.msk.f32.gmra.mxu1 %vm3808_vm5, %v3792_v36  ;;  %v13200_v36 = vld [vmem:[%s22112_s2 + $0x1b8] sm:$0xff] }
 0x4fc   : > { %v3794_v20 = vpop.f32.mrf.mxu0 }
 0x4fd   : > { %v13199_v20 = vld [vmem:[%s22112_s2 + $0x1b0] sm:$0xff] }
 0x4fe   : > { %v3797_v8 = vpop.f32.mrf.mxu0 }
 0x4ff   : > { %14902 = vmatprep.mubr.msk.f32.mxu1 %vm3808_vm5, %v3797_v8  ;;  %v13202_v8 = vld [vmem:[%s22112_s2 + $0x1c8] sm:$0xff] }
 0x500   : > { %v3799_v11 = vpop.f32.mrf.mxu0 }
 0x501   : > { %v13201_v11 = vld [vmem:[%s22112_s2 + $0x1c0] sm:$0xff] }
 0x502   : > { %v3802_v48 = vpop.f32.mrf.mxu0 }
 0x503   : > { %14903 = vmatmul.mubr.msk.f32.gmra.mxu1 %vm3808_vm5, %v3802_v48  ;;  %v13204_v48 = vld [vmem:[%s22112_s2 + $0x1d8] sm:$0xff] }
 0x504   : > { %v3804_v32 = vpop.f32.mrf.mxu0 }
 0x505   : > { %v13203_v32 = vld [vmem:[%s22112_s2 + $0x1d0] sm:$0xff] }
 0x50a   : > { %v4057_v15 = vpop.f32.mrf.mxu0 }
 0x50b   : > { %14909 = vmatprep.mubr.msk.f32.mxu1 %vm3808_vm5, %v4057_v15  ;;  %v13206_v15 = vld [vmem:[%s22112_s2 + $0x1e8] sm:$0xff] }
 0x50c   : > { %v4059_v29 = vpop.f32.mrf.mxu0 }
 0x50d   : > { %v13205_v29 = vld [vmem:[%s22112_s2 + $0x1e0] sm:$0xff] }
 0x50e   : > { %v4062_v3 = vpop.f32.mrf.mxu0 }
 0x50f   : > { %14910 = vmatmul.mubr.msk.f32.vlgmr.msra.gmra.mxu1 %vm3808_vm5, %v4062_v3  ;;  %v13208_v3 = vld [vmem:[%s22112_s2 + $0x1f8] sm:$0xff] }
 0x510   : > { %v4064_v5 = vpop.f32.mrf.mxu0  ;;  %14922 = vmatpush3.msk.msra.mxu1 %vm3833_vm4, %v13183_v38 }
 0x511   : > { %14923 = vmatprep.subr.mxu1 %v13182_v31  ;;  %v13229_v5 = vld [vmem:[%s22112_s2 + $0x208] sm:$0xff] }
 0x512   : > { %v4067_v60 = vpop.f32.mrf.mxu0  ;;  %14924 = vmatpush3.msra.mxu1 %v13182_v31  ;;  %v13207_v31 = vld [vmem:[%s22112_s2 + $0x1f0] sm:$0xff] }
 0x513   : > { %14912 = vmatprep.mubr.msk.f32.mxu1 %vm3808_vm5, %v4067_v60  ;;  %4569 = vmatprep.subr.mxu1 %v22473_v43  ;;  %v13228_v60 = vld [vmem:[%s22112_s2 + $0x200] sm:$0xff] }
 0x514   : > { %v4069_v44 = vpop.f32.mrf.mxu0 }
 0x515   : > { %v13231_v44 = vld [vmem:[%s22112_s2 + $0x218] sm:$0xff] }
 0x516   : > { %v4072_v52 = vpop.f32.mrf.mxu0 }
 0x517   : > { %14913 = vmatmul.mubr.msk.f32.gmra.mxu1 %vm3808_vm5, %v4072_v52  ;;  %v13230_v52 = vld [vmem:[%s22112_s2 + $0x210] sm:$0xff] }
 0x518   : > { %v4074_v26 = vpop.f32.mrf.mxu0 }
 0x519   : > { %v13233_v26 = vld [vmem:[%s22112_s2 + $0x228] sm:$0xff] }
 0x51a   : > { %v4077_v19 = vpop.f32.mrf.mxu0 }
 0x51b   : > { %14915 = vmatprep.mubr.msk.f32.mxu1 %vm3808_vm5, %v4077_v19  ;;  %v13232_v19 = vld [vmem:[%s22112_s2 + $0x220] sm:$0xff] }
 0x51c   : > { %v4079_v56 = vpop.f32.mrf.mxu0 }
 0x51d   : > { %v13235_v56 = vld [vmem:[%s22112_s2 + $0x238] sm:$0xff] }
 0x51e   : > { %v4082_v55 = vpop.f32.mrf.mxu0 }
 0x51f   : > { %14916 = vmatmul.mubr.msk.f32.gmra.mxu1 %vm3808_vm5, %v4082_v55  ;;  %v13234_v55 = vld [vmem:[%s22112_s2 + $0x230] sm:$0xff] }
 0x520   : > { %v4084_v1 = vpop.f32.mrf.mxu0 }
 0x521   : > { %v13237_v1 = vld [vmem:[%s22112_s2 + $0x248] sm:$0xff] }
 0x522   : > { %v4087_v13 = vpop.f32.mrf.mxu0 }
 0x523   : > { %14918 = vmatprep.mubr.msk.f32.mxu1 %vm3808_vm5, %v4087_v13  ;;  %v13236_v13 = vld [vmem:[%s22112_s2 + $0x240] sm:$0xff] }
 0x524   : > { %v4089_v49 = vpop.f32.mrf.mxu0 }
 0x525   : > { %v13239_v49 = vld [vmem:[%s22112_s2 + $0x258] sm:$0xff] }
 0x526   : > { %v4092_v28 = vpop.f32.mrf.mxu0 }
 0x527   : > { %14919 = vmatmul.mubr.msk.f32.gmra.mxu1 %vm3808_vm5, %v4092_v28  ;;  %v13238_v28 = vld [vmem:[%s22112_s2 + $0x250] sm:$0xff] }
 0x528   : > { %v4094_v4 = vpop.f32.mrf.mxu0 }
 0x529   : > { %v13241_v4 = vld [vmem:[%s22112_s2 + $0x268] sm:$0xff] }
 0x52e   : > { %v4346_v25 = vpop.f32.mrf.mxu0 }
 0x52f   : > { %14925 = vmatprep.mubr.msk.f32.mxu1 %vm3808_vm5, %v4346_v25  ;;  %v13240_v25 = vld [vmem:[%s22112_s2 + $0x260] sm:$0xff] }
 0x530   : > { %v4348_v41 = vpop.f32.mrf.mxu0 }
 0x531   : > { %v13243_v41 = vld [vmem:[%s22112_s2 + $0x278] sm:$0xff] }
 0x532   : > { %v4351_v21 = vpop.f32.mrf.mxu0 }
 0x533   : > { %14926 = vmatmul.mubr.msk.f32.vlgmr.msra.gmra.mxu1 %vm3808_vm5, %v4351_v21  ;;  %v13242_v21 = vld [vmem:[%s22112_s2 + $0x270] sm:$0xff] }
 0x534   : > { %4570 = vmatpush1.msra.mxu1 %v18532_v23  ;;  %v4353_v18 = vpop.f32.mrf.mxu0 }
 0x535   : > { %4571 = vmatprep.subr.mxu1 %v22473_v43  ;;  %v13218_v18 = vld [vmem:[%s22116_s6 + $0x38] sm:$0x3] }
 0x536   : > { %4572 = vmatpush1.msra.mxu1 %v18539_v62  ;;  %v4356_v16 = vpop.f32.mrf.mxu0  ;;  %14937 = vmatprep.subr.msk.mxu0 %vm3833_vm4, %v13218_v18 }
 0x537   : > { %4573 = vmatprep.subr.mxu1 %v22473_v43  ;;  %14928 = vmatprep.mubr.msk.f32.mxu1 %vm3808_vm5, %v4356_v16  ;;  %v13217_v16 = vld [vmem:[%s22116_s6 + $0x30] sm:$0xff] }
 0x538   : > { %4574 = vmatpush1.msra.mxu1 %v18546_v33  ;;  %v4358_v61 = vpop.f32.mrf.mxu0  ;;  %14938 = vmatpush3.msk.msra.mxu0 %vm3833_vm4, %v13218_v18 }
 0x539   : > { %4575 = vmatprep.subr.mxu1 %v22473_v43  ;;  %14939 = vmatprep.subr.mxu0 %v13217_v16 }
 0x53a   : > { %4576 = vmatpush1.msra.mxu1 %v18553_v37  ;;  %v4361_v40 = vpop.f32.mrf.mxu0  ;;  %14940 = vmatpush3.msra.mxu0 %v13217_v16 }
 0x53b   : > { %4577 = vmatprep.subr.mxu1 %v22473_v43  ;;  %14929 = vmatmul.mubr.msk.f32.gmra.mxu1 %vm3808_vm5, %v4361_v40 }
 0x53c   : > { %4578 = vmatpush1.msra.mxu1 %v18557_v47  ;;  %v4363_v12 = vpop.f32.mrf.mxu0 }
 0x53d   : > { %4579 = vmatprep.subr.mxu1 %v22473_v43  ;;  %v13253_v12 = vld [vmem:[%s22116_s6 + $0x48] sm:$0x3] }
 0x53e   : > { %4580 = vmatpush1.msra.mxu1 %v18561_v14  ;;  %v4366_v30 = vpop.f32.mrf.mxu0  ;;  %14953 = vmatprep.subr.msk.mxu0 %vm3833_vm4, %v13253_v12 }
 0x53f   : > { %4581 = vmatprep.subr.mxu1 %v22473_v43  ;;  %14931 = vmatprep.mubr.msk.f32.mxu1 %vm3808_vm5, %v4366_v30 }
 0x540   : > { %4582 = vmatpush1.msra.mxu1 %v18565_v51  ;;  %v4368_v58 = vpop.f32.mrf.mxu0 }
 0x541   : > { %4583 = vmatprep.subr.mxu1 %v22473_v43 }
 0x542   : > { %4584 = vmatpush1.msra.mxu1 %v18569_v24  ;;  %v4371_v35 = vpop.f32.mrf.mxu0 }
 0x543   : > { %4585 = vmatprep.subr.mxu1 %v22473_v43  ;;  %14932 = vmatmul.mubr.msk.f32.gmra.mxu1 %vm3808_vm5, %v4371_v35 }
 0x544   : > { %4586 = vmatpush1.msra.mxu1 %v18574_v57  ;;  %v4373_v34 = vpop.f32.mrf.mxu0 }
 0x545   : > { %4587 = vmatprep.subr.mxu1 %v22473_v43 }
 0x546   : > { %4588 = vmatpush1.msra.mxu1 %v18579_v27  ;;  %v4376_v46 = vpop.f32.mrf.mxu0 }
 0x547   : > { %4589 = vmatprep.subr.mxu1 %v22473_v43  ;;  %14934 = vmatprep.mubr.msk.f32.mxu1 %vm3808_vm5, %v4376_v46 }
 0x548   : > { %4590 = vmatpush1.msra.mxu1 %v18584_v22  ;;  %v4378_v59 = vpop.f32.mrf.mxu0 }
 0x549   : > { %4591 = vmatprep.subr.mxu1 %v22473_v43  ;;  %v13105_v59 = vld [vmem:[%s22117_s7] ss:$0 sm:$0xff] }
 0x54a   : > { %4592 = vmatpush1.msra.mxu1 %v18589_v42  ;;  %v4381_v38 = vpop.f32.mrf.mxu0 }
 0x54b   : > { %4593 = vmatprep.subr.mxu1 %v22473_v43  ;;  %14935 = vmatmul.mubr.msk.f32.gmra.mxu1 %vm3808_vm5, %v4381_v38 }
 0x54c   : > { %4594 = vmatpush1.msra.mxu1 %v18594_v50  ;;  %13209 = vmatprep.mubr.msk.f32.mxu1 %vm3676_vm3, %v13194_v7  ;;  %v4383_v17 = vpop.f32.mrf.mxu0 }
 0x54d   : > { %4595 = vmatprep.subr.mxu1 %v22473_v43 }
 0x54e   : > { %4596 = vmatpush1.msra.mxu1 %v18599_v10 }
 0x54f   : > { %4597 = vmatprep.subr.mxu1 %v22473_v43 }
 0x550   : > { %4598 = vmatpush1.msra.mxu1 %v18604_v2 }
 0x551   : > { %4599 = vmatprep.subr.mxu1 %v22473_v43 }
 0x552   : > { %4600 = vmatpush1.msra.mxu1 %v18609_v63 }
 0x553   : > { %4629 = vmatprep.subr.mxu1 %v22473_v43 }
 0x554   : > { %4630 = vmatpush2.msra.mxu1 %v18613_v45 }
 0x555   : > { %4631 = vmatprep.subr.mxu1 %v22473_v43 }
 0x556   : > { %4632 = vmatpush2.msra.mxu1 %v18617_v6 }
 0x557   : > { %4634 = vmatmul.mubr.f32.vlgmr.msra.gmra.mxu1 %v13193_v9  ;;  %4858 = vmatprep.subr.mxu1 %v22473_v43 }
 0x558   : > { %4859 = vmatpush1.msra.mxu1 %v18532_v23  ;;  %13210 = vmatprep.mubr.msk.f32.mxu1 %vm3676_vm3, %v13196_v0 }
 0x559   : > { %4860 = vmatprep.subr.mxu1 %v22473_v43 }
 0x55a   : > { %4861 = vmatpush1.msra.mxu1 %v18539_v62 }
 0x55b   : > { %4639 = vmatmul.mubr.f32.gmra.mxu1 %v13195_v39  ;;  %4862 = vmatprep.subr.mxu1 %v22473_v43 }
 0x55c   : > { %4863 = vmatpush1.msra.mxu1 %v18546_v33  ;;  %13211 = vmatprep.mubr.msk.f32.mxu1 %vm3676_vm3, %v13198_v54 }
 0x55d   : > { %4864 = vmatprep.subr.mxu1 %v22473_v43 }
 0x55e   : > { %4865 = vmatpush1.msra.mxu1 %v18553_v37 }
 0x55f   : > { %4644 = vmatmul.mubr.f32.gmra.mxu1 %v13197_v53  ;;  %4866 = vmatprep.subr.mxu1 %v22473_v43 }
 0x560   : > { %4867 = vmatpush1.msra.mxu1 %v18557_v47  ;;  %13212 = vmatprep.mubr.msk.f32.mxu1 %vm3676_vm3, %v13200_v36 }
 0x561   : > { %4868 = vmatprep.subr.mxu1 %v22473_v43 }
 0x562   : > { %4869 = vmatpush1.msra.mxu1 %v18561_v14 }
 0x563   : > { %4649 = vmatmul.mubr.f32.gmra.mxu1 %v13199_v20  ;;  %4870 = vmatprep.subr.mxu1 %v22473_v43 }
 0x564   : > { %4871 = vmatpush1.msra.mxu1 %v18565_v51  ;;  %13213 = vmatprep.mubr.msk.f32.mxu1 %vm3676_vm3, %v13202_v8 }
 0x565   : > { %4872 = vmatprep.subr.mxu1 %v22473_v43 }
 0x566   : > { %4873 = vmatpush1.msra.mxu1 %v18569_v24 }
 0x567   : > { %4654 = vmatmul.mubr.f32.gmra.mxu1 %v13201_v11  ;;  %4874 = vmatprep.subr.mxu1 %v22473_v43 }
 0x568   : > { %4875 = vmatpush1.msra.mxu1 %v18574_v57  ;;  %13214 = vmatprep.mubr.msk.f32.mxu1 %vm3676_vm3, %v13204_v48 }
 0x569   : > { %4876 = vmatprep.subr.mxu1 %v22473_v43 }
 0x56a   : > { %4877 = vmatpush1.msra.mxu1 %v18579_v27 }
 0x56b   : > { %4659 = vmatmul.mubr.f32.gmra.mxu1 %v13203_v32  ;;  %4878 = vmatprep.subr.mxu1 %v22473_v43 }
 0x56c   : > { %4879 = vmatpush1.msra.mxu1 %v18584_v22  ;;  %13215 = vmatprep.mubr.msk.f32.mxu1 %vm3676_vm3, %v13206_v15 }
 0x56d   : > { %4880 = vmatprep.subr.mxu1 %v22473_v43 }
 0x56e   : > { %4881 = vmatpush1.msra.mxu1 %v18589_v42 }
 0x56f   : > { %4664 = vmatmul.mubr.f32.gmra.mxu1 %v13205_v29  ;;  %4882 = vmatprep.subr.mxu1 %v22473_v43 }
 0x570   : > { %4883 = vmatpush1.msra.mxu1 %v18594_v50  ;;  %13216 = vmatprep.mubr.msk.f32.mxu1 %vm3676_vm3, %v13208_v3 }
 0x571   : > { %4884 = vmatprep.subr.mxu1 %v22473_v43 }
 0x572   : > { %4885 = vmatpush1.msra.mxu1 %v18599_v10 }
 0x573   : > { %4669 = vmatmul.mubr.f32.gmra.mxu1 %v13207_v31  ;;  %4886 = vmatprep.subr.mxu1 %v22473_v43 }
 0x574   : > { %4887 = vmatpush1.msra.mxu1 %v18604_v2  ;;  %13244 = vmatprep.mubr.msk.f32.mxu1 %vm3676_vm3, %v13229_v5 }
 0x575   : > { %4888 = vmatprep.subr.mxu1 %v22473_v43 }
 0x576   : > { %4889 = vmatpush1.msra.mxu1 %v18609_v63 }
 0x577   : > { %4918 = vmatprep.subr.mxu1 %v22473_v43 }
 0x578   : > { %4919 = vmatpush2.msra.mxu1 %v18613_v45 }
 0x579   : > { %4920 = vmatprep.subr.mxu1 %v22473_v43 }
 0x57a   : > { %4921 = vmatpush2.msra.mxu1 %v18617_v6 }
 0x57b   : > { %4923 = vmatmul.mubr.f32.vlgmr.msra.gmra.mxu1 %v13228_v60 }
 0x57c   : > { %13245 = vmatprep.mubr.msk.f32.mxu1 %vm3676_vm3, %v13231_v44 }
 0x57f   : > { %4928 = vmatmul.mubr.f32.gmra.mxu1 %v13230_v52 }
 0x580   : > { %13246 = vmatprep.mubr.msk.f32.mxu1 %vm3676_vm3, %v13233_v26 }
 0x583   : > { %4933 = vmatmul.mubr.f32.gmra.mxu1 %v13232_v19 }
 0x584   : > { %13247 = vmatprep.mubr.msk.f32.mxu1 %vm3676_vm3, %v13235_v56 }
 0x587   : > { %4938 = vmatmul.mubr.f32.gmra.mxu1 %v13234_v55 }
 0x588   : > { %13248 = vmatprep.mubr.msk.f32.mxu1 %vm3676_vm3, %v13237_v1 }
 0x58b   : > { %4943 = vmatmul.mubr.f32.gmra.mxu1 %v13236_v13 }
 0x58c   : > { %13249 = vmatprep.mubr.msk.f32.mxu1 %vm3676_vm3, %v13239_v49 }
 0x58f   : > { %4948 = vmatmul.mubr.f32.gmra.mxu1 %v13238_v28 }
 0x590   : > { %13250 = vmatprep.mubr.msk.f32.mxu1 %vm3676_vm3, %v13241_v4 }
 0x593   : > { %4953 = vmatmul.mubr.f32.gmra.mxu1 %v13240_v25 }
 0x594   : > { %13251 = vmatprep.mubr.msk.f32.mxu1 %vm3676_vm3, %v13243_v41  ;;  %v13252_v41 = vld [vmem:[%s22116_s6 + $0x40] sm:$0xff] }
 0x597   : > { %4958 = vmatmul.mubr.f32.gmra.mxu1 %v13242_v21 }
 0x5ab   : > { %v14895_v61 = vpop.f32.mrf.mxu1 }
 0x5ac   : > { %v3943_v38 = vadd.f32 %v14895_v61, %v13105_v59 }
 0x5ad   : > { %v19098_v40 = vpop.f32.mrf.mxu1 }
 0x5ae   : > { %22479 = vst [vmem:[#allocation44_spill] sm:$0xff] %v19098_v40 }
 0x5b3   : > { %v14898_v30 = vpop.f32.mrf.mxu1 }
 0x5b4   : > { %v3945_v39 = vadd.f32 %v14898_v30, %v13105_v59 }
 0x5b5   : > { %v19104_v58 = vpop.f32.mrf.mxu1 }
 0x5bb   : > { %v14901_v35 = vpop.f32.mrf.mxu1 }
 0x5bc   : > { %v3947_v20 = vadd.f32 %v14901_v35, %v13105_v59 }
 0x5bd   : > { %v19106_v34 = vpop.f32.mrf.mxu1 }
 0x5c3   : > { %v14904_v46 = vpop.f32.mrf.mxu1 }
 0x5c4   : > { %v3949_v32 = vadd.f32 %v14904_v46, %v13105_v59 }
 0x5c5   : > { %v19111_v7 = vpop.f32.mrf.mxu1 }
 0x5cf   : > { %v14911_v17 = vpop.f32.mrf.mxu1 }
 0x5d0   : > { %v4232_v9 = vadd.f32 %v14911_v17, %v3943_v38 }
 0x5d1   : > { %v19113_v0 = vpop.f32.mrf.mxu1 }
 0x5d2   : > { %22480 = vst [vmem:[#allocation45_spill] sm:$0xff] %v19113_v0 }
 0x5d7   : > { %v14914_v54 = vpop.f32.mrf.mxu1 }
 0x5d8   : > { %v4234_v53 = vadd.f32 %v14914_v54, %v3945_v39 }
 0x5d9   : > { %v19115_v36 = vpop.f32.mrf.mxu1 }
 0x5df   : > { %v14917_v8 = vpop.f32.mrf.mxu1 }
 0x5e0   : > { %v4236_v11 = vadd.f32 %v14917_v8, %v3947_v20 }
 0x5e1   : > { %v19117_v48 = vpop.f32.mrf.mxu1 }
 0x5e7   : > { %v14920_v15 = vpop.f32.mrf.mxu1 }
 0x5e8   : > { %v4238_v29 = vadd.f32 %v14920_v15, %v3949_v32 }
 0x5e9   : > { %v19119_v3 = vpop.f32.mrf.mxu1 }
 0x5f3   : > { %v14927_v31 = vpop.f32.mrf.mxu1 }
 0x5f4   : > { %v19121_v5 = vadd.f32 %v14927_v31, %v4232_v9 }
 0x5f5   : > { %v19123_v60 = vpop.f32.mrf.mxu1 }
 0x5f6   : > { %22481 = vst [vmem:[#allocation46_spill] sm:$0xff] %v19123_v60 }
 0x5fb   : > { %v14930_v44 = vpop.f32.mrf.mxu1 }
 0x5fc   : > { %v19125_v52 = vadd.f32 %v14930_v44, %v4234_v53 }
 0x5fd   : > { %v19127_v26 = vpop.f32.mrf.mxu1 }
 0x603   : > { %v14933_v19 = vpop.f32.mrf.mxu1 }
 0x604   : > { %v19129_v56 = vadd.f32 %v14933_v19, %v4236_v11 }
 0x605   : > { %v19131_v55 = vpop.f32.mrf.mxu1 }
 0x60b   : > { %v14936_v1 = vpop.f32.mrf.mxu1 }
 0x60c   : > { %v19133_v13 = vadd.f32 %v14936_v1, %v4238_v29 }
 0x60d   : > { %v19135_v49 = vpop.f32.mrf.mxu1 }
 0x617   : > { %v4635_v28 = vpop.f32.mrf.mxu1 }
 0x618   : > { %14941 = vmatprep.mubr.msk.f32.mxu0 %vm3808_vm5, %v4635_v28 }
 0x619   : > { %v4637_v4 = vpop.f32.mrf.mxu1 }
 0x61b   : > { %v4640_v25 = vpop.f32.mrf.mxu1 }
 0x61c   : > { %14942 = vmatmul.mubr.msk.f32.vlgmr.msra.gmra.mxu0 %vm3808_vm5, %v4640_v25  ;;  %v13264_v25 = vld [vmem:[%s22112_s2 + $0x288] sm:$0xff] }
 0x61d   : > { %v4642_v21 = vpop.f32.mrf.mxu1  ;;  %14954 = vmatpush3.msk.msra.mxu0 %vm3833_vm4, %v13253_v12 }
 0x61e   : > { %14955 = vmatprep.subr.mxu0 %v13252_v41 }
 0x61f   : > { %v4645_v18 = vpop.f32.mrf.mxu1  ;;  %14956 = vmatpush3.msra.mxu0 %v13252_v41 }
 0x620   : > { %14944 = vmatprep.mubr.msk.f32.mxu0 %vm3808_vm5, %v4645_v18  ;;  %5147 = vmatprep.subr.mxu0 %v22473_v43  ;;  %v13263_v18 = vld [vmem:[%s22112_s2 + $0x280] sm:$0xff] }
 0x621   : > { %v4647_v16 = vpop.f32.mrf.mxu1 }
 0x622   : > { %v13266_v16 = vld [vmem:[%s22112_s2 + $0x298] sm:$0xff] }
 0x623   : > { %v4650_v61 = vpop.f32.mrf.mxu1 }
 0x624   : > { %14945 = vmatmul.mubr.msk.f32.gmra.mxu0 %vm3808_vm5, %v4650_v61  ;;  %v13265_v61 = vld [vmem:[%s22112_s2 + $0x290] sm:$0xff] }
 0x625   : > { %v4652_v30 = vpop.f32.mrf.mxu1 }
 0x626   : > { %v13268_v30 = vld [vmem:[%s22112_s2 + $0x2a8] sm:$0xff] }
 0x627   : > { %v4655_v35 = vpop.f32.mrf.mxu1 }
 0x628   : > { %14947 = vmatprep.mubr.msk.f32.mxu0 %vm3808_vm5, %v4655_v35  ;;  %v13267_v35 = vld [vmem:[%s22112_s2 + $0x2a0] sm:$0xff] }
 0x629   : > { %v4657_v46 = vpop.f32.mrf.mxu1 }
 0x62a   : > { %v13270_v46 = vld [vmem:[%s22112_s2 + $0x2b8] sm:$0xff] }
 0x62b   : > { %v4660_v59 = vpop.f32.mrf.mxu1 }
 0x62c   : > { %14948 = vmatmul.mubr.msk.f32.gmra.mxu0 %vm3808_vm5, %v4660_v59  ;;  %v13269_v59 = vld [vmem:[%s22112_s2 + $0x2b0] sm:$0xff] }
 0x62d   : > { %v4662_v12 = vpop.f32.mrf.mxu1 }
 0x62e   : > { %v13272_v12 = vld [vmem:[%s22112_s2 + $0x2c8] sm:$0xff] }
 0x62f   : > { %v4665_v38 = vpop.f32.mrf.mxu1 }
 0x630   : > { %14950 = vmatprep.mubr.msk.f32.mxu0 %vm3808_vm5, %v4665_v38  ;;  %v13271_v38 = vld [vmem:[%s22112_s2 + $0x2c0] sm:$0xff] }
 0x631   : > { %v4667_v17 = vpop.f32.mrf.mxu1 }
 0x632   : > { %v13274_v17 = vld [vmem:[%s22112_s2 + $0x2d8] sm:$0xff] }
 0x633   : > { %v4670_v9 = vpop.f32.mrf.mxu1 }
 0x634   : > { %14951 = vmatmul.mubr.msk.f32.gmra.mxu0 %vm3808_vm5, %v4670_v9  ;;  %v13273_v9 = vld [vmem:[%s22112_s2 + $0x2d0] sm:$0xff] }
 0x635   : > { %v4672_v39 = vpop.f32.mrf.mxu1 }
 0x636   : > { %v13276_v39 = vld [vmem:[%s22112_s2 + $0x2e8] sm:$0xff] }
 0x63b   : > { %v4924_v54 = vpop.f32.mrf.mxu1 }
 0x63c   : > { %14957 = vmatprep.mubr.msk.f32.mxu0 %vm3808_vm5, %v4924_v54  ;;  %v13275_v54 = vld [vmem:[%s22112_s2 + $0x2e0] sm:$0xff] }
 0x63d   : > { %v4926_v53 = vpop.f32.mrf.mxu1 }
 0x63e   : > { %v13278_v53 = vld [vmem:[%s22112_s2 + $0x2f8] sm:$0xff] }
 0x63f   : > { %v4929_v20 = vpop.f32.mrf.mxu1 }
 0x640   : > { %14958 = vmatmul.mubr.msk.f32.vlgmr.msra.gmra.mxu0 %vm3808_vm5, %v4929_v20  ;;  %v13277_v20 = vld [vmem:[%s22112_s2 + $0x2f0] sm:$0xff] }
 0x641   : > { %5148 = vmatpush1.msra.mxu0 %v18532_v23  ;;  %v4931_v8 = vpop.f32.mrf.mxu1 }
 0x642   : > { %5149 = vmatprep.subr.mxu0 %v22473_v43  ;;  %v13299_v8 = vld [vmem:[%s22112_s2 + $0x308] sm:$0xff] }
 0x643   : > { %5150 = vmatpush1.msra.mxu0 %v18539_v62  ;;  %v4934_v11 = vpop.f32.mrf.mxu1 }
 0x644   : > { %5151 = vmatprep.subr.mxu0 %v22473_v43  ;;  %14960 = vmatprep.mubr.msk.f32.mxu0 %vm3808_vm5, %v4934_v11  ;;  %v13298_v11 = vld [vmem:[%s22112_s2 + $0x300] sm:$0xff] }
 0x645   : > { %5152 = vmatpush1.msra.mxu0 %v18546_v33  ;;  %v4936_v32 = vpop.f32.mrf.mxu1 }
 0x646   : > { %5153 = vmatprep.subr.mxu0 %v22473_v43  ;;  %v13301_v32 = vld [vmem:[%s22112_s2 + $0x318] sm:$0xff] }
 0x647   : > { %5154 = vmatpush1.msra.mxu0 %v18553_v37  ;;  %v4939_v15 = vpop.f32.mrf.mxu1 }
 0x648   : > { %5155 = vmatprep.subr.mxu0 %v22473_v43  ;;  %14961 = vmatmul.mubr.msk.f32.gmra.mxu0 %vm3808_vm5, %v4939_v15  ;;  %v13300_v15 = vld [vmem:[%s22112_s2 + $0x310] sm:$0xff] }
 0x649   : > { %5156 = vmatpush1.msra.mxu0 %v18557_v47  ;;  %v4941_v29 = vpop.f32.mrf.mxu1 }
 0x64a   : > { %5157 = vmatprep.subr.mxu0 %v22473_v43  ;;  %v13303_v29 = vld [vmem:[%s22112_s2 + $0x328] sm:$0xff] }
 0x64b   : > { %5158 = vmatpush1.msra.mxu0 %v18561_v14  ;;  %v4944_v31 = vpop.f32.mrf.mxu1 }
 0x64c   : > { %5159 = vmatprep.subr.mxu0 %v22473_v43  ;;  %14963 = vmatprep.mubr.msk.f32.mxu0 %vm3808_vm5, %v4944_v31  ;;  %v13302_v31 = vld [vmem:[%s22112_s2 + $0x320] sm:$0xff] }
 0x64d   : > { %5160 = vmatpush1.msra.mxu0 %v18565_v51  ;;  %v4946_v44 = vpop.f32.mrf.mxu1 }
 0x64e   : > { %5161 = vmatprep.subr.mxu0 %v22473_v43  ;;  %v13305_v44 = vld [vmem:[%s22112_s2 + $0x338] sm:$0xff] }
 0x64f   : > { %5162 = vmatpush1.msra.mxu0 %v18569_v24  ;;  %v4949_v19 = vpop.f32.mrf.mxu1 }
 0x650   : > { %5163 = vmatprep.subr.mxu0 %v22473_v43  ;;  %14964 = vmatmul.mubr.msk.f32.gmra.mxu0 %vm3808_vm5, %v4949_v19  ;;  %v13304_v19 = vld [vmem:[%s22112_s2 + $0x330] sm:$0xff] }
 0x651   : > { %5164 = vmatpush1.msra.mxu0 %v18574_v57  ;;  %v4951_v1 = vpop.f32.mrf.mxu1 }
 0x652   : > { %5165 = vmatprep.subr.mxu0 %v22473_v43  ;;  %v13307_v1 = vld [vmem:[%s22112_s2 + $0x348] sm:$0xff] }
 0x653   : > { %5166 = vmatpush1.msra.mxu0 %v18579_v27  ;;  %v4954_v28 = vpop.f32.mrf.mxu1 }
 0x654   : > { %5167 = vmatprep.subr.mxu0 %v22473_v43  ;;  %14966 = vmatprep.mubr.msk.f32.mxu0 %vm3808_vm5, %v4954_v28  ;;  %v13306_v28 = vld [vmem:[%s22112_s2 + $0x340] sm:$0xff] }
 0x655   : > { %5168 = vmatpush1.msra.mxu0 %v18584_v22  ;;  %v4956_v4 = vpop.f32.mrf.mxu1 }
 0x656   : > { %5169 = vmatprep.subr.mxu0 %v22473_v43  ;;  %v13309_v4 = vld [vmem:[%s22112_s2 + $0x358] sm:$0xff] }
 0x657   : > { %5170 = vmatpush1.msra.mxu0 %v18589_v42  ;;  %v4959_v41 = vpop.f32.mrf.mxu1 }
 0x658   : > { %5171 = vmatprep.subr.mxu0 %v22473_v43  ;;  %14967 = vmatmul.mubr.msk.f32.gmra.mxu0 %vm3808_vm5, %v4959_v41  ;;  %v13311_v41 = vld [vmem:[%s22112_s2 + $0x368] sm:$0xff] }
 0x659   : > { %5172 = vmatpush1.msra.mxu0 %v18594_v50  ;;  %13279 = vmatprep.mubr.msk.f32.mxu0 %vm3676_vm3, %v13264_v25  ;;  %v4961_v21 = vpop.f32.mrf.mxu1  ;;  %v13308_v25 = vld [vmem:[%s22112_s2 + $0x350] sm:$0xff] }
 0x65a   : > { %5173 = vmatprep.subr.mxu0 %v22473_v43  ;;  %v13310_v21 = vld [vmem:[%s22112_s2 + $0x360] sm:$0xff] }
 0x65b   : > { %5174 = vmatpush1.msra.mxu0 %v18599_v10 }
 0x65c   : > { %5175 = vmatprep.subr.mxu0 %v22473_v43 }
 0x65d   : > { %5176 = vmatpush1.msra.mxu0 %v18604_v2 }
 0x65e   : > { %5177 = vmatprep.subr.mxu0 %v22473_v43 }
 0x65f   : > { %5178 = vmatpush1.msra.mxu0 %v18609_v63 }
 0x660   : > { %5207 = vmatprep.subr.mxu0 %v22473_v43 }
 0x661   : > { %5208 = vmatpush2.msra.mxu0 %v18613_v45 }
 0x662   : > { %5209 = vmatprep.subr.mxu0 %v22473_v43 }
 0x663   : > { %5210 = vmatpush2.msra.mxu0 %v18617_v6 }
 0x664   : > { %5212 = vmatmul.mubr.f32.vlgmr.msra.gmra.mxu0 %v13263_v18  ;;  %5436 = vmatprep.subr.mxu0 %v22473_v43  ;;  %v13313_v18 = vld [vmem:[%s22112_s2 + $0x378] sm:$0xff] }
 0x665   : > { %5437 = vmatpush1.msra.mxu0 %v18532_v23  ;;  %13280 = vmatprep.mubr.msk.f32.mxu0 %vm3676_vm3, %v13266_v16  ;;  %v13312_v16 = vld [vmem:[%s22112_s2 + $0x370] sm:$0xff] }
 0x666   : > { %5438 = vmatprep.subr.mxu0 %v22473_v43 }
 0x667   : > { %5439 = vmatpush1.msra.mxu0 %v18539_v62 }
 0x668   : > { %5217 = vmatmul.mubr.f32.gmra.mxu0 %v13265_v61  ;;  %5440 = vmatprep.subr.mxu0 %v22473_v43  ;;  %v13288_v61 = vld [vmem:[%s22116_s6 + $0x58] sm:$0x3] }
 0x669   : > { %5441 = vmatpush1.msra.mxu0 %v18546_v33  ;;  %13281 = vmatprep.mubr.msk.f32.mxu0 %vm3676_vm3, %v13268_v30  ;;  %v13287_v30 = vld [vmem:[%s22116_s6 + $0x50] sm:$0xff] }
 0x66a   : > { %5442 = vmatprep.subr.mxu0 %v22473_v43  ;;  %14969 = vmatprep.subr.msk.mxu1 %vm3833_vm4, %v13288_v61 }
 0x66b   : > { %5443 = vmatpush1.msra.mxu0 %v18553_v37  ;;  %14970 = vmatpush3.msk.msra.mxu1 %vm3833_vm4, %v13288_v61 }
 0x66c   : > { %5222 = vmatmul.mubr.f32.gmra.mxu0 %v13267_v35  ;;  %5444 = vmatprep.subr.mxu0 %v22473_v43  ;;  %v13323_v35 = vld [vmem:[%s22116_s6 + $0x68] sm:$0x3] }
 0x66d   : > { %5445 = vmatpush1.msra.mxu0 %v18557_v47  ;;  %13282 = vmatprep.mubr.msk.f32.mxu0 %vm3676_vm3, %v13270_v46 }
 0x66e   : > { %5446 = vmatprep.subr.mxu0 %v22473_v43  ;;  %14971 = vmatprep.subr.mxu1 %v13287_v30 }
 0x66f   : > { %5447 = vmatpush1.msra.mxu0 %v18561_v14  ;;  %14972 = vmatpush3.msra.mxu1 %v13287_v30 }
 0x670   : > { %5227 = vmatmul.mubr.f32.gmra.mxu0 %v13269_v59  ;;  %5448 = vmatprep.subr.mxu0 %v22473_v43 }
 0x671   : > { %5449 = vmatpush1.msra.mxu0 %v18565_v51  ;;  %13283 = vmatprep.mubr.msk.f32.mxu0 %vm3676_vm3, %v13272_v12 }
 0x672   : > { %5450 = vmatprep.subr.mxu0 %v22473_v43  ;;  %14985 = vmatprep.subr.msk.mxu1 %vm3833_vm4, %v13323_v35 }
 0x673   : > { %5451 = vmatpush1.msra.mxu0 %v18569_v24 }
 0x674   : > { %5232 = vmatmul.mubr.f32.gmra.mxu0 %v13271_v38  ;;  %5452 = vmatprep.subr.mxu0 %v22473_v43 }
 0x675   : > { %5453 = vmatpush1.msra.mxu0 %v18574_v57  ;;  %13284 = vmatprep.mubr.msk.f32.mxu0 %vm3676_vm3, %v13274_v17 }
 0x676   : > { %5454 = vmatprep.subr.mxu0 %v22473_v43 }
 0x677   : > { %5455 = vmatpush1.msra.mxu0 %v18579_v27 }
 0x678   : > { %5237 = vmatmul.mubr.f32.gmra.mxu0 %v13273_v9  ;;  %5456 = vmatprep.subr.mxu0 %v22473_v43 }
 0x679   : > { %5457 = vmatpush1.msra.mxu0 %v18584_v22  ;;  %13285 = vmatprep.mubr.msk.f32.mxu0 %vm3676_vm3, %v13276_v39 }
 0x67a   : > { %5458 = vmatprep.subr.mxu0 %v22473_v43 }
 0x67b   : > { %5459 = vmatpush1.msra.mxu0 %v18589_v42 }
 0x67c   : > { %5242 = vmatmul.mubr.f32.gmra.mxu0 %v13275_v54  ;;  %5460 = vmatprep.subr.mxu0 %v22473_v43 }
 0x67d   : > { %5461 = vmatpush1.msra.mxu0 %v18594_v50  ;;  %13286 = vmatprep.mubr.msk.f32.mxu0 %vm3676_vm3, %v13278_v53 }
 0x67e   : > { %5462 = vmatprep.subr.mxu0 %v22473_v43 }
 0x67f   : > { %5463 = vmatpush1.msra.mxu0 %v18599_v10 }
 0x680   : > { %5247 = vmatmul.mubr.f32.gmra.mxu0 %v13277_v20  ;;  %5464 = vmatprep.subr.mxu0 %v22473_v43 }
 0x681   : > { %5465 = vmatpush1.msra.mxu0 %v18604_v2  ;;  %13314 = vmatprep.mubr.msk.f32.mxu0 %vm3676_vm3, %v13299_v8 }
 0x682   : > { %5466 = vmatprep.subr.mxu0 %v22473_v43 }
 0x683   : > { %5467 = vmatpush1.msra.mxu0 %v18609_v63 }
 0x684   : > { %5496 = vmatprep.subr.mxu0 %v22473_v43 }
 0x685   : > { %5497 = vmatpush2.msra.mxu0 %v18613_v45 }
 0x686   : > { %5498 = vmatprep.subr.mxu0 %v22473_v43 }
 0x687   : > { %5499 = vmatpush2.msra.mxu0 %v18617_v6 }
 0x688   : > { %5501 = vmatmul.mubr.f32.vlgmr.msra.gmra.mxu0 %v13298_v11 }
 0x689   : > { %13315 = vmatprep.mubr.msk.f32.mxu0 %vm3676_vm3, %v13301_v32 }
 0x68c   : > { %5506 = vmatmul.mubr.f32.gmra.mxu0 %v13300_v15 }
 0x68d   : > { %13316 = vmatprep.mubr.msk.f32.mxu0 %vm3676_vm3, %v13303_v29 }
 0x690   : > { %5511 = vmatmul.mubr.f32.gmra.mxu0 %v13302_v31 }
 0x691   : > { %13317 = vmatprep.mubr.msk.f32.mxu0 %vm3676_vm3, %v13305_v44 }
 0x694   : > { %5516 = vmatmul.mubr.f32.gmra.mxu0 %v13304_v19 }
 0x695   : > { %13318 = vmatprep.mubr.msk.f32.mxu0 %vm3676_vm3, %v13307_v1 }
 0x698   : > { %5521 = vmatmul.mubr.f32.gmra.mxu0 %v13306_v28 }
 0x699   : > { %13319 = vmatprep.mubr.msk.f32.mxu0 %vm3676_vm3, %v13309_v4 }
 0x69c   : > { %5526 = vmatmul.mubr.f32.gmra.mxu0 %v13308_v25 }
 0x69d   : > { %13320 = vmatprep.mubr.msk.f32.mxu0 %vm3676_vm3, %v13311_v41 }
 0x6a0   : > { %5531 = vmatmul.mubr.f32.gmra.mxu0 %v13310_v21  ;;  %v13322_v21 = vld [vmem:[%s22116_s6 + $0x60] sm:$0xff] }
 0x6a1   : > { %13321 = vmatprep.mubr.msk.f32.mxu0 %vm3676_vm3, %v13313_v18 }
 0x6a4   : > { %5536 = vmatmul.mubr.f32.gmra.mxu0 %v13312_v16 }
 0x6dc   : > { %v14943_v46 = vpop.f32.mrf.mxu0 }
 0x6dd   : > { %v4810_v59 = vadd.f32 %v14943_v46, %v19121_v5 }
 0x6de   : > { %v19354_v12 = vpop.f32.mrf.mxu0 }
 0x6df   : > { %22482 = vst [vmem:[#allocation12_spill] sm:$0xff] %v19354_v12 }
 0x6e4   : > { %v14946_v38 = vpop.f32.mrf.mxu0 }
 0x6e5   : > { %v4812_v17 = vadd.f32 %v14946_v38, %v19125_v52 }
 0x6e6   : > { %v19357_v9 = vpop.f32.mrf.mxu0 }
 0x6ec   : > { %v14949_v39 = vpop.f32.mrf.mxu0 }
 0x6ed   : > { %v4814_v54 = vadd.f32 %v14949_v39, %v19129_v56 }
 0x6ee   : > { %v19360_v53 = vpop.f32.mrf.mxu0 }
 0x6f4   : > { %v14952_v20 = vpop.f32.mrf.mxu0 }
 0x6f5   : > { %v4816_v8 = vadd.f32 %v14952_v20, %v19133_v13 }
 0x6f6   : > { %v19363_v11 = vpop.f32.mrf.mxu0 }
 0x700   : > { %v14959_v32 = vpop.f32.mrf.mxu0 }
 0x701   : > { %v19365_v15 = vadd.f32 %v14959_v32, %v4810_v59 }
 0x702   : > { %v19367_v5 = vpop.f32.mrf.mxu0 }
 0x703   : > { %22483 = vst [vmem:[#allocation30_spill] sm:$0xff] %v19367_v5 }
 0x708   : > { %v14962_v29 = vpop.f32.mrf.mxu0 }
 0x709   : > { %v19369_v31 = vadd.f32 %v14962_v29, %v4812_v17 }
 0x70a   : > { %v19371_v52 = vpop.f32.mrf.mxu0 }
 0x710   : > { %v14965_v44 = vpop.f32.mrf.mxu0 }
 0x711   : > { %v19373_v19 = vadd.f32 %v14965_v44, %v4814_v54 }
 0x712   : > { %v19375_v56 = vpop.f32.mrf.mxu0 }
 0x718   : > { %v14968_v1 = vpop.f32.mrf.mxu0 }
 0x719   : > { %v19377_v28 = vadd.f32 %v14968_v1, %v4816_v8 }
 0x71a   : > { %v19379_v13 = vpop.f32.mrf.mxu0 }
 0x724   : > { %v5213_v4 = vpop.f32.mrf.mxu0 }
 0x725   : > { %14973 = vmatprep.mubr.msk.f32.mxu1 %vm3808_vm5, %v5213_v4 }
 0x726   : > { %v5215_v25 = vpop.f32.mrf.mxu0 }
 0x728   : > { %v5218_v41 = vpop.f32.mrf.mxu0 }
 0x729   : > { %14974 = vmatmul.mubr.msk.f32.vlgmr.msra.gmra.mxu1 %vm3808_vm5, %v5218_v41 }
 0x72a   : > { %v5220_v18 = vpop.f32.mrf.mxu0  ;;  %14986 = vmatpush3.msk.msra.mxu1 %vm3833_vm4, %v13323_v35 }
 0x72b   : > { %14987 = vmatprep.subr.mxu1 %v13322_v21 }
 0x72c   : > { %v5223_v16 = vpop.f32.mrf.mxu0  ;;  %14988 = vmatpush3.msra.mxu1 %v13322_v21 }
 0x72d   : > { %14976 = vmatprep.mubr.msk.f32.mxu1 %vm3808_vm5, %v5223_v16  ;;  %5725 = vmatprep.subr.mxu1 %v22473_v43 }
 0x72e   : > { %v5225_v61 = vpop.f32.mrf.mxu0 }
 0x730   : > { %v5228_v30 = vpop.f32.mrf.mxu0 }
 0x731   : > { %14977 = vmatmul.mubr.msk.f32.gmra.mxu1 %vm3808_vm5, %v5228_v30 }
 0x732   : > { %v5230_v46 = vpop.f32.mrf.mxu0 }
 0x734   : > { %v5233_v59 = vpop.f32.mrf.mxu0 }
 0x735   : > { %14979 = vmatprep.mubr.msk.f32.mxu1 %vm3808_vm5, %v5233_v59 }
 0x736   : > { %v5235_v38 = vpop.f32.mrf.mxu0 }
 0x737   : > { %v13334_v38 = vld [vmem:[%s22112_s2 + $0x388] sm:$0xff] }
 0x738   : > { %v5238_v17 = vpop.f32.mrf.mxu0 }
 0x739   : > { %14980 = vmatmul.mubr.msk.f32.gmra.mxu1 %vm3808_vm5, %v5238_v17 }
 0x73a   : > { %v5240_v35 = vpop.f32.mrf.mxu0 }
 0x73c   : > { %v5243_v39 = vpop.f32.mrf.mxu0 }
 0x73d   : > { %14982 = vmatprep.mubr.msk.f32.mxu1 %vm3808_vm5, %v5243_v39  ;;  %v13333_v39 = vld [vmem:[%s22112_s2 + $0x380] sm:$0xff] }
 0x73e   : > { %v5245_v54 = vpop.f32.mrf.mxu0 }
 0x73f   : > { %v13336_v54 = vld [vmem:[%s22112_s2 + $0x398] sm:$0xff] }
 0x740   : > { %v5248_v20 = vpop.f32.mrf.mxu0 }
 0x741   : > { %14983 = vmatmul.mubr.msk.f32.gmra.mxu1 %vm3808_vm5, %v5248_v20  ;;  %v13335_v20 = vld [vmem:[%s22112_s2 + $0x390] sm:$0xff] }
 0x742   : > { %v5250_v8 = vpop.f32.mrf.mxu0 }
 0x743   : > { %v13338_v8 = vld [vmem:[%s22112_s2 + $0x3a8] sm:$0xff] }
 0x748   : > { %v5502_v32 = vpop.f32.mrf.mxu0 }
 0x749   : > { %14989 = vmatprep.mubr.msk.f32.mxu1 %vm3808_vm5, %v5502_v32  ;;  %v13337_v32 = vld [vmem:[%s22112_s2 + $0x3a0] sm:$0xff] }
 0x74a   : > { %v5504_v29 = vpop.f32.mrf.mxu0 }
 0x74b   : > { %v13340_v29 = vld [vmem:[%s22112_s2 + $0x3b8] sm:$0xff] }
 0x74c   : > { %v5507_v44 = vpop.f32.mrf.mxu0 }
 0x74d   : > { %14990 = vmatmul.mubr.msk.f32.vlgmr.msra.gmra.mxu1 %vm3808_vm5, %v5507_v44  ;;  %v13339_v44 = vld [vmem:[%s22112_s2 + $0x3b0] sm:$0xff] }
 0x74e   : > { %5726 = vmatpush1.msra.mxu1 %v18532_v23  ;;  %v5509_v1 = vpop.f32.mrf.mxu0 }
 0x74f   : > { %5727 = vmatprep.subr.mxu1 %v22473_v43  ;;  %v13342_v1 = vld [vmem:[%s22112_s2 + $0x3c8] sm:$0xff] }
 0x750   : > { %5728 = vmatpush1.msra.mxu1 %v18539_v62  ;;  %v5512_v4 = vpop.f32.mrf.mxu0 }
 0x751   : > { %5729 = vmatprep.subr.mxu1 %v22473_v43  ;;  %14992 = vmatprep.mubr.msk.f32.mxu1 %vm3808_vm5, %v5512_v4  ;;  %v13341_v4 = vld [vmem:[%s22112_s2 + $0x3c0] sm:$0xff] }
 0x752   : > { %5730 = vmatpush1.msra.mxu1 %v18546_v33  ;;  %v5514_v25 = vpop.f32.mrf.mxu0 }
 0x753   : > { %5731 = vmatprep.subr.mxu1 %v22473_v43  ;;  %v13344_v25 = vld [vmem:[%s22112_s2 + $0x3d8] sm:$0xff] }
 0x754   : > { %5732 = vmatpush1.msra.mxu1 %v18553_v37  ;;  %v5517_v41 = vpop.f32.mrf.mxu0 }
 0x755   : > { %5733 = vmatprep.subr.mxu1 %v22473_v43  ;;  %14993 = vmatmul.mubr.msk.f32.gmra.mxu1 %vm3808_vm5, %v5517_v41  ;;  %v13343_v41 = vld [vmem:[%s22112_s2 + $0x3d0] sm:$0xff] }
 0x756   : > { %5734 = vmatpush1.msra.mxu1 %v18557_v47  ;;  %v5519_v21 = vpop.f32.mrf.mxu0 }
 0x757   : > { %5735 = vmatprep.subr.mxu1 %v22473_v43  ;;  %v13346_v21 = vld [vmem:[%s22112_s2 + $0x3e8] sm:$0xff] }
 0x758   : > { %5736 = vmatpush1.msra.mxu1 %v18561_v14  ;;  %v5522_v18 = vpop.f32.mrf.mxu0 }
 0x759   : > { %5737 = vmatprep.subr.mxu1 %v22473_v43  ;;  %14995 = vmatprep.mubr.msk.f32.mxu1 %vm3808_vm5, %v5522_v18  ;;  %v13345_v18 = vld [vmem:[%s22112_s2 + $0x3e0] sm:$0xff] }
 0x75a   : > { %5738 = vmatpush1.msra.mxu1 %v18565_v51  ;;  %v5524_v16 = vpop.f32.mrf.mxu0 }
 0x75b   : > { %5739 = vmatprep.subr.mxu1 %v22473_v43  ;;  %v13348_v16 = vld [vmem:[%s22112_s2 + $0x3f8] sm:$0xff] }
 0x75c   : > { %5740 = vmatpush1.msra.mxu1 %v18569_v24  ;;  %v5527_v61 = vpop.f32.mrf.mxu0 }
 0x75d   : > { %5741 = vmatprep.subr.mxu1 %v22473_v43  ;;  %14996 = vmatmul.mubr.msk.f32.gmra.mxu1 %vm3808_vm5, %v5527_v61  ;;  %v13347_v61 = vld [vmem:[%s22112_s2 + $0x3f0] sm:$0xff] }
 0x75e   : > { %5742 = vmatpush1.msra.mxu1 %v18574_v57  ;;  %v5529_v30 = vpop.f32.mrf.mxu0 }
 0x75f   : > { %5743 = vmatprep.subr.mxu1 %v22473_v43  ;;  %v13369_v30 = vld [vmem:[%s22112_s2 + $0x408] sm:$0xff] }
 0x760   : > { %5744 = vmatpush1.msra.mxu1 %v18579_v27  ;;  %v5532_v46 = vpop.f32.mrf.mxu0 }
 0x761   : > { %5745 = vmatprep.subr.mxu1 %v22473_v43  ;;  %14998 = vmatprep.mubr.msk.f32.mxu1 %vm3808_vm5, %v5532_v46  ;;  %v13368_v46 = vld [vmem:[%s22112_s2 + $0x400] sm:$0xff] }
 0x762   : > { %5746 = vmatpush1.msra.mxu1 %v18584_v22  ;;  %v5534_v59 = vpop.f32.mrf.mxu0 }
 0x763   : > { %5747 = vmatprep.subr.mxu1 %v22473_v43  ;;  %v13371_v59 = vld [vmem:[%s22112_s2 + $0x418] sm:$0xff] }
 0x764   : > { %5748 = vmatpush1.msra.mxu1 %v18589_v42  ;;  %v5537_v17 = vpop.f32.mrf.mxu0 }
 0x765   : > { %5749 = vmatprep.subr.mxu1 %v22473_v43  ;;  %14999 = vmatmul.mubr.msk.f32.gmra.mxu1 %vm3808_vm5, %v5537_v17  ;;  %v13373_v17 = vld [vmem:[%s22112_s2 + $0x428] sm:$0xff] }
 0x766   : > { %5750 = vmatpush1.msra.mxu1 %v18594_v50  ;;  %13349 = vmatprep.mubr.msk.f32.mxu1 %vm3676_vm3, %v13334_v38  ;;  %v5539_v35 = vpop.f32.mrf.mxu0  ;;  %v13370_v38 = vld [vmem:[%s22112_s2 + $0x410] sm:$0xff] }
 0x767   : > { %5751 = vmatprep.subr.mxu1 %v22473_v43  ;;  %v13372_v35 = vld [vmem:[%s22112_s2 + $0x420] sm:$0xff] }
 0x768   : > { %5752 = vmatpush1.msra.mxu1 %v18599_v10 }
 0x769   : > { %5753 = vmatprep.subr.mxu1 %v22473_v43 }
 0x76a   : > { %5754 = vmatpush1.msra.mxu1 %v18604_v2 }
 0x76b   : > { %5755 = vmatprep.subr.mxu1 %v22473_v43 }
 0x76c   : > { %5756 = vmatpush1.msra.mxu1 %v18609_v63 }
 0x76d   : > { %5785 = vmatprep.subr.mxu1 %v22473_v43 }
 0x76e   : > { %5786 = vmatpush2.msra.mxu1 %v18613_v45 }
 0x76f   : > { %5787 = vmatprep.subr.mxu1 %v22473_v43 }
 0x770   : > { %5788 = vmatpush2.msra.mxu1 %v18617_v6 }
 0x771   : > { %5790 = vmatmul.mubr.f32.vlgmr.msra.gmra.mxu1 %v13333_v39  ;;  %6014 = vmatprep.subr.mxu1 %v22473_v43  ;;  %v13375_v39 = vld [vmem:[%s22112_s2 + $0x438] sm:$0xff] }
 0x772   : > { %6015 = vmatpush1.msra.mxu1 %v18532_v23  ;;  %13350 = vmatprep.mubr.msk.f32.mxu1 %vm3676_vm3, %v13336_v54  ;;  %v13374_v54 = vld [vmem:[%s22112_s2 + $0x430] sm:$0xff] }
 0x773   : > { %6016 = vmatprep.subr.mxu1 %v22473_v43 }
 0x774   : > { %6017 = vmatpush1.msra.mxu1 %v18539_v62 }
 0x775   : > { %5795 = vmatmul.mubr.f32.gmra.mxu1 %v13335_v20  ;;  %6018 = vmatprep.subr.mxu1 %v22473_v43  ;;  %v13377_v20 = vld [vmem:[%s22112_s2 + $0x448] sm:$0xff] }
 0x776   : > { %6019 = vmatpush1.msra.mxu1 %v18546_v33  ;;  %13351 = vmatprep.mubr.msk.f32.mxu1 %vm3676_vm3, %v13338_v8  ;;  %v13376_v8 = vld [vmem:[%s22112_s2 + $0x440] sm:$0xff] }
 0x777   : > { %6020 = vmatprep.subr.mxu1 %v22473_v43 }
 0x778   : > { %6021 = vmatpush1.msra.mxu1 %v18553_v37 }
 0x779   : > { %5800 = vmatmul.mubr.f32.gmra.mxu1 %v13337_v32  ;;  %6022 = vmatprep.subr.mxu1 %v22473_v43  ;;  %v13379_v32 = vld [vmem:[%s22112_s2 + $0x458] sm:$0xff] }
 0x77a   : > { %6023 = vmatpush1.msra.mxu1 %v18557_v47  ;;  %13352 = vmatprep.mubr.msk.f32.mxu1 %vm3676_vm3, %v13340_v29  ;;  %v13378_v29 = vld [vmem:[%s22112_s2 + $0x450] sm:$0xff] }
 0x77b   : > { %6024 = vmatprep.subr.mxu1 %v22473_v43 }
 0x77c   : > { %6025 = vmatpush1.msra.mxu1 %v18561_v14 }
 0x77d   : > { %5805 = vmatmul.mubr.f32.gmra.mxu1 %v13339_v44  ;;  %6026 = vmatprep.subr.mxu1 %v22473_v43  ;;  %v13381_v44 = vld [vmem:[%s22112_s2 + $0x468] sm:$0xff] }
 0x77e   : > { %6027 = vmatpush1.msra.mxu1 %v18565_v51  ;;  %13353 = vmatprep.mubr.msk.f32.mxu1 %vm3676_vm3, %v13342_v1  ;;  %v13380_v1 = vld [vmem:[%s22112_s2 + $0x460] sm:$0xff] }
 0x77f   : > { %6028 = vmatprep.subr.mxu1 %v22473_v43 }
 0x780   : > { %6029 = vmatpush1.msra.mxu1 %v18569_v24 }
 0x781   : > { %5810 = vmatmul.mubr.f32.gmra.mxu1 %v13341_v4  ;;  %6030 = vmatprep.subr.mxu1 %v22473_v43  ;;  %v13383_v4 = vld [vmem:[%s22112_s2 + $0x478] sm:$0xff] }
 0x782   : > { %6031 = vmatpush1.msra.mxu1 %v18574_v57  ;;  %13354 = vmatprep.mubr.msk.f32.mxu1 %vm3676_vm3, %v13344_v25  ;;  %v13382_v25 = vld [vmem:[%s22112_s2 + $0x470] sm:$0xff] }
 0x783   : > { %6032 = vmatprep.subr.mxu1 %v22473_v43 }
 0x784   : > { %6033 = vmatpush1.msra.mxu1 %v18579_v27 }
 0x785   : > { %5815 = vmatmul.mubr.f32.gmra.mxu1 %v13343_v41  ;;  %6034 = vmatprep.subr.mxu1 %v22473_v43  ;;  %v13358_v41 = vld [vmem:[%s22116_s6 + $0x78] sm:$0x3] }
 0x786   : > { %6035 = vmatpush1.msra.mxu1 %v18584_v22  ;;  %13355 = vmatprep.mubr.msk.f32.mxu1 %vm3676_vm3, %v13346_v21  ;;  %v13357_v21 = vld [vmem:[%s22116_s6 + $0x70] sm:$0xff] }
 0x787   : > { %6036 = vmatprep.subr.mxu1 %v22473_v43  ;;  %15001 = vmatprep.subr.msk.mxu0 %vm3833_vm4, %v13358_v41 }
 0x788   : > { %6037 = vmatpush1.msra.mxu1 %v18589_v42  ;;  %15002 = vmatpush3.msk.msra.mxu0 %vm3833_vm4, %v13358_v41 }
 0x789   : > { %5820 = vmatmul.mubr.f32.gmra.mxu1 %v13345_v18  ;;  %6038 = vmatprep.subr.mxu1 %v22473_v43  ;;  %v13393_v18 = vld [vmem:[%s22116_s6 + $0x88] sm:$0x3] }
 0x78a   : > { %6039 = vmatpush1.msra.mxu1 %v18594_v50  ;;  %13356 = vmatprep.mubr.msk.f32.mxu1 %vm3676_vm3, %v13348_v16 }
 0x78b   : > { %6040 = vmatprep.subr.mxu1 %v22473_v43  ;;  %15003 = vmatprep.subr.mxu0 %v13357_v21 }
 0x78c   : > { %6041 = vmatpush1.msra.mxu1 %v18599_v10  ;;  %15004 = vmatpush3.msra.mxu0 %v13357_v21 }
 0x78d   : > { %5825 = vmatmul.mubr.f32.gmra.mxu1 %v13347_v61  ;;  %6042 = vmatprep.subr.mxu1 %v22473_v43 }
 0x78e   : > { %6043 = vmatpush1.msra.mxu1 %v18604_v2  ;;  %13384 = vmatprep.mubr.msk.f32.mxu1 %vm3676_vm3, %v13369_v30 }
 0x78f   : > { %6044 = vmatprep.subr.mxu1 %v22473_v43  ;;  %15017 = vmatprep.subr.msk.mxu0 %vm3833_vm4, %v13393_v18 }
 0x790   : > { %6045 = vmatpush1.msra.mxu1 %v18609_v63 }
 0x791   : > { %6074 = vmatprep.subr.mxu1 %v22473_v43 }
 0x792   : > { %6075 = vmatpush2.msra.mxu1 %v18613_v45 }
 0x793   : > { %6076 = vmatprep.subr.mxu1 %v22473_v43 }
 0x794   : > { %6077 = vmatpush2.msra.mxu1 %v18617_v6 }
 0x795   : > { %6079 = vmatmul.mubr.f32.vlgmr.msra.gmra.mxu1 %v13368_v46 }
 0x796   : > { %13385 = vmatprep.mubr.msk.f32.mxu1 %vm3676_vm3, %v13371_v59 }
 0x799   : > { %6084 = vmatmul.mubr.f32.gmra.mxu1 %v13370_v38 }
 0x79a   : > { %13386 = vmatprep.mubr.msk.f32.mxu1 %vm3676_vm3, %v13373_v17 }
 0x79d   : > { %6089 = vmatmul.mubr.f32.gmra.mxu1 %v13372_v35 }
 0x79e   : > { %13387 = vmatprep.mubr.msk.f32.mxu1 %vm3676_vm3, %v13375_v39 }
 0x7a1   : > { %6094 = vmatmul.mubr.f32.gmra.mxu1 %v13374_v54 }
 0x7a2   : > { %13388 = vmatprep.mubr.msk.f32.mxu1 %vm3676_vm3, %v13377_v20 }
 0x7a5   : > { %6099 = vmatmul.mubr.f32.gmra.mxu1 %v13376_v8 }
 0x7a6   : > { %13389 = vmatprep.mubr.msk.f32.mxu1 %vm3676_vm3, %v13379_v32 }
 0x7a9   : > { %6104 = vmatmul.mubr.f32.gmra.mxu1 %v13378_v29 }
 0x7aa   : > { %13390 = vmatprep.mubr.msk.f32.mxu1 %vm3676_vm3, %v13381_v44 }
 0x7ad   : > { %6109 = vmatmul.mubr.f32.gmra.mxu1 %v13380_v1 }
 0x7ae   : > { %13391 = vmatprep.mubr.msk.f32.mxu1 %vm3676_vm3, %v13383_v4 }
 0x7b1   : > { %6114 = vmatmul.mubr.f32.gmra.mxu1 %v13382_v25 }
 0x7e9   : > { %v14975_v16 = vpop.f32.mrf.mxu1 }
 0x7ea   : > { %v5388_v61 = vadd.f32 %v14975_v16, %v19365_v15 }
 0x7eb   : > { %v19598_v30 = vpop.f32.mrf.mxu1 }
 0x7ec   : > { %22484 = vst [vmem:[#allocation41_spill] sm:$0xff] %v19598_v30 }
 0x7f1   : > { %v14978_v46 = vpop.f32.mrf.mxu1 }
 0x7f2   : > { %v5390_v59 = vadd.f32 %v14978_v46, %v19369_v31 }
 0x7f3   : > { %v19601_v38 = vpop.f32.mrf.mxu1 }
 0x7f9   : > { %v14981_v17 = vpop.f32.mrf.mxu1 }
 0x7fa   : > { %v5392_v35 = vadd.f32 %v14981_v17, %v19373_v19 }
 0x7fb   : > { %v19604_v39 = vpop.f32.mrf.mxu1 }
 0x801   : > { %v14984_v54 = vpop.f32.mrf.mxu1 }
 0x802   : > { %v5394_v20 = vadd.f32 %v14984_v54, %v19377_v28 }
 0x803   : > { %v19607_v8 = vpop.f32.mrf.mxu1 }
 0x804   : > { %22485 = vst [vmem:[#allocation22_spill] sm:$0xff] %v19607_v8 }
 0x80d   : > { %v14991_v32 = vpop.f32.mrf.mxu1 }
 0x80e   : > { %v19609_v29 = vadd.f32 %v14991_v32, %v5388_v61 }
 0x80f   : > { %v19611_v15 = vpop.f32.mrf.mxu1 }
 0x810   : > { %22486 = vst [vmem:[#allocation36_spill] sm:$0xff] %v19611_v15 }
 0x815   : > { %v14994_v44 = vpop.f32.mrf.mxu1 }
 0x816   : > { %v19613_v1 = vadd.f32 %v14994_v44, %v5390_v59  ;;  %v13392_v59 = vld [vmem:[%s22116_s6 + $0x80] sm:$0xff] }
 0x817   : > { %v19615_v31 = vpop.f32.mrf.mxu1 }
 0x81d   : > { %v14997_v4 = vpop.f32.mrf.mxu1 }
 0x81e   : > { %v19617_v25 = vadd.f32 %v14997_v4, %v5392_v35 }
 0x81f   : > { %v19619_v19 = vpop.f32.mrf.mxu1 }
 0x825   : > { %v15000_v41 = vpop.f32.mrf.mxu1 }
 0x826   : > { %v19621_v21 = vadd.f32 %v15000_v41, %v5394_v20 }
 0x827   : > { %v19623_v28 = vpop.f32.mrf.mxu1 }
 0x828   : > { %22487 = vst [vmem:[#allocation42_spill] sm:$0xff] %v19623_v28 }
 0x831   : > { %v5791_v16 = vpop.f32.mrf.mxu1 }
 0x832   : > { %15005 = vmatprep.mubr.msk.f32.mxu0 %vm3808_vm5, %v5791_v16 }
 0x833   : > { %v5793_v61 = vpop.f32.mrf.mxu1 }
 0x835   : > { %v5796_v46 = vpop.f32.mrf.mxu1 }
 0x836   : > { %15006 = vmatmul.mubr.msk.f32.vlgmr.msra.gmra.mxu0 %vm3808_vm5, %v5796_v46 }
 0x837   : > { %v5798_v17 = vpop.f32.mrf.mxu1  ;;  %15018 = vmatpush3.msk.msra.mxu0 %vm3833_vm4, %v13393_v18 }
 0x838   : > { %15019 = vmatprep.subr.mxu0 %v13392_v59 }
 0x839   : > { %v5801_v35 = vpop.f32.mrf.mxu1  ;;  %15020 = vmatpush3.msra.mxu0 %v13392_v59 }
 0x83a   : > { %15008 = vmatprep.mubr.msk.f32.mxu0 %vm3808_vm5, %v5801_v35  ;;  %6303 = vmatprep.subr.mxu0 %v22473_v43 }
 0x83b   : > { %v5803_v54 = vpop.f32.mrf.mxu1 }
 0x83d   : > { %v5806_v20 = vpop.f32.mrf.mxu1 }
 0x83e   : > { %15009 = vmatmul.mubr.msk.f32.gmra.mxu0 %vm3808_vm5, %v5806_v20 }
 0x83f   : > { %v5808_v32 = vpop.f32.mrf.mxu1 }
 0x841   : > { %v5811_v44 = vpop.f32.mrf.mxu1 }
 0x842   : > { %15011 = vmatprep.mubr.msk.f32.mxu0 %vm3808_vm5, %v5811_v44 }
 0x843   : > { %v5813_v4 = vpop.f32.mrf.mxu1 }
 0x845   : > { %v5816_v41 = vpop.f32.mrf.mxu1 }
 0x846   : > { %15012 = vmatmul.mubr.msk.f32.gmra.mxu0 %vm3808_vm5, %v5816_v41 }
 0x847   : > { %v5818_v18 = vpop.f32.mrf.mxu1 }
 0x849   : > { %v5821_v16 = vpop.f32.mrf.mxu1 }
 0x84a   : > { %15014 = vmatprep.mubr.msk.f32.mxu0 %vm3808_vm5, %v5821_v16 }
 0x84b   : > { %v5823_v61 = vpop.f32.mrf.mxu1 }
 0x84d   : > { %v5826_v46 = vpop.f32.mrf.mxu1 }
 0x84e   : > { %15015 = vmatmul.mubr.msk.f32.gmra.mxu0 %vm3808_vm5, %v5826_v46 }
 0x84f   : > { %v5828_v59 = vpop.f32.mrf.mxu1 }
 0x855   : > { %v6080_v17 = vpop.f32.mrf.mxu1 }
 0x856   : > { %15021 = vmatprep.mubr.msk.f32.mxu0 %vm3808_vm5, %v6080_v17 }
 0x857   : > { %v6082_v35 = vpop.f32.mrf.mxu1 }
 0x858   : > { %v13404_v35 = vld [vmem:[%s22112_s2 + $0x488] sm:$0xff] }
 0x859   : > { %v6085_v54 = vpop.f32.mrf.mxu1 }
 0x85a   : > { %15022 = vmatmul.mubr.msk.f32.vlgmr.msra.gmra.mxu0 %vm3808_vm5, %v6085_v54 }
 0x85b   : > { %6304 = vmatpush1.msra.mxu0 %v18532_v23  ;;  %v6087_v20 = vpop.f32.mrf.mxu1 }
 0x85c   : > { %6305 = vmatprep.subr.mxu0 %v22473_v43 }
 0x85d   : > { %6306 = vmatpush1.msra.mxu0 %v18539_v62  ;;  %v6090_v32 = vpop.f32.mrf.mxu1 }
 0x85e   : > { %6307 = vmatprep.subr.mxu0 %v22473_v43  ;;  %15024 = vmatprep.mubr.msk.f32.mxu0 %vm3808_vm5, %v6090_v32  ;;  %v13403_v32 = vld [vmem:[%s22112_s2 + $0x480] sm:$0xff] }
 0x85f   : > { %6308 = vmatpush1.msra.mxu0 %v18546_v33  ;;  %v6092_v44 = vpop.f32.mrf.mxu1 }
 0x860   : > { %6309 = vmatprep.subr.mxu0 %v22473_v43  ;;  %v13406_v44 = vld [vmem:[%s22112_s2 + $0x498] sm:$0xff] }
 0x861   : > { %6310 = vmatpush1.msra.mxu0 %v18553_v37  ;;  %v6095_v4 = vpop.f32.mrf.mxu1 }
 0x862   : > { %6311 = vmatprep.subr.mxu0 %v22473_v43  ;;  %15025 = vmatmul.mubr.msk.f32.gmra.mxu0 %vm3808_vm5, %v6095_v4  ;;  %v13405_v4 = vld [vmem:[%s22112_s2 + $0x490] sm:$0xff] }
 0x863   : > { %6312 = vmatpush1.msra.mxu0 %v18557_v47  ;;  %v6097_v41 = vpop.f32.mrf.mxu1 }
 0x864   : > { %6313 = vmatprep.subr.mxu0 %v22473_v43  ;;  %v13408_v41 = vld [vmem:[%s22112_s2 + $0x4a8] sm:$0xff] }
 0x865   : > { %6314 = vmatpush1.msra.mxu0 %v18561_v14  ;;  %v6100_v18 = vpop.f32.mrf.mxu1 }
 0x866   : > { %6315 = vmatprep.subr.mxu0 %v22473_v43  ;;  %15027 = vmatprep.mubr.msk.f32.mxu0 %vm3808_vm5, %v6100_v18  ;;  %v13407_v18 = vld [vmem:[%s22112_s2 + $0x4a0] sm:$0xff] }
 0x867   : > { %6316 = vmatpush1.msra.mxu0 %v18565_v51  ;;  %v6102_v16 = vpop.f32.mrf.mxu1 }
 0x868   : > { %6317 = vmatprep.subr.mxu0 %v22473_v43  ;;  %v13410_v16 = vld [vmem:[%s22112_s2 + $0x4b8] sm:$0xff] }
 0x869   : > { %6318 = vmatpush1.msra.mxu0 %v18569_v24  ;;  %v6105_v61 = vpop.f32.mrf.mxu1 }
 0x86a   : > { %6319 = vmatprep.subr.mxu0 %v22473_v43  ;;  %15028 = vmatmul.mubr.msk.f32.gmra.mxu0 %vm3808_vm5, %v6105_v61  ;;  %v13409_v61 = vld [vmem:[%s22112_s2 + $0x4b0] sm:$0xff] }
 0x86b   : > { %6320 = vmatpush1.msra.mxu0 %v18574_v57  ;;  %v6107_v46 = vpop.f32.mrf.mxu1 }
 0x86c   : > { %6321 = vmatprep.subr.mxu0 %v22473_v43  ;;  %v13412_v46 = vld [vmem:[%s22112_s2 + $0x4c8] sm:$0xff] }
 0x86d   : > { %6322 = vmatpush1.msra.mxu0 %v18579_v27  ;;  %v6110_v59 = vpop.f32.mrf.mxu1 }
 0x86e   : > { %6323 = vmatprep.subr.mxu0 %v22473_v43  ;;  %15030 = vmatprep.mubr.msk.f32.mxu0 %vm3808_vm5, %v6110_v59  ;;  %v13411_v59 = vld [vmem:[%s22112_s2 + $0x4c0] sm:$0xff] }
 0x86f   : > { %6324 = vmatpush1.msra.mxu0 %v18584_v22  ;;  %v6112_v17 = vpop.f32.mrf.mxu1 }
 0x870   : > { %6325 = vmatprep.subr.mxu0 %v22473_v43  ;;  %v13414_v17 = vld [vmem:[%s22112_s2 + $0x4d8] sm:$0xff] }
 0x871   : > { %6326 = vmatpush1.msra.mxu0 %v18589_v42  ;;  %v6115_v54 = vpop.f32.mrf.mxu1 }
 0x872   : > { %6327 = vmatprep.subr.mxu0 %v22473_v43  ;;  %15031 = vmatmul.mubr.msk.f32.gmra.mxu0 %vm3808_vm5, %v6115_v54  ;;  %v13416_v54 = vld [vmem:[%s22112_s2 + $0x4e8] sm:$0xff] }
 0x873   : > { %6328 = vmatpush1.msra.mxu0 %v18594_v50  ;;  %13419 = vmatprep.mubr.msk.f32.mxu0 %vm3676_vm3, %v13404_v35  ;;  %v6117_v20 = vpop.f32.mrf.mxu1  ;;  %v13413_v35 = vld [vmem:[%s22112_s2 + $0x4d0] sm:$0xff] }
 0x874   : > { %6329 = vmatprep.subr.mxu0 %v22473_v43  ;;  %v13415_v20 = vld [vmem:[%s22112_s2 + $0x4e0] sm:$0xff] }
 0x875   : > { %6330 = vmatpush1.msra.mxu0 %v18599_v10 }
 0x876   : > { %6331 = vmatprep.subr.mxu0 %v22473_v43 }
 0x877   : > { %6332 = vmatpush1.msra.mxu0 %v18604_v2 }
 0x878   : > { %6333 = vmatprep.subr.mxu0 %v22473_v43 }
 0x879   : > { %6334 = vmatpush1.msra.mxu0 %v18609_v63 }
 0x87a   : > { %6363 = vmatprep.subr.mxu0 %v22473_v43 }
 0x87b   : > { %6364 = vmatpush2.msra.mxu0 %v18613_v45 }
 0x87c   : > { %6365 = vmatprep.subr.mxu0 %v22473_v43 }
 0x87d   : > { %6366 = vmatpush2.msra.mxu0 %v18617_v6 }
 0x87e   : > { %6368 = vmatmul.mubr.f32.vlgmr.msra.gmra.mxu0 %v13403_v32  ;;  %6592 = vmatprep.subr.mxu0 %v22473_v43  ;;  %v13418_v32 = vld [vmem:[%s22112_s2 + $0x4f8] sm:$0xff] }
 0x87f   : > { %6593 = vmatpush1.msra.mxu0 %v18532_v23  ;;  %13420 = vmatprep.mubr.msk.f32.mxu0 %vm3676_vm3, %v13406_v44  ;;  %v13417_v44 = vld [vmem:[%s22112_s2 + $0x4f0] sm:$0xff] }
 0x880   : > { %6594 = vmatprep.subr.mxu0 %v22473_v43 }
 0x881   : > { %6595 = vmatpush1.msra.mxu0 %v18539_v62 }
 0x882   : > { %6373 = vmatmul.mubr.f32.gmra.mxu0 %v13405_v4  ;;  %6596 = vmatprep.subr.mxu0 %v22473_v43  ;;  %v13439_v4 = vld [vmem:[%s22112_s2 + $0x508] sm:$0xff] }
 0x883   : > { %6597 = vmatpush1.msra.mxu0 %v18546_v33  ;;  %13421 = vmatprep.mubr.msk.f32.mxu0 %vm3676_vm3, %v13408_v41  ;;  %v13438_v41 = vld [vmem:[%s22112_s2 + $0x500] sm:$0xff] }
 0x884   : > { %6598 = vmatprep.subr.mxu0 %v22473_v43 }
 0x885   : > { %6599 = vmatpush1.msra.mxu0 %v18553_v37 }
 0x886   : > { %6378 = vmatmul.mubr.f32.gmra.mxu0 %v13407_v18  ;;  %6600 = vmatprep.subr.mxu0 %v22473_v43  ;;  %v13441_v18 = vld [vmem:[%s22112_s2 + $0x518] sm:$0xff] }
 0x887   : > { %6601 = vmatpush1.msra.mxu0 %v18557_v47  ;;  %13422 = vmatprep.mubr.msk.f32.mxu0 %vm3676_vm3, %v13410_v16  ;;  %v13440_v16 = vld [vmem:[%s22112_s2 + $0x510] sm:$0xff] }
 0x888   : > { %6602 = vmatprep.subr.mxu0 %v22473_v43 }
 0x889   : > { %6603 = vmatpush1.msra.mxu0 %v18561_v14 }
 0x88a   : > { %6383 = vmatmul.mubr.f32.gmra.mxu0 %v13409_v61  ;;  %6604 = vmatprep.subr.mxu0 %v22473_v43  ;;  %v13443_v61 = vld [vmem:[%s22112_s2 + $0x528] sm:$0xff] }
 0x88b   : > { %6605 = vmatpush1.msra.mxu0 %v18565_v51  ;;  %13423 = vmatprep.mubr.msk.f32.mxu0 %vm3676_vm3, %v13412_v46  ;;  %v13442_v46 = vld [vmem:[%s22112_s2 + $0x520] sm:$0xff] }
 0x88c   : > { %6606 = vmatprep.subr.mxu0 %v22473_v43 }
 0x88d   : > { %6607 = vmatpush1.msra.mxu0 %v18569_v24 }
 0x88e   : > { %6388 = vmatmul.mubr.f32.gmra.mxu0 %v13411_v59  ;;  %6608 = vmatprep.subr.mxu0 %v22473_v43  ;;  %v13445_v59 = vld [vmem:[%s22112_s2 + $0x538] sm:$0xff] }
 0x88f   : > { %6609 = vmatpush1.msra.mxu0 %v18574_v57  ;;  %13424 = vmatprep.mubr.msk.f32.mxu0 %vm3676_vm3, %v13414_v17  ;;  %v13444_v17 = vld [vmem:[%s22112_s2 + $0x530] sm:$0xff] }
 0x890   : > { %6610 = vmatprep.subr.mxu0 %v22473_v43 }
 0x891   : > { %6611 = vmatpush1.msra.mxu0 %v18579_v27 }
 0x892   : > { %6393 = vmatmul.mubr.f32.gmra.mxu0 %v13413_v35  ;;  %6612 = vmatprep.subr.mxu0 %v22473_v43  ;;  %v13447_v35 = vld [vmem:[%s22112_s2 + $0x548] sm:$0xff] }
 0x893   : > { %6613 = vmatpush1.msra.mxu0 %v18584_v22  ;;  %13425 = vmatprep.mubr.msk.f32.mxu0 %vm3676_vm3, %v13416_v54  ;;  %v13446_v54 = vld [vmem:[%s22112_s2 + $0x540] sm:$0xff] }
 0x894   : > { %6614 = vmatprep.subr.mxu0 %v22473_v43 }
 0x895   : > { %6615 = vmatpush1.msra.mxu0 %v18589_v42 }
 0x896   : > { %6398 = vmatmul.mubr.f32.gmra.mxu0 %v13415_v20  ;;  %6616 = vmatprep.subr.mxu0 %v22473_v43  ;;  %v13449_v20 = vld [vmem:[%s22112_s2 + $0x558] sm:$0xff] }
 0x897   : > { %6617 = vmatpush1.msra.mxu0 %v18594_v50  ;;  %13426 = vmatprep.mubr.msk.f32.mxu0 %vm3676_vm3, %v13418_v32  ;;  %v13448_v32 = vld [vmem:[%s22112_s2 + $0x550] sm:$0xff] }
 0x898   : > { %6618 = vmatprep.subr.mxu0 %v22473_v43 }
 0x899   : > { %6619 = vmatpush1.msra.mxu0 %v18599_v10 }
 0x89a   : > { %6403 = vmatmul.mubr.f32.gmra.mxu0 %v13417_v44  ;;  %6620 = vmatprep.subr.mxu0 %v22473_v43  ;;  %v13451_v44 = vld [vmem:[%s22112_s2 + $0x568] sm:$0xff] }
 0x89b   : > { %6621 = vmatpush1.msra.mxu0 %v18604_v2  ;;  %13454 = vmatprep.mubr.msk.f32.mxu0 %vm3676_vm3, %v13439_v4  ;;  %v13450_v4 = vld [vmem:[%s22112_s2 + $0x560] sm:$0xff] }
 0x89c   : > { %6622 = vmatprep.subr.mxu0 %v22473_v43 }
 0x89d   : > { %6623 = vmatpush1.msra.mxu0 %v18609_v63 }
 0x89e   : > { %6652 = vmatprep.subr.mxu0 %v22473_v43 }
 0x89f   : > { %6653 = vmatpush2.msra.mxu0 %v18613_v45 }
 0x8a0   : > { %6654 = vmatprep.subr.mxu0 %v22473_v43 }
 0x8a1   : > { %6655 = vmatpush2.msra.mxu0 %v18617_v6 }
 0x8a2   : > { %6657 = vmatmul.mubr.f32.vlgmr.msra.gmra.mxu0 %v13438_v41  ;;  %v13453_v41 = vld [vmem:[%s22112_s2 + $0x578] sm:$0xff] }
 0x8a3   : > { %13455 = vmatprep.mubr.msk.f32.mxu0 %vm3676_vm3, %v13441_v18  ;;  %v13452_v18 = vld [vmem:[%s22112_s2 + $0x570] sm:$0xff] }
 0x8a6   : > { %6662 = vmatmul.mubr.f32.gmra.mxu0 %v13440_v16  ;;  %v13428_v16 = vld [vmem:[%s22116_s6 + $0x98] sm:$0x3] }
 0x8a7   : > { %13456 = vmatprep.mubr.msk.f32.mxu0 %vm3676_vm3, %v13443_v61  ;;  %15033 = vmatprep.subr.msk.mxu1 %vm3833_vm4, %v13428_v16  ;;  %v13427_v61 = vld [vmem:[%s22116_s6 + $0x90] sm:$0xff] }
 0x8a8   : > { %15034 = vmatpush3.msk.msra.mxu1 %vm3833_vm4, %v13428_v16 }
 0x8a9   : > { %15035 = vmatprep.subr.mxu1 %v13427_v61 }
 0x8aa   : > { %6667 = vmatmul.mubr.f32.gmra.mxu0 %v13442_v46  ;;  %15036 = vmatpush3.msra.mxu1 %v13427_v61  ;;  %v13463_v46 = vld [vmem:[%s22116_s6 + $0xa8] sm:$0x3] }
 0x8ab   : > { %13457 = vmatprep.mubr.msk.f32.mxu0 %vm3676_vm3, %v13445_v59  ;;  %15049 = vmatprep.subr.msk.mxu1 %vm3833_vm4, %v13463_v46 }
 0x8ae   : > { %6672 = vmatmul.mubr.f32.gmra.mxu0 %v13444_v17 }
 0x8af   : > { %13458 = vmatprep.mubr.msk.f32.mxu0 %vm3676_vm3, %v13447_v35 }
 0x8b2   : > { %6677 = vmatmul.mubr.f32.gmra.mxu0 %v13446_v54 }
 0x8b3   : > { %13459 = vmatprep.mubr.msk.f32.mxu0 %vm3676_vm3, %v13449_v20 }
 0x8b6   : > { %6682 = vmatmul.mubr.f32.gmra.mxu0 %v13448_v32 }
 0x8b7   : > { %13460 = vmatprep.mubr.msk.f32.mxu0 %vm3676_vm3, %v13451_v44 }
 0x8ba   : > { %6687 = vmatmul.mubr.f32.gmra.mxu0 %v13450_v4 }
 0x8bb   : > { %13461 = vmatprep.mubr.msk.f32.mxu0 %vm3676_vm3, %v13453_v41 }
 0x8be   : > { %6692 = vmatmul.mubr.f32.gmra.mxu0 %v13452_v18 }
 0x8f6   : > { %v15007_v59 = vpop.f32.mrf.mxu0 }
 0x8f7   : > { %v5966_v17 = vadd.f32 %v15007_v59, %v19609_v29 }
 0x8f8   : > { %v19842_v35 = vpop.f32.mrf.mxu0 }
 0x8f9   : > { %22488 = vst [vmem:[#allocation25_spill] sm:$0xff] %v19842_v35 }
 0x8fe   : > { %v15010_v54 = vpop.f32.mrf.mxu0 }
 0x8ff   : > { %v5968_v20 = vadd.f32 %v15010_v54, %v19613_v1 }
 0x900   : > { %v19845_v32 = vpop.f32.mrf.mxu0 }
 0x906   : > { %v15013_v44 = vpop.f32.mrf.mxu0 }
 0x907   : > { %v5970_v4 = vadd.f32 %v15013_v44, %v19617_v25 }
 0x908   : > { %v19848_v41 = vpop.f32.mrf.mxu0 }
 0x90e   : > { %v15016_v18 = vpop.f32.mrf.mxu0 }
 0x90f   : > { %v5972_v16 = vadd.f32 %v15016_v18, %v19621_v21 }
 0x910   : > { %v19851_v61 = vpop.f32.mrf.mxu0 }
 0x911   : > { %22489 = vst [vmem:[#allocation13_spill] sm:$0xff] %v19851_v61 }
 0x91a   : > { %v15023_v15 = vpop.f32.mrf.mxu0 }
 0x91b   : > { %v19853_v30 = vadd.f32 %v15023_v15, %v5966_v17 }
 0x91c   : > { %v19855_v29 = vpop.f32.mrf.mxu0 }
 0x91d   : > { %22490 = vst [vmem:[#allocation43_spill] sm:$0xff] %v19855_v29 }
 0x922   : > { %v15026_v59 = vpop.f32.mrf.mxu0 }
 0x923   : > { %v19857_v35 = vadd.f32 %v15026_v59, %v5968_v20  ;;  %v13462_v20 = vld [vmem:[%s22116_s6 + $0xa0] sm:$0xff] }
 0x924   : > { %v19859_v1 = vpop.f32.mrf.mxu0 }
 0x92a   : > { %v15029_v54 = vpop.f32.mrf.mxu0 }
 0x92b   : > { %v19861_v5 = vadd.f32 %v15029_v54, %v5970_v4 }
 0x92c   : > { %v19863_v25 = vpop.f32.mrf.mxu0 }
 0x932   : > { %v15032_v44 = vpop.f32.mrf.mxu0 }
 0x933   : > { %v19865_v12 = vadd.f32 %v15032_v44, %v5972_v16 }
 0x934   : > { %v19867_v21 = vpop.f32.mrf.mxu0 }
 0x935   : > { %22491 = vst [vmem:[#allocation5_spill] sm:$0xff] %v19867_v21 }
 0x93e   : > { %v6369_v18 = vpop.f32.mrf.mxu0 }
 0x93f   : > { %15037 = vmatprep.mubr.msk.f32.mxu1 %vm3808_vm5, %v6369_v18 }
 0x940   : > { %v6371_v15 = vpop.f32.mrf.mxu0 }
 0x942   : > { %v6374_v17 = vpop.f32.mrf.mxu0 }
 0x943   : > { %15038 = vmatmul.mubr.msk.f32.vlgmr.msra.gmra.mxu1 %vm3808_vm5, %v6374_v17 }
 0x944   : > { %v6376_v4 = vpop.f32.mrf.mxu0  ;;  %15050 = vmatpush3.msk.msra.mxu1 %vm3833_vm4, %v13463_v46 }
 0x945   : > { %15051 = vmatprep.subr.mxu1 %v13462_v20 }
 0x946   : > { %v6379_v59 = vpop.f32.mrf.mxu0  ;;  %15052 = vmatpush3.msra.mxu1 %v13462_v20 }
 0x947   : > { %15040 = vmatprep.mubr.msk.f32.mxu1 %vm3808_vm5, %v6379_v59  ;;  %6881 = vmatprep.subr.mxu1 %v22473_v43 }
 0x948   : > { %v6381_v16 = vpop.f32.mrf.mxu0 }
 0x94a   : > { %v6384_v54 = vpop.f32.mrf.mxu0 }
 0x94b   : > { %15041 = vmatmul.mubr.msk.f32.gmra.mxu1 %vm3808_vm5, %v6384_v54 }
 0x94c   : > { %v6386_v44 = vpop.f32.mrf.mxu0 }
 0x94e   : > { %v6389_v18 = vpop.f32.mrf.mxu0 }
 0x94f   : > { %15043 = vmatprep.mubr.msk.f32.mxu1 %vm3808_vm5, %v6389_v18 }
 0x950   : > { %v6391_v15 = vpop.f32.mrf.mxu0 }
 0x952   : > { %v6394_v17 = vpop.f32.mrf.mxu0 }
 0x953   : > { %15044 = vmatmul.mubr.msk.f32.gmra.mxu1 %vm3808_vm5, %v6394_v17 }
 0x954   : > { %v6396_v46 = vpop.f32.mrf.mxu0 }
 0x956   : > { %v6399_v4 = vpop.f32.mrf.mxu0 }
 0x957   : > { %15046 = vmatprep.mubr.msk.f32.mxu1 %vm3808_vm5, %v6399_v4 }
 0x958   : > { %v6401_v20 = vpop.f32.mrf.mxu0 }
 0x95a   : > { %v6404_v59 = vpop.f32.mrf.mxu0 }
 0x95b   : > { %15047 = vmatmul.mubr.msk.f32.gmra.mxu1 %vm3808_vm5, %v6404_v59 }
 0x95c   : > { %v6406_v16 = vpop.f32.mrf.mxu0 }
 0x962   : > { %v6658_v29 = vpop.f32.mrf.mxu0 }
 0x963   : > { %15053 = vmatprep.mubr.msk.f32.mxu1 %vm3808_vm5, %v6658_v29 }
 0x964   : > { %v6660_v54 = vpop.f32.mrf.mxu0 }
 0x966   : > { %v6663_v44 = vpop.f32.mrf.mxu0 }
 0x967   : > { %15054 = vmatmul.mubr.msk.f32.vlgmr.msra.gmra.mxu1 %vm3808_vm5, %v6663_v44 }
 0x968   : > { %6882 = vmatpush1.msra.mxu1 %v18532_v23  ;;  %v6665_v18 = vpop.f32.mrf.mxu0 }
 0x969   : > { %6883 = vmatprep.subr.mxu1 %v22473_v43  ;;  %v13474_v18 = vld [vmem:[%s22112_s2 + $0x588] sm:$0xff] }
 0x96a   : > { %6884 = vmatpush1.msra.mxu1 %v18539_v62  ;;  %v6668_v15 = vpop.f32.mrf.mxu0 }
 0x96b   : > { %6885 = vmatprep.subr.mxu1 %v22473_v43  ;;  %15056 = vmatprep.mubr.msk.f32.mxu1 %vm3808_vm5, %v6668_v15 }
 0x96c   : > { %6886 = vmatpush1.msra.mxu1 %v18546_v33  ;;  %v6670_v17 = vpop.f32.mrf.mxu0 }
 0x96d   : > { %6887 = vmatprep.subr.mxu1 %v22473_v43 }
 0x96e   : > { %6888 = vmatpush1.msra.mxu1 %v18553_v37  ;;  %v6673_v29 = vpop.f32.mrf.mxu0 }
 0x96f   : > { %6889 = vmatprep.subr.mxu1 %v22473_v43  ;;  %15057 = vmatmul.mubr.msk.f32.gmra.mxu1 %vm3808_vm5, %v6673_v29  ;;  %v13473_v29 = vld [vmem:[%s22112_s2 + $0x580] sm:$0xff] }
 0x970   : > { %6890 = vmatpush1.msra.mxu1 %v18557_v47  ;;  %v6675_v46 = vpop.f32.mrf.mxu0 }
 0x971   : > { %6891 = vmatprep.subr.mxu1 %v22473_v43  ;;  %v13476_v46 = vld [vmem:[%s22112_s2 + $0x598] sm:$0xff] }
 0x972   : > { %6892 = vmatpush1.msra.mxu1 %v18561_v14  ;;  %v6678_v4 = vpop.f32.mrf.mxu0 }
 0x973   : > { %6893 = vmatprep.subr.mxu1 %v22473_v43  ;;  %15059 = vmatprep.mubr.msk.f32.mxu1 %vm3808_vm5, %v6678_v4  ;;  %v13475_v4 = vld [vmem:[%s22112_s2 + $0x590] sm:$0xff] }
 0x974   : > { %6894 = vmatpush1.msra.mxu1 %v18565_v51  ;;  %v6680_v20 = vpop.f32.mrf.mxu0 }
 0x975   : > { %6895 = vmatprep.subr.mxu1 %v22473_v43  ;;  %v13478_v20 = vld [vmem:[%s22112_s2 + $0x5a8] sm:$0xff] }
 0x976   : > { %6896 = vmatpush1.msra.mxu1 %v18569_v24  ;;  %v6683_v59 = vpop.f32.mrf.mxu0 }
 0x977   : > { %6897 = vmatprep.subr.mxu1 %v22473_v43  ;;  %15060 = vmatmul.mubr.msk.f32.gmra.mxu1 %vm3808_vm5, %v6683_v59  ;;  %v13477_v59 = vld [vmem:[%s22112_s2 + $0x5a0] sm:$0xff] }
 0x978   : > { %6898 = vmatpush1.msra.mxu1 %v18574_v57  ;;  %v6685_v16 = vpop.f32.mrf.mxu0 }
 0x979   : > { %6899 = vmatprep.subr.mxu1 %v22473_v43  ;;  %v13480_v16 = vld [vmem:[%s22112_s2 + $0x5b8] sm:$0xff] }
 0x97a   : > { %6900 = vmatpush1.msra.mxu1 %v18579_v27  ;;  %v6688_v54 = vpop.f32.mrf.mxu0 }
 0x97b   : > { %6901 = vmatprep.subr.mxu1 %v22473_v43  ;;  %15062 = vmatprep.mubr.msk.f32.mxu1 %vm3808_vm5, %v6688_v54  ;;  %v13479_v54 = vld [vmem:[%s22112_s2 + $0x5b0] sm:$0xff] }
 0x97c   : > { %6902 = vmatpush1.msra.mxu1 %v18584_v22  ;;  %v6690_v44 = vpop.f32.mrf.mxu0 }
 0x97d   : > { %6903 = vmatprep.subr.mxu1 %v22473_v43  ;;  %v13482_v44 = vld [vmem:[%s22112_s2 + $0x5c8] sm:$0xff] }
 0x97e   : > { %6904 = vmatpush1.msra.mxu1 %v18589_v42  ;;  %v6693_v15 = vpop.f32.mrf.mxu0 }
 0x97f   : > { %6905 = vmatprep.subr.mxu1 %v22473_v43  ;;  %15063 = vmatmul.mubr.msk.f32.gmra.mxu1 %vm3808_vm5, %v6693_v15  ;;  %v13484_v15 = vld [vmem:[%s22112_s2 + $0x5d8] sm:$0xff] }
 0x980   : > { %6906 = vmatpush1.msra.mxu1 %v18594_v50  ;;  %13489 = vmatprep.mubr.msk.f32.mxu1 %vm3676_vm3, %v13474_v18  ;;  %v6695_v17 = vpop.f32.mrf.mxu0  ;;  %v13481_v18 = vld [vmem:[%s22112_s2 + $0x5c0] sm:$0xff] }
 0x981   : > { %6907 = vmatprep.subr.mxu1 %v22473_v43  ;;  %v13483_v17 = vld [vmem:[%s22112_s2 + $0x5d0] sm:$0xff] }
 0x982   : > { %6908 = vmatpush1.msra.mxu1 %v18599_v10 }
 0x983   : > { %6909 = vmatprep.subr.mxu1 %v22473_v43 }
 0x984   : > { %6910 = vmatpush1.msra.mxu1 %v18604_v2 }
 0x985   : > { %6911 = vmatprep.subr.mxu1 %v22473_v43 }
 0x986   : > { %6912 = vmatpush1.msra.mxu1 %v18609_v63 }
 0x987   : > { %6941 = vmatprep.subr.mxu1 %v22473_v43 }
 0x988   : > { %6942 = vmatpush2.msra.mxu1 %v18613_v45 }
 0x989   : > { %6943 = vmatprep.subr.mxu1 %v22473_v43 }
 0x98a   : > { %6944 = vmatpush2.msra.mxu1 %v18617_v6 }
 0x98b   : > { %6946 = vmatmul.mubr.f32.vlgmr.msra.gmra.mxu1 %v13473_v29  ;;  %7170 = vmatprep.subr.mxu1 %v22473_v43  ;;  %v13486_v29 = vld [vmem:[%s22112_s2 + $0x5e8] sm:$0xff] }
 0x98c   : > { %7171 = vmatpush1.msra.mxu1 %v18532_v23  ;;  %13490 = vmatprep.mubr.msk.f32.mxu1 %vm3676_vm3, %v13476_v46  ;;  %v13485_v46 = vld [vmem:[%s22112_s2 + $0x5e0] sm:$0xff] }
 0x98d   : > { %7172 = vmatprep.subr.mxu1 %v22473_v43 }
 0x98e   : > { %7173 = vmatpush1.msra.mxu1 %v18539_v62 }
 0x98f   : > { %6951 = vmatmul.mubr.f32.gmra.mxu1 %v13475_v4  ;;  %7174 = vmatprep.subr.mxu1 %v22473_v43  ;;  %v13488_v4 = vld [vmem:[%s22112_s2 + $0x5f8] sm:$0xff] }
 0x990   : > { %7175 = vmatpush1.msra.mxu1 %v18546_v33  ;;  %13491 = vmatprep.mubr.msk.f32.mxu1 %vm3676_vm3, %v13478_v20  ;;  %v13487_v20 = vld [vmem:[%s22112_s2 + $0x5f0] sm:$0xff] }
 0x991   : > { %7176 = vmatprep.subr.mxu1 %v22473_v43 }
 0x992   : > { %7177 = vmatpush1.msra.mxu1 %v18553_v37 }
 0x993   : > { %6956 = vmatmul.mubr.f32.gmra.mxu1 %v13477_v59  ;;  %7178 = vmatprep.subr.mxu1 %v22473_v43  ;;  %v13509_v59 = vld [vmem:[%s22112_s2 + $0x608] sm:$0xff] }
 0x994   : > { %7179 = vmatpush1.msra.mxu1 %v18557_v47  ;;  %13492 = vmatprep.mubr.msk.f32.mxu1 %vm3676_vm3, %v13480_v16  ;;  %v13508_v16 = vld [vmem:[%s22112_s2 + $0x600] sm:$0xff] }
 0x995   : > { %7180 = vmatprep.subr.mxu1 %v22473_v43 }
 0x996   : > { %7181 = vmatpush1.msra.mxu1 %v18561_v14 }
 0x997   : > { %6961 = vmatmul.mubr.f32.gmra.mxu1 %v13479_v54  ;;  %7182 = vmatprep.subr.mxu1 %v22473_v43  ;;  %v13511_v54 = vld [vmem:[%s22112_s2 + $0x618] sm:$0xff] }
 0x998   : > { %7183 = vmatpush1.msra.mxu1 %v18565_v51  ;;  %13493 = vmatprep.mubr.msk.f32.mxu1 %vm3676_vm3, %v13482_v44  ;;  %v13510_v44 = vld [vmem:[%s22112_s2 + $0x610] sm:$0xff] }
 0x999   : > { %7184 = vmatprep.subr.mxu1 %v22473_v43 }
 0x99a   : > { %7185 = vmatpush1.msra.mxu1 %v18569_v24 }
 0x99b   : > { %6966 = vmatmul.mubr.f32.gmra.mxu1 %v13481_v18  ;;  %7186 = vmatprep.subr.mxu1 %v22473_v43  ;;  %v13513_v18 = vld [vmem:[%s22112_s2 + $0x628] sm:$0xff] }
 0x99c   : > { %7187 = vmatpush1.msra.mxu1 %v18574_v57  ;;  %13494 = vmatprep.mubr.msk.f32.mxu1 %vm3676_vm3, %v13484_v15  ;;  %v13512_v15 = vld [vmem:[%s22112_s2 + $0x620] sm:$0xff] }
 0x99d   : > { %7188 = vmatprep.subr.mxu1 %v22473_v43 }
 0x99e   : > { %7189 = vmatpush1.msra.mxu1 %v18579_v27 }
 0x99f   : > { %6971 = vmatmul.mubr.f32.gmra.mxu1 %v13483_v17  ;;  %7190 = vmatprep.subr.mxu1 %v22473_v43  ;;  %v13515_v17 = vld [vmem:[%s22112_s2 + $0x638] sm:$0xff] }
 0x9a0   : > { %7191 = vmatpush1.msra.mxu1 %v18584_v22  ;;  %13495 = vmatprep.mubr.msk.f32.mxu1 %vm3676_vm3, %v13486_v29  ;;  %v13514_v29 = vld [vmem:[%s22112_s2 + $0x630] sm:$0xff] }
 0x9a1   : > { %7192 = vmatprep.subr.mxu1 %v22473_v43 }
 0x9a2   : > { %7193 = vmatpush1.msra.mxu1 %v18589_v42 }
 0x9a3   : > { %6976 = vmatmul.mubr.f32.gmra.mxu1 %v13485_v46  ;;  %7194 = vmatprep.subr.mxu1 %v22473_v43  ;;  %v13517_v46 = vld [vmem:[%s22112_s2 + $0x648] sm:$0xff] }
 0x9a4   : > { %7195 = vmatpush1.msra.mxu1 %v18594_v50  ;;  %13496 = vmatprep.mubr.msk.f32.mxu1 %vm3676_vm3, %v13488_v4  ;;  %v13516_v4 = vld [vmem:[%s22112_s2 + $0x640] sm:$0xff] }
 0x9a5   : > { %7196 = vmatprep.subr.mxu1 %v22473_v43 }
 0x9a6   : > { %7197 = vmatpush1.msra.mxu1 %v18599_v10 }
 0x9a7   : > { %6981 = vmatmul.mubr.f32.gmra.mxu1 %v13487_v20  ;;  %7198 = vmatprep.subr.mxu1 %v22473_v43  ;;  %v13519_v20 = vld [vmem:[%s22112_s2 + $0x658] sm:$0xff] }
 0x9a8   : > { %7199 = vmatpush1.msra.mxu1 %v18604_v2  ;;  %13524 = vmatprep.mubr.msk.f32.mxu1 %vm3676_vm3, %v13509_v59  ;;  %v13518_v59 = vld [vmem:[%s22112_s2 + $0x650] sm:$0xff] }
 0x9a9   : > { %7200 = vmatprep.subr.mxu1 %v22473_v43 }
 0x9aa   : > { %7201 = vmatpush1.msra.mxu1 %v18609_v63 }
 0x9ab   : > { %7230 = vmatprep.subr.mxu1 %v22473_v43 }
 0x9ac   : > { %7231 = vmatpush2.msra.mxu1 %v18613_v45 }
 0x9ad   : > { %7232 = vmatprep.subr.mxu1 %v22473_v43 }
 0x9ae   : > { %7233 = vmatpush2.msra.mxu1 %v18617_v6 }
 0x9af   : > { %7235 = vmatmul.mubr.f32.vlgmr.msra.gmra.mxu1 %v13508_v16  ;;  %v13521_v16 = vld [vmem:[%s22112_s2 + $0x668] sm:$0xff] }
 0x9b0   : > { %13525 = vmatprep.mubr.msk.f32.mxu1 %vm3676_vm3, %v13511_v54  ;;  %v13520_v54 = vld [vmem:[%s22112_s2 + $0x660] sm:$0xff] }
 0x9b3   : > { %7240 = vmatmul.mubr.f32.gmra.mxu1 %v13510_v44  ;;  %v13523_v44 = vld [vmem:[%s22112_s2 + $0x678] sm:$0xff] }
 0x9b4   : > { %13526 = vmatprep.mubr.msk.f32.mxu1 %vm3676_vm3, %v13513_v18  ;;  %v13522_v18 = vld [vmem:[%s22112_s2 + $0x670] sm:$0xff] }
 0x9b7   : > { %7245 = vmatmul.mubr.f32.gmra.mxu1 %v13512_v15  ;;  %v13498_v15 = vld [vmem:[%s22116_s6 + $0xb8] sm:$0x3] }
 0x9b8   : > { %13527 = vmatprep.mubr.msk.f32.mxu1 %vm3676_vm3, %v13515_v17  ;;  %15065 = vmatprep.subr.msk.mxu0 %vm3833_vm4, %v13498_v15  ;;  %v13497_v17 = vld [vmem:[%s22116_s6 + $0xb0] sm:$0xff] }
 0x9b9   : > { %15066 = vmatpush3.msk.msra.mxu0 %vm3833_vm4, %v13498_v15 }
 0x9ba   : > { %15067 = vmatprep.subr.mxu0 %v13497_v17 }
 0x9bb   : > { %7250 = vmatmul.mubr.f32.gmra.mxu1 %v13514_v29  ;;  %15068 = vmatpush3.msra.mxu0 %v13497_v17  ;;  %v13533_v29 = vld [vmem:[%s22116_s6 + $0xc8] sm:$0x3] }
 0x9bc   : > { %13528 = vmatprep.mubr.msk.f32.mxu1 %vm3676_vm3, %v13517_v46  ;;  %15081 = vmatprep.subr.msk.mxu0 %vm3833_vm4, %v13533_v29 }
 0x9bf   : > { %7255 = vmatmul.mubr.f32.gmra.mxu1 %v13516_v4 }
 0x9c0   : > { %13529 = vmatprep.mubr.msk.f32.mxu1 %vm3676_vm3, %v13519_v20 }
 0x9c3   : > { %7260 = vmatmul.mubr.f32.gmra.mxu1 %v13518_v59 }
 0x9c4   : > { %13530 = vmatprep.mubr.msk.f32.mxu1 %vm3676_vm3, %v13521_v16 }
 0x9c7   : > { %7265 = vmatmul.mubr.f32.gmra.mxu1 %v13520_v54 }
 0x9c8   : > { %13531 = vmatprep.mubr.msk.f32.mxu1 %vm3676_vm3, %v13523_v44 }
 0x9cb   : > { %7270 = vmatmul.mubr.f32.gmra.mxu1 %v13522_v18 }
 0xa03   : > { %v15039_v46 = vpop.f32.mrf.mxu1 }
 0xa04   : > { %v6544_v4 = vadd.f32 %v15039_v46, %v19853_v30 }
 0xa05   : > { %v20086_v20 = vpop.f32.mrf.mxu1 }
 0xa06   : > { %22492 = vst [vmem:[#allocation38_spill] sm:$0xff] %v20086_v20 }
 0xa0b   : > { %v15042_v59 = vpop.f32.mrf.mxu1 }
 0xa0c   : > { %v6546_v16 = vadd.f32 %v15042_v59, %v19857_v35 }
 0xa0d   : > { %v20089_v54 = vpop.f32.mrf.mxu1 }
 0xa13   : > { %v15045_v44 = vpop.f32.mrf.mxu1 }
 0xa14   : > { %v6548_v18 = vadd.f32 %v15045_v44, %v19861_v5 }
 0xa15   : > { %v20092_v15 = vpop.f32.mrf.mxu1 }
 0xa16   : > { %22493 = vst [vmem:[#allocation52_spill] sm:$0xff] %v20092_v15 }
 0xa1b   : > { %v15048_v17 = vpop.f32.mrf.mxu1 }
 0xa1c   : > { %v6550_v60 = vadd.f32 %v15048_v17, %v19865_v12 }
 0xa1d   : > { %v20095_v0 = vpop.f32.mrf.mxu1 }
 0xa1e   : > { %22494 = vst [vmem:[#allocation26_spill] sm:$0xff] %v20095_v0 }
 0xa27   : > { %v15055_v40 = vpop.f32.mrf.mxu1 }
 0xa28   : > { %v20097_v21 = vadd.f32 %v15055_v40, %v6544_v4 }
 0xa29   : > { %v20099_v30 = vpop.f32.mrf.mxu1 }
 0xa2a   : > { %22495 = vst [vmem:[#allocation51_spill] sm:$0xff] %v20099_v30 }
 0xa2f   : > { %v15058_v46 = vpop.f32.mrf.mxu1 }
 0xa30   : > { %v20101_v20 = vadd.f32 %v15058_v46, %v6546_v16  ;;  %v13532_v16 = vld [vmem:[%s22116_s6 + $0xc0] sm:$0xff] }
 0xa31   : > { %v20103_v35 = vpop.f32.mrf.mxu1 }
 0xa37   : > { %v15061_v59 = vpop.f32.mrf.mxu1 }
 0xa38   : > { %v20105_v61 = vadd.f32 %v15061_v59, %v6548_v18 }
 0xa39   : > { %v20107_v5 = vpop.f32.mrf.mxu1 }
 0xa3a   : > { %22496 = vst [vmem:[#allocation33_spill] sm:$0xff] %v20107_v5 }
 0xa3f   : > { %v15064_v44 = vpop.f32.mrf.mxu1 }
 0xa40   : > { %v20109_v28 = vadd.f32 %v15064_v44, %v6550_v60 }
 0xa41   : > { %v20111_v12 = vpop.f32.mrf.mxu1 }
 0xa42   : > { %22497 = vst [vmem:[#allocation6_spill] sm:$0xff] %v20111_v12 }
 0xa4b   : > { %v6947_v17 = vpop.f32.mrf.mxu1 }
 0xa4c   : > { %15069 = vmatprep.mubr.msk.f32.mxu0 %vm3808_vm5, %v6947_v17 }
 0xa4d   : > { %v6949_v40 = vpop.f32.mrf.mxu1 }
 0xa4f   : > { %v6952_v4 = vpop.f32.mrf.mxu1 }
 0xa50   : > { %15070 = vmatmul.mubr.msk.f32.vlgmr.msra.gmra.mxu0 %vm3808_vm5, %v6952_v4 }
 0xa51   : > { %v6954_v18 = vpop.f32.mrf.mxu1  ;;  %15082 = vmatpush3.msk.msra.mxu0 %vm3833_vm4, %v13533_v29 }
 0xa52   : > { %15083 = vmatprep.subr.mxu0 %v13532_v16 }
 0xa53   : > { %v6957_v46 = vpop.f32.mrf.mxu1  ;;  %15084 = vmatpush3.msra.mxu0 %v13532_v16 }
 0xa54   : > { %15072 = vmatprep.mubr.msk.f32.mxu0 %vm3808_vm5, %v6957_v46  ;;  %7459 = vmatprep.subr.mxu0 %v22473_v43 }
 0xa55   : > { %v6959_v60 = vpop.f32.mrf.mxu1 }
 0xa57   : > { %v6962_v59 = vpop.f32.mrf.mxu1 }
 0xa58   : > { %15073 = vmatmul.mubr.msk.f32.gmra.mxu0 %vm3808_vm5, %v6962_v59 }
 0xa59   : > { %v6964_v44 = vpop.f32.mrf.mxu1 }
 0xa5b   : > { %v6967_v17 = vpop.f32.mrf.mxu1 }
 0xa5c   : > { %15075 = vmatprep.mubr.msk.f32.mxu0 %vm3808_vm5, %v6967_v17 }
 0xa5d   : > { %v6969_v40 = vpop.f32.mrf.mxu1 }
 0xa5f   : > { %v6972_v4 = vpop.f32.mrf.mxu1 }
 0xa60   : > { %15076 = vmatmul.mubr.msk.f32.gmra.mxu0 %vm3808_vm5, %v6972_v4 }
 0xa61   : > { %v6974_v29 = vpop.f32.mrf.mxu1 }
 0xa63   : > { %v6977_v18 = vpop.f32.mrf.mxu1 }
 0xa64   : > { %15078 = vmatprep.mubr.msk.f32.mxu0 %vm3808_vm5, %v6977_v18 }
 0xa65   : > { %v6979_v16 = vpop.f32.mrf.mxu1 }
 0xa67   : > { %v6982_v46 = vpop.f32.mrf.mxu1 }
 0xa68   : > { %15079 = vmatmul.mubr.msk.f32.gmra.mxu0 %vm3808_vm5, %v6982_v46 }
 0xa69   : > { %v6984_v60 = vpop.f32.mrf.mxu1 }
 0xa6f   : > { %v7236_v30 = vpop.f32.mrf.mxu1 }
 0xa70   : > { %15085 = vmatprep.mubr.msk.f32.mxu0 %vm3808_vm5, %v7236_v30 }
 0xa71   : > { %v7238_v59 = vpop.f32.mrf.mxu1 }
 0xa73   : > { %v7241_v44 = vpop.f32.mrf.mxu1 }
 0xa74   : > { %15086 = vmatmul.mubr.msk.f32.vlgmr.msra.gmra.mxu0 %vm3808_vm5, %v7241_v44 }
 0xa75   : > { %7460 = vmatpush1.msra.mxu0 %v18532_v23  ;;  %v7243_v17 = vpop.f32.mrf.mxu1 }
 0xa76   : > { %7461 = vmatprep.subr.mxu0 %v22473_v43  ;;  %v13544_v17 = vld [vmem:[%s22112_s2 + $0x688] sm:$0xff] }
 0xa77   : > { %7462 = vmatpush1.msra.mxu0 %v18539_v62  ;;  %v7246_v40 = vpop.f32.mrf.mxu1 }
 0xa78   : > { %7463 = vmatprep.subr.mxu0 %v22473_v43  ;;  %15088 = vmatprep.mubr.msk.f32.mxu0 %vm3808_vm5, %v7246_v40 }
 0xa79   : > { %7464 = vmatpush1.msra.mxu0 %v18546_v33  ;;  %v7248_v4 = vpop.f32.mrf.mxu1 }
 0xa7a   : > { %7465 = vmatprep.subr.mxu0 %v22473_v43 }
 0xa7b   : > { %7466 = vmatpush1.msra.mxu0 %v18553_v37  ;;  %v7251_v30 = vpop.f32.mrf.mxu1 }
 0xa7c   : > { %7467 = vmatprep.subr.mxu0 %v22473_v43  ;;  %15089 = vmatmul.mubr.msk.f32.gmra.mxu0 %vm3808_vm5, %v7251_v30  ;;  %v13543_v30 = vld [vmem:[%s22112_s2 + $0x680] sm:$0xff] }
 0xa7d   : > { %7468 = vmatpush1.msra.mxu0 %v18557_v47  ;;  %v7253_v29 = vpop.f32.mrf.mxu1 }
 0xa7e   : > { %7469 = vmatprep.subr.mxu0 %v22473_v43  ;;  %v13546_v29 = vld [vmem:[%s22112_s2 + $0x698] sm:$0xff] }
 0xa7f   : > { %7470 = vmatpush1.msra.mxu0 %v18561_v14  ;;  %v7256_v18 = vpop.f32.mrf.mxu1 }
 0xa80   : > { %7471 = vmatprep.subr.mxu0 %v22473_v43  ;;  %15091 = vmatprep.mubr.msk.f32.mxu0 %vm3808_vm5, %v7256_v18  ;;  %v13545_v18 = vld [vmem:[%s22112_s2 + $0x690] sm:$0xff] }
 0xa81   : > { %7472 = vmatpush1.msra.mxu0 %v18565_v51  ;;  %v7258_v16 = vpop.f32.mrf.mxu1 }
 0xa82   : > { %7473 = vmatprep.subr.mxu0 %v22473_v43  ;;  %v13548_v16 = vld [vmem:[%s22112_s2 + $0x6a8] sm:$0xff] }
 0xa83   : > { %7474 = vmatpush1.msra.mxu0 %v18569_v24  ;;  %v7261_v46 = vpop.f32.mrf.mxu1 }
 0xa84   : > { %7475 = vmatprep.subr.mxu0 %v22473_v43  ;;  %15092 = vmatmul.mubr.msk.f32.gmra.mxu0 %vm3808_vm5, %v7261_v46  ;;  %v13547_v46 = vld [vmem:[%s22112_s2 + $0x6a0] sm:$0xff] }
 0xa85   : > { %7476 = vmatpush1.msra.mxu0 %v18574_v57  ;;  %v7263_v60 = vpop.f32.mrf.mxu1 }
 0xa86   : > { %7477 = vmatprep.subr.mxu0 %v22473_v43  ;;  %v13550_v60 = vld [vmem:[%s22112_s2 + $0x6b8] sm:$0xff] }
 0xa87   : > { %7478 = vmatpush1.msra.mxu0 %v18579_v27  ;;  %v7266_v59 = vpop.f32.mrf.mxu1 }
 0xa88   : > { %7479 = vmatprep.subr.mxu0 %v22473_v43  ;;  %15094 = vmatprep.mubr.msk.f32.mxu0 %vm3808_vm5, %v7266_v59  ;;  %v13549_v59 = vld [vmem:[%s22112_s2 + $0x6b0] sm:$0xff] }
 0xa89   : > { %7480 = vmatpush1.msra.mxu0 %v18584_v22  ;;  %v7268_v44 = vpop.f32.mrf.mxu1 }
 0xa8a   : > { %7481 = vmatprep.subr.mxu0 %v22473_v43  ;;  %v13552_v44 = vld [vmem:[%s22112_s2 + $0x6c8] sm:$0xff] }
 0xa8b   : > { %7482 = vmatpush1.msra.mxu0 %v18589_v42  ;;  %v7271_v40 = vpop.f32.mrf.mxu1 }
 0xa8c   : > { %7483 = vmatprep.subr.mxu0 %v22473_v43  ;;  %15095 = vmatmul.mubr.msk.f32.gmra.mxu0 %vm3808_vm5, %v7271_v40  ;;  %v13554_v40 = vld [vmem:[%s22112_s2 + $0x6d8] sm:$0xff] }
 0xa8d   : > { %7484 = vmatpush1.msra.mxu0 %v18594_v50  ;;  %13559 = vmatprep.mubr.msk.f32.mxu0 %vm3676_vm3, %v13544_v17  ;;  %v7273_v4 = vpop.f32.mrf.mxu1  ;;  %v13551_v17 = vld [vmem:[%s22112_s2 + $0x6c0] sm:$0xff] }
 0xa8e   : > { %7485 = vmatprep.subr.mxu0 %v22473_v43  ;;  %v13553_v4 = vld [vmem:[%s22112_s2 + $0x6d0] sm:$0xff] }
 0xa8f   : > { %7486 = vmatpush1.msra.mxu0 %v18599_v10 }
 0xa90   : > { %7487 = vmatprep.subr.mxu0 %v22473_v43 }
 0xa91   : > { %7488 = vmatpush1.msra.mxu0 %v18604_v2 }
 0xa92   : > { %7489 = vmatprep.subr.mxu0 %v22473_v43 }
 0xa93   : > { %7490 = vmatpush1.msra.mxu0 %v18609_v63 }
 0xa94   : > { %7519 = vmatprep.subr.mxu0 %v22473_v43 }
 0xa95   : > { %7520 = vmatpush2.msra.mxu0 %v18613_v45 }
 0xa96   : > { %7521 = vmatprep.subr.mxu0 %v22473_v43 }
 0xa97   : > { %7522 = vmatpush2.msra.mxu0 %v18617_v6 }
 0xa98   : > { %7524 = vmatmul.mubr.f32.vlgmr.msra.gmra.mxu0 %v13543_v30  ;;  %7748 = vmatprep.subr.mxu0 %v22473_v43  ;;  %v13556_v30 = vld [vmem:[%s22112_s2 + $0x6e8] sm:$0xff] }
 0xa99   : > { %7749 = vmatpush1.msra.mxu0 %v18532_v23  ;;  %13560 = vmatprep.mubr.msk.f32.mxu0 %vm3676_vm3, %v13546_v29  ;;  %v13555_v29 = vld [vmem:[%s22112_s2 + $0x6e0] sm:$0xff] }
 0xa9a   : > { %7750 = vmatprep.subr.mxu0 %v22473_v43 }
 0xa9b   : > { %7751 = vmatpush1.msra.mxu0 %v18539_v62 }
 0xa9c   : > { %7529 = vmatmul.mubr.f32.gmra.mxu0 %v13545_v18  ;;  %7752 = vmatprep.subr.mxu0 %v22473_v43  ;;  %v13558_v18 = vld [vmem:[%s22112_s2 + $0x6f8] sm:$0xff] }
 0xa9d   : > { %7753 = vmatpush1.msra.mxu0 %v18546_v33  ;;  %13561 = vmatprep.mubr.msk.f32.mxu0 %vm3676_vm3, %v13548_v16  ;;  %v13557_v16 = vld [vmem:[%s22112_s2 + $0x6f0] sm:$0xff] }
 0xa9e   : > { %7754 = vmatprep.subr.mxu0 %v22473_v43 }
 0xa9f   : > { %7755 = vmatpush1.msra.mxu0 %v18553_v37 }
 0xaa0   : > { %7534 = vmatmul.mubr.f32.gmra.mxu0 %v13547_v46  ;;  %7756 = vmatprep.subr.mxu0 %v22473_v43  ;;  %v13579_v46 = vld [vmem:[%s22112_s2 + $0x708] sm:$0xff] }
 0xaa1   : > { %7757 = vmatpush1.msra.mxu0 %v18557_v47  ;;  %13562 = vmatprep.mubr.msk.f32.mxu0 %vm3676_vm3, %v13550_v60  ;;  %v13578_v60 = vld [vmem:[%s22112_s2 + $0x700] sm:$0xff] }
 0xaa2   : > { %7758 = vmatprep.subr.mxu0 %v22473_v43 }
 0xaa3   : > { %7759 = vmatpush1.msra.mxu0 %v18561_v14 }
 0xaa4   : > { %7539 = vmatmul.mubr.f32.gmra.mxu0 %v13549_v59  ;;  %7760 = vmatprep.subr.mxu0 %v22473_v43  ;;  %v13581_v59 = vld [vmem:[%s22112_s2 + $0x718] sm:$0xff] }
 0xaa5   : > { %7761 = vmatpush1.msra.mxu0 %v18565_v51  ;;  %13563 = vmatprep.mubr.msk.f32.mxu0 %vm3676_vm3, %v13552_v44  ;;  %v13580_v44 = vld [vmem:[%s22112_s2 + $0x710] sm:$0xff] }
 0xaa6   : > { %7762 = vmatprep.subr.mxu0 %v22473_v43 }
 0xaa7   : > { %7763 = vmatpush1.msra.mxu0 %v18569_v24 }
 0xaa8   : > { %7544 = vmatmul.mubr.f32.gmra.mxu0 %v13551_v17  ;;  %7764 = vmatprep.subr.mxu0 %v22473_v43  ;;  %v13583_v17 = vld [vmem:[%s22112_s2 + $0x728] sm:$0xff] }
 0xaa9   : > { %7765 = vmatpush1.msra.mxu0 %v18574_v57  ;;  %13564 = vmatprep.mubr.msk.f32.mxu0 %vm3676_vm3, %v13554_v40  ;;  %v13582_v40 = vld [vmem:[%s22112_s2 + $0x720] sm:$0xff] }
 0xaaa   : > { %7766 = vmatprep.subr.mxu0 %v22473_v43 }
 0xaab   : > { %7767 = vmatpush1.msra.mxu0 %v18579_v27 }
 0xaac   : > { %7549 = vmatmul.mubr.f32.gmra.mxu0 %v13553_v4  ;;  %7768 = vmatprep.subr.mxu0 %v22473_v43  ;;  %v13585_v4 = vld [vmem:[%s22112_s2 + $0x738] sm:$0xff] }
 0xaad   : > { %7769 = vmatpush1.msra.mxu0 %v18584_v22  ;;  %13565 = vmatprep.mubr.msk.f32.mxu0 %vm3676_vm3, %v13556_v30  ;;  %v13584_v30 = vld [vmem:[%s22112_s2 + $0x730] sm:$0xff] }
 0xaae   : > { %7770 = vmatprep.subr.mxu0 %v22473_v43 }
 0xaaf   : > { %7771 = vmatpush1.msra.mxu0 %v18589_v42 }
 0xab0   : > { %7554 = vmatmul.mubr.f32.gmra.mxu0 %v13555_v29  ;;  %7772 = vmatprep.subr.mxu0 %v22473_v43  ;;  %v13587_v29 = vld [vmem:[%s22112_s2 + $0x748] sm:$0xff] }
 0xab1   : > { %7773 = vmatpush1.msra.mxu0 %v18594_v50  ;;  %13566 = vmatprep.mubr.msk.f32.mxu0 %vm3676_vm3, %v13558_v18  ;;  %v13586_v18 = vld [vmem:[%s22112_s2 + $0x740] sm:$0xff] }
 0xab2   : > { %7774 = vmatprep.subr.mxu0 %v22473_v43 }
 0xab3   : > { %7775 = vmatpush1.msra.mxu0 %v18599_v10 }
 0xab4   : > { %7559 = vmatmul.mubr.f32.gmra.mxu0 %v13557_v16  ;;  %7776 = vmatprep.subr.mxu0 %v22473_v43  ;;  %v13589_v16 = vld [vmem:[%s22112_s2 + $0x758] sm:$0xff] }
 0xab5   : > { %7777 = vmatpush1.msra.mxu0 %v18604_v2  ;;  %13594 = vmatprep.mubr.msk.f32.mxu0 %vm3676_vm3, %v13579_v46  ;;  %v13588_v46 = vld [vmem:[%s22112_s2 + $0x750] sm:$0xff] }
 0xab6   : > { %7778 = vmatprep.subr.mxu0 %v22473_v43 }
 0xab7   : > { %7779 = vmatpush1.msra.mxu0 %v18609_v63 }
 0xab8   : > { %7808 = vmatprep.subr.mxu0 %v22473_v43 }
 0xab9   : > { %7809 = vmatpush2.msra.mxu0 %v18613_v45 }
 0xaba   : > { %7810 = vmatprep.subr.mxu0 %v22473_v43 }
 0xabb   : > { %7811 = vmatpush2.msra.mxu0 %v18617_v6 }
 0xabc   : > { %7813 = vmatmul.mubr.f32.vlgmr.msra.gmra.mxu0 %v13578_v60  ;;  %v13591_v60 = vld [vmem:[%s22112_s2 + $0x768] sm:$0xff] }
 0xabd   : > { %13595 = vmatprep.mubr.msk.f32.mxu0 %vm3676_vm3, %v13581_v59  ;;  %v13590_v59 = vld [vmem:[%s22112_s2 + $0x760] sm:$0xff] }
 0xac0   : > { %7818 = vmatmul.mubr.f32.gmra.mxu0 %v13580_v44  ;;  %v13593_v44 = vld [vmem:[%s22112_s2 + $0x778] sm:$0xff] }
 0xac1   : > { %13596 = vmatprep.mubr.msk.f32.mxu0 %vm3676_vm3, %v13583_v17  ;;  %v13592_v17 = vld [vmem:[%s22112_s2 + $0x770] sm:$0xff] }
 0xac4   : > { %7823 = vmatmul.mubr.f32.gmra.mxu0 %v13582_v40  ;;  %v13568_v40 = vld [vmem:[%s22116_s6 + $0xd8] sm:$0x3] }
 0xac5   : > { %13597 = vmatprep.mubr.msk.f32.mxu0 %vm3676_vm3, %v13585_v4  ;;  %15097 = vmatprep.subr.msk.mxu1 %vm3833_vm4, %v13568_v40  ;;  %v13567_v4 = vld [vmem:[%s22116_s6 + $0xd0] sm:$0xff] }
 0xac6   : > { %15098 = vmatpush3.msk.msra.mxu1 %vm3833_vm4, %v13568_v40 }
 0xac7   : > { %15099 = vmatprep.subr.mxu1 %v13567_v4 }
 0xac8   : > { %7828 = vmatmul.mubr.f32.gmra.mxu0 %v13584_v30  ;;  %15100 = vmatpush3.msra.mxu1 %v13567_v4  ;;  %v13603_v30 = vld [vmem:[%s22116_s6 + $0xe8] sm:$0x3] }
 0xac9   : > { %13598 = vmatprep.mubr.msk.f32.mxu0 %vm3676_vm3, %v13587_v29  ;;  %15113 = vmatprep.subr.msk.mxu1 %vm3833_vm4, %v13603_v30 }
 0xacc   : > { %7833 = vmatmul.mubr.f32.gmra.mxu0 %v13586_v18 }
 0xacd   : > { %13599 = vmatprep.mubr.msk.f32.mxu0 %vm3676_vm3, %v13589_v16 }
 0xad0   : > { %7838 = vmatmul.mubr.f32.gmra.mxu0 %v13588_v46 }
 0xad1   : > { %13600 = vmatprep.mubr.msk.f32.mxu0 %vm3676_vm3, %v13591_v60 }
 0xad4   : > { %7843 = vmatmul.mubr.f32.gmra.mxu0 %v13590_v59 }
 0xad5   : > { %13601 = vmatprep.mubr.msk.f32.mxu0 %vm3676_vm3, %v13593_v44 }
 0xad8   : > { %7848 = vmatmul.mubr.f32.gmra.mxu0 %v13592_v17 }
 0xb10   : > { %v15071_v29 = vpop.f32.mrf.mxu0 }
 0xb11   : > { %v7122_v18 = vadd.f32 %v15071_v29, %v20097_v21 }
 0xb12   : > { %v20330_v16 = vpop.f32.mrf.mxu0 }
 0xb13   : > { %22498 = vst [vmem:[#allocation32_spill] sm:$0xff] %v20330_v16 }
 0xb18   : > { %v15074_v46 = vpop.f32.mrf.mxu0 }
 0xb19   : > { %v7124_v60 = vadd.f32 %v15074_v46, %v20101_v20 }
 0xb1a   : > { %v20333_v59 = vpop.f32.mrf.mxu0 }
 0xb20   : > { %v15077_v44 = vpop.f32.mrf.mxu0 }
 0xb21   : > { %v7126_v17 = vadd.f32 %v15077_v44, %v20105_v61 }
 0xb22   : > { %v20336_v40 = vpop.f32.mrf.mxu0 }
 0xb23   : > { %22499 = vst [vmem:[#allocation40_spill] sm:$0xff] %v20336_v40 }
 0xb28   : > { %v15080_v4 = vpop.f32.mrf.mxu0 }
 0xb29   : > { %v7128_v12 = vadd.f32 %v15080_v4, %v20109_v28 }
 0xb2a   : > { %v20339_v0 = vpop.f32.mrf.mxu0 }
 0xb2b   : > { %22500 = vst [vmem:[#allocation47_spill] sm:$0xff] %v20339_v0 }
 0xb34   : > { %v15087_v5 = vpop.f32.mrf.mxu0 }
 0xb35   : > { %v20341_v15 = vadd.f32 %v15087_v5, %v7122_v18 }
 0xb36   : > { %v20343_v21 = vpop.f32.mrf.mxu0 }
 0xb37   : > { %22501 = vst [vmem:[#allocation28_spill] sm:$0xff] %v20343_v21 }
 0xb3c   : > { %v15090_v29 = vpop.f32.mrf.mxu0 }
 0xb3d   : > { %v20345_v16 = vadd.f32 %v15090_v29, %v7124_v60  ;;  %v13602_v60 = vld [vmem:[%s22116_s6 + $0xe0] sm:$0xff] }
 0xb3e   : > { %v20347_v20 = vpop.f32.mrf.mxu0 }
 0xb3f   : > { %22502 = vst [vmem:[#allocation7_spill] sm:$0xff] %v20347_v20 }
 0xb44   : > { %v15093_v46 = vpop.f32.mrf.mxu0 }
 0xb45   : > { %v20349_v8 = vadd.f32 %v15093_v46, %v7126_v17 }
 0xb46   : > { %v20351_v61 = vpop.f32.mrf.mxu0 }
 0xb47   : > { %22503 = vst [vmem:[#allocation8_spill] sm:$0xff] %v20351_v61 }
 0xb4c   : > { %v15096_v44 = vpop.f32.mrf.mxu0 }
 0xb4d   : > { %v20353_v40 = vadd.f32 %v15096_v44, %v7128_v12 }
 0xb4e   : > { %v20355_v28 = vpop.f32.mrf.mxu0 }
 0xb4f   : > { %22504 = vst [vmem:[#allocation9_spill] sm:$0xff] %v20355_v28 }
 0xb58   : > { %v7525_v4 = vpop.f32.mrf.mxu0 }
 0xb59   : > { %15101 = vmatprep.mubr.msk.f32.mxu1 %vm3808_vm5, %v7525_v4 }
 0xb5a   : > { %v7527_v5 = vpop.f32.mrf.mxu0 }
 0xb5c   : > { %v7530_v18 = vpop.f32.mrf.mxu0 }
 0xb5d   : > { %15102 = vmatmul.mubr.msk.f32.vlgmr.msra.gmra.mxu1 %vm3808_vm5, %v7530_v18 }
 0xb5e   : > { %v7532_v17 = vpop.f32.mrf.mxu0  ;;  %15114 = vmatpush3.msk.msra.mxu1 %vm3833_vm4, %v13603_v30 }
 0xb5f   : > { %15115 = vmatprep.subr.mxu1 %v13602_v60 }
 0xb60   : > { %v7535_v29 = vpop.f32.mrf.mxu0  ;;  %15116 = vmatpush3.msra.mxu1 %v13602_v60 }
 0xb61   : > { %15104 = vmatprep.mubr.msk.f32.mxu1 %vm3808_vm5, %v7535_v29  ;;  %8037 = vmatprep.subr.mxu1 %v22473_v43 }
 0xb62   : > { %v7537_v12 = vpop.f32.mrf.mxu0 }
 0xb64   : > { %v7540_v46 = vpop.f32.mrf.mxu0 }
 0xb65   : > { %15105 = vmatmul.mubr.msk.f32.gmra.mxu1 %vm3808_vm5, %v7540_v46 }
 0xb66   : > { %v7542_v44 = vpop.f32.mrf.mxu0 }
 0xb68   : > { %v7545_v4 = vpop.f32.mrf.mxu0 }
 0xb69   : > { %15107 = vmatprep.mubr.msk.f32.mxu1 %vm3808_vm5, %v7545_v4 }
 0xb6a   : > { %v7547_v5 = vpop.f32.mrf.mxu0 }
 0xb6c   : > { %v7550_v18 = vpop.f32.mrf.mxu0 }
 0xb6d   : > { %15108 = vmatmul.mubr.msk.f32.gmra.mxu1 %vm3808_vm5, %v7550_v18 }
 0xb6e   : > { %v7552_v30 = vpop.f32.mrf.mxu0 }
 0xb70   : > { %v7555_v17 = vpop.f32.mrf.mxu0 }
 0xb71   : > { %15110 = vmatprep.mubr.msk.f32.mxu1 %vm3808_vm5, %v7555_v17 }
 0xb72   : > { %v7557_v60 = vpop.f32.mrf.mxu0 }
 0xb74   : > { %v7560_v29 = vpop.f32.mrf.mxu0 }
 0xb75   : > { %15111 = vmatmul.mubr.msk.f32.gmra.mxu1 %vm3808_vm5, %v7560_v29 }
 0xb76   : > { %v7562_v12 = vpop.f32.mrf.mxu0 }
 0xb7c   : > { %v7814_v21 = vpop.f32.mrf.mxu0 }
 0xb7d   : > { %15117 = vmatprep.mubr.msk.f32.mxu1 %vm3808_vm5, %v7814_v21 }
 0xb7e   : > { %v7816_v46 = vpop.f32.mrf.mxu0 }
 0xb80   : > { %v7819_v44 = vpop.f32.mrf.mxu0 }
 0xb81   : > { %15118 = vmatmul.mubr.msk.f32.vlgmr.msra.gmra.mxu1 %vm3808_vm5, %v7819_v44 }
 0xb82   : > { %8038 = vmatpush1.msra.mxu1 %v18532_v23  ;;  %v7821_v4 = vpop.f32.mrf.mxu0 }
 0xb83   : > { %8039 = vmatprep.subr.mxu1 %v22473_v43  ;;  %v13614_v4 = vld [vmem:[%s22112_s2 + $0x788] sm:$0xff] }
 0xb84   : > { %8040 = vmatpush1.msra.mxu1 %v18539_v62  ;;  %v7824_v5 = vpop.f32.mrf.mxu0 }
 0xb85   : > { %8041 = vmatprep.subr.mxu1 %v22473_v43  ;;  %15120 = vmatprep.mubr.msk.f32.mxu1 %vm3808_vm5, %v7824_v5 }
 0xb86   : > { %8042 = vmatpush1.msra.mxu1 %v18546_v33  ;;  %v7826_v18 = vpop.f32.mrf.mxu0 }
 0xb87   : > { %8043 = vmatprep.subr.mxu1 %v22473_v43 }
 0xb88   : > { %8044 = vmatpush1.msra.mxu1 %v18553_v37  ;;  %v7829_v21 = vpop.f32.mrf.mxu0 }
 0xb89   : > { %8045 = vmatprep.subr.mxu1 %v22473_v43  ;;  %15121 = vmatmul.mubr.msk.f32.gmra.mxu1 %vm3808_vm5, %v7829_v21  ;;  %v13613_v21 = vld [vmem:[%s22112_s2 + $0x780] sm:$0xff] }
 0xb8a   : > { %8046 = vmatpush1.msra.mxu1 %v18557_v47  ;;  %v7831_v30 = vpop.f32.mrf.mxu0 }
 0xb8b   : > { %8047 = vmatprep.subr.mxu1 %v22473_v43  ;;  %v13616_v30 = vld [vmem:[%s22112_s2 + $0x798] sm:$0xff] }
 0xb8c   : > { %8048 = vmatpush1.msra.mxu1 %v18561_v14  ;;  %v7834_v17 = vpop.f32.mrf.mxu0 }
 0xb8d   : > { %8049 = vmatprep.subr.mxu1 %v22473_v43  ;;  %15123 = vmatprep.mubr.msk.f32.mxu1 %vm3808_vm5, %v7834_v17  ;;  %v13615_v17 = vld [vmem:[%s22112_s2 + $0x790] sm:$0xff] }
 0xb8e   : > { %8050 = vmatpush1.msra.mxu1 %v18565_v51  ;;  %v7836_v60 = vpop.f32.mrf.mxu0 }
 0xb8f   : > { %8051 = vmatprep.subr.mxu1 %v22473_v43  ;;  %v13618_v60 = vld [vmem:[%s22112_s2 + $0x7a8] sm:$0xff] }
 0xb90   : > { %8052 = vmatpush1.msra.mxu1 %v18569_v24  ;;  %v7839_v29 = vpop.f32.mrf.mxu0 }
 0xb91   : > { %8053 = vmatprep.subr.mxu1 %v22473_v43  ;;  %15124 = vmatmul.mubr.msk.f32.gmra.mxu1 %vm3808_vm5, %v7839_v29  ;;  %v13617_v29 = vld [vmem:[%s22112_s2 + $0x7a0] sm:$0xff] }
 0xb92   : > { %8054 = vmatpush1.msra.mxu1 %v18574_v57  ;;  %v7841_v12 = vpop.f32.mrf.mxu0 }
 0xb93   : > { %8055 = vmatprep.subr.mxu1 %v22473_v43  ;;  %v13620_v12 = vld [vmem:[%s22112_s2 + $0x7b8] sm:$0xff] }
 0xb94   : > { %8056 = vmatpush1.msra.mxu1 %v18579_v27  ;;  %v7844_v46 = vpop.f32.mrf.mxu0 }
 0xb95   : > { %8057 = vmatprep.subr.mxu1 %v22473_v43  ;;  %15126 = vmatprep.mubr.msk.f32.mxu1 %vm3808_vm5, %v7844_v46  ;;  %v13619_v46 = vld [vmem:[%s22112_s2 + $0x7b0] sm:$0xff] }
 0xb96   : > { %8058 = vmatpush1.msra.mxu1 %v18584_v22  ;;  %v7846_v44 = vpop.f32.mrf.mxu0 }
 0xb97   : > { %8059 = vmatprep.subr.mxu1 %v22473_v43  ;;  %v13622_v44 = vld [vmem:[%s22112_s2 + $0x7c8] sm:$0xff] }
 0xb98   : > { %8060 = vmatpush1.msra.mxu1 %v18589_v42  ;;  %v7849_v5 = vpop.f32.mrf.mxu0 }
 0xb99   : > { %8061 = vmatprep.subr.mxu1 %v22473_v43  ;;  %15127 = vmatmul.mubr.msk.f32.gmra.mxu1 %vm3808_vm5, %v7849_v5  ;;  %v13624_v5 = vld [vmem:[%s22112_s2 + $0x7d8] sm:$0xff] }
 0xb9a   : > { %8062 = vmatpush1.msra.mxu1 %v18594_v50  ;;  %13629 = vmatprep.mubr.msk.f32.mxu1 %vm3676_vm3, %v13614_v4  ;;  %v7851_v18 = vpop.f32.mrf.mxu0  ;;  %v13621_v4 = vld [vmem:[%s22112_s2 + $0x7c0] sm:$0xff] }
 0xb9b   : > { %8063 = vmatprep.subr.mxu1 %v22473_v43  ;;  %v13623_v18 = vld [vmem:[%s22112_s2 + $0x7d0] sm:$0xff] }
 0xb9c   : > { %8064 = vmatpush1.msra.mxu1 %v18599_v10 }
 0xb9d   : > { %8065 = vmatprep.subr.mxu1 %v22473_v43 }
 0xb9e   : > { %8066 = vmatpush1.msra.mxu1 %v18604_v2 }
 0xb9f   : > { %8067 = vmatprep.subr.mxu1 %v22473_v43 }
 0xba0   : > { %8068 = vmatpush1.msra.mxu1 %v18609_v63 }
 0xba1   : > { %8097 = vmatprep.subr.mxu1 %v22473_v43 }
 0xba2   : > { %8098 = vmatpush2.msra.mxu1 %v18613_v45 }
 0xba3   : > { %8099 = vmatprep.subr.mxu1 %v22473_v43 }
 0xba4   : > { %8100 = vmatpush2.msra.mxu1 %v18617_v6 }
 0xba5   : > { %8102 = vmatmul.mubr.f32.vlgmr.msra.gmra.mxu1 %v13613_v21  ;;  %8326 = vmatprep.subr.mxu1 %v22473_v43  ;;  %v13626_v21 = vld [vmem:[%s22112_s2 + $0x7e8] sm:$0xff] }
 0xba6   : > { %8327 = vmatpush1.msra.mxu1 %v18532_v23  ;;  %13630 = vmatprep.mubr.msk.f32.mxu1 %vm3676_vm3, %v13616_v30  ;;  %v13625_v30 = vld [vmem:[%s22112_s2 + $0x7e0] sm:$0xff] }
 0xba7   : > { %8328 = vmatprep.subr.mxu1 %v22473_v43 }
 0xba8   : > { %8329 = vmatpush1.msra.mxu1 %v18539_v62 }
 0xba9   : > { %8107 = vmatmul.mubr.f32.gmra.mxu1 %v13615_v17  ;;  %8330 = vmatprep.subr.mxu1 %v22473_v43  ;;  %v13628_v17 = vld [vmem:[%s22112_s2 + $0x7f8] sm:$0xff] }
 0xbaa   : > { %8331 = vmatpush1.msra.mxu1 %v18546_v33  ;;  %13631 = vmatprep.mubr.msk.f32.mxu1 %vm3676_vm3, %v13618_v60  ;;  %v13627_v60 = vld [vmem:[%s22112_s2 + $0x7f0] sm:$0xff] }
 0xbab   : > { %8332 = vmatprep.subr.mxu1 %v22473_v43 }
 0xbac   : > { %8333 = vmatpush1.msra.mxu1 %v18553_v37 }
 0xbad   : > { %8112 = vmatmul.mubr.f32.gmra.mxu1 %v13617_v29  ;;  %8334 = vmatprep.subr.mxu1 %v22473_v43  ;;  %v13649_v29 = vld [vmem:[%s22112_s2 + $0x808] sm:$0xff] }
 0xbae   : > { %8335 = vmatpush1.msra.mxu1 %v18557_v47  ;;  %13632 = vmatprep.mubr.msk.f32.mxu1 %vm3676_vm3, %v13620_v12  ;;  %v13648_v12 = vld [vmem:[%s22112_s2 + $0x800] sm:$0xff] }
 0xbaf   : > { %8336 = vmatprep.subr.mxu1 %v22473_v43 }
 0xbb0   : > { %8337 = vmatpush1.msra.mxu1 %v18561_v14 }
 0xbb1   : > { %8117 = vmatmul.mubr.f32.gmra.mxu1 %v13619_v46  ;;  %8338 = vmatprep.subr.mxu1 %v22473_v43  ;;  %v13651_v46 = vld [vmem:[%s22112_s2 + $0x818] sm:$0xff] }
 0xbb2   : > { %8339 = vmatpush1.msra.mxu1 %v18565_v51  ;;  %13633 = vmatprep.mubr.msk.f32.mxu1 %vm3676_vm3, %v13622_v44  ;;  %v13650_v44 = vld [vmem:[%s22112_s2 + $0x810] sm:$0xff] }
 0xbb3   : > { %8340 = vmatprep.subr.mxu1 %v22473_v43 }
 0xbb4   : > { %8341 = vmatpush1.msra.mxu1 %v18569_v24 }
 0xbb5   : > { %8122 = vmatmul.mubr.f32.gmra.mxu1 %v13621_v4  ;;  %8342 = vmatprep.subr.mxu1 %v22473_v43  ;;  %v13653_v4 = vld [vmem:[%s22112_s2 + $0x828] sm:$0xff] }
 0xbb6   : > { %8343 = vmatpush1.msra.mxu1 %v18574_v57  ;;  %13634 = vmatprep.mubr.msk.f32.mxu1 %vm3676_vm3, %v13624_v5  ;;  %v13652_v5 = vld [vmem:[%s22112_s2 + $0x820] sm:$0xff] }
 0xbb7   : > { %8344 = vmatprep.subr.mxu1 %v22473_v43 }
 0xbb8   : > { %8345 = vmatpush1.msra.mxu1 %v18579_v27 }
 0xbb9   : > { %8127 = vmatmul.mubr.f32.gmra.mxu1 %v13623_v18  ;;  %8346 = vmatprep.subr.mxu1 %v22473_v43  ;;  %v13655_v18 = vld [vmem:[%s22112_s2 + $0x838] sm:$0xff] }
 0xbba   : > { %8347 = vmatpush1.msra.mxu1 %v18584_v22  ;;  %13635 = vmatprep.mubr.msk.f32.mxu1 %vm3676_vm3, %v13626_v21  ;;  %v13654_v21 = vld [vmem:[%s22112_s2 + $0x830] sm:$0xff] }
 0xbbb   : > { %8348 = vmatprep.subr.mxu1 %v22473_v43 }
 0xbbc   : > { %8349 = vmatpush1.msra.mxu1 %v18589_v42 }
 0xbbd   : > { %8132 = vmatmul.mubr.f32.gmra.mxu1 %v13625_v30  ;;  %8350 = vmatprep.subr.mxu1 %v22473_v43  ;;  %v13657_v30 = vld [vmem:[%s22112_s2 + $0x848] sm:$0xff] }
 0xbbe   : > { %8351 = vmatpush1.msra.mxu1 %v18594_v50  ;;  %13636 = vmatprep.mubr.msk.f32.mxu1 %vm3676_vm3, %v13628_v17  ;;  %v13656_v17 = vld [vmem:[%s22112_s2 + $0x840] sm:$0xff] }
 0xbbf   : > { %8352 = vmatprep.subr.mxu1 %v22473_v43 }
 0xbc0   : > { %8353 = vmatpush1.msra.mxu1 %v18599_v10 }
 0xbc1   : > { %8137 = vmatmul.mubr.f32.gmra.mxu1 %v13627_v60  ;;  %8354 = vmatprep.subr.mxu1 %v22473_v43  ;;  %v13659_v60 = vld [vmem:[%s22112_s2 + $0x858] sm:$0xff] }
 0xbc2   : > { %8355 = vmatpush1.msra.mxu1 %v18604_v2  ;;  %13664 = vmatprep.mubr.msk.f32.mxu1 %vm3676_vm3, %v13649_v29  ;;  %v13658_v29 = vld [vmem:[%s22112_s2 + $0x850] sm:$0xff] }
 0xbc3   : > { %8356 = vmatprep.subr.mxu1 %v22473_v43 }
 0xbc4   : > { %8357 = vmatpush1.msra.mxu1 %v18609_v63 }
 0xbc5   : > { %8386 = vmatprep.subr.mxu1 %v22473_v43 }
 0xbc6   : > { %8387 = vmatpush2.msra.mxu1 %v18613_v45 }
 0xbc7   : > { %8388 = vmatprep.subr.mxu1 %v22473_v43 }
 0xbc8   : > { %8389 = vmatpush2.msra.mxu1 %v18617_v6 }
 0xbc9   : > { %8391 = vmatmul.mubr.f32.vlgmr.msra.gmra.mxu1 %v13648_v12  ;;  %v13661_v12 = vld [vmem:[%s22112_s2 + $0x868] sm:$0xff] }
 0xbca   : > { %13665 = vmatprep.mubr.msk.f32.mxu1 %vm3676_vm3, %v13651_v46  ;;  %v13660_v46 = vld [vmem:[%s22112_s2 + $0x860] sm:$0xff] }
 0xbcd   : > { %8396 = vmatmul.mubr.f32.gmra.mxu1 %v13650_v44  ;;  %v13663_v44 = vld [vmem:[%s22112_s2 + $0x878] sm:$0xff] }
 0xbce   : > { %13666 = vmatprep.mubr.msk.f32.mxu1 %vm3676_vm3, %v13653_v4  ;;  %v13662_v4 = vld [vmem:[%s22112_s2 + $0x870] sm:$0xff] }
 0xbd1   : > { %8401 = vmatmul.mubr.f32.gmra.mxu1 %v13652_v5  ;;  %v13638_v5 = vld [vmem:[%s22116_s6 + $0xf8] sm:$0x3] }
 0xbd2   : > { %13667 = vmatprep.mubr.msk.f32.mxu1 %vm3676_vm3, %v13655_v18  ;;  %15129 = vmatprep.subr.msk.mxu0 %vm3833_vm4, %v13638_v5  ;;  %v13637_v18 = vld [vmem:[%s22116_s6 + $0xf0] sm:$0xff] }
 0xbd3   : > { %15130 = vmatpush3.msk.msra.mxu0 %vm3833_vm4, %v13638_v5 }
 0xbd4   : > { %15131 = vmatprep.subr.mxu0 %v13637_v18 }
 0xbd5   : > { %8406 = vmatmul.mubr.f32.gmra.mxu1 %v13654_v21  ;;  %15132 = vmatpush3.msra.mxu0 %v13637_v18  ;;  %v13673_v21 = vld [vmem:[%s22116_s6 + $0x108] sm:$0x3] }
 0xbd6   : > { %13668 = vmatprep.mubr.msk.f32.mxu1 %vm3676_vm3, %v13657_v30  ;;  %15145 = vmatprep.subr.msk.mxu0 %vm3833_vm4, %v13673_v21 }
 0xbd9   : > { %8411 = vmatmul.mubr.f32.gmra.mxu1 %v13656_v17 }
 0xbda   : > { %13669 = vmatprep.mubr.msk.f32.mxu1 %vm3676_vm3, %v13659_v60 }
 0xbdd   : > { %8416 = vmatmul.mubr.f32.gmra.mxu1 %v13658_v29 }
 0xbde   : > { %13670 = vmatprep.mubr.msk.f32.mxu1 %vm3676_vm3, %v13661_v12 }
 0xbe1   : > { %8421 = vmatmul.mubr.f32.gmra.mxu1 %v13660_v46 }
 0xbe2   : > { %13671 = vmatprep.mubr.msk.f32.mxu1 %vm3676_vm3, %v13663_v44 }
 0xbe5   : > { %8426 = vmatmul.mubr.f32.gmra.mxu1 %v13662_v4 }
 0xc1d   : > { %v15103_v30 = vpop.f32.mrf.mxu1 }
 0xc1e   : > { %v7700_v17 = vadd.f32 %v15103_v30, %v20341_v15 }
 0xc1f   : > { %v20574_v60 = vpop.f32.mrf.mxu1 }
 0xc20   : > { %22505 = vst [vmem:[#allocation15_spill] sm:$0xff] %v20574_v60 }
 0xc25   : > { %v15106_v29 = vpop.f32.mrf.mxu1 }
 0xc26   : > { %v7702_v12 = vadd.f32 %v15106_v29, %v20345_v16 }
 0xc27   : > { %v20577_v46 = vpop.f32.mrf.mxu1 }
 0xc28   : > { %22506 = vst [vmem:[#allocation24_spill] sm:$0xff] %v20577_v46 }
 0xc2d   : > { %v15109_v44 = vpop.f32.mrf.mxu1 }
 0xc2e   : > { %v7704_v4 = vadd.f32 %v15109_v44, %v20349_v8 }
 0xc2f   : > { %v20580_v5 = vpop.f32.mrf.mxu1 }
 0xc30   : > { %22507 = vst [vmem:[#allocation35_spill] sm:$0xff] %v20580_v5 }
 0xc35   : > { %v15112_v18 = vpop.f32.mrf.mxu1 }
 0xc36   : > { %v7706_v28 = vadd.f32 %v15112_v18, %v20353_v40 }
 0xc37   : > { %v20583_v0 = vpop.f32.mrf.mxu1 }
 0xc38   : > { %22508 = vst [vmem:[#allocation10_spill] sm:$0xff] %v20583_v0 }
 0xc41   : > { %v15119_v61 = vpop.f32.mrf.mxu1 }
 0xc42   : > { %v20585_v20 = vadd.f32 %v15119_v61, %v7700_v17 }
 0xc43   : > { %v20587_v15 = vpop.f32.mrf.mxu1 }
 0xc44   : > { %22509 = vst [vmem:[#allocation34_spill] sm:$0xff] %v20587_v15 }
 0xc49   : > { %v15122_v30 = vpop.f32.mrf.mxu1 }
 0xc4a   : > { %v20589_v60 = vadd.f32 %v15122_v30, %v7702_v12  ;;  %v13672_v12 = vld [vmem:[%s22116_s6 + $0x100] sm:$0xff] }
 0xc4b   : > { %v20591_v16 = vpop.f32.mrf.mxu1 }
 0xc4c   : > { %22510 = vst [vmem:[#allocation50_spill] sm:$0xff] %v20591_v16 }
 0xc51   : > { %v15125_v29 = vpop.f32.mrf.mxu1 }
 0xc52   : > { %v20593_v46 = vadd.f32 %v15125_v29, %v7704_v4 }
 0xc53   : > { %v20595_v8 = vpop.f32.mrf.mxu1 }
 0xc54   : > { %22511 = vst [vmem:[#allocation49_spill] sm:$0xff] %v20595_v8 }
 0xc59   : > { %v15128_v44 = vpop.f32.mrf.mxu1 }
 0xc5a   : > { %v20597_v5 = vadd.f32 %v15128_v44, %v7706_v28 }
 0xc5b   : > { %v20599_v40 = vpop.f32.mrf.mxu1 }
 0xc5c   : > { %22512 = vst [vmem:[#allocation14_spill] sm:$0xff] %v20599_v40 }
 0xc65   : > { %v8103_v18 = vpop.f32.mrf.mxu1 }
 0xc66   : > { %15133 = vmatprep.mubr.msk.f32.mxu0 %vm3808_vm5, %v8103_v18 }
 0xc67   : > { %v8105_v61 = vpop.f32.mrf.mxu1 }
 0xc69   : > { %v8108_v17 = vpop.f32.mrf.mxu1 }
 0xc6a   : > { %15134 = vmatmul.mubr.msk.f32.vlgmr.msra.gmra.mxu0 %vm3808_vm5, %v8108_v17 }
 0xc6b   : > { %v8110_v4 = vpop.f32.mrf.mxu1  ;;  %15146 = vmatpush3.msk.msra.mxu0 %vm3833_vm4, %v13673_v21 }
 0xc6c   : > { %15147 = vmatprep.subr.mxu0 %v13672_v12 }
 0xc6d   : > { %v8113_v30 = vpop.f32.mrf.mxu1  ;;  %15148 = vmatpush3.msra.mxu0 %v13672_v12 }
 0xc6e   : > { %15136 = vmatprep.mubr.msk.f32.mxu0 %vm3808_vm5, %v8113_v30  ;;  %8615 = vmatprep.subr.mxu0 %v22473_v43 }
 0xc6f   : > { %v8115_v28 = vpop.f32.mrf.mxu1 }
 0xc71   : > { %v8118_v29 = vpop.f32.mrf.mxu1 }
 0xc72   : > { %15137 = vmatmul.mubr.msk.f32.gmra.mxu0 %vm3808_vm5, %v8118_v29 }
 0xc73   : > { %v8120_v44 = vpop.f32.mrf.mxu1 }
 0xc75   : > { %v8123_v18 = vpop.f32.mrf.mxu1 }
 0xc76   : > { %15139 = vmatprep.mubr.msk.f32.mxu0 %vm3808_vm5, %v8123_v18 }
 0xc77   : > { %v8125_v61 = vpop.f32.mrf.mxu1 }
 0xc79   : > { %v8128_v17 = vpop.f32.mrf.mxu1 }
 0xc7a   : > { %15140 = vmatmul.mubr.msk.f32.gmra.mxu0 %vm3808_vm5, %v8128_v17 }
 0xc7b   : > { %v8130_v21 = vpop.f32.mrf.mxu1 }
 0xc7d   : > { %v8133_v4 = vpop.f32.mrf.mxu1 }
 0xc7e   : > { %15142 = vmatprep.mubr.msk.f32.mxu0 %vm3808_vm5, %v8133_v4 }
 0xc7f   : > { %v8135_v12 = vpop.f32.mrf.mxu1 }
 0xc81   : > { %v8138_v30 = vpop.f32.mrf.mxu1 }
 0xc82   : > { %15143 = vmatmul.mubr.msk.f32.gmra.mxu0 %vm3808_vm5, %v8138_v30 }
 0xc83   : > { %v8140_v28 = vpop.f32.mrf.mxu1 }
 0xc89   : > { %v8392_v15 = vpop.f32.mrf.mxu1 }
 0xc8a   : > { %15149 = vmatprep.mubr.msk.f32.mxu0 %vm3808_vm5, %v8392_v15 }
 0xc8b   : > { %v8394_v29 = vpop.f32.mrf.mxu1 }
 0xc8d   : > { %v8397_v44 = vpop.f32.mrf.mxu1 }
 0xc8e   : > { %15150 = vmatmul.mubr.msk.f32.vlgmr.msra.gmra.mxu0 %vm3808_vm5, %v8397_v44 }
 0xc8f   : > { %8616 = vmatpush1.msra.mxu0 %v18532_v23  ;;  %v8399_v18 = vpop.f32.mrf.mxu1 }
 0xc90   : > { %8617 = vmatprep.subr.mxu0 %v22473_v43  ;;  %v13684_v18 = vld [vmem:[%s22112_s2 + $0x888] sm:$0xff] }
 0xc91   : > { %8618 = vmatpush1.msra.mxu0 %v18539_v62  ;;  %v8402_v61 = vpop.f32.mrf.mxu1 }
 0xc92   : > { %8619 = vmatprep.subr.mxu0 %v22473_v43  ;;  %15152 = vmatprep.mubr.msk.f32.mxu0 %vm3808_vm5, %v8402_v61 }
 0xc93   : > { %8620 = vmatpush1.msra.mxu0 %v18546_v33  ;;  %v8404_v17 = vpop.f32.mrf.mxu1 }
 0xc94   : > { %8621 = vmatprep.subr.mxu0 %v22473_v43 }
 0xc95   : > { %8622 = vmatpush1.msra.mxu0 %v18553_v37  ;;  %v8407_v15 = vpop.f32.mrf.mxu1 }
 0xc96   : > { %8623 = vmatprep.subr.mxu0 %v22473_v43  ;;  %15153 = vmatmul.mubr.msk.f32.gmra.mxu0 %vm3808_vm5, %v8407_v15  ;;  %v13683_v15 = vld [vmem:[%s22112_s2 + $0x880] sm:$0xff] }
 0xc97   : > { %8624 = vmatpush1.msra.mxu0 %v18557_v47  ;;  %v8409_v21 = vpop.f32.mrf.mxu1 }
 0xc98   : > { %8625 = vmatprep.subr.mxu0 %v22473_v43  ;;  %v13686_v21 = vld [vmem:[%s22112_s2 + $0x898] sm:$0xff] }
 0xc99   : > { %8626 = vmatpush1.msra.mxu0 %v18561_v14  ;;  %v8412_v4 = vpop.f32.mrf.mxu1 }
 0xc9a   : > { %8627 = vmatprep.subr.mxu0 %v22473_v43  ;;  %15155 = vmatprep.mubr.msk.f32.mxu0 %vm3808_vm5, %v8412_v4  ;;  %v13685_v4 = vld [vmem:[%s22112_s2 + $0x890] sm:$0xff] }
 0xc9b   : > { %8628 = vmatpush1.msra.mxu0 %v18565_v51  ;;  %v8414_v12 = vpop.f32.mrf.mxu1 }
 0xc9c   : > { %8629 = vmatprep.subr.mxu0 %v22473_v43  ;;  %v13688_v12 = vld [vmem:[%s22112_s2 + $0x8a8] sm:$0xff] }
 0xc9d   : > { %8630 = vmatpush1.msra.mxu0 %v18569_v24  ;;  %v8417_v30 = vpop.f32.mrf.mxu1 }
 0xc9e   : > { %8631 = vmatprep.subr.mxu0 %v22473_v43  ;;  %15156 = vmatmul.mubr.msk.f32.gmra.mxu0 %vm3808_vm5, %v8417_v30  ;;  %v13687_v30 = vld [vmem:[%s22112_s2 + $0x8a0] sm:$0xff] }
 0xc9f   : > { %8632 = vmatpush1.msra.mxu0 %v18574_v57  ;;  %v8419_v28 = vpop.f32.mrf.mxu1 }
 0xca0   : > { %8633 = vmatprep.subr.mxu0 %v22473_v43  ;;  %v13690_v28 = vld [vmem:[%s22112_s2 + $0x8b8] sm:$0xff] }
 0xca1   : > { %8634 = vmatpush1.msra.mxu0 %v18579_v27  ;;  %v8422_v29 = vpop.f32.mrf.mxu1 }
 0xca2   : > { %8635 = vmatprep.subr.mxu0 %v22473_v43  ;;  %15158 = vmatprep.mubr.msk.f32.mxu0 %vm3808_vm5, %v8422_v29  ;;  %v13689_v29 = vld [vmem:[%s22112_s2 + $0x8b0] sm:$0xff] }
 0xca3   : > { %8636 = vmatpush1.msra.mxu0 %v18584_v22  ;;  %v8424_v44 = vpop.f32.mrf.mxu1 }
 0xca4   : > { %8637 = vmatprep.subr.mxu0 %v22473_v43  ;;  %v13692_v44 = vld [vmem:[%s22112_s2 + $0x8c8] sm:$0xff] }
 0xca5   : > { %8638 = vmatpush1.msra.mxu0 %v18589_v42  ;;  %v8427_v61 = vpop.f32.mrf.mxu1 }
 0xca6   : > { %8639 = vmatprep.subr.mxu0 %v22473_v43  ;;  %15159 = vmatmul.mubr.msk.f32.gmra.mxu0 %vm3808_vm5, %v8427_v61  ;;  %v13694_v61 = vld [vmem:[%s22112_s2 + $0x8d8] sm:$0xff] }
 0xca7   : > { %8640 = vmatpush1.msra.mxu0 %v18594_v50  ;;  %13699 = vmatprep.mubr.msk.f32.mxu0 %vm3676_vm3, %v13684_v18  ;;  %v8429_v17 = vpop.f32.mrf.mxu1  ;;  %v13691_v18 = vld [vmem:[%s22112_s2 + $0x8c0] sm:$0xff] }
 0xca8   : > { %8641 = vmatprep.subr.mxu0 %v22473_v43  ;;  %v13693_v17 = vld [vmem:[%s22112_s2 + $0x8d0] sm:$0xff] }
 0xca9   : > { %8642 = vmatpush1.msra.mxu0 %v18599_v10 }
 0xcaa   : > { %8643 = vmatprep.subr.mxu0 %v22473_v43 }
 0xcab   : > { %8644 = vmatpush1.msra.mxu0 %v18604_v2 }
 0xcac   : > { %8645 = vmatprep.subr.mxu0 %v22473_v43 }
 0xcad   : > { %8646 = vmatpush1.msra.mxu0 %v18609_v63 }
 0xcae   : > { %8675 = vmatprep.subr.mxu0 %v22473_v43 }
 0xcaf   : > { %8676 = vmatpush2.msra.mxu0 %v18613_v45 }
 0xcb0   : > { %8677 = vmatprep.subr.mxu0 %v22473_v43 }
 0xcb1   : > { %8678 = vmatpush2.msra.mxu0 %v18617_v6 }
 0xcb2   : > { %8680 = vmatmul.mubr.f32.vlgmr.msra.gmra.mxu0 %v13683_v15  ;;  %8904 = vmatprep.subr.mxu0 %v22473_v43  ;;  %v13696_v15 = vld [vmem:[%s22112_s2 + $0x8e8] sm:$0xff] }
 0xcb3   : > { %8905 = vmatpush1.msra.mxu0 %v18532_v23  ;;  %13700 = vmatprep.mubr.msk.f32.mxu0 %vm3676_vm3, %v13686_v21  ;;  %v13695_v21 = vld [vmem:[%s22112_s2 + $0x8e0] sm:$0xff] }
 0xcb4   : > { %8906 = vmatprep.subr.mxu0 %v22473_v43 }
 0xcb5   : > { %8907 = vmatpush1.msra.mxu0 %v18539_v62 }
 0xcb6   : > { %8685 = vmatmul.mubr.f32.gmra.mxu0 %v13685_v4  ;;  %8908 = vmatprep.subr.mxu0 %v22473_v43  ;;  %v13698_v4 = vld [vmem:[%s22112_s2 + $0x8f8] sm:$0xff] }
 0xcb7   : > { %8909 = vmatpush1.msra.mxu0 %v18546_v33  ;;  %13701 = vmatprep.mubr.msk.f32.mxu0 %vm3676_vm3, %v13688_v12  ;;  %v13697_v12 = vld [vmem:[%s22112_s2 + $0x8f0] sm:$0xff] }
 0xcb8   : > { %8910 = vmatprep.subr.mxu0 %v22473_v43 }
 0xcb9   : > { %8911 = vmatpush1.msra.mxu0 %v18553_v37 }
 0xcba   : > { %8690 = vmatmul.mubr.f32.gmra.mxu0 %v13687_v30  ;;  %8912 = vmatprep.subr.mxu0 %v22473_v43  ;;  %v13719_v30 = vld [vmem:[%s22112_s2 + $0x908] sm:$0xff] }
 0xcbb   : > { %8913 = vmatpush1.msra.mxu0 %v18557_v47  ;;  %13702 = vmatprep.mubr.msk.f32.mxu0 %vm3676_vm3, %v13690_v28  ;;  %v13718_v28 = vld [vmem:[%s22112_s2 + $0x900] sm:$0xff] }
 0xcbc   : > { %8914 = vmatprep.subr.mxu0 %v22473_v43 }
 0xcbd   : > { %8915 = vmatpush1.msra.mxu0 %v18561_v14 }
 0xcbe   : > { %8695 = vmatmul.mubr.f32.gmra.mxu0 %v13689_v29  ;;  %8916 = vmatprep.subr.mxu0 %v22473_v43  ;;  %v13721_v29 = vld [vmem:[%s22112_s2 + $0x918] sm:$0xff] }
 0xcbf   : > { %8917 = vmatpush1.msra.mxu0 %v18565_v51  ;;  %13703 = vmatprep.mubr.msk.f32.mxu0 %vm3676_vm3, %v13692_v44  ;;  %v13720_v44 = vld [vmem:[%s22112_s2 + $0x910] sm:$0xff] }
 0xcc0   : > { %8918 = vmatprep.subr.mxu0 %v22473_v43 }
 0xcc1   : > { %8919 = vmatpush1.msra.mxu0 %v18569_v24 }
 0xcc2   : > { %8700 = vmatmul.mubr.f32.gmra.mxu0 %v13691_v18  ;;  %8920 = vmatprep.subr.mxu0 %v22473_v43  ;;  %v13723_v18 = vld [vmem:[%s22112_s2 + $0x928] sm:$0xff] }
 0xcc3   : > { %8921 = vmatpush1.msra.mxu0 %v18574_v57  ;;  %13704 = vmatprep.mubr.msk.f32.mxu0 %vm3676_vm3, %v13694_v61  ;;  %v13722_v61 = vld [vmem:[%s22112_s2 + $0x920] sm:$0xff] }
 0xcc4   : > { %8922 = vmatprep.subr.mxu0 %v22473_v43 }
 0xcc5   : > { %8923 = vmatpush1.msra.mxu0 %v18579_v27 }
 0xcc6   : > { %8705 = vmatmul.mubr.f32.gmra.mxu0 %v13693_v17  ;;  %8924 = vmatprep.subr.mxu0 %v22473_v43  ;;  %v13725_v17 = vld [vmem:[%s22112_s2 + $0x938] sm:$0xff] }
 0xcc7   : > { %8925 = vmatpush1.msra.mxu0 %v18584_v22  ;;  %13705 = vmatprep.mubr.msk.f32.mxu0 %vm3676_vm3, %v13696_v15  ;;  %v13724_v15 = vld [vmem:[%s22112_s2 + $0x930] sm:$0xff] }
 0xcc8   : > { %8926 = vmatprep.subr.mxu0 %v22473_v43 }
 0xcc9   : > { %8927 = vmatpush1.msra.mxu0 %v18589_v42 }
 0xcca   : > { %8710 = vmatmul.mubr.f32.gmra.mxu0 %v13695_v21  ;;  %8928 = vmatprep.subr.mxu0 %v22473_v43  ;;  %v13727_v21 = vld [vmem:[%s22112_s2 + $0x948] sm:$0xff] }
 0xccb   : > { %8929 = vmatpush1.msra.mxu0 %v18594_v50  ;;  %13706 = vmatprep.mubr.msk.f32.mxu0 %vm3676_vm3, %v13698_v4  ;;  %v13726_v4 = vld [vmem:[%s22112_s2 + $0x940] sm:$0xff] }
 0xccc   : > { %8930 = vmatprep.subr.mxu0 %v22473_v43 }
 0xccd   : > { %8931 = vmatpush1.msra.mxu0 %v18599_v10 }
 0xcce   : > { %8715 = vmatmul.mubr.f32.gmra.mxu0 %v13697_v12  ;;  %8932 = vmatprep.subr.mxu0 %v22473_v43  ;;  %v13729_v12 = vld [vmem:[%s22112_s2 + $0x958] sm:$0xff] }
 0xccf   : > { %8933 = vmatpush1.msra.mxu0 %v18604_v2  ;;  %13734 = vmatprep.mubr.msk.f32.mxu0 %vm3676_vm3, %v13719_v30  ;;  %v13728_v30 = vld [vmem:[%s22112_s2 + $0x950] sm:$0xff] }
 0xcd0   : > { %8934 = vmatprep.subr.mxu0 %v22473_v43 }
 0xcd1   : > { %8935 = vmatpush1.msra.mxu0 %v18609_v63 }
 0xcd2   : > { %8964 = vmatprep.subr.mxu0 %v22473_v43 }
 0xcd3   : > { %8965 = vmatpush2.msra.mxu0 %v18613_v45 }
 0xcd4   : > { %8966 = vmatprep.subr.mxu0 %v22473_v43 }
 0xcd5   : > { %8967 = vmatpush2.msra.mxu0 %v18617_v6 }
 0xcd6   : > { %8969 = vmatmul.mubr.f32.vlgmr.msra.gmra.mxu0 %v13718_v28  ;;  %v13731_v28 = vld [vmem:[%s22112_s2 + $0x968] sm:$0xff] }
 0xcd7   : > { %13735 = vmatprep.mubr.msk.f32.mxu0 %vm3676_vm3, %v13721_v29  ;;  %v13730_v29 = vld [vmem:[%s22112_s2 + $0x960] sm:$0xff] }
 0xcda   : > { %8974 = vmatmul.mubr.f32.gmra.mxu0 %v13720_v44  ;;  %v13733_v44 = vld [vmem:[%s22112_s2 + $0x978] sm:$0xff] }
 0xcdb   : > { %13736 = vmatprep.mubr.msk.f32.mxu0 %vm3676_vm3, %v13723_v18  ;;  %v13732_v18 = vld [vmem:[%s22112_s2 + $0x970] sm:$0xff] }
 0xcde   : > { %8979 = vmatmul.mubr.f32.gmra.mxu0 %v13722_v61  ;;  %v13708_v61 = vld [vmem:[%s22116_s6 + $0x118] sm:$0x3] }
 0xcdf   : > { %13737 = vmatprep.mubr.msk.f32.mxu0 %vm3676_vm3, %v13725_v17  ;;  %15161 = vmatprep.subr.msk.mxu1 %vm3833_vm4, %v13708_v61  ;;  %v13707_v17 = vld [vmem:[%s22116_s6 + $0x110] sm:$0xff] }
 0xce0   : > { %15162 = vmatpush3.msk.msra.mxu1 %vm3833_vm4, %v13708_v61 }
 0xce1   : > { %15163 = vmatprep.subr.mxu1 %v13707_v17 }
 0xce2   : > { %8984 = vmatmul.mubr.f32.gmra.mxu0 %v13724_v15  ;;  %15164 = vmatpush3.msra.mxu1 %v13707_v17  ;;  %v13743_v15 = vld [vmem:[%s22116_s6 + $0x128] sm:$0x3] }
 0xce3   : > { %13738 = vmatprep.mubr.msk.f32.mxu0 %vm3676_vm3, %v13727_v21  ;;  %15177 = vmatprep.subr.msk.mxu1 %vm3833_vm4, %v13743_v15 }
 0xce6   : > { %8989 = vmatmul.mubr.f32.gmra.mxu0 %v13726_v4 }
 0xce7   : > { %13739 = vmatprep.mubr.msk.f32.mxu0 %vm3676_vm3, %v13729_v12 }
 0xcea   : > { %8994 = vmatmul.mubr.f32.gmra.mxu0 %v13728_v30 }
 0xceb   : > { %13740 = vmatprep.mubr.msk.f32.mxu0 %vm3676_vm3, %v13731_v28 }
 0xcee   : > { %8999 = vmatmul.mubr.f32.gmra.mxu0 %v13730_v29 }
 0xcef   : > { %13741 = vmatprep.mubr.msk.f32.mxu0 %vm3676_vm3, %v13733_v44 }
 0xcf2   : > { %9004 = vmatmul.mubr.f32.gmra.mxu0 %v13732_v18 }
 0xd2a   : > { %v15135_v21 = vpop.f32.mrf.mxu0 }
 0xd2b   : > { %v8278_v4 = vadd.f32 %v15135_v21, %v20585_v20 }
 0xd2c   : > { %v20818_v12 = vpop.f32.mrf.mxu0 }
 0xd2d   : > { %22513 = vst [vmem:[#allocation17_spill] sm:$0xff] %v20818_v12 }
 0xd32   : > { %v15138_v30 = vpop.f32.mrf.mxu0 }
 0xd33   : > { %v8280_v28 = vadd.f32 %v15138_v30, %v20589_v60 }
 0xd34   : > { %v20821_v29 = vpop.f32.mrf.mxu0 }
 0xd35   : > { %22514 = vst [vmem:[#allocation11_spill] sm:$0xff] %v20821_v29 }
 0xd3a   : > { %v15141_v44 = vpop.f32.mrf.mxu0 }
 0xd3b   : > { %v8282_v18 = vadd.f32 %v15141_v44, %v20593_v46 }
 0xd3c   : > { %v20824_v61 = vpop.f32.mrf.mxu0 }
 0xd3d   : > { %22515 = vst [vmem:[#allocation37_spill] sm:$0xff] %v20824_v61 }
 0xd42   : > { %v15144_v17 = vpop.f32.mrf.mxu0 }
 0xd43   : > { %v8284_v40 = vadd.f32 %v15144_v17, %v20597_v5 }
 0xd44   : > { %v20827_v0 = vpop.f32.mrf.mxu0 }
 0xd4e   : > { %v15151_v8 = vpop.f32.mrf.mxu0 }
 0xd4f   : > { %v20829_v16 = vadd.f32 %v15151_v8, %v8278_v4 }
 0xd50   : > { %v20831_v20 = vpop.f32.mrf.mxu0 }
 0xd51   : > { %22516 = vst [vmem:[#allocation18_spill] sm:$0xff] %v20831_v20 }
 0xd56   : > { %v15154_v21 = vpop.f32.mrf.mxu0 }
 0xd57   : > { %v20833_v12 = vadd.f32 %v15154_v21, %v8280_v28  ;;  %v13742_v28 = vld [vmem:[%s22116_s6 + $0x120] sm:$0xff] }
 0xd58   : > { %v20835_v60 = vpop.f32.mrf.mxu0 }
 0xd5e   : > { %v15157_v30 = vpop.f32.mrf.mxu0 }
 0xd5f   : > { %v20837_v29 = vadd.f32 %v15157_v30, %v8282_v18 }
 0xd60   : > { %v20839_v46 = vpop.f32.mrf.mxu0 }
 0xd66   : > { %v15160_v44 = vpop.f32.mrf.mxu0 }
 0xd67   : > { %v20841_v61 = vadd.f32 %v15160_v44, %v8284_v40 }
 0xd68   : > { %v20843_v5 = vpop.f32.mrf.mxu0 }
 0xd72   : > { %v8681_v17 = vpop.f32.mrf.mxu0 }
 0xd73   : > { %15165 = vmatprep.mubr.msk.f32.mxu1 %vm3808_vm5, %v8681_v17 }
 0xd74   : > { %v8683_v8 = vpop.f32.mrf.mxu0 }
 0xd76   : > { %v8686_v4 = vpop.f32.mrf.mxu0 }
 0xd77   : > { %15166 = vmatmul.mubr.msk.f32.vlgmr.msra.gmra.mxu1 %vm3808_vm5, %v8686_v4 }
 0xd78   : > { %v8688_v18 = vpop.f32.mrf.mxu0  ;;  %15178 = vmatpush3.msk.msra.mxu1 %vm3833_vm4, %v13743_v15 }
 0xd79   : > { %15179 = vmatprep.subr.mxu1 %v13742_v28 }
 0xd7a   : > { %v8691_v21 = vpop.f32.mrf.mxu0  ;;  %15180 = vmatpush3.msra.mxu1 %v13742_v28 }
 0xd7b   : > { %15168 = vmatprep.mubr.msk.f32.mxu1 %vm3808_vm5, %v8691_v21  ;;  %9193 = vmatprep.subr.mxu1 %v22473_v43 }
 0xd7c   : > { %v8693_v40 = vpop.f32.mrf.mxu0 }
 0xd7e   : > { %v8696_v30 = vpop.f32.mrf.mxu0 }
 0xd7f   : > { %15169 = vmatmul.mubr.msk.f32.gmra.mxu1 %vm3808_vm5, %v8696_v30 }
 0xd80   : > { %v8698_v44 = vpop.f32.mrf.mxu0 }
 0xd82   : > { %v8701_v17 = vpop.f32.mrf.mxu0 }
 0xd83   : > { %15171 = vmatprep.mubr.msk.f32.mxu1 %vm3808_vm5, %v8701_v17 }
 0xd84   : > { %v8703_v8 = vpop.f32.mrf.mxu0 }
 0xd86   : > { %v8706_v4 = vpop.f32.mrf.mxu0 }
 0xd87   : > { %15172 = vmatmul.mubr.msk.f32.gmra.mxu1 %vm3808_vm5, %v8706_v4 }
 0xd88   : > { %v8708_v15 = vpop.f32.mrf.mxu0 }
 0xd8a   : > { %v8711_v18 = vpop.f32.mrf.mxu0 }
 0xd8b   : > { %15174 = vmatprep.mubr.msk.f32.mxu1 %vm3808_vm5, %v8711_v18 }
 0xd8c   : > { %v8713_v28 = vpop.f32.mrf.mxu0 }
 0xd8e   : > { %v8716_v21 = vpop.f32.mrf.mxu0 }
 0xd8f   : > { %15175 = vmatmul.mubr.msk.f32.gmra.mxu1 %vm3808_vm5, %v8716_v21 }
 0xd90   : > { %v8718_v40 = vpop.f32.mrf.mxu0 }
 0xd96   : > { %v8970_v20 = vpop.f32.mrf.mxu0 }
 0xd97   : > { %15181 = vmatprep.mubr.msk.f32.mxu1 %vm3808_vm5, %v8970_v20 }
 0xd98   : > { %v8972_v30 = vpop.f32.mrf.mxu0 }
 0xd9a   : > { %v8975_v44 = vpop.f32.mrf.mxu0 }
 0xd9b   : > { %15182 = vmatmul.mubr.msk.f32.vlgmr.msra.gmra.mxu1 %vm3808_vm5, %v8975_v44 }
 0xd9c   : > { %9194 = vmatpush1.msra.mxu1 %v18532_v23  ;;  %v8977_v17 = vpop.f32.mrf.mxu0 }
 0xd9d   : > { %9195 = vmatprep.subr.mxu1 %v22473_v43  ;;  %v13754_v17 = vld [vmem:[%s22112_s2 + $0x988] sm:$0xff] }
 0xd9e   : > { %9196 = vmatpush1.msra.mxu1 %v18539_v62  ;;  %v8980_v8 = vpop.f32.mrf.mxu0 }
 0xd9f   : > { %9197 = vmatprep.subr.mxu1 %v22473_v43  ;;  %15184 = vmatprep.mubr.msk.f32.mxu1 %vm3808_vm5, %v8980_v8 }
 0xda0   : > { %9198 = vmatpush1.msra.mxu1 %v18546_v33  ;;  %v8982_v4 = vpop.f32.mrf.mxu0 }
 0xda1   : > { %9199 = vmatprep.subr.mxu1 %v22473_v43 }
 0xda2   : > { %9200 = vmatpush1.msra.mxu1 %v18553_v37  ;;  %v8985_v20 = vpop.f32.mrf.mxu0 }
 0xda3   : > { %9201 = vmatprep.subr.mxu1 %v22473_v43  ;;  %15185 = vmatmul.mubr.msk.f32.gmra.mxu1 %vm3808_vm5, %v8985_v20  ;;  %v13753_v20 = vld [vmem:[%s22112_s2 + $0x980] sm:$0xff] }
 0xda4   : > { %9202 = vmatpush1.msra.mxu1 %v18557_v47  ;;  %v8987_v15 = vpop.f32.mrf.mxu0 }
 0xda5   : > { %9203 = vmatprep.subr.mxu1 %v22473_v43  ;;  %v13756_v15 = vld [vmem:[%s22112_s2 + $0x998] sm:$0xff] }
 0xda6   : > { %9204 = vmatpush1.msra.mxu1 %v18561_v14  ;;  %v8990_v18 = vpop.f32.mrf.mxu0 }
 0xda7   : > { %9205 = vmatprep.subr.mxu1 %v22473_v43  ;;  %15187 = vmatprep.mubr.msk.f32.mxu1 %vm3808_vm5, %v8990_v18  ;;  %v13755_v18 = vld [vmem:[%s22112_s2 + $0x990] sm:$0xff] }
 0xda8   : > { %9206 = vmatpush1.msra.mxu1 %v18565_v51  ;;  %v8992_v28 = vpop.f32.mrf.mxu0 }
 0xda9   : > { %9207 = vmatprep.subr.mxu1 %v22473_v43  ;;  %v13758_v28 = vld [vmem:[%s22112_s2 + $0x9a8] sm:$0xff] }
 0xdaa   : > { %9208 = vmatpush1.msra.mxu1 %v18569_v24  ;;  %v8995_v21 = vpop.f32.mrf.mxu0 }
 0xdab   : > { %9209 = vmatprep.subr.mxu1 %v22473_v43  ;;  %15188 = vmatmul.mubr.msk.f32.gmra.mxu1 %vm3808_vm5, %v8995_v21  ;;  %v13757_v21 = vld [vmem:[%s22112_s2 + $0x9a0] sm:$0xff] }
 0xdac   : > { %9210 = vmatpush1.msra.mxu1 %v18574_v57  ;;  %v8997_v40 = vpop.f32.mrf.mxu0 }
 0xdad   : > { %9211 = vmatprep.subr.mxu1 %v22473_v43  ;;  %v13760_v40 = vld [vmem:[%s22112_s2 + $0x9b8] sm:$0xff] }
 0xdae   : > { %9212 = vmatpush1.msra.mxu1 %v18579_v27  ;;  %v9000_v30 = vpop.f32.mrf.mxu0 }
 0xdaf   : > { %9213 = vmatprep.subr.mxu1 %v22473_v43  ;;  %15190 = vmatprep.mubr.msk.f32.mxu1 %vm3808_vm5, %v9000_v30  ;;  %v13759_v30 = vld [vmem:[%s22112_s2 + $0x9b0] sm:$0xff] }
 0xdb0   : > { %9214 = vmatpush1.msra.mxu1 %v18584_v22  ;;  %v9002_v44 = vpop.f32.mrf.mxu0 }
 0xdb1   : > { %9215 = vmatprep.subr.mxu1 %v22473_v43  ;;  %v13762_v44 = vld [vmem:[%s22112_s2 + $0x9c8] sm:$0xff] }
 0xdb2   : > { %9216 = vmatpush1.msra.mxu1 %v18589_v42  ;;  %v9005_v8 = vpop.f32.mrf.mxu0 }
 0xdb3   : > { %9217 = vmatprep.subr.mxu1 %v22473_v43  ;;  %15191 = vmatmul.mubr.msk.f32.gmra.mxu1 %vm3808_vm5, %v9005_v8  ;;  %v13764_v8 = vld [vmem:[%s22112_s2 + $0x9d8] sm:$0xff] }
 0xdb4   : > { %9218 = vmatpush1.msra.mxu1 %v18594_v50  ;;  %13769 = vmatprep.mubr.msk.f32.mxu1 %vm3676_vm3, %v13754_v17  ;;  %v9007_v4 = vpop.f32.mrf.mxu0  ;;  %v13761_v17 = vld [vmem:[%s22112_s2 + $0x9c0] sm:$0xff] }
 0xdb5   : > { %9219 = vmatprep.subr.mxu1 %v22473_v43  ;;  %v13763_v4 = vld [vmem:[%s22112_s2 + $0x9d0] sm:$0xff] }
 0xdb6   : > { %9220 = vmatpush1.msra.mxu1 %v18599_v10 }
 0xdb7   : > { %9221 = vmatprep.subr.mxu1 %v22473_v43 }
 0xdb8   : > { %9222 = vmatpush1.msra.mxu1 %v18604_v2 }
 0xdb9   : > { %9223 = vmatprep.subr.mxu1 %v22473_v43 }
 0xdba   : > { %9224 = vmatpush1.msra.mxu1 %v18609_v63 }
 0xdbb   : > { %9253 = vmatprep.subr.mxu1 %v22473_v43 }
 0xdbc   : > { %9254 = vmatpush2.msra.mxu1 %v18613_v45 }
 0xdbd   : > { %9255 = vmatprep.subr.mxu1 %v22473_v43 }
 0xdbe   : > { %9256 = vmatpush2.msra.mxu1 %v18617_v6 }
 0xdbf   : > { %9258 = vmatmul.mubr.f32.vlgmr.msra.gmra.mxu1 %v13753_v20  ;;  %9482 = vmatprep.subr.mxu1 %v22473_v43  ;;  %v13766_v20 = vld [vmem:[%s22112_s2 + $0x9e8] sm:$0xff] }
 0xdc0   : > { %9483 = vmatpush1.msra.mxu1 %v18532_v23  ;;  %13770 = vmatprep.mubr.msk.f32.mxu1 %vm3676_vm3, %v13756_v15  ;;  %v13765_v15 = vld [vmem:[%s22112_s2 + $0x9e0] sm:$0xff] }
 0xdc1   : > { %9484 = vmatprep.subr.mxu1 %v22473_v43 }
 0xdc2   : > { %9485 = vmatpush1.msra.mxu1 %v18539_v62 }
 0xdc3   : > { %9263 = vmatmul.mubr.f32.gmra.mxu1 %v13755_v18  ;;  %9486 = vmatprep.subr.mxu1 %v22473_v43  ;;  %v13768_v18 = vld [vmem:[%s22112_s2 + $0x9f8] sm:$0xff] }
 0xdc4   : > { %9487 = vmatpush1.msra.mxu1 %v18546_v33  ;;  %13771 = vmatprep.mubr.msk.f32.mxu1 %vm3676_vm3, %v13758_v28  ;;  %v13767_v28 = vld [vmem:[%s22112_s2 + $0x9f0] sm:$0xff] }
 0xdc5   : > { %9488 = vmatprep.subr.mxu1 %v22473_v43 }
 0xdc6   : > { %9489 = vmatpush1.msra.mxu1 %v18553_v37 }
 0xdc7   : > { %9268 = vmatmul.mubr.f32.gmra.mxu1 %v13757_v21  ;;  %9490 = vmatprep.subr.mxu1 %v22473_v43  ;;  %v13789_v21 = vld [vmem:[%s22112_s2 + $0xa08] sm:$0xff] }
 0xdc8   : > { %9491 = vmatpush1.msra.mxu1 %v18557_v47  ;;  %13772 = vmatprep.mubr.msk.f32.mxu1 %vm3676_vm3, %v13760_v40  ;;  %v13788_v40 = vld [vmem:[%s22112_s2 + $0xa00] sm:$0xff] }
 0xdc9   : > { %9492 = vmatprep.subr.mxu1 %v22473_v43 }
 0xdca   : > { %9493 = vmatpush1.msra.mxu1 %v18561_v14 }
 0xdcb   : > { %9273 = vmatmul.mubr.f32.gmra.mxu1 %v13759_v30  ;;  %9494 = vmatprep.subr.mxu1 %v22473_v43  ;;  %v13791_v30 = vld [vmem:[%s22112_s2 + $0xa18] sm:$0xff] }
 0xdcc   : > { %9495 = vmatpush1.msra.mxu1 %v18565_v51  ;;  %13773 = vmatprep.mubr.msk.f32.mxu1 %vm3676_vm3, %v13762_v44  ;;  %v13790_v44 = vld [vmem:[%s22112_s2 + $0xa10] sm:$0xff] }
 0xdcd   : > { %9496 = vmatprep.subr.mxu1 %v22473_v43 }
 0xdce   : > { %9497 = vmatpush1.msra.mxu1 %v18569_v24 }
 0xdcf   : > { %9278 = vmatmul.mubr.f32.gmra.mxu1 %v13761_v17  ;;  %9498 = vmatprep.subr.mxu1 %v22473_v43  ;;  %v13793_v17 = vld [vmem:[%s22112_s2 + $0xa28] sm:$0xff] }
 0xdd0   : > { %9499 = vmatpush1.msra.mxu1 %v18574_v57  ;;  %13774 = vmatprep.mubr.msk.f32.mxu1 %vm3676_vm3, %v13764_v8  ;;  %v13792_v8 = vld [vmem:[%s22112_s2 + $0xa20] sm:$0xff] }
 0xdd1   : > { %9500 = vmatprep.subr.mxu1 %v22473_v43 }
 0xdd2   : > { %9501 = vmatpush1.msra.mxu1 %v18579_v27 }
 0xdd3   : > { %9283 = vmatmul.mubr.f32.gmra.mxu1 %v13763_v4  ;;  %9502 = vmatprep.subr.mxu1 %v22473_v43  ;;  %v13795_v4 = vld [vmem:[%s22112_s2 + $0xa38] sm:$0xff] }
 0xdd4   : > { %9503 = vmatpush1.msra.mxu1 %v18584_v22  ;;  %13775 = vmatprep.mubr.msk.f32.mxu1 %vm3676_vm3, %v13766_v20  ;;  %v13794_v20 = vld [vmem:[%s22112_s2 + $0xa30] sm:$0xff] }
 0xdd5   : > { %9504 = vmatprep.subr.mxu1 %v22473_v43 }
 0xdd6   : > { %9505 = vmatpush1.msra.mxu1 %v18589_v42 }
 0xdd7   : > { %9288 = vmatmul.mubr.f32.gmra.mxu1 %v13765_v15  ;;  %9506 = vmatprep.subr.mxu1 %v22473_v43  ;;  %v13797_v15 = vld [vmem:[%s22112_s2 + $0xa48] sm:$0xff] }
 0xdd8   : > { %9507 = vmatpush1.msra.mxu1 %v18594_v50  ;;  %13776 = vmatprep.mubr.msk.f32.mxu1 %vm3676_vm3, %v13768_v18  ;;  %v13796_v18 = vld [vmem:[%s22112_s2 + $0xa40] sm:$0xff] }
 0xdd9   : > { %9508 = vmatprep.subr.mxu1 %v22473_v43 }
 0xdda   : > { %9509 = vmatpush1.msra.mxu1 %v18599_v10 }
 0xddb   : > { %9293 = vmatmul.mubr.f32.gmra.mxu1 %v13767_v28  ;;  %9510 = vmatprep.subr.mxu1 %v22473_v43  ;;  %v13799_v28 = vld [vmem:[%s22112_s2 + $0xa58] sm:$0xff] }
 0xddc   : > { %9511 = vmatpush1.msra.mxu1 %v18604_v2  ;;  %13804 = vmatprep.mubr.msk.f32.mxu1 %vm3676_vm3, %v13789_v21  ;;  %v13798_v21 = vld [vmem:[%s22112_s2 + $0xa50] sm:$0xff] }
 0xddd   : > { %9512 = vmatprep.subr.mxu1 %v22473_v43 }
 0xdde   : > { %9513 = vmatpush1.msra.mxu1 %v18609_v63 }
 0xddf   : > { %9542 = vmatprep.subr.mxu1 %v22473_v43 }
 0xde0   : > { %9543 = vmatpush2.msra.mxu1 %v18613_v45 }
 0xde1   : > { %9544 = vmatprep.subr.mxu1 %v22473_v43 }
 0xde2   : > { %9545 = vmatpush2.msra.mxu1 %v18617_v6 }
 0xde3   : > { %9547 = vmatmul.mubr.f32.vlgmr.msra.gmra.mxu1 %v13788_v40  ;;  %v13801_v40 = vld [vmem:[%s22112_s2 + $0xa68] sm:$0xff] }
 0xde4   : > { %13805 = vmatprep.mubr.msk.f32.mxu1 %vm3676_vm3, %v13791_v30  ;;  %v13800_v30 = vld [vmem:[%s22112_s2 + $0xa60] sm:$0xff] }
 0xde7   : > { %9552 = vmatmul.mubr.f32.gmra.mxu1 %v13790_v44  ;;  %v13803_v44 = vld [vmem:[%s22112_s2 + $0xa78] sm:$0xff] }
 0xde8   : > { %13806 = vmatprep.mubr.msk.f32.mxu1 %vm3676_vm3, %v13793_v17  ;;  %v13802_v17 = vld [vmem:[%s22112_s2 + $0xa70] sm:$0xff] }
 0xdeb   : > { %9557 = vmatmul.mubr.f32.gmra.mxu1 %v13792_v8  ;;  %v13778_v8 = vld [vmem:[%s22116_s6 + $0x138] sm:$0x3] }
 0xdec   : > { %13807 = vmatprep.mubr.msk.f32.mxu1 %vm3676_vm3, %v13795_v4  ;;  %15193 = vmatprep.subr.msk.mxu0 %vm3833_vm4, %v13778_v8  ;;  %v13777_v4 = vld [vmem:[%s22116_s6 + $0x130] sm:$0xff] }
 0xded   : > { %15194 = vmatpush3.msk.msra.mxu0 %vm3833_vm4, %v13778_v8 }
 0xdee   : > { %15195 = vmatprep.subr.mxu0 %v13777_v4 }
 0xdef   : > { %9562 = vmatmul.mubr.f32.gmra.mxu1 %v13794_v20  ;;  %15196 = vmatpush3.msra.mxu0 %v13777_v4  ;;  %v21060_v20 = vld [vmem:[%s22116_s6 + $0x148] sm:$0x3] }
 0xdf0   : > { %13808 = vmatprep.mubr.msk.f32.mxu1 %vm3676_vm3, %v13797_v15  ;;  %15209 = vmatprep.subr.msk.mxu0 %vm3833_vm4, %v21060_v20 }
 0xdf3   : > { %9567 = vmatmul.mubr.f32.gmra.mxu1 %v13796_v18 }
 0xdf4   : > { %13809 = vmatprep.mubr.msk.f32.mxu1 %vm3676_vm3, %v13799_v28 }
 0xdf7   : > { %9572 = vmatmul.mubr.f32.gmra.mxu1 %v13798_v21 }
 0xdf8   : > { %13810 = vmatprep.mubr.msk.f32.mxu1 %vm3676_vm3, %v13801_v40 }
 0xdfb   : > { %9577 = vmatmul.mubr.f32.gmra.mxu1 %v13800_v30  ;;  %v21071_v30 = vld [vmem:[%s22117_s7] ss:$0 sm:$0xff] }
 0xdfc   : > { %13811 = vmatprep.mubr.msk.f32.mxu1 %vm3676_vm3, %v13803_v44  ;;  %v3944_v44 = vadd.f32 %v21071_v30, %v19104_v58 }
 0xdff   : > { %9582 = vmatmul.mubr.f32.gmra.mxu1 %v13802_v17  ;;  %v4233_v17 = vadd.f32 %v19115_v36, %v3944_v44 }
 0xe01   : > { %v4522_v4 = vadd.f32 %v19127_v26, %v4233_v17 }
 0xe37   : > { %v15167_v15 = vpop.f32.mrf.mxu1 }
 0xe38   : > { %v8856_v18 = vadd.f32 %v15167_v15, %v20829_v16  ;;  %v4811_v16 = vadd.f32 %v19357_v9, %v4522_v4  ;;  %v22519_v4 = vld [vmem:[#allocation22_spill] sm:$0xff] }
 0xe39   : > { %v21065_v28 = vpop.f32.mrf.mxu1 }
 0xe3a   : > { %22517 = vst [vmem:[#allocation48_spill] sm:$0xff] %v21065_v28 }
 0xe3f   : > { %v15170_v21 = vpop.f32.mrf.mxu1 }
 0xe40   : > { %v8858_v40 = vadd.f32 %v15170_v21, %v20833_v12  ;;  %v3946_v12 = vadd.f32 %v21071_v30, %v19106_v34  ;;  %v5100_v21 = vadd.f32 %v19371_v52, %v4811_v16  ;;  %v3948_v34 = vadd.f32 %v21071_v30, %v19111_v7  ;;  %v22520_v16 = vld [vmem:[#allocation52_spill] sm:$0xff] }
 0xe41   : > { %v8826_v8 = vpop.f32.mrf.mxu1 }
 0xe42   : > { %v4235_v28 = vadd.f32 %v19117_v48, %v3946_v12  ;;  %v5389_v45 = vadd.f32 %v19601_v38, %v5100_v21  ;;  %v4237_v38 = vadd.f32 %v19119_v3, %v3948_v34  ;;  %v22521_v12 = vld [vmem:[#allocation24_spill] sm:$0xff]  ;;  %v22527_v34 = vld [vmem:[#allocation11_spill] sm:$0xff] }
 0xe44   : > { %v4524_v36 = vadd.f32 %v19131_v55, %v4235_v28  ;;  %v5678_v44 = vadd.f32 %v19615_v31, %v5389_v45  ;;  %v4526_v31 = vadd.f32 %v19135_v49, %v4237_v38  ;;  %v22528_v38 = vld [vmem:[#allocation5_spill] sm:$0xff] }
 0xe46   : > { %v4813_v17 = vadd.f32 %v19360_v53, %v4524_v36  ;;  %v5967_v9 = vadd.f32 %v19845_v32, %v5678_v44  ;;  %v22523_v36 = vld [vmem:[#allocation33_spill] sm:$0xff]  ;;  %v22524_v44 = vld [vmem:[#allocation50_spill] sm:$0xff] }
 0xe47   : > { %v15173_v6 = vpop.f32.mrf.mxu1 }
 0xe48   : > { %v8860_v15 = vadd.f32 %v15173_v6, %v20837_v29  ;;  %v5102_v52 = vadd.f32 %v19375_v56, %v4813_v17  ;;  %v6256_v48 = vadd.f32 %v19859_v1, %v5967_v9  ;;  %v4815_v29 = vadd.f32 %v19363_v11, %v4526_v31  ;;  %v22522_v11 = vld [vmem:[#allocation42_spill] sm:$0xff] }
 0xe49   : > { %v8836_v58 = vpop.f32.mrf.mxu1 }
 0xe4a   : > { %v5391_v55 = vadd.f32 %v19604_v39, %v5102_v52  ;;  %v6545_v45 = vadd.f32 %v20089_v54, %v6256_v48  ;;  %v5104_v1 = vadd.f32 %v19379_v13, %v4815_v29  ;;  %v22518_v39 = vld [vmem:[#allocation7_spill] sm:$0xff]  ;;  %v22525_v13 = vld [vmem:[#allocation13_spill] sm:$0xff] }
 0xe4c   : > { %v5680_v53 = vadd.f32 %v19619_v19, %v5391_v55  ;;  %v6834_v32 = vadd.f32 %v20103_v35, %v6545_v45  ;;  %v5393_v49 = vadd.f32 %v22519_v4, %v5104_v1  ;;  %v22529_v45 = vld [vmem:[#allocation8_spill] sm:$0xff]  ;;  %v22533_v4 = vld [vmem:[#allocation49_spill] sm:$0xff] }
 0xe4e   : > { %v5969_v7 = vadd.f32 %v19848_v41, %v5680_v53  ;;  %v7123_v56 = vadd.f32 %v20333_v59, %v6834_v32  ;;  %v5682_v41 = vadd.f32 %v22522_v11, %v5393_v49  ;;  %v22530_v32 = vld [vmem:[#allocation26_spill] sm:$0xff] }
 0xe4f   : > { %v15176_v26 = vpop.f32.mrf.mxu1 }
 0xe50   : > { %v8862_v6 = vadd.f32 %v15176_v26, %v20841_v61  ;;  %v6258_v3 = vadd.f32 %v19863_v25, %v5969_v7  ;;  %v7412_v28 = vadd.f32 %v22518_v39, %v7123_v56  ;;  %v5971_v17 = vadd.f32 %v22525_v13, %v5682_v41  ;;  %v22526_v25 = vld [vmem:[#allocation40_spill] sm:$0xff]  ;;  %v22531_v7 = vld [vmem:[#allocation35_spill] sm:$0xff] }
 0xe51   : > { %v8846_v61 = vpop.f32.mrf.mxu1 }
 0xe52   : > { %v6547_v19 = vadd.f32 %v22520_v16, %v6258_v3  ;;  %v7701_v35 = vadd.f32 %v22521_v12, %v7412_v28  ;;  %v6260_v55 = vadd.f32 %v22528_v38, %v5971_v17  ;;  %v22532_v28 = vld [vmem:[#allocation6_spill] sm:$0xff] }
 0xe53   : > { %v22538_v17 = vld [vmem:[#allocation14_spill] sm:$0xff] }
 0xe54   : > { %v6836_v59 = vadd.f32 %v22523_v36, %v6547_v19  ;;  %v7990_v26 = vadd.f32 %v22524_v44, %v7701_v35  ;;  %v6549_v29 = vadd.f32 %v22530_v32, %v6260_v55  ;;  %v22534_v19 = vld [vmem:[#allocation47_spill] sm:$0xff]  ;;  %v22535_v35 = vld [vmem:[#allocation37_spill] sm:$0xff]  ;;  %v22537_v44 = vld [vmem:[#allocation10_spill] sm:$0xff] }
 0xe56   : > { %v7125_v9 = vadd.f32 %v22526_v25, %v6836_v59  ;;  %v8279_v52 = vadd.f32 %v22527_v34, %v7990_v26 }
 0xe58   : > { %v7414_v31 = vadd.f32 %v22529_v45, %v7125_v9 }
 0xe5a   : > { %v7703_v56 = vadd.f32 %v22531_v7, %v7414_v31 }
 0xe5b   : > { %v15183_v54 = vpop.f32.mrf.mxu1 }
 0xe5c   : > { %v21108_v21 = vadd.f32 %v15183_v54, %v8856_v18  ;;  %v8568_v18 = vadd.f32 %v20835_v60, %v8279_v52  ;;  %v6838_v54 = vadd.f32 %v22532_v28, %v6549_v29  ;;  %v7992_v49 = vadd.f32 %v22533_v4, %v7703_v56  ;;  %v22536_v60 = vld [vmem:[#allocation9_spill] sm:$0xff] }
 0xe5d   : > { %v21116_v48 = vpop.f32.mrf.mxu1 }
 0xe5e   : > { %v8857_v1 = vadd.f32 %v8826_v8, %v8568_v18  ;;  %v7127_v12 = vadd.f32 %v22534_v19, %v6838_v54  ;;  %v8281_v11 = vadd.f32 %v22535_v35, %v7992_v49 }
 0xe60   : > { %v7416_v41 = vadd.f32 %v22536_v60, %v7127_v12  ;;  %v8570_v36 = vadd.f32 %v20839_v46, %v8281_v11 }
 0xe62   : > { %v7705_v8 = vadd.f32 %v22537_v44, %v7416_v41 }
 0xe63   : > { %v15186_v53 = vpop.f32.mrf.mxu1 }
 0xe64   : > { %v21123_v3 = vadd.f32 %v15186_v53, %v8858_v40  ;;  %v8859_v40 = vadd.f32 %v8836_v58, %v8570_v36  ;;  %v7994_v25 = vadd.f32 %v22538_v17, %v7705_v8  ;;  %v13812_v53 = vld [vmem:[%s22116_s6 + $0x140] sm:$0xff]  ;;  %v13824_v17 = vld [vmem:[%s22112_s2 + $0xa88] sm:$0xff] }
 0xe65   : > { %v9115_v39 = vpop.f32.mrf.mxu1 }
 0xe66   : > { %v21127_v16 = vadd.f32 %v9115_v39, %v8857_v1  ;;  %v8283_v34 = vadd.f32 %v20827_v0, %v7994_v25 }
 0xe68   : > { %v8572_v52 = vadd.f32 %v20843_v5, %v8283_v34 }
 0xe6a   : > { %v8861_v55 = vadd.f32 %v8846_v61, %v8572_v52  ;;  %v22539_v52 = vld [vmem:[#allocation27_spill] sm:$0xff] }
 0xe6b   : > { %v15189_v59 = vpop.f32.mrf.mxu1 }
 0xe6c   : > { %v21134_v26 = vadd.f32 %v15189_v59, %v8860_v15 }
 0xe6d   : > { %v9125_v13 = vpop.f32.mrf.mxu1 }
 0xe6e   : > { %v21137_v9 = vadd.f32 %v9125_v13, %v8859_v40 }
 0xe73   : > { %v15192_v38 = vpop.f32.mrf.mxu1 }
 0xe74   : > { %v21141_v45 = vadd.f32 %v15192_v38, %v8862_v6  ;;  %v13823_v38 = vld [vmem:[%s22112_s2 + $0xa80] sm:$0xff] }
 0xe75   : > { %v9135_v46 = vpop.f32.mrf.mxu1 }
 0xe76   : > { %v21143_v31 = vadd.f32 %v9135_v46, %v8861_v55  ;;  %v13826_v55 = vld [vmem:[%s22112_s2 + $0xa98] sm:$0xff] }
 0xe77   : > { %v22540_v46 = vld [vmem:[#allocation16_spill] sm:$0xff] }
 0xe7f   : > { %v9259_v18 = vpop.f32.mrf.mxu1 }
 0xe80   : > { %15197 = vmatprep.mubr.msk.f32.mxu0 %vm3808_vm5, %v9259_v18  ;;  %v13825_v18 = vld [vmem:[%s22112_s2 + $0xa90] sm:$0xff] }
 0xe81   : > { %v9261_v15 = vpop.f32.mrf.mxu1 }
 0xe82   : > { %v13828_v15 = vld [vmem:[%s22112_s2 + $0xaa8] sm:$0xff] }
 0xe83   : > { %v9264_v58 = vpop.f32.mrf.mxu1 }
 0xe84   : > { %15198 = vmatmul.mubr.msk.f32.vlgmr.msra.gmra.mxu0 %vm3808_vm5, %v9264_v58  ;;  %v13827_v58 = vld [vmem:[%s22112_s2 + $0xaa0] sm:$0xff] }
 0xe85   : > { %v9266_v0 = vpop.f32.mrf.mxu1  ;;  %15210 = vmatpush3.msk.msra.mxu0 %vm3833_vm4, %v21060_v20 }
 0xe86   : > { %15211 = vmatprep.subr.mxu0 %v13812_v53  ;;  %v13829_v0 = vld [vmem:[%s22112_s2 + $0xab0] sm:$0xff] }
 0xe87   : > { %v9269_v5 = vpop.f32.mrf.mxu1  ;;  %15212 = vmatpush3.msra.mxu0 %v13812_v53  ;;  %v13830_v53 = vld [vmem:[%s22112_s2 + $0xab8] sm:$0xff] }
 0xe88   : > { %15200 = vmatprep.mubr.msk.f32.mxu0 %vm3808_vm5, %v9269_v5  ;;  %9771 = vmatprep.subr.mxu0 %v22473_v43  ;;  %v13832_v5 = vld [vmem:[%s22112_s2 + $0xac8] sm:$0xff] }
 0xe89   : > { %v9271_v6 = vpop.f32.mrf.mxu1 }
 0xe8a   : > { %v13831_v6 = vld [vmem:[%s22112_s2 + $0xac0] sm:$0xff] }
 0xe8b   : > { %v9274_v61 = vpop.f32.mrf.mxu1 }
 0xe8c   : > { %15201 = vmatmul.mubr.msk.f32.gmra.mxu0 %vm3808_vm5, %v9274_v61  ;;  %v13834_v61 = vld [vmem:[%s22112_s2 + $0xad8] sm:$0xff] }
 0xe8d   : > { %v9276_v32 = vpop.f32.mrf.mxu1 }
 0xe8e   : > { %v13833_v32 = vld [vmem:[%s22112_s2 + $0xad0] sm:$0xff] }
 0xe8f   : > { %v9279_v29 = vpop.f32.mrf.mxu1 }
 0xe90   : > { %15203 = vmatprep.mubr.msk.f32.mxu0 %vm3808_vm5, %v9279_v29  ;;  %v13836_v29 = vld [vmem:[%s22112_s2 + $0xae8] sm:$0xff] }
 0xe91   : > { %v9281_v7 = vpop.f32.mrf.mxu1 }
 0xe92   : > { %v13835_v7 = vld [vmem:[%s22112_s2 + $0xae0] sm:$0xff] }
 0xe93   : > { %v9284_v56 = vpop.f32.mrf.mxu1 }
 0xe94   : > { %15204 = vmatmul.mubr.msk.f32.gmra.mxu0 %vm3808_vm5, %v9284_v56  ;;  %v13838_v56 = vld [vmem:[%s22112_s2 + $0xaf8] sm:$0xff] }
 0xe95   : > { %v9286_v20 = vpop.f32.mrf.mxu1 }
 0xe96   : > { %v13837_v20 = vld [vmem:[%s22112_s2 + $0xaf0] sm:$0xff] }
 0xe97   : > { %v9289_v1 = vpop.f32.mrf.mxu1 }
 0xe98   : > { %15206 = vmatprep.mubr.msk.f32.mxu0 %vm3808_vm5, %v9289_v1  ;;  %v13859_v1 = vld [vmem:[%s22112_s2 + $0xb08] sm:$0xff] }
 0xe99   : > { %v9291_v39 = vpop.f32.mrf.mxu1 }
 0xe9a   : > { %v13858_v39 = vld [vmem:[%s22112_s2 + $0xb00] sm:$0xff] }
 0xe9b   : > { %v9294_v28 = vpop.f32.mrf.mxu1 }
 0xe9c   : > { %15207 = vmatmul.mubr.msk.f32.gmra.mxu0 %vm3808_vm5, %v9294_v28  ;;  %v13861_v28 = vld [vmem:[%s22112_s2 + $0xb18] sm:$0xff] }
 0xe9d   : > { %v9296_v54 = vpop.f32.mrf.mxu1 }
 0xe9e   : > { %v13860_v54 = vld [vmem:[%s22112_s2 + $0xb10] sm:$0xff] }
 0xea3   : > { %v9548_v4 = vpop.f32.mrf.mxu1 }
 0xea4   : > { %15213 = vmatprep.mubr.msk.f32.mxu0 %vm3808_vm5, %v9548_v4  ;;  %v13863_v4 = vld [vmem:[%s22112_s2 + $0xb28] sm:$0xff] }
 0xea5   : > { %v9550_v49 = vpop.f32.mrf.mxu1 }
 0xea6   : > { %v13862_v49 = vld [vmem:[%s22112_s2 + $0xb20] sm:$0xff] }
 0xea7   : > { %v9553_v19 = vpop.f32.mrf.mxu1 }
 0xea8   : > { %15214 = vmatmul.mubr.msk.f32.vlgmr.msra.gmra.mxu0 %vm3808_vm5, %v9553_v19  ;;  %v13865_v19 = vld [vmem:[%s22112_s2 + $0xb38] sm:$0xff] }
 0xea9   : > { %9772 = vmatpush1.msra.mxu0 %v18532_v23  ;;  %v9555_v12 = vpop.f32.mrf.mxu1 }
 0xeaa   : > { %9773 = vmatprep.subr.mxu0 %v22473_v43  ;;  %v13864_v12 = vld [vmem:[%s22112_s2 + $0xb30] sm:$0xff] }
 0xeab   : > { %9774 = vmatpush1.msra.mxu0 %v18539_v62  ;;  %v9558_v35 = vpop.f32.mrf.mxu1 }
 0xeac   : > { %9775 = vmatprep.subr.mxu0 %v22473_v43  ;;  %15216 = vmatprep.mubr.msk.f32.mxu0 %vm3808_vm5, %v9558_v35  ;;  %v13867_v35 = vld [vmem:[%s22112_s2 + $0xb48] sm:$0xff] }
 0xead   : > { %9776 = vmatpush1.msra.mxu0 %v18546_v33  ;;  %v9560_v11 = vpop.f32.mrf.mxu1 }
 0xeae   : > { %9777 = vmatprep.subr.mxu0 %v22473_v43  ;;  %v13866_v11 = vld [vmem:[%s22112_s2 + $0xb40] sm:$0xff] }
 0xeaf   : > { %9778 = vmatpush1.msra.mxu0 %v18553_v37  ;;  %v9563_v60 = vpop.f32.mrf.mxu1 }
 0xeb0   : > { %9779 = vmatprep.subr.mxu0 %v22473_v43  ;;  %15217 = vmatmul.mubr.msk.f32.gmra.mxu0 %vm3808_vm5, %v9563_v60  ;;  %v13869_v60 = vld [vmem:[%s22112_s2 + $0xb58] sm:$0xff] }
 0xeb1   : > { %9780 = vmatpush1.msra.mxu0 %v18557_v47  ;;  %v9565_v41 = vpop.f32.mrf.mxu1 }
 0xeb2   : > { %9781 = vmatprep.subr.mxu0 %v22473_v43  ;;  %v13868_v41 = vld [vmem:[%s22112_s2 + $0xb50] sm:$0xff] }
 0xeb3   : > { %9782 = vmatpush1.msra.mxu0 %v18561_v14  ;;  %v9568_v36 = vpop.f32.mrf.mxu1 }
 0xeb4   : > { %9783 = vmatprep.subr.mxu0 %v22473_v43  ;;  %15219 = vmatprep.mubr.msk.f32.mxu0 %vm3808_vm5, %v9568_v36  ;;  %v13871_v36 = vld [vmem:[%s22112_s2 + $0xb68] sm:$0xff] }
 0xeb5   : > { %9784 = vmatpush1.msra.mxu0 %v18565_v51  ;;  %v9570_v59 = vpop.f32.mrf.mxu1 }
 0xeb6   : > { %9785 = vmatprep.subr.mxu0 %v22473_v43  ;;  %v13870_v59 = vld [vmem:[%s22112_s2 + $0xb60] sm:$0xff] }
 0xeb7   : > { %9786 = vmatpush1.msra.mxu0 %v18569_v24  ;;  %v9573_v44 = vpop.f32.mrf.mxu1 }
 0xeb8   : > { %9787 = vmatprep.subr.mxu0 %v22473_v43  ;;  %15220 = vmatmul.mubr.msk.f32.gmra.mxu0 %vm3808_vm5, %v9573_v44  ;;  %v13873_v44 = vld [vmem:[%s22112_s2 + $0xb78] sm:$0xff] }
 0xeb9   : > { %9788 = vmatpush1.msra.mxu0 %v18574_v57  ;;  %v9575_v8 = vpop.f32.mrf.mxu1 }
 0xeba   : > { %9789 = vmatprep.subr.mxu0 %v22473_v43  ;;  %v13872_v8 = vld [vmem:[%s22112_s2 + $0xb70] sm:$0xff] }
 0xebb   : > { %9790 = vmatpush1.msra.mxu0 %v18579_v27  ;;  %v9578_v40 = vpop.f32.mrf.mxu1 }
 0xebc   : > { %9791 = vmatprep.subr.mxu0 %v22473_v43  ;;  %15222 = vmatprep.mubr.msk.f32.mxu0 %vm3808_vm5, %v9578_v40  ;;  %v13848_v40 = vld [vmem:[%s22116_s6 + $0x158] sm:$0x3] }
 0xebd   : > { %9792 = vmatpush1.msra.mxu0 %v18584_v22  ;;  %v9580_v13 = vpop.f32.mrf.mxu1  ;;  %15225 = vmatprep.subr.msk.mxu1 %vm3833_vm4, %v13848_v40 }
 0xebe   : > { %9793 = vmatprep.subr.mxu0 %v22473_v43  ;;  %15226 = vmatpush3.msk.msra.mxu1 %vm3833_vm4, %v13848_v40  ;;  %v13847_v13 = vld [vmem:[%s22116_s6 + $0x150] sm:$0xff]  ;;  %v22558_v40 = vld [vmem:[#allocation48_spill] sm:$0xff] }
 0xebf   : > { %9794 = vmatpush1.msra.mxu0 %v18589_v42  ;;  %v9583_v25 = vpop.f32.mrf.mxu1  ;;  %15227 = vmatprep.subr.mxu1 %v13847_v13 }
 0xec0   : > { %9795 = vmatprep.subr.mxu0 %v22473_v43  ;;  %15223 = vmatmul.mubr.msk.f32.gmra.mxu0 %vm3808_vm5, %v9583_v25 }
 0xec1   : > { %9796 = vmatpush1.msra.mxu0 %v18594_v50  ;;  %13839 = vmatprep.mubr.msk.f32.mxu0 %vm3676_vm3, %v13824_v17  ;;  %v9585_v34 = vpop.f32.mrf.mxu1  ;;  %v22541_v17 = vld [vmem:[#allocation44_spill] sm:$0xff] }
 0xec2   : > { %9797 = vmatprep.subr.mxu0 %v22473_v43  ;;  %15228 = vmatpush3.msra.mxu1 %v13847_v13  ;;  %v3942_v25 = vadd.f32 %v21071_v30, %v22541_v17  ;;  %v22542_v34 = vld [vmem:[#allocation45_spill] sm:$0xff] }
 0xec3   : > { %9798 = vmatpush1.msra.mxu0 %v18599_v10 }
 0xec4   : > { %9799 = vmatprep.subr.mxu0 %v22473_v43 }
 0xec5   : > { %9800 = vmatpush1.msra.mxu0 %v18604_v2 }
 0xec6   : > { %9801 = vmatprep.subr.mxu0 %v22473_v43 }
 0xec7   : > { %9802 = vmatpush1.msra.mxu0 %v18609_v63 }
 0xec8   : > { %9831 = vmatprep.subr.mxu0 %v22473_v43 }
 0xec9   : > { %9832 = vmatpush2.msra.mxu0 %v22539_v52 }
 0xeca   : > { %9833 = vmatprep.subr.mxu0 %v22473_v43 }
 0xecb   : > { %9834 = vmatpush2.msra.mxu0 %v22540_v46 }
 0xecc   : > { %9836 = vmatmul.mubr.f32.vlgmr.msra.gmra.mxu0 %v13823_v38  ;;  %10060 = vmatprep.subr.mxu0 %v22473_v43  ;;  %v4231_v38 = vadd.f32 %v22542_v34, %v3942_v25 }
 0xecd   : > { %10061 = vmatpush1.msra.mxu0 %v18532_v23  ;;  %13840 = vmatprep.mubr.msk.f32.mxu0 %vm3676_vm3, %v13826_v55  ;;  %v22543_v55 = vld [vmem:[#allocation46_spill] sm:$0xff] }
 0xece   : > { %10062 = vmatprep.subr.mxu0 %v22473_v43 }
 0xecf   : > { %10063 = vmatpush1.msra.mxu0 %v18539_v62 }
 0xed0   : > { %9841 = vmatmul.mubr.f32.gmra.mxu0 %v13825_v18  ;;  %10064 = vmatprep.subr.mxu0 %v22473_v43  ;;  %v4520_v18 = vadd.f32 %v22543_v55, %v4231_v38 }
 0xed1   : > { %10065 = vmatpush1.msra.mxu0 %v18546_v33  ;;  %13841 = vmatprep.mubr.msk.f32.mxu0 %vm3676_vm3, %v13828_v15  ;;  %v22544_v15 = vld [vmem:[#allocation12_spill] sm:$0xff] }
 0xed2   : > { %10066 = vmatprep.subr.mxu0 %v22473_v43 }
 0xed3   : > { %10067 = vmatpush1.msra.mxu0 %v18553_v37 }
 0xed4   : > { %9846 = vmatmul.mubr.f32.gmra.mxu0 %v13827_v58  ;;  %10068 = vmatprep.subr.mxu0 %v22473_v43  ;;  %v4809_v58 = vadd.f32 %v22544_v15, %v4520_v18 }
 0xed5   : > { %10069 = vmatpush1.msra.mxu0 %v18557_v47  ;;  %13842 = vmatprep.mubr.msk.f32.mxu0 %vm3676_vm3, %v13830_v53  ;;  %v22545_v53 = vld [vmem:[#allocation30_spill] sm:$0xff] }
 0xed6   : > { %10070 = vmatprep.subr.mxu0 %v22473_v43 }
 0xed7   : > { %10071 = vmatpush1.msra.mxu0 %v18561_v14 }
 0xed8   : > { %9851 = vmatmul.mubr.f32.gmra.mxu0 %v13829_v0  ;;  %10072 = vmatprep.subr.mxu0 %v22473_v43  ;;  %v5098_v0 = vadd.f32 %v22545_v53, %v4809_v58 }
 0xed9   : > { %10073 = vmatpush1.msra.mxu0 %v18565_v51  ;;  %13843 = vmatprep.mubr.msk.f32.mxu0 %vm3676_vm3, %v13832_v5  ;;  %v22546_v5 = vld [vmem:[#allocation41_spill] sm:$0xff] }
 0xeda   : > { %10074 = vmatprep.subr.mxu0 %v22473_v43 }
 0xedb   : > { %10075 = vmatpush1.msra.mxu0 %v18569_v24 }
 0xedc   : > { %9856 = vmatmul.mubr.f32.gmra.mxu0 %v13831_v6  ;;  %10076 = vmatprep.subr.mxu0 %v22473_v43  ;;  %v5387_v6 = vadd.f32 %v22546_v5, %v5098_v0 }
 0xedd   : > { %10077 = vmatpush1.msra.mxu0 %v18574_v57  ;;  %13844 = vmatprep.mubr.msk.f32.mxu0 %vm3676_vm3, %v13834_v61  ;;  %v22547_v61 = vld [vmem:[#allocation36_spill] sm:$0xff] }
 0xede   : > { %10078 = vmatprep.subr.mxu0 %v22473_v43 }
 0xedf   : > { %10079 = vmatpush1.msra.mxu0 %v18579_v27 }
 0xee0   : > { %9861 = vmatmul.mubr.f32.gmra.mxu0 %v13833_v32  ;;  %10080 = vmatprep.subr.mxu0 %v22473_v43  ;;  %v5676_v32 = vadd.f32 %v22547_v61, %v5387_v6 }
 0xee1   : > { %10081 = vmatpush1.msra.mxu0 %v18584_v22  ;;  %13845 = vmatprep.mubr.msk.f32.mxu0 %vm3676_vm3, %v13836_v29  ;;  %v22548_v29 = vld [vmem:[#allocation25_spill] sm:$0xff] }
 0xee2   : > { %10082 = vmatprep.subr.mxu0 %v22473_v43 }
 0xee3   : > { %10083 = vmatpush1.msra.mxu0 %v18589_v42 }
 0xee4   : > { %9866 = vmatmul.mubr.f32.gmra.mxu0 %v13835_v7  ;;  %10084 = vmatprep.subr.mxu0 %v22473_v43  ;;  %v5965_v7 = vadd.f32 %v22548_v29, %v5676_v32 }
 0xee5   : > { %10085 = vmatpush1.msra.mxu0 %v18594_v50  ;;  %13846 = vmatprep.mubr.msk.f32.mxu0 %vm3676_vm3, %v13838_v56  ;;  %v13883_v56 = vld [vmem:[%s22116_s6 + $0x168] sm:$0x3] }
 0xee6   : > { %10086 = vmatprep.subr.mxu0 %v22473_v43  ;;  %15241 = vmatprep.subr.msk.mxu1 %vm3833_vm4, %v13883_v56 }
 0xee7   : > { %10087 = vmatpush1.msra.mxu0 %v18599_v10 }
 0xee8   : > { %9871 = vmatmul.mubr.f32.gmra.mxu0 %v13837_v20  ;;  %10088 = vmatprep.subr.mxu0 %v22473_v43  ;;  %v22549_v20 = vld [vmem:[#allocation43_spill] sm:$0xff] }
 0xee9   : > { %10089 = vmatpush1.msra.mxu0 %v18604_v2  ;;  %13874 = vmatprep.mubr.msk.f32.mxu0 %vm3676_vm3, %v13859_v1  ;;  %v6254_v30 = vadd.f32 %v22549_v20, %v5965_v7  ;;  %v22550_v1 = vld [vmem:[#allocation38_spill] sm:$0xff] }
 0xeea   : > { %10090 = vmatprep.subr.mxu0 %v22473_v43 }
 0xeeb   : > { %10091 = vmatpush1.msra.mxu0 %v18609_v63 }
 0xeec   : > { %10120 = vmatprep.subr.mxu0 %v22473_v43 }
 0xeed   : > { %10121 = vmatpush2.msra.mxu0 %v22539_v52 }
 0xeee   : > { %10122 = vmatprep.subr.mxu0 %v22473_v43 }
 0xeef   : > { %10123 = vmatpush2.msra.mxu0 %v22540_v46 }
 0xef0   : > { %10125 = vmatmul.mubr.f32.vlgmr.msra.gmra.mxu0 %v13858_v39  ;;  %v6543_v39 = vadd.f32 %v22550_v1, %v6254_v30 }
 0xef1   : > { %13875 = vmatprep.mubr.msk.f32.mxu0 %vm3676_vm3, %v13861_v28  ;;  %v22551_v28 = vld [vmem:[#allocation51_spill] sm:$0xff] }
 0xef4   : > { %10130 = vmatmul.mubr.f32.gmra.mxu0 %v13860_v54  ;;  %v6832_v54 = vadd.f32 %v22551_v28, %v6543_v39 }
 0xef5   : > { %13876 = vmatprep.mubr.msk.f32.mxu0 %vm3676_vm3, %v13863_v4  ;;  %v22552_v4 = vld [vmem:[#allocation32_spill] sm:$0xff] }
 0xef8   : > { %10135 = vmatmul.mubr.f32.gmra.mxu0 %v13862_v49  ;;  %v7121_v49 = vadd.f32 %v22552_v4, %v6832_v54 }
 0xef9   : > { %13877 = vmatprep.mubr.msk.f32.mxu0 %vm3676_vm3, %v13865_v19  ;;  %v22553_v19 = vld [vmem:[#allocation28_spill] sm:$0xff] }
 0xefc   : > { %10140 = vmatmul.mubr.f32.gmra.mxu0 %v13864_v12  ;;  %v7410_v12 = vadd.f32 %v22553_v19, %v7121_v49 }
 0xefd   : > { %13878 = vmatprep.mubr.msk.f32.mxu0 %vm3676_vm3, %v13867_v35  ;;  %v22554_v35 = vld [vmem:[#allocation15_spill] sm:$0xff] }
 0xf00   : > { %10145 = vmatmul.mubr.f32.gmra.mxu0 %v13866_v11  ;;  %v7699_v11 = vadd.f32 %v22554_v35, %v7410_v12 }
 0xf01   : > { %13879 = vmatprep.mubr.msk.f32.mxu0 %vm3676_vm3, %v13869_v60  ;;  %v22555_v60 = vld [vmem:[#allocation34_spill] sm:$0xff] }
 0xf04   : > { %10150 = vmatmul.mubr.f32.gmra.mxu0 %v13868_v41  ;;  %v7988_v41 = vadd.f32 %v22555_v60, %v7699_v11  ;;  %v13882_v60 = vld [vmem:[%s22116_s6 + $0x160] sm:$0xff] }
 0xf05   : > { %13880 = vmatprep.mubr.msk.f32.mxu0 %vm3676_vm3, %v13871_v36  ;;  %v22556_v36 = vld [vmem:[#allocation17_spill] sm:$0xff] }
 0xf08   : > { %10155 = vmatmul.mubr.f32.gmra.mxu0 %v13870_v59  ;;  %v8277_v59 = vadd.f32 %v22556_v36, %v7988_v41 }
 0xf09   : > { %13881 = vmatprep.mubr.msk.f32.mxu0 %vm3676_vm3, %v13873_v44  ;;  %v22557_v44 = vld [vmem:[#allocation18_spill] sm:$0xff] }
 0xf0c   : > { %10160 = vmatmul.mubr.f32.gmra.mxu0 %v13872_v8  ;;  %v8566_v8 = vadd.f32 %v22557_v44, %v8277_v59 }
 0xf0e   : > { %v8855_v13 = vadd.f32 %v22558_v40, %v8566_v8 }
 0xf10   : > { %v9144_v25 = vadd.f32 %v21116_v48, %v8855_v13 }
 0xf44   : > { %v15199_v17 = vpop.f32.mrf.mxu0 }
 0xf45   : > { %v9434_v34 = vadd.f32 %v15199_v17, %v21108_v21 }
 0xf46   : > { %v9394_v38 = vpop.f32.mrf.mxu0 }
 0xf47   : > { %v9433_v55 = vadd.f32 %v9394_v38, %v9144_v25 }
 0xf4c   : > { %v15202_v18 = vpop.f32.mrf.mxu0 }
 0xf4d   : > { %v9436_v15 = vadd.f32 %v15202_v18, %v21123_v3 }
 0xf4e   : > { %v9404_v58 = vpop.f32.mrf.mxu0 }
 0xf4f   : > { %v9435_v53 = vadd.f32 %v9404_v58, %v21127_v16 }
 0xf54   : > { %v15205_v0 = vpop.f32.mrf.mxu0 }
 0xf55   : > { %v9438_v5 = vadd.f32 %v15205_v0, %v21134_v26 }
 0xf56   : > { %v9414_v6 = vpop.f32.mrf.mxu0 }
 0xf57   : > { %v9437_v61 = vadd.f32 %v9414_v6, %v21137_v9 }
 0xf5c   : > { %v15208_v32 = vpop.f32.mrf.mxu0 }
 0xf5d   : > { %v9440_v29 = vadd.f32 %v15208_v32, %v21141_v45 }
 0xf5e   : > { %v9424_v48 = vpop.f32.mrf.mxu0 }
 0xf5f   : > { %v9439_v21 = vadd.f32 %v9424_v48, %v21143_v31 }
 0xf68   : > { %v15215_v7 = vpop.f32.mrf.mxu0 }
 0xf69   : > { %v21389_v20 = vadd.f32 %v15215_v7, %v9434_v34 }
 0xf6a   : > { %v9683_v30 = vpop.f32.mrf.mxu0 }
 0xf6b   : > { %v21391_v3 = vadd.f32 %v9683_v30, %v9433_v55 }
 0xf70   : > { %v15218_v1 = vpop.f32.mrf.mxu0 }
 0xf71   : > { %v21393_v16 = vadd.f32 %v15218_v1, %v9436_v15  ;;  %v13894_v1 = vld [vmem:[%s22112_s2 + $0xb88] sm:$0xff] }
 0xf72   : > { %v9693_v39 = vpop.f32.mrf.mxu0 }
 0xf73   : > { %v21395_v26 = vadd.f32 %v9693_v39, %v9435_v53 }
 0xf78   : > { %v15221_v28 = vpop.f32.mrf.mxu0 }
 0xf79   : > { %v21397_v9 = vadd.f32 %v15221_v28, %v9438_v5 }
 0xf7a   : > { %v9703_v54 = vpop.f32.mrf.mxu0 }
 0xf7b   : > { %v21399_v45 = vadd.f32 %v9703_v54, %v9437_v61  ;;  %v13893_v54 = vld [vmem:[%s22112_s2 + $0xb80] sm:$0xff] }
 0xf80   : > { %v15224_v4 = vpop.f32.mrf.mxu0 }
 0xf81   : > { %v21401_v31 = vadd.f32 %v15224_v4, %v9440_v29  ;;  %v13896_v4 = vld [vmem:[%s22112_s2 + $0xb98] sm:$0xff] }
 0xf82   : > { %v9713_v49 = vpop.f32.mrf.mxu0 }
 0xf83   : > { %v21403_v19 = vadd.f32 %v9713_v49, %v9439_v21  ;;  %v13895_v49 = vld [vmem:[%s22112_s2 + $0xb90] sm:$0xff] }
 0xf8c   : > { %v9837_v12 = vpop.f32.mrf.mxu0 }
 0xf8d   : > { %15229 = vmatprep.mubr.msk.f32.mxu1 %vm3808_vm5, %v9837_v12  ;;  %v13898_v12 = vld [vmem:[%s22112_s2 + $0xba8] sm:$0xff] }
 0xf8e   : > { %v9839_v35 = vpop.f32.mrf.mxu0 }
 0xf8f   : > { %v13900_v35 = vld [vmem:[%s22112_s2 + $0xbb8] sm:$0xff] }
 0xf90   : > { %v9842_v11 = vpop.f32.mrf.mxu0 }
 0xf91   : > { %15230 = vmatmul.mubr.msk.f32.vlgmr.msra.gmra.mxu1 %vm3808_vm5, %v9842_v11  ;;  %v13937_v11 = vld [vmem:[%s22112_s2 + $0xc48] sm:$0xff] }
 0xf92   : > { %v9844_v41 = vpop.f32.mrf.mxu0  ;;  %15242 = vmatpush3.msk.msra.mxu1 %vm3833_vm4, %v13883_v56 }
 0xf93   : > { %15243 = vmatprep.subr.mxu1 %v13882_v60  ;;  %v13939_v41 = vld [vmem:[%s22112_s2 + $0xc58] sm:$0xff] }
 0xf94   : > { %v9847_v36 = vpop.f32.mrf.mxu0  ;;  %15244 = vmatpush3.msra.mxu1 %v13882_v60  ;;  %v13936_v60 = vld [vmem:[%s22112_s2 + $0xc40] sm:$0xff] }
 0xf95   : > { %15232 = vmatprep.mubr.msk.f32.mxu1 %vm3808_vm5, %v9847_v36  ;;  %10349 = vmatprep.subr.mxu1 %v22473_v43  ;;  %v13938_v36 = vld [vmem:[%s22112_s2 + $0xc50] sm:$0xff] }
 0xf96   : > { %v9849_v59 = vpop.f32.mrf.mxu0 }
 0xf97   : > { %v13941_v59 = vld [vmem:[%s22112_s2 + $0xc68] sm:$0xff] }
 0xf98   : > { %v9852_v44 = vpop.f32.mrf.mxu0 }
 0xf99   : > { %15233 = vmatmul.mubr.msk.f32.gmra.mxu1 %vm3808_vm5, %v9852_v44  ;;  %v13940_v44 = vld [vmem:[%s22112_s2 + $0xc60] sm:$0xff] }
 0xf9a   : > { %v9854_v8 = vpop.f32.mrf.mxu0 }
 0xf9b   : > { %v13943_v8 = vld [vmem:[%s22112_s2 + $0xc78] sm:$0xff] }
 0xf9c   : > { %v9857_v40 = vpop.f32.mrf.mxu0 }
 0xf9d   : > { %15235 = vmatprep.mubr.msk.f32.mxu1 %vm3808_vm5, %v9857_v40  ;;  %v13942_v40 = vld [vmem:[%s22112_s2 + $0xc70] sm:$0xff] }
 0xf9e   : > { %v9859_v13 = vpop.f32.mrf.mxu0 }
 0xf9f   : > { %v13918_v13 = vld [vmem:[%s22116_s6 + $0x178] sm:$0x3] }
 0xfa0   : > { %v9862_v17 = vpop.f32.mrf.mxu0  ;;  %15257 = vmatprep.subr.msk.mxu0 %vm3833_vm4, %v13918_v13 }
 0xfa1   : > { %15236 = vmatmul.mubr.msk.f32.gmra.mxu1 %vm3808_vm5, %v9862_v17  ;;  %15258 = vmatpush3.msk.msra.mxu0 %vm3833_vm4, %v13918_v13  ;;  %v13917_v17 = vld [vmem:[%s22116_s6 + $0x170] sm:$0xff] }
 0xfa2   : > { %v9864_v56 = vpop.f32.mrf.mxu0  ;;  %15259 = vmatprep.subr.mxu0 %v13917_v17 }
 0xfa3   : > { %15260 = vmatpush3.msra.mxu0 %v13917_v17  ;;  %v13953_v56 = vld [vmem:[%s22116_s6 + $0x188] sm:$0x3] }
 0xfa4   : > { %v9867_v25 = vpop.f32.mrf.mxu0  ;;  %15273 = vmatprep.subr.msk.mxu0 %vm3833_vm4, %v13953_v56 }
 0xfa5   : > { %15238 = vmatprep.mubr.msk.f32.mxu1 %vm3808_vm5, %v9867_v25 }
 0xfa6   : > { %v9869_v34 = vpop.f32.mrf.mxu0 }
 0xfa8   : > { %v9872_v38 = vpop.f32.mrf.mxu0 }
 0xfa9   : > { %15239 = vmatmul.mubr.msk.f32.gmra.mxu1 %vm3808_vm5, %v9872_v38 }
 0xfaa   : > { %v9874_v55 = vpop.f32.mrf.mxu0 }
 0xfb0   : > { %v10126_v18 = vpop.f32.mrf.mxu0 }
 0xfb1   : > { %15245 = vmatprep.mubr.msk.f32.mxu1 %vm3808_vm5, %v10126_v18 }
 0xfb2   : > { %v10128_v15 = vpop.f32.mrf.mxu0 }
 0xfb4   : > { %v10131_v58 = vpop.f32.mrf.mxu0 }
 0xfb5   : > { %15246 = vmatmul.mubr.msk.f32.vlgmr.msra.gmra.mxu1 %vm3808_vm5, %v10131_v58 }
 0xfb6   : > { %10350 = vmatpush1.msra.mxu1 %v18532_v23  ;;  %v10133_v53 = vpop.f32.mrf.mxu0 }
 0xfb7   : > { %10351 = vmatprep.subr.mxu1 %v22473_v43 }
 0xfb8   : > { %10352 = vmatpush1.msra.mxu1 %v18539_v62  ;;  %v10136_v0 = vpop.f32.mrf.mxu0 }
 0xfb9   : > { %10353 = vmatprep.subr.mxu1 %v22473_v43  ;;  %15248 = vmatprep.mubr.msk.f32.mxu1 %vm3808_vm5, %v10136_v0 }
 0xfba   : > { %10354 = vmatpush1.msra.mxu1 %v18546_v33  ;;  %v10138_v5 = vpop.f32.mrf.mxu0 }
 0xfbb   : > { %10355 = vmatprep.subr.mxu1 %v22473_v43 }
 0xfbc   : > { %10356 = vmatpush1.msra.mxu1 %v18553_v37  ;;  %v10141_v6 = vpop.f32.mrf.mxu0 }
 0xfbd   : > { %10357 = vmatprep.subr.mxu1 %v22473_v43  ;;  %15249 = vmatmul.mubr.msk.f32.gmra.mxu1 %vm3808_vm5, %v10141_v6 }
 0xfbe   : > { %10358 = vmatpush1.msra.mxu1 %v18557_v47  ;;  %v10143_v61 = vpop.f32.mrf.mxu0 }
 0xfbf   : > { %10359 = vmatprep.subr.mxu1 %v22473_v43 }
 0xfc0   : > { %10360 = vmatpush1.msra.mxu1 %v18561_v14  ;;  %v10146_v32 = vpop.f32.mrf.mxu0 }
 0xfc1   : > { %10361 = vmatprep.subr.mxu1 %v22473_v43  ;;  %15251 = vmatprep.mubr.msk.f32.mxu1 %vm3808_vm5, %v10146_v32 }
 0xfc2   : > { %10362 = vmatpush1.msra.mxu1 %v18565_v51  ;;  %v10148_v29 = vpop.f32.mrf.mxu0 }
 0xfc3   : > { %10363 = vmatprep.subr.mxu1 %v22473_v43 }
 0xfc4   : > { %10364 = vmatpush1.msra.mxu1 %v18569_v24  ;;  %v10151_v48 = vpop.f32.mrf.mxu0 }
 0xfc5   : > { %10365 = vmatprep.subr.mxu1 %v22473_v43  ;;  %15252 = vmatmul.mubr.msk.f32.gmra.mxu1 %vm3808_vm5, %v10151_v48 }
 0xfc6   : > { %10366 = vmatpush1.msra.mxu1 %v18574_v57  ;;  %v10153_v21 = vpop.f32.mrf.mxu0 }
 0xfc7   : > { %10367 = vmatprep.subr.mxu1 %v22473_v43 }
 0xfc8   : > { %10368 = vmatpush1.msra.mxu1 %v18579_v27  ;;  %v10156_v7 = vpop.f32.mrf.mxu0 }
 0xfc9   : > { %10369 = vmatprep.subr.mxu1 %v22473_v43  ;;  %15254 = vmatprep.mubr.msk.f32.mxu1 %vm3808_vm5, %v10156_v7 }
 0xfca   : > { %10370 = vmatpush1.msra.mxu1 %v18584_v22  ;;  %v10158_v30 = vpop.f32.mrf.mxu0 }
 0xfcb   : > { %10371 = vmatprep.subr.mxu1 %v22473_v43 }
 0xfcc   : > { %10372 = vmatpush1.msra.mxu1 %v18589_v42  ;;  %v10161_v39 = vpop.f32.mrf.mxu0 }
 0xfcd   : > { %10373 = vmatprep.subr.mxu1 %v22473_v43  ;;  %15255 = vmatmul.mubr.msk.f32.gmra.mxu1 %vm3808_vm5, %v10161_v39 }
 0xfce   : > { %10374 = vmatpush1.msra.mxu1 %v18594_v50  ;;  %13909 = vmatprep.mubr.msk.f32.mxu1 %vm3676_vm3, %v13894_v1  ;;  %v10163_v28 = vpop.f32.mrf.mxu0 }
 0xfcf   : > { %10375 = vmatprep.subr.mxu1 %v22473_v43 }
 0xfd0   : > { %10376 = vmatpush1.msra.mxu1 %v18599_v10 }
 0xfd1   : > { %10377 = vmatprep.subr.mxu1 %v22473_v43 }
 0xfd2   : > { %10378 = vmatpush1.msra.mxu1 %v18604_v2 }
 0xfd3   : > { %10379 = vmatprep.subr.mxu1 %v22473_v43 }
 0xfd4   : > { %10380 = vmatpush1.msra.mxu1 %v18609_v63 }
 0xfd5   : > { %10409 = vmatprep.subr.mxu1 %v22473_v43 }
 0xfd6   : > { %10410 = vmatpush2.msra.mxu1 %v22539_v52 }
 0xfd7   : > { %10411 = vmatprep.subr.mxu1 %v22473_v43 }
 0xfd8   : > { %10412 = vmatpush2.msra.mxu1 %v22540_v46 }
 0xfd9   : > { %10414 = vmatmul.mubr.f32.vlgmr.msra.gmra.mxu1 %v13893_v54  ;;  %10638 = vmatprep.subr.mxu1 %v22473_v43 }
 0xfda   : > { %10639 = vmatpush1.msra.mxu1 %v18532_v23  ;;  %13910 = vmatprep.mubr.msk.f32.mxu1 %vm3676_vm3, %v13896_v4  ;;  %v13897_v23 = vld [vmem:[%s22112_s2 + $0xba0] sm:$0xff] }
 0xfdb   : > { %10640 = vmatprep.subr.mxu1 %v22473_v43 }
 0xfdc   : > { %10641 = vmatpush1.msra.mxu1 %v18539_v62  ;;  %v13899_v62 = vld [vmem:[%s22112_s2 + $0xbb0] sm:$0xff] }
 0xfdd   : > { %10419 = vmatmul.mubr.f32.gmra.mxu1 %v13895_v49  ;;  %10642 = vmatprep.subr.mxu1 %v22473_v43 }
 0xfde   : > { %10643 = vmatpush1.msra.mxu1 %v18546_v33  ;;  %13911 = vmatprep.mubr.msk.f32.mxu1 %vm3676_vm3, %v13898_v12  ;;  %v13902_v33 = vld [vmem:[%s22112_s2 + $0xbc8] sm:$0xff] }
 0xfdf   : > { %10644 = vmatprep.subr.mxu1 %v22473_v43 }
 0xfe0   : > { %10645 = vmatpush1.msra.mxu1 %v18553_v37  ;;  %v13901_v37 = vld [vmem:[%s22112_s2 + $0xbc0] sm:$0xff] }
 0xfe1   : > { %10424 = vmatmul.mubr.f32.gmra.mxu1 %v13897_v23  ;;  %10646 = vmatprep.subr.mxu1 %v22473_v43 }
 0xfe2   : > { %10647 = vmatpush1.msra.mxu1 %v18557_v47  ;;  %13912 = vmatprep.mubr.msk.f32.mxu1 %vm3676_vm3, %v13900_v35  ;;  %v13904_v47 = vld [vmem:[%s22112_s2 + $0xbd8] sm:$0xff] }
 0xfe3   : > { %10648 = vmatprep.subr.mxu1 %v22473_v43 }
 0xfe4   : > { %10649 = vmatpush1.msra.mxu1 %v18561_v14  ;;  %v13903_v14 = vld [vmem:[%s22112_s2 + $0xbd0] sm:$0xff] }
 0xfe5   : > { %10429 = vmatmul.mubr.f32.gmra.mxu1 %v13899_v62  ;;  %10650 = vmatprep.subr.mxu1 %v22473_v43  ;;  %v13952_v62 = vld [vmem:[%s22116_s6 + $0x180] sm:$0xff] }
 0xfe6   : > { %10651 = vmatpush1.msra.mxu1 %v18565_v51  ;;  %13913 = vmatprep.mubr.msk.f32.mxu1 %vm3676_vm3, %v13902_v33  ;;  %v13906_v51 = vld [vmem:[%s22112_s2 + $0xbe8] sm:$0xff] }
 0xfe7   : > { %10652 = vmatprep.subr.mxu1 %v22473_v43 }
 0xfe8   : > { %10653 = vmatpush1.msra.mxu1 %v18569_v24  ;;  %v13905_v24 = vld [vmem:[%s22112_s2 + $0xbe0] sm:$0xff] }
 0xfe9   : > { %10434 = vmatmul.mubr.f32.gmra.mxu1 %v13901_v37  ;;  %10654 = vmatprep.subr.mxu1 %v22473_v43 }
 0xfea   : > { %10655 = vmatpush1.msra.mxu1 %v18574_v57  ;;  %13914 = vmatprep.mubr.msk.f32.mxu1 %vm3676_vm3, %v13904_v47  ;;  %v13908_v57 = vld [vmem:[%s22112_s2 + $0xbf8] sm:$0xff] }
 0xfeb   : > { %10656 = vmatprep.subr.mxu1 %v22473_v43 }
 0xfec   : > { %10657 = vmatpush1.msra.mxu1 %v18579_v27  ;;  %v13907_v27 = vld [vmem:[%s22112_s2 + $0xbf0] sm:$0xff] }
 0xfed   : > { %10439 = vmatmul.mubr.f32.gmra.mxu1 %v13903_v14  ;;  %10658 = vmatprep.subr.mxu1 %v22473_v43 }
 0xfee   : > { %10659 = vmatpush1.msra.mxu1 %v18584_v22  ;;  %13915 = vmatprep.mubr.msk.f32.mxu1 %vm3676_vm3, %v13906_v51  ;;  %v13929_v22 = vld [vmem:[%s22112_s2 + $0xc08] sm:$0xff] }
 0xfef   : > { %10660 = vmatprep.subr.mxu1 %v22473_v43 }
 0xff0   : > { %10661 = vmatpush1.msra.mxu1 %v18589_v42  ;;  %v13928_v42 = vld [vmem:[%s22112_s2 + $0xc00] sm:$0xff] }
 0xff1   : > { %10444 = vmatmul.mubr.f32.gmra.mxu1 %v13905_v24  ;;  %10662 = vmatprep.subr.mxu1 %v22473_v43 }
 0xff2   : > { %10663 = vmatpush1.msra.mxu1 %v18594_v50  ;;  %13916 = vmatprep.mubr.msk.f32.mxu1 %vm3676_vm3, %v13908_v57  ;;  %v13931_v50 = vld [vmem:[%s22112_s2 + $0xc18] sm:$0xff] }
 0xff3   : > { %10664 = vmatprep.subr.mxu1 %v22473_v43 }
 0xff4   : > { %10665 = vmatpush1.msra.mxu1 %v18599_v10  ;;  %v13930_v10 = vld [vmem:[%s22112_s2 + $0xc10] sm:$0xff] }
 0xff5   : > { %10449 = vmatmul.mubr.f32.gmra.mxu1 %v13907_v27  ;;  %10666 = vmatprep.subr.mxu1 %v22473_v43 }
 0xff6   : > { %10667 = vmatpush1.msra.mxu1 %v18604_v2  ;;  %13944 = vmatprep.mubr.msk.f32.mxu1 %vm3676_vm3, %v13929_v22  ;;  %v13933_v2 = vld [vmem:[%s22112_s2 + $0xc28] sm:$0xff] }
 0xff7   : > { %10668 = vmatprep.subr.mxu1 %v22473_v43 }
 0xff8   : > { %10669 = vmatpush1.msra.mxu1 %v18609_v63  ;;  %v13932_v63 = vld [vmem:[%s22112_s2 + $0xc20] sm:$0xff] }
 0xff9   : > { %10698 = vmatprep.subr.mxu1 %v22473_v43 }
 0xffa   : > { %10699 = vmatpush2.msra.mxu1 %v22539_v52  ;;  %v13935_v52 = vld [vmem:[%s22112_s2 + $0xc38] sm:$0xff] }
 0xffb   : > { %10700 = vmatprep.subr.mxu1 %v22473_v43 }
 0xffc   : > { %10701 = vmatpush2.msra.mxu1 %v22540_v46  ;;  %v13934_v46 = vld [vmem:[%s22112_s2 + $0xc30] sm:$0xff] }
 0xffd   : > { %10703 = vmatmul.mubr.f32.vlgmr.msra.gmra.mxu1 %v13928_v42 }
 0xffe   : > { %13945 = vmatprep.mubr.msk.f32.mxu1 %vm3676_vm3, %v13931_v50 }
0x1001   : > { %10708 = vmatmul.mubr.f32.gmra.mxu1 %v13930_v10 }
0x1002   : > { %13946 = vmatprep.mubr.msk.f32.mxu1 %vm3676_vm3, %v13933_v2 }
0x1005   : > { %10713 = vmatmul.mubr.f32.gmra.mxu1 %v13932_v63 }
0x1006   : > { %13947 = vmatprep.mubr.msk.f32.mxu1 %vm3676_vm3, %v13935_v52 }
0x1009   : > { %10718 = vmatmul.mubr.f32.gmra.mxu1 %v13934_v46 }
0x100a   : > { %13948 = vmatprep.mubr.msk.f32.mxu1 %vm3676_vm3, %v13937_v11 }
0x100d   : > { %10723 = vmatmul.mubr.f32.gmra.mxu1 %v13936_v60 }
0x100e   : > { %13949 = vmatprep.mubr.msk.f32.mxu1 %vm3676_vm3, %v13939_v41 }
0x1011   : > { %10728 = vmatmul.mubr.f32.gmra.mxu1 %v13938_v36 }
0x1012   : > { %13950 = vmatprep.mubr.msk.f32.mxu1 %vm3676_vm3, %v13941_v59 }
0x1015   : > { %10733 = vmatmul.mubr.f32.gmra.mxu1 %v13940_v44 }
0x1016   : > { %13951 = vmatprep.mubr.msk.f32.mxu1 %vm3676_vm3, %v13943_v8 }
0x1019   : > { %10738 = vmatmul.mubr.f32.gmra.mxu1 %v13942_v40 }
0x1051   : > { %v15231_v25 = vpop.f32.mrf.mxu1 }
0x1052   : > { %v10012_v34 = vadd.f32 %v15231_v25, %v21389_v20 }
0x1053   : > { %v9972_v38 = vpop.f32.mrf.mxu1 }
0x1054   : > { %v10011_v55 = vadd.f32 %v9972_v38, %v21391_v3  ;;  %v10886_v38 = vld [vmem:[%s22113_s3] sm:$0xff] }
0x1059   : > { %v15234_v18 = vpop.f32.mrf.mxu1 }
0x105a   : > { %v10014_v15 = vadd.f32 %v15234_v18, %v21393_v16 }
0x105b   : > { %v9982_v58 = vpop.f32.mrf.mxu1 }
0x105c   : > { %v10013_v53 = vadd.f32 %v9982_v58, %v21395_v26 }
0x1061   : > { %v15237_v0 = vpop.f32.mrf.mxu1 }
0x1062   : > { %v10016_v5 = vadd.f32 %v15237_v0, %v21397_v9 }
0x1063   : > { %v9992_v6 = vpop.f32.mrf.mxu1 }
0x1064   : > { %v10015_v61 = vadd.f32 %v9992_v6, %v21399_v45 }
0x1069   : > { %v15240_v32 = vpop.f32.mrf.mxu1 }
0x106a   : > { %v10018_v29 = vadd.f32 %v15240_v32, %v21401_v31 }
0x106b   : > { %v10002_v48 = vpop.f32.mrf.mxu1 }
0x106c   : > { %v10017_v20 = vadd.f32 %v10002_v48, %v21403_v19 }
0x1075   : > { %v15247_v21 = vpop.f32.mrf.mxu1 }
0x1076   : > { %v21629_v3 = vadd.f32 %v15247_v21, %v10012_v34 }
0x1077   : > { %v10261_v7 = vpop.f32.mrf.mxu1 }
0x1078   : > { %v21631_v16 = vadd.f32 %v10261_v7, %v10011_v55  ;;  %v13969_v55 = vld [vmem:[%s22113_s3 + $0x20] sm:$0xff] }
0x1079   : > { %15343 = vmatprep.mubr.msk.f32.mxu1 %vm1230_vm2, %v13969_v55 }
0x107d   : > { %v15250_v30 = vpop.f32.mrf.mxu1 }
0x107e   : > { %v21633_v26 = vadd.f32 %v15250_v30, %v10014_v15 }
0x107f   : > { %v10271_v1 = vpop.f32.mrf.mxu1 }
0x1080   : > { %v21635_v9 = vadd.f32 %v10271_v1, %v10013_v53 }
0x1085   : > { %v15253_v39 = vpop.f32.mrf.mxu1 }
0x1086   : > { %v21637_v45 = vadd.f32 %v15253_v39, %v10016_v5 }
0x1087   : > { %v10281_v28 = vpop.f32.mrf.mxu1 }
0x1088   : > { %v21639_v31 = vadd.f32 %v10281_v28, %v10015_v61 }
0x108d   : > { %v15256_v54 = vpop.f32.mrf.mxu1 }
0x108e   : > { %v21641_v19 = vadd.f32 %v15256_v54, %v10018_v29 }
0x108f   : > { %v10291_v4 = vpop.f32.mrf.mxu1 }
0x1090   : > { %v21643_v49 = vadd.f32 %v10291_v4, %v10017_v20 }
0x1099   : > { %v10415_v12 = vpop.f32.mrf.mxu1 }
0x109a   : > { %15261 = vmatprep.mubr.msk.f32.mxu0 %vm3808_vm5, %v10415_v12 }
0x109b   : > { %v10417_v23 = vpop.f32.mrf.mxu1 }
0x109d   : > { %v10420_v35 = vpop.f32.mrf.mxu1 }
0x109e   : > { %15262 = vmatmul.mubr.msk.f32.vlgmr.msra.gmra.mxu0 %vm3808_vm5, %v10420_v35 }
0x109f   : > { %v10422_v33 = vpop.f32.mrf.mxu1  ;;  %15274 = vmatpush3.msk.msra.mxu0 %vm3833_vm4, %v13953_v56 }
0x10a0   : > { %15275 = vmatprep.subr.mxu0 %v13952_v62 }
0x10a1   : > { %v10425_v37 = vpop.f32.mrf.mxu1  ;;  %15276 = vmatpush3.msra.mxu0 %v13952_v62 }
0x10a2   : > { %15264 = vmatprep.mubr.msk.f32.mxu0 %vm3808_vm5, %v10425_v37 }
0x10a3   : > { %v10427_v47 = vpop.f32.mrf.mxu1 }
0x10a4   : > { %v13970_v47 = vld [vmem:[%s22113_s3 + $0x28] sm:$0xff] }
0x10a5   : > { %v10430_v14 = vpop.f32.mrf.mxu1 }
0x10a6   : > { %15265 = vmatmul.mubr.msk.f32.gmra.mxu0 %vm3808_vm5, %v10430_v14  ;;  %v13966_v14 = vld [vmem:[%s22113_s3 + $0x18] sm:$0xff] }
0x10a7   : > { %v10432_v51 = vpop.f32.mrf.mxu1 }
0x10a8   : > { %v13973_v51 = vld [vmem:[%s22113_s3 + $0x30] sm:$0xff] }
0x10a9   : > { %v10435_v24 = vpop.f32.mrf.mxu1 }
0x10aa   : > { %15267 = vmatprep.mubr.msk.f32.mxu0 %vm3808_vm5, %v10435_v24  ;;  %v13974_v24 = vld [vmem:[%s22113_s3 + $0x38] sm:$0xff] }
0x10ab   : > { %v10437_v57 = vpop.f32.mrf.mxu1 }
0x10ac   : > { %v11233_v57 = vld [vmem:[%s22118_s8 + $0x10] sm:$0xf] }
0x10ad   : > { %v10440_v27 = vpop.f32.mrf.mxu1 }
0x10ae   : > { %15268 = vmatmul.mubr.msk.f32.gmra.mxu0 %vm3808_vm5, %v10440_v27  ;;  %v11232_v27 = vld [vmem:[%s22118_s8 + $0x8] sm:$0xff] }
0x10af   : > { %v10442_v22 = vpop.f32.mrf.mxu1 }
0x10b0   : > { %v13986_v22 = vld [vmem:[%s22118_s8 + $0x40] sm:$0xf] }
0x10b1   : > { %v10445_v42 = vpop.f32.mrf.mxu1 }
0x10b2   : > { %15270 = vmatprep.mubr.msk.f32.mxu0 %vm3808_vm5, %v10445_v42  ;;  %v11231_v42 = vld [vmem:[%s22118_s8] sm:$0xff] }
0x10b3   : > { %v10447_v50 = vpop.f32.mrf.mxu1 }
0x10b4   : > { %v13985_v50 = vld [vmem:[%s22118_s8 + $0x38] sm:$0xff] }
0x10b5   : > { %v10450_v10 = vpop.f32.mrf.mxu1 }
0x10b6   : > { %15271 = vmatmul.mubr.msk.f32.gmra.mxu0 %vm3808_vm5, %v10450_v10  ;;  %v13984_v10 = vld [vmem:[%s22118_s8 + $0x30] sm:$0xff] }
0x10b7   : > { %v10452_v2 = vpop.f32.mrf.mxu1 }
0x10bd   : > { %v10704_v63 = vpop.f32.mrf.mxu1 }
0x10be   : > { %15277 = vmatprep.mubr.msk.f32.mxu0 %vm3808_vm5, %v10704_v63 }
0x10bf   : > { %v10706_v52 = vpop.f32.mrf.mxu1 }
0x10c1   : > { %v10709_v46 = vpop.f32.mrf.mxu1 }
0x10c2   : > { %15278 = vmatmul.mubr.msk.f32.vlgmr.msra.gmra.mxu0 %vm3808_vm5, %v10709_v46 }
0x10c3   : > { %v10711_v11 = vpop.f32.mrf.mxu1 }
0x10c5   : > { %v10714_v60 = vpop.f32.mrf.mxu1 }
0x10c6   : > { %15280 = vmatprep.mubr.msk.f32.mxu0 %vm3808_vm5, %v10714_v60 }
0x10c7   : > { %v10716_v41 = vpop.f32.mrf.mxu1 }
0x10c9   : > { %v10719_v36 = vpop.f32.mrf.mxu1 }
0x10ca   : > { %15281 = vmatmul.mubr.msk.f32.gmra.mxu0 %vm3808_vm5, %v10719_v36 }
0x10cb   : > { %v10721_v59 = vpop.f32.mrf.mxu1 }
0x10cd   : > { %v10724_v44 = vpop.f32.mrf.mxu1 }
0x10ce   : > { %15283 = vmatprep.mubr.msk.f32.mxu0 %vm3808_vm5, %v10724_v44 }
0x10cf   : > { %v10726_v8 = vpop.f32.mrf.mxu1 }
0x10d1   : > { %v10729_v40 = vpop.f32.mrf.mxu1 }
0x10d2   : > { %15284 = vmatmul.mubr.msk.f32.gmra.mxu0 %vm3808_vm5, %v10729_v40 }
0x10d3   : > { %v10731_v13 = vpop.f32.mrf.mxu1 }
0x10d4   : > { %v13981_v13 = vld [vmem:[%s22118_s8 + $0x28] sm:$0xf] }
0x10d5   : > { %v10734_v17 = vpop.f32.mrf.mxu1 }
0x10d6   : > { %15286 = vmatprep.mubr.msk.f32.mxu0 %vm3808_vm5, %v10734_v17  ;;  %v13980_v17 = vld [vmem:[%s22118_s8 + $0x20] sm:$0xff] }
0x10d7   : > { %v10736_v56 = vpop.f32.mrf.mxu1 }
0x10d9   : > { %v10739_v25 = vpop.f32.mrf.mxu1 }
0x10da   : > { %15287 = vmatmul.mubr.msk.f32.gmra.mxu0 %vm3808_vm5, %v10739_v25  ;;  %v13996_v25 = vld [vmem:[%s22118_s8 + $0x70] sm:$0xf] }
0x10db   : > { %v10741_v34 = vpop.f32.mrf.mxu1  ;;  %15305 = vmatprep.mubr.msk.f32.mxu0 %vm1230_vm2, %v10886_v38  ;;  %v13995_v38 = vld [vmem:[%s22118_s8 + $0x68] sm:$0xff] }
0x10dc   : > { %v13979_v34 = vld [vmem:[%s22118_s8 + $0x18] sm:$0xff] }
0x115e   : > { %v15263_v18 = vpop.f32.mrf.mxu0 }
0x1160   : > { %v10550_v15 = vpop.f32.mrf.mxu0 }
0x1161   : > { %v10589_v33 = vadd.f32 %v10550_v15, %v21631_v16  ;;  %v13965_v16 = vld [vmem:[%s22113_s3 + $0x10] sm:$0xff] }
0x1162   : > { %v13990_v15 = vld [vmem:[%s22118_s8 + $0x50] sm:$0xff] }
0x1166   : > { %v15266_v58 = vpop.f32.mrf.mxu0 }
0x1168   : > { %v10560_v53 = vpop.f32.mrf.mxu0 }
0x116e   : > { %v15269_v0 = vpop.f32.mrf.mxu0 }
0x116f   : > { %v10594_v4 = vadd.f32 %v15269_v0, %v21637_v45  ;;  %v10592_v45 = vadd.f32 %v15266_v58, %v21633_v26  ;;  %v10590_v26 = vadd.f32 %v15263_v18, %v21629_v3  ;;  %v10887_v3 = vld [vmem:[%s22113_s3 + $0x8] sm:$0xff]  ;;  %v13991_v18 = vld [vmem:[%s22118_s8 + $0x58] sm:$0xf]  ;;  %v13994_v58 = vld [vmem:[%s22118_s8 + $0x60] sm:$0xff] }
0x1170   : > { %v10570_v5 = vpop.f32.mrf.mxu0 }
0x1176   : > { %v15272_v6 = vpop.f32.mrf.mxu0 }
0x1177   : > { %v10596_v30 = vadd.f32 %v15272_v6, %v21641_v19  ;;  %v10593_v19 = vadd.f32 %v10570_v5, %v21639_v31  ;;  %v10591_v31 = vadd.f32 %v10560_v53, %v21635_v9  ;;  %v13989_v53 = vld [vmem:[%s22118_s8 + $0x48] sm:$0xff] }
0x1178   : > { %v10580_v61 = vpop.f32.mrf.mxu0  ;;  %v14001_v5 = vld [vmem:[%s22118_s8 + $0x88] sm:$0xf] }
0x1179   : > { %v10595_v39 = vadd.f32 %v10580_v61, %v21643_v49  ;;  %v14006_v61 = vld [vmem:[%s22118_s8 + $0xa0] sm:$0xf] }
0x1182   : > { %v15279_v32 = vpop.f32.mrf.mxu0 }
0x1183   : > { %v10879_v37 = vadd.f32 %v15279_v32, %v10590_v26  ;;  %v14000_v32 = vld [vmem:[%s22118_s8 + $0x80] sm:$0xff] }
0x1184   : > { %v10839_v29 = vpop.f32.mrf.mxu0  ;;  %v14020_v26 = vld [vmem:[%s22118_s8 + $0xe0] sm:$0xff] }
0x1185   : > { %v10878_v9 = vadd.f32 %v10839_v29, %v10589_v33  ;;  %v14005_v29 = vld [vmem:[%s22118_s8 + $0x98] sm:$0xff] }
0x1186   : > { %v14019_v33 = vld [vmem:[%s22118_s8 + $0xd8] sm:$0xff] }
0x118a   : > { %v15282_v48 = vpop.f32.mrf.mxu0 }
0x118b   : > { %v10881_v35 = vadd.f32 %v15282_v48, %v10592_v45  ;;  %v13999_v48 = vld [vmem:[%s22118_s8 + $0x78] sm:$0xff] }
0x118c   : > { %v10849_v20 = vpop.f32.mrf.mxu0 }
0x118d   : > { %v10880_v62 = vadd.f32 %v10849_v20, %v10591_v31  ;;  %v14004_v20 = vld [vmem:[%s22118_s8 + $0x90] sm:$0xff] }
0x1192   : > { %v15285_v21 = vpop.f32.mrf.mxu0 }
0x1193   : > { %v21685_v23 = vadd.f32 %v15285_v21, %v10594_v4  ;;  %v14015_v4 = vld [vmem:[%s22118_s8 + $0xc8] sm:$0xff] }
0x1194   : > { %v10859_v7 = vpop.f32.mrf.mxu0 }
0x1195   : > { %v21692_v49 = vadd.f32 %v10859_v7, %v10593_v19  ;;  %v14011_v7 = vld [vmem:[%s22118_s8 + $0xb8] sm:$0xf] }
0x119a   : > { %v15288_v1 = vpop.f32.mrf.mxu0 }
0x119b   : > { %v21675_v28 = vadd.f32 %v15288_v1, %v10596_v30 }
0x119c   : > { %v10869_v54 = vpop.f32.mrf.mxu0 }
0x119d   : > { %v21678_v12 = vadd.f32 %v10869_v54, %v10595_v39  ;;  %15289 = vmatprep.subr.mxu0 %v21675_v28  ;;  %15327 = vmatprep.subr.mxu1 %v21675_v28  ;;  %v14016_v39 = vld [vmem:[%s22118_s8 + $0xd0] sm:$0xf] }
0x119e   : > { %15290 = vmatpush3.msra.mxu0 %v21675_v28  ;;  %15328 = vmatpush3.msra.mxu1 %v21675_v28 }
0x119f   : > { %15291 = vmatprep.subr.mxu0 %v21678_v12  ;;  %15329 = vmatprep.subr.mxu1 %v21678_v12 }
0x11a0   : > { %15292 = vmatpush3.msra.mxu0 %v21678_v12  ;;  %15330 = vmatpush3.msra.mxu1 %v21678_v12 }
0x11a1   : > { %15293 = vmatprep.subr.mxu0 %v21685_v23  ;;  %15331 = vmatprep.subr.mxu1 %v21685_v23 }
0x11a2   : > { %15294 = vmatpush3.msra.mxu0 %v21685_v23  ;;  %15332 = vmatpush3.msra.mxu1 %v21685_v23 }
0x11a3   : > { %15295 = vmatprep.subr.mxu0 %v21692_v49  ;;  %15333 = vmatprep.subr.mxu1 %v21692_v49 }
0x11a4   : > { %15296 = vmatpush3.msra.mxu0 %v21692_v49  ;;  %15334 = vmatpush3.msra.mxu1 %v21692_v49 }
0x11a5   : > { %15297 = vmatprep.subr.mxu0 %v10881_v35  ;;  %15335 = vmatprep.subr.mxu1 %v10881_v35 }
0x11a6   : > { %15298 = vmatpush3.msra.mxu0 %v10881_v35  ;;  %15336 = vmatpush3.msra.mxu1 %v10881_v35 }
0x11a7   : > { %15299 = vmatprep.subr.mxu0 %v10880_v62  ;;  %15337 = vmatprep.subr.mxu1 %v10880_v62 }
0x11a8   : > { %15300 = vmatpush3.msra.mxu0 %v10880_v62  ;;  %15338 = vmatpush3.msra.mxu1 %v10880_v62 }
0x11a9   : > { %15301 = vmatprep.subr.mxu0 %v10879_v37  ;;  %15339 = vmatprep.subr.mxu1 %v10879_v37 }
0x11aa   : > { %15302 = vmatpush3.msra.mxu0 %v10879_v37  ;;  %15340 = vmatpush3.msra.mxu1 %v10879_v37 }
0x11ab   : > { %15303 = vmatprep.subr.mxu0 %v10878_v9  ;;  %15341 = vmatprep.subr.mxu1 %v10878_v9 }
0x11ac   : > { %15304 = vmatpush3.msra.mxu0 %v10878_v9  ;;  %15342 = vmatpush3.msra.mxu1 %v10878_v9 }
0x11ad   : > { %15308 = vmatprep.subr.mxu0 %v21675_v28  ;;  %15306 = vmatmul.mubr.msk.f32.vlgmr.msra.gmra.mxu0 %vm1230_vm2, %v10887_v3  ;;  %v14031_v3 = vld [vmem:[%s22118_s8 + $0x118] sm:$0xf] }
0x11ae   : > { %15309 = vmatpush3.msra.mxu0 %v21675_v28  ;;  %15324 = vmatprep.mubr.msk.f32.mxu0 %vm1230_vm2, %v13965_v16 }
0x11af   : > { %15310 = vmatprep.subr.mxu0 %v21678_v12  ;;  %15344 = vmatmul.mubr.msk.f32.vlgmr.msra.gmra.mxu1 %vm1230_vm2, %v13970_v47  ;;  %v14036_v47 = vld [vmem:[%s22118_s8 + $0x130] sm:$0xf] }
0x11b0   : > { %15311 = vmatpush3.msra.mxu0 %v21678_v12  ;;  %15383 = vmatprep.subr.mxu1 %v22473_v43 }
0x11b1   : > { %15312 = vmatprep.subr.mxu0 %v21685_v23  ;;  %15384 = vmatpush3.msk.msra.mxu1 %vm11238_vm6, %v13986_v22  ;;  %v14041_v22 = vld [vmem:[%s22118_s8 + $0x148] sm:$0xf] }
0x11b2   : > { %15313 = vmatpush3.msra.mxu0 %v21685_v23  ;;  %15385 = vmatprep.subr.mxu1 %v22473_v43 }
0x11b3   : > { %15314 = vmatprep.subr.mxu0 %v21692_v49  ;;  %15386 = vmatpush3.msra.mxu1 %v13985_v50  ;;  %v14046_v50 = vld [vmem:[%s22118_s8 + $0x160] sm:$0xf] }
0x11b4   : > { %15315 = vmatpush3.msra.mxu0 %v21692_v49  ;;  %15387 = vmatprep.subr.mxu1 %v22473_v43 }
0x11b5   : > { %15316 = vmatprep.subr.mxu0 %v10881_v35  ;;  %15389 = vmatprep.mubr.msk.f32.mxu1 %vm15632_vm7, %v22473_v43 }
0x11b6   : > { %15317 = vmatpush3.msra.mxu0 %v10881_v35  ;;  %15388 = vmatpush3.msra.mxu1 %v13984_v10  ;;  %v14040_v10 = vld [vmem:[%s22118_s8 + $0x140] sm:$0xff] }
0x11b7   : > { %15318 = vmatprep.subr.mxu0 %v10880_v62  ;;  %15401 = vmatprep.subr.mxu1 %v22473_v43 }
0x11b8   : > { %15319 = vmatpush3.msra.mxu0 %v10880_v62 }
0x11b9   : > { %15320 = vmatprep.subr.mxu0 %v10879_v37 }
0x11ba   : > { %15321 = vmatpush3.msra.mxu0 %v10879_v37 }
0x11bb   : > { %15322 = vmatprep.subr.mxu0 %v10878_v9 }
0x11bc   : > { %15323 = vmatpush3.msra.mxu0 %v10878_v9 }
0x11bd   : > { %15346 = vmatprep.subr.mxu0 %v21675_v28  ;;  %15325 = vmatmul.mubr.msk.f32.vlgmr.msra.gmra.mxu0 %vm1230_vm2, %v13966_v14  ;;  %v14030_v14 = vld [vmem:[%s22118_s8 + $0x110] sm:$0xff] }
0x11be   : > { %15347 = vmatpush3.msra.mxu0 %v21675_v28  ;;  %15362 = vmatprep.mubr.msk.f32.mxu0 %vm1230_vm2, %v13973_v51  ;;  %v14010_v28 = vld [vmem:[%s22118_s8 + $0xb0] sm:$0xff]  ;;  %v14035_v51 = vld [vmem:[%s22118_s8 + $0x128] sm:$0xff] }
0x11bf   : > { %15348 = vmatprep.subr.mxu0 %v21678_v12 }
0x11c0   : > { %15349 = vmatpush3.msra.mxu0 %v21678_v12  ;;  %v14009_v12 = vld [vmem:[%s22118_s8 + $0xa8] sm:$0xff] }
0x11c1   : > { %15350 = vmatprep.subr.mxu0 %v21685_v23 }
0x11c2   : > { %15351 = vmatpush3.msra.mxu0 %v21685_v23  ;;  %v14014_v23 = vld [vmem:[%s22118_s8 + $0xc0] sm:$0xff] }
0x11c3   : > { %15352 = vmatprep.subr.mxu0 %v21692_v49 }
0x11c4   : > { %15353 = vmatpush3.msra.mxu0 %v21692_v49  ;;  %v14021_v49 = vld [vmem:[%s22118_s8 + $0xe8] sm:$0xf] }
0x11c5   : > { %15354 = vmatprep.subr.mxu0 %v10881_v35 }
0x11c6   : > { %15355 = vmatpush3.msra.mxu0 %v10881_v35  ;;  %v14026_v35 = vld [vmem:[%s22118_s8 + $0x100] sm:$0xf] }
0x11c7   : > { %15356 = vmatprep.subr.mxu0 %v10880_v62 }
0x11c8   : > { %15357 = vmatpush3.msra.mxu0 %v10880_v62  ;;  %v14025_v62 = vld [vmem:[%s22118_s8 + $0xf8] sm:$0xff] }
0x11c9   : > { %15358 = vmatprep.subr.mxu0 %v10879_v37 }
0x11ca   : > { %15359 = vmatpush3.msra.mxu0 %v10879_v37  ;;  %v14024_v37 = vld [vmem:[%s22118_s8 + $0xf0] sm:$0xff] }
0x11cb   : > { %15360 = vmatprep.subr.mxu0 %v10878_v9 }
0x11cc   : > { %15361 = vmatpush3.msra.mxu0 %v10878_v9 }
0x11cd   : > { %15363 = vmatmul.mubr.msk.f32.vlgmr.msra.gmra.mxu0 %vm1230_vm2, %v13974_v24  ;;  %15365 = vmatprep.subr.mxu0 %v22473_v43  ;;  %v14029_v24 = vld [vmem:[%s22118_s8 + $0x108] sm:$0xff] }
0x11ce   : > { %15366 = vmatpush3.msk.msra.mxu0 %vm11238_vm6, %v11233_v57  ;;  %15371 = vmatprep.mubr.msk.f32.mxu0 %vm15632_vm7, %v22473_v43  ;;  %v14034_v57 = vld [vmem:[%s22118_s8 + $0x120] sm:$0xff] }
0x11cf   : > { %15367 = vmatprep.subr.mxu0 %v22473_v43 }
0x11d0   : > { %15368 = vmatpush3.msra.mxu0 %v11232_v27 }
0x11d1   : > { %15369 = vmatprep.subr.mxu0 %v22473_v43 }
0x11d2   : > { %15370 = vmatpush3.msra.mxu0 %v11231_v42 }
0x11d3   : > { %15374 = vmatprep.subr.mxu0 %v22473_v43 }
0x126d   : > { %v21777_v2 = vpop.f32.mrf.mxu0 }
0x126f   : > { %v10960_v63 = vpop.f32.mrf.mxu0  ;;  %v21781_v11 = vpop.f32.mrf.mxu1 }
0x1271   : > { %v11128_v41 = vpop.f32.mrf.mxu1 }
0x127d   : > { %v21779_v52 = vpop.f32.mrf.mxu0 }
0x127e   : > { %v11222_v54 = vmax.f32 %v21777_v2, %v21779_v52  ;;  %v14045_v2 = vld [vmem:[%s22118_s8 + $0x158] sm:$0xff]  ;;  %v14044_v52 = vld [vmem:[%s22118_s8 + $0x150] sm:$0xff] }
0x127f   : > { %v11044_v46 = vpop.f32.mrf.mxu0 }
0x1280   : > { %v11221_v59 = vmax.f32 %v10960_v63, %v11044_v46  ;;  %v14039_v63 = vld [vmem:[%s22118_s8 + $0x138] sm:$0xff] }
0x128d   : > { %v21783_v60 = vpop.f32.mrf.mxu0 }
0x128e   : > { %v11224_v30 = vmax.f32 %v21781_v11, %v21783_v60  ;;  %v14051_v60 = vld [vmem:[%s22118_s8 + $0x178] sm:$0xf] }
0x128f   : > { %v11212_v36 = vpop.f32.mrf.mxu0 }
0x1290   : > { %v11223_v44 = vmax.f32 %v11128_v41, %v11212_v36  ;;  %v11226_v19 = vmax.f32 %v11222_v54, %v11224_v30  ;;  %v14050_v41 = vld [vmem:[%s22118_s8 + $0x170] sm:$0xff]  ;;  %v14049_v36 = vld [vmem:[%s22118_s8 + $0x168] sm:$0xff] }
0x1292   : > { %v11225_v8 = vmax.f32 %v11221_v59, %v11223_v44  ;;  %v21910_v31 = vmax.f32 %v11226_v19, 0.0  ;;  %v12535_v44 = vld [vmem:[%s22120_s10 + $0x30] sm:$0x3] }
0x1294   : > { %v21785_v40 = vmax.f32 %v11225_v8, 0.0  ;;  %v11965_v9 = vrot.slane %v21910_v31, 1  ;;  %v12046_v16 = vrot.slane %v21910_v31, 2  ;;  %v12127_v27 = vrot.slane %v21910_v31, 3  ;;  %v12534_v8 = vld [vmem:[%s22120_s10 + $0x28] sm:$0xff] }
0x1295   : > { %v12208_v42 = vrot.slane %v21910_v31, 4  ;;  %v12289_v46 = vrot.slane %v21910_v31, 5  ;;  %v12370_v11 = vrot.slane %v21910_v31, 6  ;;  %v12451_v59 = vrot.slane %v21910_v31, 7 }
0x1296   : > { %15372 = vmatmul.mubr.msk.f32.vlgmr.msra.gmra.mxu0 %vm11234_vm8, %v21785_v40  ;;  %v11398_v56 = vrot.slane %v21785_v40, 2  ;;  %v11317_v55 = vrot.slane %v21785_v40, 1  ;;  %v11479_v0 = vrot.slane %v21785_v40, 3  ;;  %v11560_v6 = vrot.slane %v21785_v40, 4 }
0x1297   : > { %15375 = vmatpush3.msk.msra.mxu0 %vm11238_vm6, %v13981_v13  ;;  %15380 = vmatprep.mubr.msk.f32.mxu0 %vm15632_vm7, %v22473_v43  ;;  %v11641_v21 = vrot.slane %v21785_v40, 5  ;;  %v11722_v1 = vrot.slane %v21785_v40, 6  ;;  %v11803_v45 = vrot.slane %v21785_v40, 7  ;;  %v12533_v40 = vld [vmem:[%s22120_s10 + $0x20] sm:$0xff]  ;;  %v12532_v13 = vld [vmem:[%s22120_s10 + $0x18] sm:$0xff] }
0x1298   : > { %15376 = vmatprep.subr.mxu0 %v22473_v43  ;;  %15390 = vmatmul.mubr.msk.f32.vlgmr.msra.gmra.mxu1 %vm11234_vm8, %v11398_v56  ;;  %v12530_v56 = vld [vmem:[%s22120_s10 + $0x8] sm:$0xff] }
0x1299   : > { %15377 = vmatpush3.msra.mxu0 %v13980_v17  ;;  %15402 = vmatpush3.msk.msra.mxu1 %vm11238_vm6, %v13996_v25  ;;  %v12531_v17 = vld [vmem:[%s22120_s10 + $0x10] sm:$0xff]  ;;  %v12529_v25 = vld [vmem:[%s22120_s10] sm:$0xff] }
0x129a   : > { %15378 = vmatprep.subr.mxu0 %v22473_v43  ;;  %15403 = vmatprep.subr.mxu1 %v22473_v43 }
0x129b   : > { %15379 = vmatpush3.msra.mxu0 %v13979_v34  ;;  %15404 = vmatpush3.msra.mxu1 %v13995_v38 }
0x129c   : > { %15392 = vmatprep.subr.mxu0 %v22473_v43  ;;  %15381 = vmatmul.mubr.msk.f32.vlgmr.msra.gmra.mxu0 %vm11234_vm8, %v11317_v55 }
0x129d   : > { %15393 = vmatpush3.msk.msra.mxu0 %vm11238_vm6, %v13991_v18  ;;  %15405 = vmatprep.subr.mxu1 %v22473_v43 }
0x129e   : > { %15394 = vmatprep.subr.mxu0 %v22473_v43  ;;  %15398 = vmatprep.mubr.msk.f32.mxu0 %vm15632_vm7, %v22473_v43 }
0x129f   : > { %15395 = vmatpush3.msra.mxu0 %v13990_v15  ;;  %15406 = vmatpush3.msra.mxu1 %v13994_v58 }
0x12a0   : > { %15396 = vmatprep.subr.mxu0 %v22473_v43  ;;  %15407 = vmatprep.mubr.msk.f32.mxu1 %vm15632_vm7, %v22473_v43 }
0x12a1   : > { %15397 = vmatpush3.msra.mxu0 %v13989_v53  ;;  %15419 = vmatprep.subr.mxu1 %v22473_v43  ;;  %v11229_v53 = vld [vmem:[%s22119_s9] sm:$0x1] }
0x12a2   : > { %15410 = vmatprep.subr.mxu0 %v22473_v43  ;;  %15399 = vmatmul.mubr.msk.f32.vlgmr.msra.gmra.mxu0 %vm11234_vm8, %v11479_v0 }
0x12a3   : > { %15411 = vmatpush3.msk.msra.mxu0 %vm11238_vm6, %v14001_v5  ;;  %15408 = vmatmul.mubr.msk.f32.vlgmr.msra.gmra.mxu1 %vm11234_vm8, %v11560_v6 }
0x12a4   : > { %15412 = vmatprep.subr.mxu0 %v22473_v43  ;;  %15420 = vmatpush3.msk.msra.mxu1 %vm11238_vm6, %v14006_v61 }
0x12a5   : > { %15413 = vmatpush3.msra.mxu0 %v14000_v32  ;;  %15421 = vmatprep.subr.mxu1 %v22473_v43 }
0x12a6   : > { %15414 = vmatprep.subr.mxu0 %v22473_v43  ;;  %15422 = vmatpush3.msra.mxu1 %v14005_v29 }
0x12a7   : > { %15415 = vmatpush3.msra.mxu0 %v13999_v48  ;;  %15423 = vmatprep.subr.mxu1 %v22473_v43 }
0x12a8   : > { %15416 = vmatprep.mubr.msk.f32.mxu0 %vm15632_vm7, %v22473_v43  ;;  %15424 = vmatpush3.msra.mxu1 %v14004_v20 }
0x12a9   : > { %15428 = vmatprep.subr.mxu0 %v22473_v43  ;;  %15417 = vmatmul.mubr.msk.f32.vlgmr.msra.gmra.mxu0 %vm11234_vm8, %v11641_v21 }
0x12aa   : > { %15425 = vmatprep.mubr.msk.f32.mxu1 %vm15632_vm7, %v22473_v43  ;;  %15429 = vmatpush3.msk.msra.mxu0 %vm11238_vm6, %v14011_v7 }
0x12ab   : > { %15437 = vmatprep.subr.mxu1 %v22473_v43  ;;  %15426 = vmatmul.mubr.msk.f32.vlgmr.msra.gmra.mxu1 %vm11234_vm8, %v11722_v1 }
0x12ac   : > { %15430 = vmatprep.subr.mxu0 %v22473_v43  ;;  %15438 = vmatpush3.msk.msra.mxu1 %vm11238_vm6, %v14016_v39 }
0x12ad   : > { %15431 = vmatpush3.msra.mxu0 %v14010_v28  ;;  %15439 = vmatprep.subr.mxu1 %v22473_v43 }
0x12ae   : > { %15432 = vmatprep.subr.mxu0 %v22473_v43  ;;  %15440 = vmatpush3.msra.mxu1 %v14015_v4 }
0x12af   : > { %15433 = vmatpush3.msra.mxu0 %v14009_v12  ;;  %15441 = vmatprep.subr.mxu1 %v22473_v43 }
0x12b0   : > { %15434 = vmatprep.mubr.msk.f32.mxu0 %vm15632_vm7, %v22473_v43  ;;  %15442 = vmatpush3.msra.mxu1 %v14014_v23 }
0x12b1   : > { %15446 = vmatprep.subr.mxu0 %v22473_v43  ;;  %15435 = vmatmul.mubr.msk.f32.vlgmr.msra.gmra.mxu0 %vm11234_vm8, %v11803_v45 }
0x12b2   : > { %15443 = vmatprep.mubr.msk.f32.mxu1 %vm15632_vm7, %v22473_v43  ;;  %15447 = vmatpush3.msk.msra.mxu0 %vm11238_vm6, %v14021_v49 }
0x12b3   : > { %15455 = vmatprep.subr.mxu1 %v22473_v43  ;;  %15444 = vmatmul.mubr.msk.f32.vlgmr.msra.gmra.mxu1 %vm11234_vm8, %v21910_v31 }
0x12b4   : > { %15448 = vmatprep.subr.mxu0 %v22473_v43  ;;  %15456 = vmatpush3.msk.msra.mxu1 %vm11238_vm6, %v14026_v35 }
0x12b5   : > { %15449 = vmatpush3.msra.mxu0 %v14020_v26  ;;  %15457 = vmatprep.subr.mxu1 %v22473_v43 }
0x12b6   : > { %15450 = vmatprep.subr.mxu0 %v22473_v43  ;;  %15458 = vmatpush3.msra.mxu1 %v14025_v62 }
0x12b7   : > { %15451 = vmatpush3.msra.mxu0 %v14019_v33  ;;  %15459 = vmatprep.subr.mxu1 %v22473_v43 }
0x12b8   : > { %15452 = vmatprep.mubr.msk.f32.mxu0 %vm15632_vm7, %v22473_v43  ;;  %15460 = vmatpush3.msra.mxu1 %v14024_v37 }
0x12b9   : > { %15464 = vmatprep.subr.mxu0 %v22473_v43  ;;  %15453 = vmatmul.mubr.msk.f32.vlgmr.msra.gmra.mxu0 %vm11234_vm8, %v11965_v9 }
0x12ba   : > { %15461 = vmatprep.mubr.msk.f32.mxu1 %vm15632_vm7, %v22473_v43  ;;  %15465 = vmatpush3.msk.msra.mxu0 %vm11238_vm6, %v14031_v3 }
0x12bb   : > { %15473 = vmatprep.subr.mxu1 %v22473_v43  ;;  %15462 = vmatmul.mubr.msk.f32.vlgmr.msra.gmra.mxu1 %vm11234_vm8, %v12046_v16 }
0x12bc   : > { %15466 = vmatprep.subr.mxu0 %v22473_v43  ;;  %15474 = vmatpush3.msk.msra.mxu1 %vm11238_vm6, %v14036_v47 }
0x12bd   : > { %15467 = vmatpush3.msra.mxu0 %v14030_v14  ;;  %15475 = vmatprep.subr.mxu1 %v22473_v43 }
0x12be   : > { %15468 = vmatprep.subr.mxu0 %v22473_v43  ;;  %15476 = vmatpush3.msra.mxu1 %v14035_v51 }
0x12bf   : > { %15469 = vmatpush3.msra.mxu0 %v14029_v24  ;;  %15477 = vmatprep.subr.mxu1 %v22473_v43 }
0x12c0   : > { %15470 = vmatprep.mubr.msk.f32.mxu0 %vm15632_vm7, %v22473_v43  ;;  %15478 = vmatpush3.msra.mxu1 %v14034_v57 }
0x12c1   : > { %15482 = vmatprep.subr.mxu0 %v22473_v43  ;;  %15471 = vmatmul.mubr.msk.f32.vlgmr.msra.gmra.mxu0 %vm11234_vm8, %v12127_v27 }
0x12c2   : > { %15479 = vmatprep.mubr.msk.f32.mxu1 %vm15632_vm7, %v22473_v43  ;;  %15483 = vmatpush3.msk.msra.mxu0 %vm11238_vm6, %v14041_v22 }
0x12c3   : > { %15491 = vmatprep.subr.mxu1 %v22473_v43  ;;  %15480 = vmatmul.mubr.msk.f32.vlgmr.msra.gmra.mxu1 %vm11234_vm8, %v12208_v42 }
0x12c4   : > { %15484 = vmatprep.subr.mxu0 %v22473_v43  ;;  %15492 = vmatpush3.msk.msra.mxu1 %vm11238_vm6, %v14046_v50 }
0x12c5   : > { %15485 = vmatpush3.msra.mxu0 %v14040_v10  ;;  %15493 = vmatprep.subr.mxu1 %v22473_v43 }
0x12c6   : > { %15486 = vmatprep.subr.mxu0 %v22473_v43  ;;  %15494 = vmatpush3.msra.mxu1 %v14045_v2 }
0x12c7   : > { %15487 = vmatpush3.msra.mxu0 %v14039_v63  ;;  %15495 = vmatprep.subr.mxu1 %v22473_v43 }
0x12c8   : > { %15488 = vmatprep.mubr.msk.f32.mxu0 %vm15632_vm7, %v22473_v43  ;;  %15496 = vmatpush3.msra.mxu1 %v14044_v52  ;;  %v12536_v52 = vld [vmem:[%s22121_s11] sm:$0x1] }
0x12c9   : > { %15497 = vmatprep.mubr.msk.f32.mxu1 %vm15632_vm7, %v22473_v43  ;;  %15500 = vmatprep.subr.mxu0 %v22473_v43 }
0x12ca   : > { %15489 = vmatmul.mubr.msk.f32.vlgmr.msra.gmra.mxu0 %vm11234_vm8, %v12289_v46  ;;  %15498 = vmatmul.mubr.msk.f32.vlgmr.msra.gmra.mxu1 %vm11234_vm8, %v12370_v11 }
0x12cb   : > { %15501 = vmatpush3.msk.msra.mxu0 %vm11238_vm6, %v14051_v60  ;;  %15506 = vmatprep.mubr.msk.f32.mxu0 %vm15632_vm7, %v22473_v43 }
0x12cc   : > { %15502 = vmatprep.subr.mxu0 %v22473_v43  ;;  %15509 = vmatprep.subr.mxu1 %v22473_v43 }
0x12cd   : > { %15503 = vmatpush3.msra.mxu0 %v14050_v41  ;;  %15523 = vmatprep.mubr.msk.f32.mxu1 %vm15632_vm7, %v22473_v43 }
0x12ce   : > { %15504 = vmatprep.subr.mxu0 %v22473_v43  ;;  %15510 = vmatpush3.msk.msra.mxu1 %vm3833_vm4, %v12535_v44 }
0x12cf   : > { %15505 = vmatpush3.msra.mxu0 %v14049_v36  ;;  %15511 = vmatprep.subr.mxu1 %v22473_v43 }
0x12d0   : > { %15507 = vmatmul.mubr.msk.f32.vlgmr.msra.gmra.mxu0 %vm11234_vm8, %v12451_v59  ;;  %15512 = vmatpush3.msra.mxu1 %v12534_v8 }
0x12d1   : > { %15513 = vmatprep.subr.mxu1 %v22473_v43 }
0x12d2   : > { %15514 = vmatpush3.msra.mxu1 %v12533_v40 }
0x12d3   : > { %15515 = vmatprep.subr.mxu1 %v22473_v43 }
0x12d4   : > { %15516 = vmatpush3.msra.mxu1 %v12532_v13 }
0x12d5   : > { %15517 = vmatprep.subr.mxu1 %v22473_v43 }
0x12d6   : > { %15518 = vmatpush3.msra.mxu1 %v12531_v17 }
0x12d7   : > { %15519 = vmatprep.subr.mxu1 %v22473_v43 }
0x12d8   : > { %15520 = vmatpush3.msra.mxu1 %v12530_v56 }
0x12d9   : > { %15521 = vmatprep.subr.mxu1 %v22473_v43 }
0x12da   : > { %15522 = vmatpush3.msra.mxu1 %v12529_v25 }
0x1356   : > { %v11308_v34 = vpop.f32.mrf.mxu0 }
0x1357   : > { %v11312_v61 = vadd.f32 %v11308_v34, %v11229_v53 }
0x1358   : > { %v15373_v38 = vpop.f32.mrf.mxu0  ;;  %v11470_v55 = vpop.f32.mrf.mxu1 }
0x135a   : > { %v15391_v18 = vpop.f32.mrf.mxu1 }
0x135c   : > { %v11389_v15 = vpop.f32.mrf.mxu0 }
0x135d   : > { %v11393_v29 = vadd.f32 %v11389_v15, %v11312_v61 }
0x135e   : > { %v15382_v58 = vpop.f32.mrf.mxu0 }
0x135f   : > { %v11474_v20 = vadd.f32 %v11470_v55, %v11393_v29 }
0x1362   : > { %v11551_v0 = vpop.f32.mrf.mxu0 }
0x1363   : > { %v11632_v5 = vpop.f32.mrf.mxu1  ;;  %v11555_v7 = vadd.f32 %v11551_v0, %v11474_v20 }
0x1364   : > { %v15400_v6 = vpop.f32.mrf.mxu0 }
0x1365   : > { %v15409_v32 = vpop.f32.mrf.mxu1  ;;  %v11636_v1 = vadd.f32 %v11632_v5, %v11555_v7 }
0x1369   : > { %v11713_v48 = vpop.f32.mrf.mxu0 }
0x136a   : > { %v11717_v28 = vadd.f32 %v11713_v48, %v11636_v1 }
0x136b   : > { %v11794_v43 = vpop.f32.mrf.mxu1  ;;  %v15418_v21 = vpop.f32.mrf.mxu0 }
0x136c   : > { %v11798_v19 = vadd.f32 %v11794_v43, %v11717_v28 }
0x136d   : > { %v15427_v30 = vpop.f32.mrf.mxu1 }
0x1371   : > { %v11875_v39 = vpop.f32.mrf.mxu0 }
0x1372   : > { %v11879_v23 = vadd.f32 %v11875_v39, %v11798_v19 }
0x1373   : > { %v11956_v54 = vpop.f32.mrf.mxu1  ;;  %v15436_v4 = vpop.f32.mrf.mxu0 }
0x1374   : > { %v11960_v35 = vadd.f32 %v11956_v54, %v11879_v23 }
0x1375   : > { %v15445_v12 = vpop.f32.mrf.mxu1 }
0x1379   : > { %v12037_v45 = vpop.f32.mrf.mxu0 }
0x137a   : > { %v12041_v62 = vadd.f32 %v12037_v45, %v11960_v35 }
0x137b   : > { %v12118_v49 = vpop.f32.mrf.mxu1  ;;  %v15454_v31 = vpop.f32.mrf.mxu0 }
0x137c   : > { %v12122_v37 = vadd.f32 %v12118_v49, %v12041_v62 }
0x137d   : > { %v15463_v26 = vpop.f32.mrf.mxu1 }
0x1381   : > { %v12199_v33 = vpop.f32.mrf.mxu0 }
0x1382   : > { %v12203_v16 = vadd.f32 %v12199_v33, %v12122_v37 }
0x1383   : > { %v12280_v9 = vpop.f32.mrf.mxu1  ;;  %v15472_v3 = vpop.f32.mrf.mxu0 }
0x1384   : > { %v12284_v14 = vadd.f32 %v12280_v9, %v12203_v16 }
0x1385   : > { %v15481_v47 = vpop.f32.mrf.mxu1 }
0x138a   : > { %v12361_v51 = vpop.f32.mrf.mxu0  ;;  %v12442_v24 = vpop.f32.mrf.mxu1 }
0x138b   : > { %v12365_v57 = vadd.f32 %v12361_v51, %v12284_v14 }
0x138c   : > { %v15490_v27 = vpop.f32.mrf.mxu0  ;;  %v15499_v22 = vpop.f32.mrf.mxu1 }
0x138d   : > { %v12446_v42 = vadd.f32 %v12442_v24, %v12365_v57 }
0x1390   : > { %v12523_v50 = vpop.f32.mrf.mxu0 }
0x1391   : > { %v12527_v10 = vadd.f32 %v12523_v50, %v12446_v42 }
0x1392   : > { %v15508_v2 = vpop.f32.mrf.mxu0 }
0x1393   : > { %v12528_v63 = vmax.f32 %v12527_v10, 0.0 }
0x1395   : > { %15524 = vmatmul.mubr.msk.f32.vlgmr.msra.gmra.mxu1 %vm12537_vm9, %v12528_v63 }
0x1455   : > { %v12610_v46 = vpop.f32.mrf.mxu1 }
0x1456   : > { %v12611_v11 = vadd.f32 %v12610_v46, %v12536_v52 }
0x1457   : > { %v15525_v60 = vpop.f32.mrf.mxu1 }
0x1458   : > { %12615 = vst.msk [vmem:[%s405_s0] sm:$0x1] %vm12614_vm10, %v12611_v11 }
0x1459   : > { %15582 = shalt.err (!%p15579_p3)
}
0x145a   : > { %s15583_s15 = scalar_lea.hbm %s22075_s19, 16  ;;  %s15587_s17 = scalar_lea.hbm %s22122_s12, 32 }
0x145b   : > { %p15584_p4 = scmp.ne.s32.totalorder %s22075_s19, %s15583_s15  ;;  %p15588_p9 = scmp.lt.s32.totalorder %s22075_s19, %s22122_s12 }
0x145c   : > { %p15589_p10 = scmp.lt.s32.totalorder %s15587_s17, %s15583_s15 }
0x145d   : > { %p15585_p7 = pnand %p15584_p4, %p15737_p5 }
0x145e   : > { %p15590_p11 = por %p15589_p10, %p15588_p9 }
0x145f   : > { %p15586_p8 = pneg %p15585_p7 }
0x1461   : > { %p15591_p12 = pnand %p15590_p11, %p15586_p8 }
0x1463   : > { %15594 = shalt.err (!%p15591_p12)
}
0x1464   : > { %15527 = dma.vmem_to_hbm [thread:$0]  (%p15737_p5), %s12630_s16, 16, %s22075_s19, %s12617_s20  }
0x1465 PF: > { %p15533_p13 = scmp.ge.s32.totalorder %s15629_s24, 2  ;;  %s12641_s1 = sand.u32 1, %s15617_s21  }
0x1466   : > { %s12642_s28 = scalar_lea.sflag [#allocation3], %s12641_s1 }
0x1467   : > { %p15530_p0 = pnand %p15533_p13, %p15741_p6 }
0x1469   : > { %p15531_p1 = pneg %p15530_p0 }
0x146b   : > { %15612 = dma.done.wait (%p15531_p1), %s12642_s28, 16  }
0x146c   : > { %15614 = vsyncadd (%p15531_p1), %s12642_s28, 4294967280  ;;  %p22_p2 = scmp.ge.s32.totalorder %s15724_s27, 4   ;;  %s22559_s21 = smov %s15621_s22 }
0x146d   : > { %s22560_s22 = smov %s15625_s23  ;;  %s22561_s23 = smov %s15735_s30 }
0x146e   : > { %s22562_s24 = smov %s15724_s27  ;;  %24 = sbr.rel (!%p22_p2) target bundleno = 6 (0x6), region = 172 }
0x1473   :  { %12646 = vsyncpa [#allocation3], 1 }
0x1474   :  { %12648 = vsyncpa [#allocation3 + $0x1], 1 }

</bundles_post_ra>
